<compile_context>
chip_gen: v6e
topology: v6e:2x2x1
jax: 0.10.0
libtpu: 0.0.40
codegen_flags: <defaults>
</compile_context>

<pallas_src>
import functools

import jax
import jax.numpy as jnp
from jax.experimental import pallas as pl
from jax.experimental.pallas import tpu as pltpu

GN_EPS = 1e-5                      # nn.GroupNorm default
_VMEM_LIMIT = 32 * 1024 * 1024     # safe scoped budget on v5e/v6e/v7x at these shapes


# ---------------------------------------------------------------------------
# Pallas kernel: Conv2d (row-band GEMMs) + GroupNorm(32) + SiLU [+ fused 1x1]
# ---------------------------------------------------------------------------
def _stage_kernel(*refs, taps, rows, ho, bt, has_bias, has_proj):
    """refs = (x, w_slab, [bias], gamma, beta, collect, spread, [pw, pb], out).

    x       (bt*rows, K)       bf16  padded, row-flattened activations (batch-folded)
    w_slab  (taps, K, WoC)     bf16  block-Toeplitz weight slabs
    [bias]/gamma/beta (1, WoC) f32   per-output-column (xo, c) vectors
    collect (WoC, C) / spread (C, WoC) f32  GroupNorm group maps (collect has 1/count)
    [pw (WoC, WoE) bf16, pb (1, WoE) f32]   fused final 1x1 conv
    out     (bt, ho, WoC or WoE)
    """
    it = iter(refs)
    x_ref, w_ref = next(it), next(it)
    b_ref = next(it) if has_bias else None
    g_ref, be_ref, col_ref, spr_ref = next(it), next(it), next(it), next(it)
    pw_ref, pb_ref = (next(it), next(it)) if has_proj else (None, None)
    o_ref = next(it)

    m_full = bt * rows - taps + 1
    # Conv: `taps` row-band GEMMs over the whole batch block (M = m_full rows).
    acc = jnp.dot(x_ref[0:m_full, :], w_ref[0], preferred_element_type=jnp.float32)
    for t in range(1, taps):
        acc = acc + jnp.dot(x_ref[t:t + m_full, :], w_ref[t],
                            preferred_element_type=jnp.float32)
    if has_bias:
        acc = acc + b_ref[...]

    # Per-sample GroupNorm + SiLU (+ fused 1x1 projection) epilogue.
    for s in range(bt):                               # static unroll, bt is small
        ys = acc[s * rows:s * rows + ho, :]           # valid conv rows of sample s

        def gmean(v):
            # spatial sum on the XLU; group collect/spread on the MXU
            gs = jnp.dot(jnp.sum(v, axis=0, keepdims=True), col_ref[...],
                         preferred_element_type=jnp.float32)
            return jnp.dot(gs, spr_ref[...], preferred_element_type=jnp.float32)

        mean = gmean(ys)
        d = ys - mean
        var = gmean(d * d)                            # centered two-pass variance
        z = d * jax.lax.rsqrt(var + GN_EPS) * g_ref[...] + be_ref[...]
        z = z * jax.nn.sigmoid(z)                     # SiLU
        if has_proj:
            z = jnp.dot(z.astype(jnp.bfloat16), pw_ref[...],
                        preferred_element_type=jnp.float32) + pb_ref[...]
        o_ref[s] = z.astype(o_ref.dtype)


# ---------------------------------------------------------------------------
# One-time preparation: block-Toeplitz weight slabs + GN / projection constants
# ---------------------------------------------------------------------------
def _toeplitz(w_kcc, wp, wo, xstride):
    """One vertical tap (kw, Cin, Cout) -> (Wp*Cin, Wo*Cout) block-Toeplitz slab."""
    kw, cin, cout = w_kcc.shape
    d = jnp.arange(wp)[:, None] - xstride * jnp.arange(wo)[None, :]   # xin - s*xout
    valid = ((d >= 0) & (d < kw)).astype(w_kcc.dtype)
    wb = jnp.take(w_kcc, jnp.clip(d, 0, kw - 1), axis=0)              # (Wp, Wo, Cin, Cout)
    wb = wb * valid[:, :, None, None]
    wb = jnp.transpose(wb, (0, 2, 1, 3))                              # (Wp, Cin, Wo, Cout)
    return wb.reshape(wp * cin, wo * cout)


def prepare_encoder(params, height, width, num_groups=32):
    """Build (static stage configs, per-stage constant arrays) once from params."""
    embed = params["conv_out_w"].shape[0]

    convs = [(params["conv0_w"], params["conv0_b"], 1, 1)]
    convs += [(blk["conv_w"], blk["conv_b"], 2, 1) for blk in params["blocks"]]
    gns = [(blk["gn_g"], blk["gn_b"]) for blk in params["blocks"]]
    gns.append((params["gn_f_g"], params["gn_f_b"]))

    cfgs, arrays = [], []
    h, w = height, width
    for idx, ((cw, cb, stride, pad), (gg, gb)) in enumerate(zip(convs, gns)):
        is_last = idx == len(convs) - 1
        cout, cin, kh, kw = cw.shape
        hp, wp = h + 2 * pad, w + 2 * pad
        if stride == 2:
            assert (kh, kw) == (4, 4) and hp % 2 == 0
            ho, wo = (hp - kh) // 2 + 1, (wp - kw) // 2 + 1
            rows, k, taps = hp // 2, 2 * wp * cin, 2
            slabs = []
            for t in range(2):   # super-row tap t holds padded rows 2*(yo+t)+p, p=0,1
                parts = [_toeplitz(jnp.transpose(cw[:, :, 2 * t + p, :], (2, 1, 0)),
                                   wp, wo, 2) for p in range(2)]
                slabs.append(jnp.concatenate(parts, axis=0))
            w_slab = jnp.stack(slabs).astype(jnp.bfloat16)      # (2, 2*Wp*Cin, Wo*Cout)
        else:
            assert stride == 1
            ho, wo = hp - kh + 1, wp - kw + 1
            rows, k, taps = hp, wp * cin, kh
            w_slab = jnp.stack(
                [_toeplitz(jnp.transpose(cw[:, :, dy, :], (2, 1, 0)), wp, wo, 1)
                 for dy in range(kh)]).astype(jnp.bfloat16)     # (kh, Wp*Cin, Wo*Cout)

        woc = wo * cout
        gsize = cout // num_groups
        has_bias = gsize != 1   # per-channel GroupNorm (gsize==1) cancels conv bias
        arrs = [w_slab]
        if has_bias:
            arrs.append(jnp.tile(cb.astype(jnp.float32), wo).reshape(1, woc))

        cid = jnp.arange(woc) % cout
        collect = ((cid // gsize)[:, None] ==
                   (jnp.arange(cout) // gsize)[None, :]).astype(jnp.float32)
        collect = collect / float(gsize * ho * wo)
        spread = (jnp.arange(cout)[:, None] == cid[None, :]).astype(jnp.float32)
        arrs += [jnp.tile(gg.astype(jnp.float32), wo).reshape(1, woc),
                 jnp.tile(gb.astype(jnp.float32), wo).reshape(1, woc),
                 collect, spread]

        if is_last:   # fuse the final 1x1 conv as a block-diagonal dot
            w1 = jnp.transpose(params["conv_out_w"][:, :, 0, 0], (1, 0))  # (hidden, embed)
            eye = jnp.eye(wo, dtype=jnp.float32)
            proj_w = (eye[:, None, :, None] * w1[None, :, None, :]).reshape(
                woc, wo * embed).astype(jnp.bfloat16)
            proj_b = jnp.tile(params["conv_out_b"].astype(jnp.float32),
                              wo).reshape(1, wo * embed)
            arrs += [proj_w, proj_b]
            out_c, out_dtype = embed, jnp.float32
        else:
            out_c, out_dtype = cout, jnp.bfloat16

        cfgs.append(dict(in_h=h, in_w=w, pad=pad, rows=rows, k=k, taps=taps,
                         ho=ho, wo=wo, woc=woc, cgrp=cout, has_bias=has_bias,
                         has_proj=is_last, out_c=out_c, out_cols=wo * out_c,
                         out_dtype=out_dtype))
        arrays.append(tuple(arrs))
        h, w = ho, wo
    return tuple(cfgs), tuple(arrays)


# ---------------------------------------------------------------------------
# Forward pass
# ---------------------------------------------------------------------------
def _pick_bt(n, rows, ho, target_m=256):
    """Batch-fold factor: bt | n; x block stays 8-row tileable unless it spans the
    whole batch; aim for M = bt*ho >= target_m to fill the 256-wide MXU."""
    best = n
    for bt in range(1, n + 1):
        if n % bt or (bt != n and (bt * rows) % 8):
            continue
        best = bt
        if bt * ho >= target_m:
            break
    return best


def _run_stage(x_nhwc, arrs, cfg):
    n, h, w, _ = x_nhwc.shape
    assert (h, w) == (cfg["in_h"], cfg["in_w"]), (x_nhwc.shape, cfg)
    pad = cfg["pad"]
    if pad:
        x_nhwc = jnp.pad(x_nhwc, ((0, 0), (pad, pad), (pad, pad), (0, 0)))
    rows, k = cfg["rows"], cfg["k"]
    # Free row-major reshape: also folds the vertical pairing for 4x4/stride-2.
    xr = x_nhwc.reshape(n * rows, k)

    taps, ho, wo = cfg["taps"], cfg["ho"], cfg["wo"]
    woc, cgrp, out_cols = cfg["woc"], cfg["cgrp"], cfg["out_cols"]
    bt = _pick_bt(n, rows, ho)
    grid = (n // bt,)

    in_specs = [pl.BlockSpec((bt * rows, k), lambda i: (i, 0)),
                pl.BlockSpec((taps, k, woc), lambda i: (0, 0, 0))]
    if cfg["has_bias"]:
        in_specs.append(pl.BlockSpec((1, woc), lambda i: (0, 0)))
    in_specs += [pl.BlockSpec((1, woc), lambda i: (0, 0)),
                 pl.BlockSpec((1, woc), lambda i: (0, 0)),
                 pl.BlockSpec((woc, cgrp), lambda i: (0, 0)),
                 pl.BlockSpec((cgrp, woc), lambda i: (0, 0))]
    if cfg["has_proj"]:
        in_specs += [pl.BlockSpec((woc, out_cols), lambda i: (0, 0)),
                     pl.BlockSpec((1, out_cols), lambda i: (0, 0))]

    kernel = functools.partial(_stage_kernel, taps=taps, rows=rows, ho=ho, bt=bt,
                               has_bias=cfg["has_bias"], has_proj=cfg["has_proj"])

    m_full = bt * rows - taps + 1
    flops = 2.0 * (n // bt) * taps * m_full * k * woc + 10.0 * n * ho * woc
    if cfg["has_proj"]:
        flops += 2.0 * n * ho * woc * out_cols
    transc = n * (ho * woc + 2 * woc)
    nbytes = (xr.size * xr.dtype.itemsize
              + sum(a.size * a.dtype.itemsize for a in arrs)
              + n * ho * out_cols * jnp.dtype(cfg["out_dtype"]).itemsize)

    out = pl.pallas_call(
        kernel,
        out_shape=jax.ShapeDtypeStruct((n, ho, out_cols), cfg["out_dtype"]),
        grid=grid,
        in_specs=in_specs,
        out_specs=pl.BlockSpec((bt, ho, out_cols), lambda i: (i, 0, 0)),
        compiler_params=pltpu.CompilerParams(
            dimension_semantics=("parallel",),
            vmem_limit_bytes=_VMEM_LIMIT),
        cost_estimate=pl.CostEstimate(flops=int(flops), transcendentals=int(transc),
                                      bytes_accessed=int(nbytes)),
    )(xr, *arrs)
    return out.reshape(n, ho, wo, cfg["out_c"])


def encoder_forward(x_nchw, stage_arrays, *, stage_cfgs):
    # NCHW (PyTorch) -> NHWC bf16 activations; each pallas_call is one Conv2d
    # fused with the *following* GroupNorm+SiLU (and the final 1x1 conv).
    x = jnp.transpose(x_nchw, (0, 2, 3, 1)).astype(jnp.bfloat16)
    for cfg, arrs in zip(stage_cfgs, stage_arrays):
        x = _run_stage(x, arrs, cfg)
    return jnp.transpose(x, (0, 3, 1, 2))          # last stage already stores f32


# ---------------------------------------------------------------------------
# Parameters + pure-JAX reference
# ---------------------------------------------------------------------------
def init_params(key, in_channels, hidden_channels, embed_dim, num_conv_blocks):
    def conv_init(k, co, ci, kh, kw):
        kw_, kb_ = jax.random.split(k)
        fan_in = ci * kh * kw
        w = jax.random.normal(kw_, (co, ci, kh, kw), jnp.float32) / jnp.sqrt(fan_in)
        b = 0.01 * jax.random.normal(kb_, (co,), jnp.float32)
        return w, b

    keys = jax.random.split(key, 2 + num_conv_blocks)
    params = {}
    params["conv0_w"], params["conv0_b"] = conv_init(
        keys[0], hidden_channels, in_channels, 3, 3)
    blocks = []
    for i in range(num_conv_blocks):
        w, b = conv_init(keys[1 + i], hidden_channels, hidden_channels, 4, 4)
        blocks.append({
            "gn_g": jnp.ones((hidden_channels,), jnp.float32),
            "gn_b": jnp.zeros((hidden_channels,), jnp.float32),
            "conv_w": w, "conv_b": b,
        })
    params["blocks"] = blocks
    params["gn_f_g"] = jnp.ones((hidden_channels,), jnp.float32)
    params["gn_f_b"] = jnp.zeros((hidden_channels,), jnp.float32)
    params["conv_out_w"], params["conv_out_b"] = conv_init(
        keys[-1], embed_dim, hidden_channels, 1, 1)
    return params


def _ref_conv(x, w, b, stride, pad):
    out = jax.lax.conv_general_dilated(
        x, w, window_strides=(stride, stride), padding=((pad, pad), (pad, pad)),
        dimension_numbers=("NCHW", "OIHW", "NCHW"))
    return out + b[None, :, None, None]


def _ref_gn_silu(x, g, b, groups=32):
    n, c, h, w = x.shape
    xg = x.reshape(n, groups, -1)
    m = xg.mean(axis=-1, keepdims=True)
    v = xg.var(axis=-1, keepdims=True)
    xn = ((xg - m) / jnp.sqrt(v + GN_EPS)).reshape(n, c, h, w)
    y = xn * g[None, :, None, None] + b[None, :, None, None]
    return y * jax.nn.sigmoid(y)


@jax.jit
def reference_forward(x, params):
    x = _ref_conv(x, params["conv0_w"], params["conv0_b"], 1, 1)
    for blk in params["blocks"]:
        x = _ref_gn_silu(x, blk["gn_g"], blk["gn_b"])
        x = _ref_conv(x, blk["conv_w"], blk["conv_b"], 2, 1)
    x = _ref_gn_silu(x, params["gn_f_g"], params["gn_f_b"])
    x = _ref_conv(x, params["conv_out_w"], params["conv_out_b"], 1, 0)
    return x


if __name__ == "__main__":
    # cfg: in_channels=4, hidden_channels=32, embed_dim=8, num_conv_blocks=2, bias=True
    in_channels, hidden_channels, embed_dim, num_conv_blocks = 4, 32, 8, 2

    root = jax.random.PRNGKey(0)
    k_x, k_p = jax.random.split(root)
    x = jax.random.normal(k_x, (2, in_channels, 16, 16), jnp.float32)
    params = init_params(k_p, in_channels, hidden_channels, embed_dim, num_conv_blocks)

    # Hoisted once: Toeplitz weight slabs, GN maps, fused 1x1 projection.
    stage_cfgs, stage_arrays = prepare_encoder(params, 16, 16)
    fwd = jax.jit(functools.partial(encoder_forward, stage_cfgs=stage_cfgs))

    out = jax.block_until_ready(fwd(x, stage_arrays))

    expected_spatial = 16 // (2 ** num_conv_blocks)
    assert out.shape == (2, embed_dim, expected_spatial, expected_spatial), out.shape
    assert out.dtype == jnp.float32
    assert bool(jnp.all(jnp.isfinite(out)))

    # Loose check against the plain-JAX f32 reference (Pallas path keeps
    # activations/weights in bf16 on the MXU, so small differences remain).
    ref = jax.block_until_ready(reference_forward(x, params))
    max_err = float(jnp.max(jnp.abs(out - ref)))
    assert max_err < 0.5, max_err

    print("KERNEL_OK")
</pallas_src>

<mosaic_0001>
module attributes {stable_mosaic.version = 11 : i64} {
  func.func @_stage_kernel(%arg0: i32, %arg1: memref<36x72xbf16, #tpu.memory_space<vmem>>, %arg2: memref<3x72x512xbf16, #tpu.memory_space<vmem>>, %arg3: memref<1x512xf32, #tpu.memory_space<vmem>>, %arg4: memref<1x512xf32, #tpu.memory_space<vmem>>, %arg5: memref<512x32xf32, #tpu.memory_space<vmem>>, %arg6: memref<32x512xf32, #tpu.memory_space<vmem>>, %arg7: memref<2x16x512xbf16, #tpu.memory_space<vmem>>) attributes {dimension_semantics = [#tpu.dimension_semantics<parallel>], iteration_bounds = array<i64: 1>, scalar_prefetch = 0 : i64, scratch_operands = 0 : i64, tpu.core_type = #tpu.core_type<tc>, window_params = [{transform_indices = @transform_0, window_bounds = array<i64: 36, 72>}, {pipeline_mode = #tpu.pipeline_mode<synchronous>, transform_indices = @transform_1, window_bounds = array<i64: 3, 72, 512>}, {pipeline_mode = #tpu.pipeline_mode<synchronous>, transform_indices = @transform_2, window_bounds = array<i64: 1, 512>}, {pipeline_mode = #tpu.pipeline_mode<synchronous>, transform_indices = @transform_3, window_bounds = array<i64: 1, 512>}, {pipeline_mode = #tpu.pipeline_mode<synchronous>, transform_indices = @transform_4, window_bounds = array<i64: 512, 32>}, {pipeline_mode = #tpu.pipeline_mode<synchronous>, transform_indices = @transform_5, window_bounds = array<i64: 32, 512>}, {transform_indices = @transform_6, window_bounds = array<i64: 2, 16, 512>}]} {
    %c0 = arith.constant 0 : index
    %c0_0 = arith.constant 0 : index
    %0 = vector.load %arg1[%c0, %c0_0] : memref<36x72xbf16, #tpu.memory_space<vmem>>, vector<34x72xbf16>
    %c0_1 = arith.constant 0 : index
    %c0_2 = arith.constant 0 : index
    %c0_3 = arith.constant 0 : index
    %1 = vector.load %arg2[%c0_1, %c0_2, %c0_3] : memref<3x72x512xbf16, #tpu.memory_space<vmem>>, vector<1x72x512xbf16>
    %2 = vector.shape_cast %1 : vector<1x72x512xbf16> to vector<72x512xbf16>
    %cst = arith.constant dense<0.000000e+00> : vector<34x512xf32>
    %3 = tpu.matmul %0, %2, %cst {dimension_numbers = #tpu.dot_dimension_numbers<[1], [0], [0], [1], [0, 0, 1, 1], [], []>} : vector<34x72xbf16>, vector<72x512xbf16>, vector<34x512xf32> -> vector<34x512xf32>
    %c1 = arith.constant 1 : index
    %c0_4 = arith.constant 0 : index
    %4 = vector.load %arg1[%c1, %c0_4] : memref<36x72xbf16, #tpu.memory_space<vmem>>, vector<34x72xbf16>
    %c1_5 = arith.constant 1 : index
    %c0_6 = arith.constant 0 : index
    %c0_7 = arith.constant 0 : index
    %5 = vector.load %arg2[%c1_5, %c0_6, %c0_7] : memref<3x72x512xbf16, #tpu.memory_space<vmem>>, vector<1x72x512xbf16>
    %6 = vector.shape_cast %5 : vector<1x72x512xbf16> to vector<72x512xbf16>
    %cst_8 = arith.constant dense<0.000000e+00> : vector<34x512xf32>
    %7 = tpu.matmul %4, %6, %cst_8 {dimension_numbers = #tpu.dot_dimension_numbers<[1], [0], [0], [1], [0, 0, 1, 1], [], []>} : vector<34x72xbf16>, vector<72x512xbf16>, vector<34x512xf32> -> vector<34x512xf32>
    %8 = arith.addf %3, %7 : vector<34x512xf32>
    %c2 = arith.constant 2 : index
    %c0_9 = arith.constant 0 : index
    %9 = vector.load %arg1[%c2, %c0_9] : memref<36x72xbf16, #tpu.memory_space<vmem>>, vector<34x72xbf16>
    %c2_10 = arith.constant 2 : index
    %c0_11 = arith.constant 0 : index
    %c0_12 = arith.constant 0 : index
    %10 = vector.load %arg2[%c2_10, %c0_11, %c0_12] : memref<3x72x512xbf16, #tpu.memory_space<vmem>>, vector<1x72x512xbf16>
    %11 = vector.shape_cast %10 : vector<1x72x512xbf16> to vector<72x512xbf16>
    %cst_13 = arith.constant dense<0.000000e+00> : vector<34x512xf32>
    %12 = tpu.matmul %9, %11, %cst_13 {dimension_numbers = #tpu.dot_dimension_numbers<[1], [0], [0], [1], [0, 0, 1, 1], [], []>} : vector<34x72xbf16>, vector<72x512xbf16>, vector<34x512xf32> -> vector<34x512xf32>
    %13 = arith.addf %8, %12 : vector<34x512xf32>
    %14 = vector.extract_strided_slice %13 {offsets = [0, 0], sizes = [16, 512], strides = [1, 1]} : vector<34x512xf32> to vector<16x512xf32>
    %cst_14 = arith.constant dense<0.000000e+00> : vector<512xf32>
    %15 = vector.multi_reduction <add>, %14, %cst_14 [0] : vector<16x512xf32> to vector<512xf32>
    %16 = vector.shape_cast %15 : vector<512xf32> to vector<1x512xf32>
    %c0_15 = arith.constant 0 : index
    %c0_16 = arith.constant 0 : index
    %17 = vector.load %arg5[%c0_15, %c0_16] : memref<512x32xf32, #tpu.memory_space<vmem>>, vector<512x32xf32>
    %cst_17 = arith.constant dense<0.000000e+00> : vector<1x32xf32>
    %18 = tpu.matmul %16, %17, %cst_17 {dimension_numbers = #tpu.dot_dimension_numbers<[1], [0], [0], [1], [0, 0, 1, 1], [], []>} : vector<1x512xf32>, vector<512x32xf32>, vector<1x32xf32> -> vector<1x32xf32>
    %c0_18 = arith.constant 0 : index
    %c0_19 = arith.constant 0 : index
    %19 = vector.load %arg6[%c0_18, %c0_19] : memref<32x512xf32, #tpu.memory_space<vmem>>, vector<32x512xf32>
    %cst_20 = arith.constant dense<0.000000e+00> : vector<1x512xf32>
    %20 = tpu.matmul %18, %19, %cst_20 {dimension_numbers = #tpu.dot_dimension_numbers<[1], [0], [0], [1], [0, 0, 1, 1], [], []>} : vector<1x32xf32>, vector<32x512xf32>, vector<1x512xf32> -> vector<1x512xf32>
    %21 = vector.broadcast %20 : vector<1x512xf32> to vector<16x512xf32>
    %22 = arith.subf %14, %21 : vector<16x512xf32>
    %23 = arith.mulf %22, %22 : vector<16x512xf32>
    %cst_21 = arith.constant dense<0.000000e+00> : vector<512xf32>
    %24 = vector.multi_reduction <add>, %23, %cst_21 [0] : vector<16x512xf32> to vector<512xf32>
    %25 = vector.shape_cast %24 : vector<512xf32> to vector<1x512xf32>
    %c0_22 = arith.constant 0 : index
    %c0_23 = arith.constant 0 : index
    %26 = vector.load %arg5[%c0_22, %c0_23] : memref<512x32xf32, #tpu.memory_space<vmem>>, vector<512x32xf32>
    %cst_24 = arith.constant dense<0.000000e+00> : vector<1x32xf32>
    %27 = tpu.matmul %25, %26, %cst_24 {dimension_numbers = #tpu.dot_dimension_numbers<[1], [0], [0], [1], [0, 0, 1, 1], [], []>} : vector<1x512xf32>, vector<512x32xf32>, vector<1x32xf32> -> vector<1x32xf32>
    %c0_25 = arith.constant 0 : index
    %c0_26 = arith.constant 0 : index
    %28 = vector.load %arg6[%c0_25, %c0_26] : memref<32x512xf32, #tpu.memory_space<vmem>>, vector<32x512xf32>
    %cst_27 = arith.constant dense<0.000000e+00> : vector<1x512xf32>
    %29 = tpu.matmul %27, %28, %cst_27 {dimension_numbers = #tpu.dot_dimension_numbers<[1], [0], [0], [1], [0, 0, 1, 1], [], []>} : vector<1x32xf32>, vector<32x512xf32>, vector<1x512xf32> -> vector<1x512xf32>
    %cst_28 = arith.constant 9.99999974E-6 : f32
    %30 = vector.broadcast %cst_28 : f32 to vector<1x512xf32>
    %31 = arith.addf %29, %30 : vector<1x512xf32>
    %32 = math.rsqrt %31 : vector<1x512xf32>
    %33 = vector.broadcast %32 : vector<1x512xf32> to vector<16x512xf32>
    %34 = arith.mulf %22, %33 : vector<16x512xf32>
    %c0_29 = arith.constant 0 : index
    %c0_30 = arith.constant 0 : index
    %35 = vector.load %arg3[%c0_29, %c0_30] : memref<1x512xf32, #tpu.memory_space<vmem>>, vector<1x512xf32>
    %36 = vector.broadcast %35 : vector<1x512xf32> to vector<16x512xf32>
    %37 = arith.mulf %34, %36 : vector<16x512xf32>
    %c0_31 = arith.constant 0 : index
    %c0_32 = arith.constant 0 : index
    %38 = vector.load %arg4[%c0_31, %c0_32] : memref<1x512xf32, #tpu.memory_space<vmem>>, vector<1x512xf32>
    %39 = vector.broadcast %38 : vector<1x512xf32> to vector<16x512xf32>
    %40 = arith.addf %37, %39 : vector<16x512xf32>
    %41 = arith.negf %40 : vector<16x512xf32>
    %42 = math.exp %41 : vector<16x512xf32>
    %cst_33 = arith.constant 1.000000e+00 : f32
    %43 = vector.broadcast %cst_33 : f32 to vector<16x512xf32>
    %44 = arith.addf %43, %42 : vector<16x512xf32>
    %45 = arith.divf %43, %44 : vector<16x512xf32>
    %46 = arith.mulf %40, %45 : vector<16x512xf32>
    %47 = arith.truncf %46 : vector<16x512xf32> to vector<16x512xbf16>
    %c0_34 = arith.constant 0 : index
    %c0_35 = arith.constant 0 : index
    %c0_36 = arith.constant 0 : index
    %48 = vector.load %arg7[%c0_34, %c0_35, %c0_36] : memref<2x16x512xbf16, #tpu.memory_space<vmem>>, vector<1x16x512xbf16>
    %49 = vector.shape_cast %48 : vector<1x16x512xbf16> to vector<16x512xbf16>
    %50 = vector.shape_cast %47 : vector<16x512xbf16> to vector<1x16x512xbf16>
    tpu.vector_store %arg7[%c0_34, %c0_35, %c0_36], %50 {strides = array<i32>} : memref<2x16x512xbf16, #tpu.memory_space<vmem>>, vector<1x16x512xbf16>,
    %51 = vector.extract_strided_slice %13 {offsets = [18, 0], sizes = [16, 512], strides = [1, 1]} : vector<34x512xf32> to vector<16x512xf32>
    %cst_37 = arith.constant dense<0.000000e+00> : vector<512xf32>
    %52 = vector.multi_reduction <add>, %51, %cst_37 [0] : vector<16x512xf32> to vector<512xf32>
    %53 = vector.shape_cast %52 : vector<512xf32> to vector<1x512xf32>
    %c0_38 = arith.constant 0 : index
    %c0_39 = arith.constant 0 : index
    %54 = vector.load %arg5[%c0_38, %c0_39] : memref<512x32xf32, #tpu.memory_space<vmem>>, vector<512x32xf32>
    %cst_40 = arith.constant dense<0.000000e+00> : vector<1x32xf32>
    %55 = tpu.matmul %53, %54, %cst_40 {dimension_numbers = #tpu.dot_dimension_numbers<[1], [0], [0], [1], [0, 0, 1, 1], [], []>} : vector<1x512xf32>, vector<512x32xf32>, vector<1x32xf32> -> vector<1x32xf32>
    %c0_41 = arith.constant 0 : index
    %c0_42 = arith.constant 0 : index
    %56 = vector.load %arg6[%c0_41, %c0_42] : memref<32x512xf32, #tpu.memory_space<vmem>>, vector<32x512xf32>
    %cst_43 = arith.constant dense<0.000000e+00> : vector<1x512xf32>
    %57 = tpu.matmul %55, %56, %cst_43 {dimension_numbers = #tpu.dot_dimension_numbers<[1], [0], [0], [1], [0, 0, 1, 1], [], []>} : vector<1x32xf32>, vector<32x512xf32>, vector<1x512xf32> -> vector<1x512xf32>
    %58 = vector.broadcast %57 : vector<1x512xf32> to vector<16x512xf32>
    %59 = arith.subf %51, %58 : vector<16x512xf32>
    %60 = arith.mulf %59, %59 : vector<16x512xf32>
    %cst_44 = arith.constant dense<0.000000e+00> : vector<512xf32>
    %61 = vector.multi_reduction <add>, %60, %cst_44 [0] : vector<16x512xf32> to vector<512xf32>
    %62 = vector.shape_cast %61 : vector<512xf32> to vector<1x512xf32>
    %c0_45 = arith.constant 0 : index
    %c0_46 = arith.constant 0 : index
    %63 = vector.load %arg5[%c0_45, %c0_46] : memref<512x32xf32, #tpu.memory_space<vmem>>, vector<512x32xf32>
    %cst_47 = arith.constant dense<0.000000e+00> : vector<1x32xf32>
    %64 = tpu.matmul %62, %63, %cst_47 {dimension_numbers = #tpu.dot_dimension_numbers<[1], [0], [0], [1], [0, 0, 1, 1], [], []>} : vector<1x512xf32>, vector<512x32xf32>, vector<1x32xf32> -> vector<1x32xf32>
    %c0_48 = arith.constant 0 : index
    %c0_49 = arith.constant 0 : index
    %65 = vector.load %arg6[%c0_48, %c0_49] : memref<32x512xf32, #tpu.memory_space<vmem>>, vector<32x512xf32>
    %cst_50 = arith.constant dense<0.000000e+00> : vector<1x512xf32>
    %66 = tpu.matmul %64, %65, %cst_50 {dimension_numbers = #tpu.dot_dimension_numbers<[1], [0], [0], [1], [0, 0, 1, 1], [], []>} : vector<1x32xf32>, vector<32x512xf32>, vector<1x512xf32> -> vector<1x512xf32>
    %cst_51 = arith.constant 9.99999974E-6 : f32
    %67 = vector.broadcast %cst_51 : f32 to vector<1x512xf32>
    %68 = arith.addf %66, %67 : vector<1x512xf32>
    %69 = math.rsqrt %68 : vector<1x512xf32>
    %70 = vector.broadcast %69 : vector<1x512xf32> to vector<16x512xf32>
    %71 = arith.mulf %59, %70 : vector<16x512xf32>
    %c0_52 = arith.constant 0 : index
    %c0_53 = arith.constant 0 : index
    %72 = vector.load %arg3[%c0_52, %c0_53] : memref<1x512xf32, #tpu.memory_space<vmem>>, vector<1x512xf32>
    %73 = vector.broadcast %72 : vector<1x512xf32> to vector<16x512xf32>
    %74 = arith.mulf %71, %73 : vector<16x512xf32>
    %c0_54 = arith.constant 0 : index
    %c0_55 = arith.constant 0 : index
    %75 = vector.load %arg4[%c0_54, %c0_55] : memref<1x512xf32, #tpu.memory_space<vmem>>, vector<1x512xf32>
    %76 = vector.broadcast %75 : vector<1x512xf32> to vector<16x512xf32>
    %77 = arith.addf %74, %76 : vector<16x512xf32>
    %78 = arith.negf %77 : vector<16x512xf32>
    %79 = math.exp %78 : vector<16x512xf32>
    %cst_56 = arith.constant 1.000000e+00 : f32
    %80 = vector.broadcast %cst_56 : f32 to vector<16x512xf32>
    %81 = arith.addf %80, %79 : vector<16x512xf32>
    %82 = arith.divf %80, %81 : vector<16x512xf32>
    %83 = arith.mulf %77, %82 : vector<16x512xf32>
    %84 = arith.truncf %83 : vector<16x512xf32> to vector<16x512xbf16>
    %c1_57 = arith.constant 1 : index
    %c0_58 = arith.constant 0 : index
    %c0_59 = arith.constant 0 : index
    %85 = vector.load %arg7[%c1_57, %c0_58, %c0_59] : memref<2x16x512xbf16, #tpu.memory_space<vmem>>, vector<1x16x512xbf16>
    %86 = vector.shape_cast %85 : vector<1x16x512xbf16> to vector<16x512xbf16>
    %87 = vector.shape_cast %84 : vector<16x512xbf16> to vector<1x16x512xbf16>
    tpu.vector_store %arg7[%c1_57, %c0_58, %c0_59], %87 {strides = array<i32>} : memref<2x16x512xbf16, #tpu.memory_space<vmem>>, vector<1x16x512xbf16>,
    return
  }
  func.func @transform_0(%arg0: i32) -> (i32, i32) {
    %c0_i32 = arith.constant 0 : i32
    %c0_i32_0 = arith.constant 0 : i32
    return %arg0, %c0_i32 : i32, i32
  }
  func.func @transform_1(%arg0: i32) -> (i32, i32, i32) {
    %c0_i32 = arith.constant 0 : i32
    %c0_i32_0 = arith.constant 0 : i32
    %c0_i32_1 = arith.constant 0 : i32
    %c0_i32_2 = arith.constant 0 : i32
    return %c0_i32, %c0_i32_0, %c0_i32_1 : i32, i32, i32
  }
  func.func @transform_2(%arg0: i32) -> (i32, i32) {
    %c0_i32 = arith.constant 0 : i32
    %c0_i32_0 = arith.constant 0 : i32
    %c0_i32_1 = arith.constant 0 : i32
    return %c0_i32, %c0_i32_0 : i32, i32
  }
  func.func @transform_3(%arg0: i32) -> (i32, i32) {
    %c0_i32 = arith.constant 0 : i32
    %c0_i32_0 = arith.constant 0 : i32
    %c0_i32_1 = arith.constant 0 : i32
    return %c0_i32, %c0_i32_0 : i32, i32
  }
  func.func @transform_4(%arg0: i32) -> (i32, i32) {
    %c0_i32 = arith.constant 0 : i32
    %c0_i32_0 = arith.constant 0 : i32
    %c0_i32_1 = arith.constant 0 : i32
    return %c0_i32, %c0_i32_0 : i32, i32
  }
  func.func @transform_5(%arg0: i32) -> (i32, i32) {
    %c0_i32 = arith.constant 0 : i32
    %c0_i32_0 = arith.constant 0 : i32
    %c0_i32_1 = arith.constant 0 : i32
    return %c0_i32, %c0_i32_0 : i32, i32
  }
  func.func @transform_6(%arg0: i32) -> (i32, i32, i32) {
    %c0_i32 = arith.constant 0 : i32
    %c0_i32_0 = arith.constant 0 : i32
    %c0_i32_1 = arith.constant 0 : i32
    return %arg0, %c0_i32, %c0_i32_0 : i32, i32, i32
  }
}

module attributes {stable_mosaic.version = 11 : i64} {
  func.func @_stage_kernel(%arg0: i32, %arg1: memref<18x1152xbf16, #tpu.memory_space<vmem>>, %arg2: memref<2x1152x256xbf16, #tpu.memory_space<vmem>>, %arg3: memref<1x256xf32, #tpu.memory_space<vmem>>, %arg4: memref<1x256xf32, #tpu.memory_space<vmem>>, %arg5: memref<256x32xf32, #tpu.memory_space<vmem>>, %arg6: memref<32x256xf32, #tpu.memory_space<vmem>>, %arg7: memref<2x8x256xbf16, #tpu.memory_space<vmem>>) attributes {dimension_semantics = [#tpu.dimension_semantics<parallel>], iteration_bounds = array<i64: 1>, scalar_prefetch = 0 : i64, scratch_operands = 0 : i64, tpu.core_type = #tpu.core_type<tc>, window_params = [{transform_indices = @transform_0, window_bounds = array<i64: 18, 1152>}, {pipeline_mode = #tpu.pipeline_mode<synchronous>, transform_indices = @transform_1, window_bounds = array<i64: 2, 1152, 256>}, {pipeline_mode = #tpu.pipeline_mode<synchronous>, transform_indices = @transform_2, window_bounds = array<i64: 1, 256>}, {pipeline_mode = #tpu.pipeline_mode<synchronous>, transform_indices = @transform_3, window_bounds = array<i64: 1, 256>}, {pipeline_mode = #tpu.pipeline_mode<synchronous>, transform_indices = @transform_4, window_bounds = array<i64: 256, 32>}, {pipeline_mode = #tpu.pipeline_mode<synchronous>, transform_indices = @transform_5, window_bounds = array<i64: 32, 256>}, {transform_indices = @transform_6, window_bounds = array<i64: 2, 8, 256>}]} {
    %c0 = arith.constant 0 : index
    %c0_0 = arith.constant 0 : index
    %0 = vector.load %arg1[%c0, %c0_0] : memref<18x1152xbf16, #tpu.memory_space<vmem>>, vector<17x1152xbf16>
    %c0_1 = arith.constant 0 : index
    %c0_2 = arith.constant 0 : index
    %c0_3 = arith.constant 0 : index
    %1 = vector.load %arg2[%c0_1, %c0_2, %c0_3] : memref<2x1152x256xbf16, #tpu.memory_space<vmem>>, vector<1x1152x256xbf16>
    %2 = vector.shape_cast %1 : vector<1x1152x256xbf16> to vector<1152x256xbf16>
    %cst = arith.constant dense<0.000000e+00> : vector<17x256xf32>
    %3 = tpu.matmul %0, %2, %cst {dimension_numbers = #tpu.dot_dimension_numbers<[1], [0], [0], [1], [0, 0, 1, 1], [], []>} : vector<17x1152xbf16>, vector<1152x256xbf16>, vector<17x256xf32> -> vector<17x256xf32>
    %c1 = arith.constant 1 : index
    %c0_4 = arith.constant 0 : index
    %4 = vector.load %arg1[%c1, %c0_4] : memref<18x1152xbf16, #tpu.memory_space<vmem>>, vector<17x1152xbf16>
    %c1_5 = arith.constant 1 : index
    %c0_6 = arith.constant 0 : index
    %c0_7 = arith.constant 0 : index
    %5 = vector.load %arg2[%c1_5, %c0_6, %c0_7] : memref<2x1152x256xbf16, #tpu.memory_space<vmem>>, vector<1x1152x256xbf16>
    %6 = vector.shape_cast %5 : vector<1x1152x256xbf16> to vector<1152x256xbf16>
    %cst_8 = arith.constant dense<0.000000e+00> : vector<17x256xf32>
    %7 = tpu.matmul %4, %6, %cst_8 {dimension_numbers = #tpu.dot_dimension_numbers<[1], [0], [0], [1], [0, 0, 1, 1], [], []>} : vector<17x1152xbf16>, vector<1152x256xbf16>, vector<17x256xf32> -> vector<17x256xf32>
    %8 = arith.addf %3, %7 : vector<17x256xf32>
    %9 = vector.extract_strided_slice %8 {offsets = [0, 0], sizes = [8, 256], strides = [1, 1]} : vector<17x256xf32> to vector<8x256xf32>
    %cst_9 = arith.constant dense<0.000000e+00> : vector<256xf32>
    %10 = vector.multi_reduction <add>, %9, %cst_9 [0] : vector<8x256xf32> to vector<256xf32>
    %11 = vector.shape_cast %10 : vector<256xf32> to vector<1x256xf32>
    %c0_10 = arith.constant 0 : index
    %c0_11 = arith.constant 0 : index
    %12 = vector.load %arg5[%c0_10, %c0_11] : memref<256x32xf32, #tpu.memory_space<vmem>>, vector<256x32xf32>
    %cst_12 = arith.constant dense<0.000000e+00> : vector<1x32xf32>
    %13 = tpu.matmul %11, %12, %cst_12 {dimension_numbers = #tpu.dot_dimension_numbers<[1], [0], [0], [1], [0, 0, 1, 1], [], []>} : vector<1x256xf32>, vector<256x32xf32>, vector<1x32xf32> -> vector<1x32xf32>
    %c0_13 = arith.constant 0 : index
    %c0_14 = arith.constant 0 : index
    %14 = vector.load %arg6[%c0_13, %c0_14] : memref<32x256xf32, #tpu.memory_space<vmem>>, vector<32x256xf32>
    %cst_15 = arith.constant dense<0.000000e+00> : vector<1x256xf32>
    %15 = tpu.matmul %13, %14, %cst_15 {dimension_numbers = #tpu.dot_dimension_numbers<[1], [0], [0], [1], [0, 0, 1, 1], [], []>} : vector<1x32xf32>, vector<32x256xf32>, vector<1x256xf32> -> vector<1x256xf32>
    %16 = vector.broadcast %15 : vector<1x256xf32> to vector<8x256xf32>
    %17 = arith.subf %9, %16 : vector<8x256xf32>
    %18 = arith.mulf %17, %17 : vector<8x256xf32>
    %cst_16 = arith.constant dense<0.000000e+00> : vector<256xf32>
    %19 = vector.multi_reduction <add>, %18, %cst_16 [0] : vector<8x256xf32> to vector<256xf32>
    %20 = vector.shape_cast %19 : vector<256xf32> to vector<1x256xf32>
    %c0_17 = arith.constant 0 : index
    %c0_18 = arith.constant 0 : index
    %21 = vector.load %arg5[%c0_17, %c0_18] : memref<256x32xf32, #tpu.memory_space<vmem>>, vector<256x32xf32>
    %cst_19 = arith.constant dense<0.000000e+00> : vector<1x32xf32>
    %22 = tpu.matmul %20, %21, %cst_19 {dimension_numbers = #tpu.dot_dimension_numbers<[1], [0], [0], [1], [0, 0, 1, 1], [], []>} : vector<1x256xf32>, vector<256x32xf32>, vector<1x32xf32> -> vector<1x32xf32>
    %c0_20 = arith.constant 0 : index
    %c0_21 = arith.constant 0 : index
    %23 = vector.load %arg6[%c0_20, %c0_21] : memref<32x256xf32, #tpu.memory_space<vmem>>, vector<32x256xf32>
    %cst_22 = arith.constant dense<0.000000e+00> : vector<1x256xf32>
    %24 = tpu.matmul %22, %23, %cst_22 {dimension_numbers = #tpu.dot_dimension_numbers<[1], [0], [0], [1], [0, 0, 1, 1], [], []>} : vector<1x32xf32>, vector<32x256xf32>, vector<1x256xf32> -> vector<1x256xf32>
    %cst_23 = arith.constant 9.99999974E-6 : f32
    %25 = vector.broadcast %cst_23 : f32 to vector<1x256xf32>
    %26 = arith.addf %24, %25 : vector<1x256xf32>
    %27 = math.rsqrt %26 : vector<1x256xf32>
    %28 = vector.broadcast %27 : vector<1x256xf32> to vector<8x256xf32>
    %29 = arith.mulf %17, %28 : vector<8x256xf32>
    %c0_24 = arith.constant 0 : index
    %c0_25 = arith.constant 0 : index
    %30 = vector.load %arg3[%c0_24, %c0_25] : memref<1x256xf32, #tpu.memory_space<vmem>>, vector<1x256xf32>
    %31 = vector.broadcast %30 : vector<1x256xf32> to vector<8x256xf32>
    %32 = arith.mulf %29, %31 : vector<8x256xf32>
    %c0_26 = arith.constant 0 : index
    %c0_27 = arith.constant 0 : index
    %33 = vector.load %arg4[%c0_26, %c0_27] : memref<1x256xf32, #tpu.memory_space<vmem>>, vector<1x256xf32>
    %34 = vector.broadcast %33 : vector<1x256xf32> to vector<8x256xf32>
    %35 = arith.addf %32, %34 : vector<8x256xf32>
    %36 = arith.negf %35 : vector<8x256xf32>
    %37 = math.exp %36 : vector<8x256xf32>
    %cst_28 = arith.constant 1.000000e+00 : f32
    %38 = vector.broadcast %cst_28 : f32 to vector<8x256xf32>
    %39 = arith.addf %38, %37 : vector<8x256xf32>
    %40 = arith.divf %38, %39 : vector<8x256xf32>
    %41 = arith.mulf %35, %40 : vector<8x256xf32>
    %42 = arith.truncf %41 : vector<8x256xf32> to vector<8x256xbf16>
    %c0_29 = arith.constant 0 : index
    %c0_30 = arith.constant 0 : index
    %c0_31 = arith.constant 0 : index
    %43 = vector.load %arg7[%c0_29, %c0_30, %c0_31] : memref<2x8x256xbf16, #tpu.memory_space<vmem>>, vector<1x8x256xbf16>
    %44 = vector.shape_cast %43 : vector<1x8x256xbf16> to vector<8x256xbf16>
    %45 = vector.shape_cast %42 : vector<8x256xbf16> to vector<1x8x256xbf16>
    tpu.vector_store %arg7[%c0_29, %c0_30, %c0_31], %45 {strides = array<i32>} : memref<2x8x256xbf16, #tpu.memory_space<vmem>>, vector<1x8x256xbf16>,
    %46 = vector.extract_strided_slice %8 {offsets = [9, 0], sizes = [8, 256], strides = [1, 1]} : vector<17x256xf32> to vector<8x256xf32>
    %cst_32 = arith.constant dense<0.000000e+00> : vector<256xf32>
    %47 = vector.multi_reduction <add>, %46, %cst_32 [0] : vector<8x256xf32> to vector<256xf32>
    %48 = vector.shape_cast %47 : vector<256xf32> to vector<1x256xf32>
    %c0_33 = arith.constant 0 : index
    %c0_34 = arith.constant 0 : index
    %49 = vector.load %arg5[%c0_33, %c0_34] : memref<256x32xf32, #tpu.memory_space<vmem>>, vector<256x32xf32>
    %cst_35 = arith.constant dense<0.000000e+00> : vector<1x32xf32>
    %50 = tpu.matmul %48, %49, %cst_35 {dimension_numbers = #tpu.dot_dimension_numbers<[1], [0], [0], [1], [0, 0, 1, 1], [], []>} : vector<1x256xf32>, vector<256x32xf32>, vector<1x32xf32> -> vector<1x32xf32>
    %c0_36 = arith.constant 0 : index
    %c0_37 = arith.constant 0 : index
    %51 = vector.load %arg6[%c0_36, %c0_37] : memref<32x256xf32, #tpu.memory_space<vmem>>, vector<32x256xf32>
    %cst_38 = arith.constant dense<0.000000e+00> : vector<1x256xf32>
    %52 = tpu.matmul %50, %51, %cst_38 {dimension_numbers = #tpu.dot_dimension_numbers<[1], [0], [0], [1], [0, 0, 1, 1], [], []>} : vector<1x32xf32>, vector<32x256xf32>, vector<1x256xf32> -> vector<1x256xf32>
    %53 = vector.broadcast %52 : vector<1x256xf32> to vector<8x256xf32>
    %54 = arith.subf %46, %53 : vector<8x256xf32>
    %55 = arith.mulf %54, %54 : vector<8x256xf32>
    %cst_39 = arith.constant dense<0.000000e+00> : vector<256xf32>
    %56 = vector.multi_reduction <add>, %55, %cst_39 [0] : vector<8x256xf32> to vector<256xf32>
    %57 = vector.shape_cast %56 : vector<256xf32> to vector<1x256xf32>
    %c0_40 = arith.constant 0 : index
    %c0_41 = arith.constant 0 : index
    %58 = vector.load %arg5[%c0_40, %c0_41] : memref<256x32xf32, #tpu.memory_space<vmem>>, vector<256x32xf32>
    %cst_42 = arith.constant dense<0.000000e+00> : vector<1x32xf32>
    %59 = tpu.matmul %57, %58, %cst_42 {dimension_numbers = #tpu.dot_dimension_numbers<[1], [0], [0], [1], [0, 0, 1, 1], [], []>} : vector<1x256xf32>, vector<256x32xf32>, vector<1x32xf32> -> vector<1x32xf32>
    %c0_43 = arith.constant 0 : index
    %c0_44 = arith.constant 0 : index
    %60 = vector.load %arg6[%c0_43, %c0_44] : memref<32x256xf32, #tpu.memory_space<vmem>>, vector<32x256xf32>
    %cst_45 = arith.constant dense<0.000000e+00> : vector<1x256xf32>
    %61 = tpu.matmul %59, %60, %cst_45 {dimension_numbers = #tpu.dot_dimension_numbers<[1], [0], [0], [1], [0, 0, 1, 1], [], []>} : vector<1x32xf32>, vector<32x256xf32>, vector<1x256xf32> -> vector<1x256xf32>
    %cst_46 = arith.constant 9.99999974E-6 : f32
    %62 = vector.broadcast %cst_46 : f32 to vector<1x256xf32>
    %63 = arith.addf %61, %62 : vector<1x256xf32>
    %64 = math.rsqrt %63 : vector<1x256xf32>
    %65 = vector.broadcast %64 : vector<1x256xf32> to vector<8x256xf32>
    %66 = arith.mulf %54, %65 : vector<8x256xf32>
    %c0_47 = arith.constant 0 : index
    %c0_48 = arith.constant 0 : index
    %67 = vector.load %arg3[%c0_47, %c0_48] : memref<1x256xf32, #tpu.memory_space<vmem>>, vector<1x256xf32>
    %68 = vector.broadcast %67 : vector<1x256xf32> to vector<8x256xf32>
    %69 = arith.mulf %66, %68 : vector<8x256xf32>
    %c0_49 = arith.constant 0 : index
    %c0_50 = arith.constant 0 : index
    %70 = vector.load %arg4[%c0_49, %c0_50] : memref<1x256xf32, #tpu.memory_space<vmem>>, vector<1x256xf32>
    %71 = vector.broadcast %70 : vector<1x256xf32> to vector<8x256xf32>
    %72 = arith.addf %69, %71 : vector<8x256xf32>
    %73 = arith.negf %72 : vector<8x256xf32>
    %74 = math.exp %73 : vector<8x256xf32>
    %cst_51 = arith.constant 1.000000e+00 : f32
    %75 = vector.broadcast %cst_51 : f32 to vector<8x256xf32>
    %76 = arith.addf %75, %74 : vector<8x256xf32>
    %77 = arith.divf %75, %76 : vector<8x256xf32>
    %78 = arith.mulf %72, %77 : vector<8x256xf32>
    %79 = arith.truncf %78 : vector<8x256xf32> to vector<8x256xbf16>
    %c1_52 = arith.constant 1 : index
    %c0_53 = arith.constant 0 : index
    %c0_54 = arith.constant 0 : index
    %80 = vector.load %arg7[%c1_52, %c0_53, %c0_54] : memref<2x8x256xbf16, #tpu.memory_space<vmem>>, vector<1x8x256xbf16>
    %81 = vector.shape_cast %80 : vector<1x8x256xbf16> to vector<8x256xbf16>
    %82 = vector.shape_cast %79 : vector<8x256xbf16> to vector<1x8x256xbf16>
    tpu.vector_store %arg7[%c1_52, %c0_53, %c0_54], %82 {strides = array<i32>} : memref<2x8x256xbf16, #tpu.memory_space<vmem>>, vector<1x8x256xbf16>,
    return
  }
  func.func @transform_0(%arg0: i32) -> (i32, i32) {
    %c0_i32 = arith.constant 0 : i32
    %c0_i32_0 = arith.constant 0 : i32
    return %arg0, %c0_i32 : i32, i32
  }
  func.func @transform_1(%arg0: i32) -> (i32, i32, i32) {
    %c0_i32 = arith.constant 0 : i32
    %c0_i32_0 = arith.constant 0 : i32
    %c0_i32_1 = arith.constant 0 : i32
    %c0_i32_2 = arith.constant 0 : i32
    return %c0_i32, %c0_i32_0, %c0_i32_1 : i32, i32, i32
  }
  func.func @transform_2(%arg0: i32) -> (i32, i32) {
    %c0_i32 = arith.constant 0 : i32
    %c0_i32_0 = arith.constant 0 : i32
    %c0_i32_1 = arith.constant 0 : i32
    return %c0_i32, %c0_i32_0 : i32, i32
  }
  func.func @transform_3(%arg0: i32) -> (i32, i32) {
    %c0_i32 = arith.constant 0 : i32
    %c0_i32_0 = arith.constant 0 : i32
    %c0_i32_1 = arith.constant 0 : i32
    return %c0_i32, %c0_i32_0 : i32, i32
  }
  func.func @transform_4(%arg0: i32) -> (i32, i32) {
    %c0_i32 = arith.constant 0 : i32
    %c0_i32_0 = arith.constant 0 : i32
    %c0_i32_1 = arith.constant 0 : i32
    return %c0_i32, %c0_i32_0 : i32, i32
  }
  func.func @transform_5(%arg0: i32) -> (i32, i32) {
    %c0_i32 = arith.constant 0 : i32
    %c0_i32_0 = arith.constant 0 : i32
    %c0_i32_1 = arith.constant 0 : i32
    return %c0_i32, %c0_i32_0 : i32, i32
  }
  func.func @transform_6(%arg0: i32) -> (i32, i32, i32) {
    %c0_i32 = arith.constant 0 : i32
    %c0_i32_0 = arith.constant 0 : i32
    %c0_i32_1 = arith.constant 0 : i32
    return %arg0, %c0_i32, %c0_i32_0 : i32, i32, i32
  }
}

module attributes {stable_mosaic.version = 11 : i64} {
  func.func @_stage_kernel(%arg0: i32, %arg1: memref<10x640xbf16, #tpu.memory_space<vmem>>, %arg2: memref<2x640x128xbf16, #tpu.memory_space<vmem>>, %arg3: memref<1x128xf32, #tpu.memory_space<vmem>>, %arg4: memref<1x128xf32, #tpu.memory_space<vmem>>, %arg5: memref<128x32xf32, #tpu.memory_space<vmem>>, %arg6: memref<32x128xf32, #tpu.memory_space<vmem>>, %arg7: memref<128x32xbf16, #tpu.memory_space<vmem>>, %arg8: memref<1x32xf32, #tpu.memory_space<vmem>>, %arg9: memref<2x4x32xf32, #tpu.memory_space<vmem>>) attributes {dimension_semantics = [#tpu.dimension_semantics<parallel>], iteration_bounds = array<i64: 1>, scalar_prefetch = 0 : i64, scratch_operands = 0 : i64, tpu.core_type = #tpu.core_type<tc>, window_params = [{transform_indices = @transform_0, window_bounds = array<i64: 10, 640>}, {pipeline_mode = #tpu.pipeline_mode<synchronous>, transform_indices = @transform_1, window_bounds = array<i64: 2, 640, 128>}, {pipeline_mode = #tpu.pipeline_mode<synchronous>, transform_indices = @transform_2, window_bounds = array<i64: 1, 128>}, {pipeline_mode = #tpu.pipeline_mode<synchronous>, transform_indices = @transform_3, window_bounds = array<i64: 1, 128>}, {pipeline_mode = #tpu.pipeline_mode<synchronous>, transform_indices = @transform_4, window_bounds = array<i64: 128, 32>}, {pipeline_mode = #tpu.pipeline_mode<synchronous>, transform_indices = @transform_5, window_bounds = array<i64: 32, 128>}, {pipeline_mode = #tpu.pipeline_mode<synchronous>, transform_indices = @transform_6, window_bounds = array<i64: 128, 32>}, {pipeline_mode = #tpu.pipeline_mode<synchronous>, transform_indices = @transform_7, window_bounds = array<i64: 1, 32>}, {transform_indices = @transform_8, window_bounds = array<i64: 2, 4, 32>}]} {
    %c0 = arith.constant 0 : index
    %c0_0 = arith.constant 0 : index
    %0 = vector.load %arg1[%c0, %c0_0] : memref<10x640xbf16, #tpu.memory_space<vmem>>, vector<9x640xbf16>
    %c0_1 = arith.constant 0 : index
    %c0_2 = arith.constant 0 : index
    %c0_3 = arith.constant 0 : index
    %1 = vector.load %arg2[%c0_1, %c0_2, %c0_3] : memref<2x640x128xbf16, #tpu.memory_space<vmem>>, vector<1x640x128xbf16>
    %2 = vector.shape_cast %1 : vector<1x640x128xbf16> to vector<640x128xbf16>
    %cst = arith.constant dense<0.000000e+00> : vector<9x128xf32>
    %3 = tpu.matmul %0, %2, %cst {dimension_numbers = #tpu.dot_dimension_numbers<[1], [0], [0], [1], [0, 0, 1, 1], [], []>} : vector<9x640xbf16>, vector<640x128xbf16>, vector<9x128xf32> -> vector<9x128xf32>
    %c1 = arith.constant 1 : index
    %c0_4 = arith.constant 0 : index
    %4 = vector.load %arg1[%c1, %c0_4] : memref<10x640xbf16, #tpu.memory_space<vmem>>, vector<9x640xbf16>
    %c1_5 = arith.constant 1 : index
    %c0_6 = arith.constant 0 : index
    %c0_7 = arith.constant 0 : index
    %5 = vector.load %arg2[%c1_5, %c0_6, %c0_7] : memref<2x640x128xbf16, #tpu.memory_space<vmem>>, vector<1x640x128xbf16>
    %6 = vector.shape_cast %5 : vector<1x640x128xbf16> to vector<640x128xbf16>
    %cst_8 = arith.constant dense<0.000000e+00> : vector<9x128xf32>
    %7 = tpu.matmul %4, %6, %cst_8 {dimension_numbers = #tpu.dot_dimension_numbers<[1], [0], [0], [1], [0, 0, 1, 1], [], []>} : vector<9x640xbf16>, vector<640x128xbf16>, vector<9x128xf32> -> vector<9x128xf32>
    %8 = arith.addf %3, %7 : vector<9x128xf32>
    %9 = vector.extract_strided_slice %8 {offsets = [0, 0], sizes = [4, 128], strides = [1, 1]} : vector<9x128xf32> to vector<4x128xf32>
    %cst_9 = arith.constant dense<0.000000e+00> : vector<128xf32>
    %10 = vector.multi_reduction <add>, %9, %cst_9 [0] : vector<4x128xf32> to vector<128xf32>
    %11 = vector.shape_cast %10 : vector<128xf32> to vector<1x128xf32>
    %c0_10 = arith.constant 0 : index
    %c0_11 = arith.constant 0 : index
    %12 = vector.load %arg5[%c0_10, %c0_11] : memref<128x32xf32, #tpu.memory_space<vmem>>, vector<128x32xf32>
    %cst_12 = arith.constant dense<0.000000e+00> : vector<1x32xf32>
    %13 = tpu.matmul %11, %12, %cst_12 {dimension_numbers = #tpu.dot_dimension_numbers<[1], [0], [0], [1], [0, 0, 1, 1], [], []>} : vector<1x128xf32>, vector<128x32xf32>, vector<1x32xf32> -> vector<1x32xf32>
    %c0_13 = arith.constant 0 : index
    %c0_14 = arith.constant 0 : index
    %14 = vector.load %arg6[%c0_13, %c0_14] : memref<32x128xf32, #tpu.memory_space<vmem>>, vector<32x128xf32>
    %cst_15 = arith.constant dense<0.000000e+00> : vector<1x128xf32>
    %15 = tpu.matmul %13, %14, %cst_15 {dimension_numbers = #tpu.dot_dimension_numbers<[1], [0], [0], [1], [0, 0, 1, 1], [], []>} : vector<1x32xf32>, vector<32x128xf32>, vector<1x128xf32> -> vector<1x128xf32>
    %16 = vector.broadcast %15 : vector<1x128xf32> to vector<4x128xf32>
    %17 = arith.subf %9, %16 : vector<4x128xf32>
    %18 = arith.mulf %17, %17 : vector<4x128xf32>
    %cst_16 = arith.constant dense<0.000000e+00> : vector<128xf32>
    %19 = vector.multi_reduction <add>, %18, %cst_16 [0] : vector<4x128xf32> to vector<128xf32>
    %20 = vector.shape_cast %19 : vector<128xf32> to vector<1x128xf32>
    %c0_17 = arith.constant 0 : index
    %c0_18 = arith.constant 0 : index
    %21 = vector.load %arg5[%c0_17, %c0_18] : memref<128x32xf32, #tpu.memory_space<vmem>>, vector<128x32xf32>
    %cst_19 = arith.constant dense<0.000000e+00> : vector<1x32xf32>
    %22 = tpu.matmul %20, %21, %cst_19 {dimension_numbers = #tpu.dot_dimension_numbers<[1], [0], [0], [1], [0, 0, 1, 1], [], []>} : vector<1x128xf32>, vector<128x32xf32>, vector<1x32xf32> -> vector<1x32xf32>
    %c0_20 = arith.constant 0 : index
    %c0_21 = arith.constant 0 : index
    %23 = vector.load %arg6[%c0_20, %c0_21] : memref<32x128xf32, #tpu.memory_space<vmem>>, vector<32x128xf32>
    %cst_22 = arith.constant dense<0.000000e+00> : vector<1x128xf32>
    %24 = tpu.matmul %22, %23, %cst_22 {dimension_numbers = #tpu.dot_dimension_numbers<[1], [0], [0], [1], [0, 0, 1, 1], [], []>} : vector<1x32xf32>, vector<32x128xf32>, vector<1x128xf32> -> vector<1x128xf32>
    %cst_23 = arith.constant 9.99999974E-6 : f32
    %25 = vector.broadcast %cst_23 : f32 to vector<1x128xf32>
    %26 = arith.addf %24, %25 : vector<1x128xf32>
    %27 = math.rsqrt %26 : vector<1x128xf32>
    %28 = vector.broadcast %27 : vector<1x128xf32> to vector<4x128xf32>
    %29 = arith.mulf %17, %28 : vector<4x128xf32>
    %c0_24 = arith.constant 0 : index
    %c0_25 = arith.constant 0 : index
    %30 = vector.load %arg3[%c0_24, %c0_25] : memref<1x128xf32, #tpu.memory_space<vmem>>, vector<1x128xf32>
    %31 = vector.broadcast %30 : vector<1x128xf32> to vector<4x128xf32>
    %32 = arith.mulf %29, %31 : vector<4x128xf32>
    %c0_26 = arith.constant 0 : index
    %c0_27 = arith.constant 0 : index
    %33 = vector.load %arg4[%c0_26, %c0_27] : memref<1x128xf32, #tpu.memory_space<vmem>>, vector<1x128xf32>
    %34 = vector.broadcast %33 : vector<1x128xf32> to vector<4x128xf32>
    %35 = arith.addf %32, %34 : vector<4x128xf32>
    %36 = arith.negf %35 : vector<4x128xf32>
    %37 = math.exp %36 : vector<4x128xf32>
    %cst_28 = arith.constant 1.000000e+00 : f32
    %38 = vector.broadcast %cst_28 : f32 to vector<4x128xf32>
    %39 = arith.addf %38, %37 : vector<4x128xf32>
    %40 = arith.divf %38, %39 : vector<4x128xf32>
    %41 = arith.mulf %35, %40 : vector<4x128xf32>
    %42 = arith.truncf %41 : vector<4x128xf32> to vector<4x128xbf16>
    %c0_29 = arith.constant 0 : index
    %c0_30 = arith.constant 0 : index
    %43 = vector.load %arg7[%c0_29, %c0_30] : memref<128x32xbf16, #tpu.memory_space<vmem>>, vector<128x32xbf16>
    %cst_31 = arith.constant dense<0.000000e+00> : vector<4x32xf32>
    %44 = tpu.matmul %42, %43, %cst_31 {dimension_numbers = #tpu.dot_dimension_numbers<[1], [0], [0], [1], [0, 0, 1, 1], [], []>} : vector<4x128xbf16>, vector<128x32xbf16>, vector<4x32xf32> -> vector<4x32xf32>
    %c0_32 = arith.constant 0 : index
    %c0_33 = arith.constant 0 : index
    %45 = vector.load %arg8[%c0_32, %c0_33] : memref<1x32xf32, #tpu.memory_space<vmem>>, vector<1x32xf32>
    %46 = vector.broadcast %45 : vector<1x32xf32> to vector<4x32xf32>
    %47 = arith.addf %44, %46 : vector<4x32xf32>
    %c0_34 = arith.constant 0 : index
    %c0_35 = arith.constant 0 : index
    %c0_36 = arith.constant 0 : index
    %48 = vector.load %arg9[%c0_34, %c0_35, %c0_36] : memref<2x4x32xf32, #tpu.memory_space<vmem>>, vector<1x4x32xf32>
    %49 = vector.shape_cast %48 : vector<1x4x32xf32> to vector<4x32xf32>
    %50 = vector.shape_cast %47 : vector<4x32xf32> to vector<1x4x32xf32>
    tpu.vector_store %arg9[%c0_34, %c0_35, %c0_36], %50 {strides = array<i32>} : memref<2x4x32xf32, #tpu.memory_space<vmem>>, vector<1x4x32xf32>,
    %51 = vector.extract_strided_slice %8 {offsets = [5, 0], sizes = [4, 128], strides = [1, 1]} : vector<9x128xf32> to vector<4x128xf32>
    %cst_37 = arith.constant dense<0.000000e+00> : vector<128xf32>
    %52 = vector.multi_reduction <add>, %51, %cst_37 [0] : vector<4x128xf32> to vector<128xf32>
    %53 = vector.shape_cast %52 : vector<128xf32> to vector<1x128xf32>
    %c0_38 = arith.constant 0 : index
    %c0_39 = arith.constant 0 : index
    %54 = vector.load %arg5[%c0_38, %c0_39] : memref<128x32xf32, #tpu.memory_space<vmem>>, vector<128x32xf32>
    %cst_40 = arith.constant dense<0.000000e+00> : vector<1x32xf32>
    %55 = tpu.matmul %53, %54, %cst_40 {dimension_numbers = #tpu.dot_dimension_numbers<[1], [0], [0], [1], [0, 0, 1, 1], [], []>} : vector<1x128xf32>, vector<128x32xf32>, vector<1x32xf32> -> vector<1x32xf32>
    %c0_41 = arith.constant 0 : index
    %c0_42 = arith.constant 0 : index
    %56 = vector.load %arg6[%c0_41, %c0_42] : memref<32x128xf32, #tpu.memory_space<vmem>>, vector<32x128xf32>
    %cst_43 = arith.constant dense<0.000000e+00> : vector<1x128xf32>
    %57 = tpu.matmul %55, %56, %cst_43 {dimension_numbers = #tpu.dot_dimension_numbers<[1], [0], [0], [1], [0, 0, 1, 1], [], []>} : vector<1x32xf32>, vector<32x128xf32>, vector<1x128xf32> -> vector<1x128xf32>
    %58 = vector.broadcast %57 : vector<1x128xf32> to vector<4x128xf32>
    %59 = arith.subf %51, %58 : vector<4x128xf32>
    %60 = arith.mulf %59, %59 : vector<4x128xf32>
    %cst_44 = arith.constant dense<0.000000e+00> : vector<128xf32>
    %61 = vector.multi_reduction <add>, %60, %cst_44 [0] : vector<4x128xf32> to vector<128xf32>
    %62 = vector.shape_cast %61 : vector<128xf32> to vector<1x128xf32>
    %c0_45 = arith.constant 0 : index
    %c0_46 = arith.constant 0 : index
    %63 = vector.load %arg5[%c0_45, %c0_46] : memref<128x32xf32, #tpu.memory_space<vmem>>, vector<128x32xf32>
    %cst_47 = arith.constant dense<0.000000e+00> : vector<1x32xf32>
    %64 = tpu.matmul %62, %63, %cst_47 {dimension_numbers = #tpu.dot_dimension_numbers<[1], [0], [0], [1], [0, 0, 1, 1], [], []>} : vector<1x128xf32>, vector<128x32xf32>, vector<1x32xf32> -> vector<1x32xf32>
    %c0_48 = arith.constant 0 : index
    %c0_49 = arith.constant 0 : index
    %65 = vector.load %arg6[%c0_48, %c0_49] : memref<32x128xf32, #tpu.memory_space<vmem>>, vector<32x128xf32>
    %cst_50 = arith.constant dense<0.000000e+00> : vector<1x128xf32>
    %66 = tpu.matmul %64, %65, %cst_50 {dimension_numbers = #tpu.dot_dimension_numbers<[1], [0], [0], [1], [0, 0, 1, 1], [], []>} : vector<1x32xf32>, vector<32x128xf32>, vector<1x128xf32> -> vector<1x128xf32>
    %cst_51 = arith.constant 9.99999974E-6 : f32
    %67 = vector.broadcast %cst_51 : f32 to vector<1x128xf32>
    %68 = arith.addf %66, %67 : vector<1x128xf32>
    %69 = math.rsqrt %68 : vector<1x128xf32>
    %70 = vector.broadcast %69 : vector<1x128xf32> to vector<4x128xf32>
    %71 = arith.mulf %59, %70 : vector<4x128xf32>
    %c0_52 = arith.constant 0 : index
    %c0_53 = arith.constant 0 : index
    %72 = vector.load %arg3[%c0_52, %c0_53] : memref<1x128xf32, #tpu.memory_space<vmem>>, vector<1x128xf32>
    %73 = vector.broadcast %72 : vector<1x128xf32> to vector<4x128xf32>
    %74 = arith.mulf %71, %73 : vector<4x128xf32>
    %c0_54 = arith.constant 0 : index
    %c0_55 = arith.constant 0 : index
    %75 = vector.load %arg4[%c0_54, %c0_55] : memref<1x128xf32, #tpu.memory_space<vmem>>, vector<1x128xf32>
    %76 = vector.broadcast %75 : vector<1x128xf32> to vector<4x128xf32>
    %77 = arith.addf %74, %76 : vector<4x128xf32>
    %78 = arith.negf %77 : vector<4x128xf32>
    %79 = math.exp %78 : vector<4x128xf32>
    %cst_56 = arith.constant 1.000000e+00 : f32
    %80 = vector.broadcast %cst_56 : f32 to vector<4x128xf32>
    %81 = arith.addf %80, %79 : vector<4x128xf32>
    %82 = arith.divf %80, %81 : vector<4x128xf32>
    %83 = arith.mulf %77, %82 : vector<4x128xf32>
    %84 = arith.truncf %83 : vector<4x128xf32> to vector<4x128xbf16>
    %c0_57 = arith.constant 0 : index
    %c0_58 = arith.constant 0 : index
    %85 = vector.load %arg7[%c0_57, %c0_58] : memref<128x32xbf16, #tpu.memory_space<vmem>>, vector<128x32xbf16>
    %cst_59 = arith.constant dense<0.000000e+00> : vector<4x32xf32>
    %86 = tpu.matmul %84, %85, %cst_59 {dimension_numbers = #tpu.dot_dimension_numbers<[1], [0], [0], [1], [0, 0, 1, 1], [], []>} : vector<4x128xbf16>, vector<128x32xbf16>, vector<4x32xf32> -> vector<4x32xf32>
    %c0_60 = arith.constant 0 : index
    %c0_61 = arith.constant 0 : index
    %87 = vector.load %arg8[%c0_60, %c0_61] : memref<1x32xf32, #tpu.memory_space<vmem>>, vector<1x32xf32>
    %88 = vector.broadcast %87 : vector<1x32xf32> to vector<4x32xf32>
    %89 = arith.addf %86, %88 : vector<4x32xf32>
    %c1_62 = arith.constant 1 : index
    %c0_63 = arith.constant 0 : index
    %c0_64 = arith.constant 0 : index
    %90 = vector.load %arg9[%c1_62, %c0_63, %c0_64] : memref<2x4x32xf32, #tpu.memory_space<vmem>>, vector<1x4x32xf32>
    %91 = vector.shape_cast %90 : vector<1x4x32xf32> to vector<4x32xf32>
    %92 = vector.shape_cast %89 : vector<4x32xf32> to vector<1x4x32xf32>
    tpu.vector_store %arg9[%c1_62, %c0_63, %c0_64], %92 {strides = array<i32>} : memref<2x4x32xf32, #tpu.memory_space<vmem>>, vector<1x4x32xf32>,
    return
  }
  func.func @transform_0(%arg0: i32) -> (i32, i32) {
    %c0_i32 = arith.constant 0 : i32
    %c0_i32_0 = arith.constant 0 : i32
    return %arg0, %c0_i32 : i32, i32
  }
  func.func @transform_1(%arg0: i32) -> (i32, i32, i32) {
    %c0_i32 = arith.constant 0 : i32
    %c0_i32_0 = arith.constant 0 : i32
    %c0_i32_1 = arith.constant 0 : i32
    %c0_i32_2 = arith.constant 0 : i32
    return %c0_i32, %c0_i32_0, %c0_i32_1 : i32, i32, i32
  }
  func.func @transform_2(%arg0: i32) -> (i32, i32) {
    %c0_i32 = arith.constant 0 : i32
    %c0_i32_0 = arith.constant 0 : i32
    %c0_i32_1 = arith.constant 0 : i32
    return %c0_i32, %c0_i32_0 : i32, i32
  }
  func.func @transform_3(%arg0: i32) -> (i32, i32) {
    %c0_i32 = arith.constant 0 : i32
    %c0_i32_0 = arith.constant 0 : i32
    %c0_i32_1 = arith.constant 0 : i32
    return %c0_i32, %c0_i32_0 : i32, i32
  }
  func.func @transform_4(%arg0: i32) -> (i32, i32) {
    %c0_i32 = arith.constant 0 : i32
    %c0_i32_0 = arith.constant 0 : i32
    %c0_i32_1 = arith.constant 0 : i32
    return %c0_i32, %c0_i32_0 : i32, i32
  }
  func.func @transform_5(%arg0: i32) -> (i32, i32) {
    %c0_i32 = arith.constant 0 : i32
    %c0_i32_0 = arith.constant 0 : i32
    %c0_i32_1 = arith.constant 0 : i32
    return %c0_i32, %c0_i32_0 : i32, i32
  }
  func.func @transform_6(%arg0: i32) -> (i32, i32) {
    %c0_i32 = arith.constant 0 : i32
    %c0_i32_0 = arith.constant 0 : i32
    %c0_i32_1 = arith.constant 0 : i32
    return %c0_i32, %c0_i32_0 : i32, i32
  }
  func.func @transform_7(%arg0: i32) -> (i32, i32) {
    %c0_i32 = arith.constant 0 : i32
    %c0_i32_0 = arith.constant 0 : i32
    %c0_i32_1 = arith.constant 0 : i32
    return %c0_i32, %c0_i32_0 : i32, i32
  }
  func.func @transform_8(%arg0: i32) -> (i32, i32, i32) {
    %c0_i32 = arith.constant 0 : i32
    %c0_i32_0 = arith.constant 0 : i32
    %c0_i32_1 = arith.constant 0 : i32
    return %arg0, %c0_i32, %c0_i32_0 : i32, i32, i32
  }
}

</mosaic_0001>

<bundles_post_ra>
// kernel: encoder_forward.3
= control target key start
LH: loop header
LB: loop body
LE: loop exit
PB: predicated region body
PF: predicated region fallthrough
CT: control target
= control target key end

     0   :  { %11 = vsyncpa [#allocation3], 0  ;;  %s5026_s0 = inlined_call_operand.vmem [shape: bf16[36,72], index: 0, kind: input, shape index: {}]   ;;  %s5027_s1 = inlined_call_operand.hbm [shape: bf16[3,72,512], index: 1, kind: input, shape index: {}]   ;;  %s5028_s2 = inlined_call_operand.hbm [shape: f32[1,512], index: 2, kind: input, shape index: {}]   ;;  %s5029_s3 = inlined_call_operand.hbm [shape: f32[1,512], index: 3, kind: input, shape index: {}]   ;;  %s5030_s4 = inlined_call_operand.vmem [shape: f32[512,32], index: 4, kind: input, shape index: {}]   ;;  %s5031_s5 = inlined_call_operand.hbm [shape: f32[32,512], index: 5, kind: input, shape index: {}]   ;;  %s5032_s6 = inlined_call_operand.vmem [shape: bf16[2,16,512], index: 6, kind: output, shape index: {}]  }
   0x1   :  { %12 = vsyncpa [#allocation5], 0 }
   0x2   :  { %13 = vsyncpa [#allocation8], 0  ;;  %s3679_s21 = smov [#allocation4]   ;;  %s3680_s23 = smov [#allocation2]  }
   0x3   :  { %s34_s22 = sshll.u32 %s3679_s21, 4  ;;  %s21_s24 = sshll.u32 %s3680_s23, 4  ;;  %s35_s22 = int_to_ptr.vmem [resolvable:$true] %s34_s22  ;;  %s22_s24 = int_to_ptr.vmem [resolvable:$true] %s21_s24 }
   0x4   :  { %s3601_s25 = scalar_lea.vmem %s35_s22, 64  ;;  %p3606_p1 = scmp.lt.s32.totalorder %s35_s22, %s35_s22 }
   0x5   :  { %p3602_p0 = scmp.ne.s32.totalorder %s35_s22, %s3601_s25  ;;  %p3607_p2 = scmp.lt.s32.totalorder %s3601_s25, %s3601_s25 }
   0x7   :  { %p3608_p3 = por %p3607_p2, %p3606_p1 }
   0x9   :  { %p3609_p4 = pnand %p3608_p3, %p3602_p0 }
   0xb   :  { %3612 = shalt.err (!%p3609_p4)
}
   0xc   :  { %37 = dma.hbm_to_vmem [thread:$0]  %s5028_s2, 64, %s35_s22, [#allocation5]  }
   0xd   :  { %s3621_s28 = scalar_lea.vmem %s22_s24, 6912  ;;  %p3626_p6 = scmp.lt.s32.totalorder %s22_s24, %s22_s24 }
   0xe   :  { %p3622_p5 = scmp.ne.s32.totalorder %s22_s24, %s3621_s28  ;;  %p3627_p7 = scmp.lt.s32.totalorder %s3621_s28, %s3621_s28 }
  0x10   :  { %p3628_p8 = por %p3627_p7, %p3626_p6 }
  0x12   :  { %p3629_p9 = pnand %p3628_p8, %p3622_p5 }
  0x14   :  { %3632 = shalt.err (!%p3629_p9)
}
  0x15   :  { %s3681_s29 = smov 256   ;;  %s3682_s30 = smov 16  }
  0x16   :  { %27 = dma.hbm_to_vmem [thread:$0]  %s5027_s1, 6912, %s22_s24, [#allocation3], %s3681_s29, %s3681_s29, %s3682_s30  }
  0x17   :  { %s3683_s9 = smov [#allocation6]   ;;  %s3684_s11 = smov [#allocation7]  }
  0x18   :  { %s44_s10 = sshll.u32 %s3683_s9, 4  ;;  %s55_s12 = sshll.u32 %s3684_s11, 4  ;;  %s45_s10 = int_to_ptr.vmem [resolvable:$true] %s44_s10  ;;  %s56_s12 = int_to_ptr.vmem [resolvable:$true] %s55_s12 }
  0x19   :  { %s3641_s2 = scalar_lea.vmem %s45_s10, 64  ;;  %p3646_p11 = scmp.lt.s32.totalorder %s45_s10, %s45_s10 }
  0x1a   :  { %p3642_p10 = scmp.ne.s32.totalorder %s45_s10, %s3641_s2  ;;  %p3647_p12 = scmp.lt.s32.totalorder %s3641_s2, %s3641_s2 }
  0x1c   :  { %p3648_p13 = por %p3647_p12, %p3646_p11 }
  0x1e   :  { %p3649_p0 = pnand %p3648_p13, %p3642_p10 }
  0x20   :  { %3652 = shalt.err (!%p3649_p0)
}
  0x21   :  { %47 = dma.hbm_to_vmem [thread:$0]  %s5029_s3, 64, %s45_s10, [#allocation5]  }
  0x22   :  { %s3661_s15 = scalar_lea.vmem %s56_s12, 2048  ;;  %p3666_p2 = scmp.lt.s32.totalorder %s56_s12, %s56_s12 }
  0x23   :  { %p3662_p1 = scmp.ne.s32.totalorder %s56_s12, %s3661_s15  ;;  %p3667_p3 = scmp.lt.s32.totalorder %s3661_s15, %s3661_s15 }
  0x25   :  { %p3668_p4 = por %p3667_p3, %p3666_p2 }
  0x27   :  { %p3669_p5 = pnand %p3668_p4, %p3662_p1 }
  0x29   :  { %3672 = shalt.err (!%p3669_p5)
}
  0x2a   :  { %s3685_s1 = smov 512   ;;  %s3686_s16 = smov 32  }
  0x2b   :  { %61 = dma.hbm_to_vmem [thread:$0]  %s5031_s5, 2048, %s56_s12, [#allocation8], %s3685_s1, %s3685_s1, %s3686_s16  }
  0x2c   :  { %3673 = dma.done.wait [#allocation3], 6912  }
  0x2d   :  { %3674 = vsyncadd [#allocation3], 4294960384 }
  0x2e   :  { %3675 = dma.done.wait [#allocation5], 128  }
  0x2f   :  { %3676 = vsyncadd [#allocation5], 4294967168 }
  0x30   :  { %3677 = dma.done.wait [#allocation8], 2048  }
  0x31   :  { %3678 = vsyncadd [#allocation8], 4294965248  ;;  %v3687_v0 = vmov 0   ;;  %v116_v1 = vld [vmem:[#allocation2 + $0x110] sm:$0xff]  ;;  %vm255_vm0 = vcmask 1043456   ;;  %v117_v2 = vld [vmem:[#allocation2 + $0x118] sm:$0xff] }
  0x32   :  { %300 = vmatprep.mubr.bf16.mxu0 %v3687_v0  ;;  %361 = vmatprep.mubr.bf16.mxu1 %v3687_v0  ;;  %v2915_v3 = vcombine.high %v116_v1, %v116_v1  ;;  %v2917_v4 = vcombine.high %v117_v2, %v117_v2  ;;  %v2914_v5 = vcombine.low %v116_v1, %v116_v1  ;;  %v3332_v7 = vld [vmem:[#allocation2 + $0xf4] ss:$16 sps:$4 sm:$0xff]   ;;  %v3334_v8 = vld [vmem:[#allocation2 + $0xfc] ss:$16 sps:$4 sm:$0xff]   ;;  %v3336_v11 = vld [vmem:[#allocation2 + $0xf0] ss:$16 sps:$4 sm:$0xff]  }
  0x33   :  { %v2916_v6 = vcombine.low %v117_v2, %v117_v2  ;;  %v3337_v12 = vld [vmem:[#allocation2 + $0xf8] ss:$16 sps:$4 sm:$0xff]   ;;  %v3338_v13 = vld [vmem:[#allocation2 + $0xd4] ss:$16 sps:$4 sm:$0xff]   ;;  %v3340_v14 = vld [vmem:[#allocation2 + $0xdc] ss:$16 sps:$4 sm:$0xff]  }
  0x34   :  { %2918 = vmatprep.subr.msk.bf16.mxu0 %vm255_vm0, %v2915_v3  ;;  %2922 = vmatprep.subr.msk.bf16.mxu1 %vm255_vm0, %v2917_v4  ;;  %v257_v9 = vsel %vm255_vm0, %v2914_v5, 0  ;;  %v3342_v15 = vld [vmem:[#allocation2 + $0xd0] ss:$16 sps:$4 sm:$0xff]   ;;  %v3343_v16 = vld [vmem:[#allocation2 + $0xd8] ss:$16 sps:$4 sm:$0xff]   ;;  %vm245_vm2 = vcmask 588800  }
  0x35   :  { %v263_v10 = vsel %vm255_vm0, %v2916_v6, 0  ;;  %275 = vmatpush1.bf16.msra.mxu0 %v257_v9  ;;  %v3344_v17 = vld [vmem:[#allocation2 + $0xb4] ss:$16 sps:$4 sm:$0xff]   ;;  %v3346_v18 = vld [vmem:[#allocation2 + $0xbc] ss:$16 sps:$4 sm:$0xff]   ;;  %vm647_vm3 = vcmask 1046528  }
  0x36   :  { %336 = vmatpush1.bf16.msra.mxu1 %v263_v10  ;;  %276 = vmatprep.subr.bf16.mxu0 %v3332_v7  ;;  %v3348_v19 = vld [vmem:[#allocation2 + $0xb0] ss:$16 sps:$4 sm:$0xff]   ;;  %v3349_v20 = vld [vmem:[#allocation2 + $0xb8] ss:$16 sps:$4 sm:$0xff]   ;;  %v3350_v21 = vld [vmem:[#allocation2 + $0x94] ss:$16 sps:$4 sm:$0xff]  }
  0x37   :  { %337 = vmatprep.subr.bf16.mxu1 %v3334_v8  ;;  %v75_v22 = vld [vmem:[%s5026_s0] sm:$0xf]  ;;  %v3748_v23 = vld [vmem:[%s5026_s0 + $0x4] sm:$0xf]  ;;  %v3756_v25 = vld [vmem:[%s5026_s0 + $0x8] sm:$0xff]   ;;  %vm1154_vm4 = vcmask 261120  }
  0x38   :  { %v3751_v24 = vcombine.low %v75_v22, %v3748_v23  ;;  %v3352_v26 = vld [vmem:[#allocation2 + $0x9c] ss:$16 sps:$4 sm:$0xff]   ;;  %v96_v27 = vld [vmem:[#allocation2 + $0x80] sm:$0xff]  ;;  %v140_v30 = vshll.u32 %v3756_v25, 16  ;;  %v3355_v33 = vld [vmem:[#allocation2 + $0x98] ss:$16 sps:$4 sm:$0xff]  }
  0x39   :  { %277 = vmatpush1.bf16.msra.mxu0 %v3336_v11  ;;  %v97_v31 = vld [vmem:[#allocation2 + $0x88] sm:$0xff]  ;;  %v3354_v32 = vld [vmem:[#allocation2 + $0x90] ss:$16 sps:$4 sm:$0xff]   ;;  %v2944_v36 = vcombine.high %v96_v27, %v96_v27  ;;  %vm131_vm1 = vsmask.f32 7424  ;;  %v2943_v38 = vcombine.low %v96_v27, %v96_v27  ;;  %v144_v44 = vshrl.u32 %v3756_v25, 16 }
  0x3a   :  { %338 = vmatpush1.bf16.msra.mxu1 %v3337_v12  ;;  %278 = vmatprep.subr.bf16.mxu0 %v3338_v13  ;;  %v133_v28 = vshrl.u32 %v3751_v24, 16  ;;  %v135_v29 = vshll.u32 %v3751_v24, 16  ;;  %v142_v35 = vrot.slane %v140_v30, 1  ;;  %v2946_v37 = vcombine.high %v97_v31, %v97_v31  ;;  %v3764_v41 = vld [vmem:[%s5026_s0 + $0x10] ss:$0 sps:$4 sm:$0x33]  }
  0x3b   :  { %339 = vmatprep.subr.bf16.mxu1 %v3340_v14  ;;  %v2945_v39 = vcombine.low %v97_v31, %v97_v31  ;;  %v3364_v43 = vld [vmem:[#allocation2 + $0x64] ss:$16 sps:$4 sm:$0xff]   ;;  %v148_v45 = vshll.u32 %v3764_v41, 16  ;;  %v491_v46 = vsel %vm255_vm0, %v2943_v38, 0  ;;  %v3367_v48 = vld [vmem:[#allocation2 + $0x6c] ss:$16 sps:$4 sm:$0xff]  }
  0x3c   :  { %v137_v34 = vrot.slane %v135_v29, 1  ;;  %v3362_v49 = vld [vmem:[#allocation2 + $0x60] ss:$16 sps:$4 sm:$0xff]   ;;  %v3365_v50 = vld [vmem:[#allocation2 + $0x68] ss:$16 sps:$4 sm:$0xff]   ;;  %v146_v51 = vor.u32 %v144_v44, %v142_v35  ;;  %v152_v61 = vshrl.u32 %v3764_v41, 16 }
  0x3d   :  { %279 = vmatpush1.bf16.msra.mxu0 %v3342_v15  ;;  %v497_v47 = vsel %vm255_vm0, %v2945_v39, 0  ;;  %v150_v52 = vrot.slane %v148_v45, 1  ;;  %v3371_v53 = vld [vmem:[#allocation2 + $0x44] ss:$16 sps:$4 sm:$0xff]   ;;  %v3374_v54 = vld [vmem:[#allocation2 + $0x4c] ss:$16 sps:$4 sm:$0xff]  }
  0x3e   :  { %340 = vmatpush1.bf16.msra.mxu1 %v3343_v16  ;;  %280 = vmatprep.subr.bf16.mxu0 %v3344_v17  ;;  %v138_v40 = vor.u32 %v137_v34, %v133_v28  ;;  %v3369_v56 = vld [vmem:[#allocation2 + $0x40] ss:$16 sps:$4 sm:$0xff]   ;;  %v3372_v57 = vld [vmem:[#allocation2 + $0x48] ss:$16 sps:$4 sm:$0xff]   ;;  %v3377_v58 = vld [vmem:[#allocation2 + $0x24] ss:$16 sps:$4 sm:$0xff]  }
  0x3f   :  { %341 = vmatprep.subr.bf16.mxu1 %v3346_v18  ;;  %v151_v55 = vsel %vm131_vm1, %v146_v51, %v150_v52  ;;  %v3380_v59 = vld [vmem:[#allocation2 + $0x2c] ss:$16 sps:$4 sm:$0xff]   ;;  %v3375_v60 = vld [vmem:[#allocation2 + $0x20] ss:$16 sps:$4 sm:$0xff]   ;;  %v3378_v62 = vld [vmem:[#allocation2 + $0x28] ss:$16 sps:$4 sm:$0xff]   ;;  %v154_v3 = vor.u32 %v152_v61, %v150_v52 }
  0x40   :  { %v143_v42 = vsel %vm131_vm1, %v138_v40, %v142_v35  ;;  %v3383_v63 = vld [vmem:[#allocation2 + $0x4] ss:$16 sps:$4 sm:$0xff]   ;;  %v3386_v1 = vld [vmem:[#allocation2 + $0xc] ss:$16 sps:$4 sm:$0xff]   ;;  %v3381_v2 = vld [vmem:[#allocation2] ss:$16 sps:$4 sm:$0xff]  }
  0x41   :  { %281 = vmatpush1.bf16.msra.mxu0 %v3348_v19  ;;  %v642_v4 = vld [vmem:[#allocation2 + $0x1a0] sm:$0xff]  ;;  %v643_v5 = vld [vmem:[#allocation2 + $0x1a8] sm:$0xff]  ;;  %v3409_v30 = vld [vmem:[%s5026_s0 + $0x10] ss:$0 sps:$4 sm:$0x11]   ;;  %v649_v35 = vrot.slane %v3756_v25, 1 }
  0x42   :  { %342 = vmatpush1.bf16.msra.mxu1 %v3349_v20  ;;  %282 = vmatprep.subr.bf16.mxu0 %v3350_v21  ;;  %v3384_v6 = vld [vmem:[#allocation2 + $0x8] ss:$16 sps:$4 sm:$0xff]   ;;  %v2973_v7 = vcombine.high %v642_v4, %v642_v4  ;;  %v2975_v8 = vcombine.high %v643_v5, %v643_v5  ;;  %v2972_v9 = vcombine.low %v642_v4, %v642_v4  ;;  %v3393_v13 = vld [vmem:[#allocation2 + $0x184] ss:$16 sps:$4 sm:$0xff]   ;;  %v3396_v14 = vld [vmem:[#allocation2 + $0x18c] ss:$16 sps:$4 sm:$0xff]  }
  0x43   :  { %343 = vmatprep.subr.bf16.mxu1 %v3352_v26  ;;  %v2974_v10 = vcombine.low %v643_v5, %v643_v5  ;;  %v3391_v15 = vld [vmem:[#allocation2 + $0x180] ss:$16 sps:$4 sm:$0xff]   ;;  %v3394_v16 = vld [vmem:[#allocation2 + $0x188] ss:$16 sps:$4 sm:$0xff]   ;;  %v3399_v17 = vld [vmem:[#allocation2 + $0x164] ss:$16 sps:$4 sm:$0xff]  }
  0x44   :  { %v753_v11 = vsel %vm255_vm0, %v2972_v9, 0  ;;  %v3402_v18 = vld [vmem:[#allocation2 + $0x16c] ss:$16 sps:$4 sm:$0xff]   ;;  %v3397_v19 = vld [vmem:[#allocation2 + $0x160] ss:$16 sps:$4 sm:$0xff]   ;;  %vm1829_vm5 = vcmask 1045504  }
  0x45   :  { %283 = vmatpush1.bf16.msra.mxu0 %v3354_v32  ;;  %v759_v12 = vsel %vm255_vm0, %v2974_v10, 0  ;;  %v3400_v20 = vld [vmem:[#allocation2 + $0x168] ss:$16 sps:$4 sm:$0xff]   ;;  %v3405_v21 = vld [vmem:[#allocation2 + $0x144] ss:$16 sps:$4 sm:$0xff]   ;;  %vm2862_vm6 = vcmask 1042432  }
  0x46   :  { %344 = vmatpush1.bf16.msra.mxu1 %v3355_v33  ;;  %2947 = vmatprep.subr.msk.bf16.mxu0 %vm255_vm0, %v2944_v36  ;;  %v3408_v22 = vld [vmem:[#allocation2 + $0x14c] ss:$16 sps:$4 sm:$0xff]   ;;  %v3406_v26 = vld [vmem:[#allocation2 + $0x148] ss:$16 sps:$4 sm:$0xff]   ;;  %v3412_v27 = vld [vmem:[#allocation2 + $0x124] ss:$16 sps:$4 sm:$0xff]  }
  0x47   :  { %2951 = vmatprep.subr.msk.bf16.mxu1 %vm255_vm0, %v2946_v37  ;;  %v3415_v28 = vld [vmem:[#allocation2 + $0x12c] ss:$16 sps:$4 sm:$0xff]   ;;  %v624_v29 = vld [vmem:[%s5026_s0] sm:$0xe]  ;;  %v3413_v32 = vld [vmem:[#allocation2 + $0x128] ss:$16 sps:$4 sm:$0xff]  }
  0x48   :  { %2919 = vmatmul.mubr.msk.bf16.vlgmr.msra.gmra.mxu0 %vm245_vm2, %v143_v42  ;;  %v3410_v31 = vld [vmem:[#allocation2 + $0x120] ss:$16 sps:$4 sm:$0xff]   ;;  %v2955_v33 = vcombine.low %v624_v29, %v3748_v23  ;;  %v651_v23 = vrot.slane %v3764_v41, 1  ;;  %v3834_v38 = vld [vmem:[%s5030_s4 + $0x1f8] sm:$0xff]  ;;  %v3877_v44 = vld [vmem:[%s5030_s4 + $0xe8] sm:$0xff]  ;;  %vm2863_vm7 = vcmask 1046532  }
  0x49   :  { %2923 = vmatmul.mubr.msk.bf16.vlgmr.msra.gmra.mxu1 %vm245_vm2, %v143_v42  ;;  %509 = vmatpush1.bf16.msra.mxu0 %v491_v46  ;;  %v3846_v39 = vld [vmem:[%s5030_s4 + $0x178] sm:$0xff]  ;;  %v3853_v40 = vld [vmem:[%s5030_s4 + $0xf0] sm:$0xff]  ;;  %v3882_v45 = vld [vmem:[%s5030_s4 + $0x1e8] sm:$0xff] }
  0x4a   :  { %570 = vmatpush1.bf16.msra.mxu1 %v497_v47  ;;  %510 = vmatprep.subr.bf16.mxu0 %v3364_v43  ;;  %v648_v34 = vrot.slane %v2955_v33, 1  ;;  %v652_v37 = vsel %vm647_vm3, %v649_v35, %v651_v23  ;;  %v3858_v41 = vld [vmem:[%s5030_s4 + $0x1f0] sm:$0xff]  ;;  %v3889_v46 = vld [vmem:[%s5030_s4 + $0x68] sm:$0xff]  ;;  %v3918_v51 = vld [vmem:[%s5030_s4 + $0x160] sm:$0xff] }
  0x4b   :  { %571 = vmatprep.subr.bf16.mxu1 %v3367_v48  ;;  %310 = vmatprep.mubr.bf16.mxu0 %v3687_v0  ;;  %v3865_v42 = vld [vmem:[%s5030_s4 + $0x70] sm:$0xff]  ;;  %5151 = vst [vmem:[#allocation12_spill] sm:$0xff] %v3889_v46  ;;  %v3894_v47 = vld [vmem:[%s5030_s4 + $0x168] sm:$0xff]  ;;  %v3901_v48 = vld [vmem:[%s5030_s4 + $0xe0] sm:$0xff] }
  0x4c   :  { %371 = vmatprep.mubr.bf16.mxu1 %v3687_v0  ;;  %v650_v36 = vsel %vm647_vm3, %v648_v34, %v649_v35  ;;  %v3870_v43 = vld [vmem:[%s5030_s4 + $0x170] sm:$0xff]  ;;  %5152 = vst [vmem:[#allocation13_spill] sm:$0xff] %v3894_v47  ;;  %5153 = vst [vmem:[#allocation14_spill] sm:$0xff] %v3901_v48  ;;  %v3925_v52 = vld [vmem:[%s5030_s4 + $0xd8] sm:$0xff] }
  0x4d   :  { %511 = vmatpush1.bf16.msra.mxu0 %v3362_v49  ;;  %v3906_v49 = vld [vmem:[%s5030_s4 + $0x1e0] sm:$0xff]  ;;  %5156 = vst [vmem:[#allocation17_spill] sm:$0xff] %v3918_v51  ;;  %5157 = vst [vmem:[#allocation18_spill] sm:$0xff] %v3925_v52  ;;  %v3978_v61 = vld [vmem:[%s5030_s4 + $0x1c8] sm:$0xff] }
  0x4e   :  { %572 = vmatpush1.bf16.msra.mxu1 %v3365_v50  ;;  %512 = vmatprep.subr.bf16.mxu0 %v3371_v53  ;;  %5154 = vst [vmem:[#allocation15_spill] sm:$0xff] %v3906_v49  ;;  %v3913_v50 = vld [vmem:[%s5030_s4 + $0x60] sm:$0xff]  ;;  %v3930_v53 = vld [vmem:[%s5030_s4 + $0x1d8] sm:$0xff]  ;;  %5166 = vst [vmem:[#allocation27_spill] sm:$0xff] %v3978_v61 }
  0x4f   :  { %573 = vmatprep.subr.bf16.mxu1 %v3374_v54  ;;  %5155 = vst [vmem:[#allocation16_spill] sm:$0xff] %v3913_v50  ;;  %5158 = vst [vmem:[#allocation19_spill] sm:$0xff] %v3930_v53  ;;  %v3937_v54 = vld [vmem:[%s5030_s4 + $0x58] sm:$0xff]  ;;  %v4014_v4 = vld [vmem:[%s5030_s4 + $0x140] sm:$0xff] }
  0x50   :  { %2920 = vmatmul.mubr.msk.bf16.gmra.mxu0 %vm245_vm2, %v151_v55  ;;  %5159 = vst [vmem:[#allocation20_spill] sm:$0xff] %v3937_v54  ;;  %5172 = vst [vmem:[#allocation33_spill] sm:$0xff] %v4014_v4  ;;  %v4021_v5 = vld [vmem:[%s5030_s4 + $0xb8] sm:$0xff]  ;;  %v4045_v9 = vld [vmem:[%s5030_s4 + $0xb0] sm:$0xff] }
  0x51   :  { %2924 = vmatmul.mubr.msk.bf16.gmra.mxu1 %vm245_vm2, %v151_v55  ;;  %513 = vmatpush1.bf16.msra.mxu0 %v3369_v56  ;;  %v3942_v55 = vld [vmem:[%s5030_s4 + $0x158] sm:$0xff]  ;;  %v3949_v56 = vld [vmem:[%s5030_s4 + $0xd0] sm:$0xff]  ;;  %5173 = vst [vmem:[#allocation34_spill] sm:$0xff] %v4021_v5  ;;  %5177 = vst [vmem:[#allocation38_spill] sm:$0xff] %v4045_v9 }
  0x52   :  { %574 = vmatpush1.bf16.msra.mxu1 %v3372_v57  ;;  %320 = vmatprep.mubr.bf16.mxu0 %v3687_v0  ;;  %5160 = vst [vmem:[#allocation21_spill] sm:$0xff] %v3942_v55  ;;  %5161 = vst [vmem:[#allocation22_spill] sm:$0xff] %v3949_v56  ;;  %v3954_v57 = vld [vmem:[%s5030_s4 + $0x1d0] sm:$0xff]  ;;  %v4177_v33 = vld [vmem:[%s5030_s4 + $0x8] sm:$0xff] }
  0x53   :  { %381 = vmatprep.mubr.bf16.mxu1 %v3687_v0  ;;  %514 = vmatprep.subr.bf16.mxu0 %v3377_v58  ;;  %5162 = vst [vmem:[#allocation23_spill] sm:$0xff] %v3954_v57  ;;  %v3961_v58 = vld [vmem:[%s5030_s4 + $0x50] sm:$0xff]  ;;  %5199 = vst [vmem:[#allocation60_spill] sm:$0xff] %v4177_v33  ;;  %v4182_v34 = vld [vmem:[%s5030_s4 + $0x108] sm:$0xff] }
  0x54   :  { %575 = vmatprep.subr.bf16.mxu1 %v3380_v59  ;;  %5163 = vst [vmem:[#allocation24_spill] sm:$0xff] %v3961_v58  ;;  %v3966_v59 = vld [vmem:[%s5030_s4 + $0x150] sm:$0xff]  ;;  %5200 = vst [vmem:[#allocation61_spill] sm:$0xff] %v4182_v34  ;;  %v4189_v35 = vld [vmem:[%s5030_s4 + $0x80] sm:$0xff] }
  0x55   :  { %515 = vmatpush1.bf16.msra.mxu0 %v3375_v60  ;;  %5164 = vst [vmem:[#allocation25_spill] sm:$0xff] %v3966_v59  ;;  %v3973_v60 = vld [vmem:[%s5030_s4 + $0xc8] sm:$0xff]  ;;  %v4050_v10 = vld [vmem:[%s5030_s4 + $0x1b0] sm:$0xff]  ;;  %5201 = vst [vmem:[#allocation62_spill] sm:$0xff] %v4189_v35 }
  0x56   :  { %576 = vmatpush1.bf16.msra.mxu1 %v3378_v62  ;;  %516 = vmatprep.subr.bf16.mxu0 %v3383_v63  ;;  %5165 = vst [vmem:[#allocation26_spill] sm:$0xff] %v3973_v60  ;;  %v3985_v62 = vld [vmem:[%s5030_s4 + $0x48] sm:$0xff]  ;;  %5178 = vst [vmem:[#allocation39_spill] sm:$0xff] %v4050_v10  ;;  %v4153_v29 = vld [vmem:[%s5030_s4 + $0x10] sm:$0xff] }
  0x57   :  { %577 = vmatprep.subr.bf16.mxu1 %v3386_v1  ;;  %5167 = vst [vmem:[#allocation28_spill] sm:$0xff] %v3985_v62  ;;  %v3990_v63 = vld [vmem:[%s5030_s4 + $0x148] sm:$0xff]  ;;  %v3997_v1 = vld [vmem:[%s5030_s4 + $0xc0] sm:$0xff]  ;;  %5195 = vst [vmem:[#allocation56_spill] sm:$0xff] %v4153_v29 }
  0x58   :  { %2921 = vmatmul.mubr.msk.bf16.gmra.mxu0 %vm245_vm2, %v154_v3  ;;  %5168 = vst [vmem:[#allocation29_spill] sm:$0xff] %v3990_v63  ;;  %5169 = vst [vmem:[#allocation30_spill] sm:$0xff] %v3997_v1 }
  0x59   :  { %2925 = vmatmul.mubr.msk.bf16.gmra.mxu1 %vm245_vm2, %v154_v3  ;;  %517 = vmatpush1.bf16.msra.mxu0 %v3381_v2  ;;  %v4002_v2 = vld [vmem:[%s5030_s4 + $0x1c0] sm:$0xff]  ;;  %vm4999_vm8 = vmor %vm2862_vm6, %vm2863_vm7 }
  0x5a   :  { %578 = vmatpush1.bf16.msra.mxu1 %v3384_v6  ;;  %534 = vmatprep.mubr.bf16.mxu0 %v3687_v0  ;;  %5170 = vst [vmem:[#allocation31_spill] sm:$0xff] %v4002_v2  ;;  %v4009_v3 = vld [vmem:[%s5030_s4 + $0x40] sm:$0xff]  ;;  %v4026_v6 = vld [vmem:[%s5030_s4 + $0x1b8] sm:$0xff] }
  0x5b   :  { %595 = vmatprep.mubr.bf16.mxu1 %v3687_v0  ;;  %2976 = vmatprep.subr.msk.bf16.mxu0 %vm255_vm0, %v2973_v7  ;;  %5171 = vst [vmem:[#allocation32_spill] sm:$0xff] %v4009_v3  ;;  %5174 = vst [vmem:[#allocation35_spill] sm:$0xff] %v4026_v6  ;;  %v4033_v7 = vld [vmem:[%s5030_s4 + $0x38] sm:$0xff] }
  0x5c   :  { %2980 = vmatprep.subr.msk.bf16.mxu1 %vm255_vm0, %v2975_v8  ;;  %5175 = vst [vmem:[#allocation36_spill] sm:$0xff] %v4033_v7  ;;  %v4038_v8 = vld [vmem:[%s5030_s4 + $0x138] sm:$0xff] }
  0x5d   :  { %5176 = vst [vmem:[#allocation37_spill] sm:$0xff] %v4038_v8 }
  0x60   :  { %2948 = vmatmul.mubr.msk.bf16.vlgmr.msra.gmra.mxu0 %vm245_vm2, %v3751_v24 }
  0x61   :  { %2952 = vmatmul.mubr.msk.bf16.vlgmr.msra.gmra.mxu1 %vm245_vm2, %v3751_v24  ;;  %771 = vmatpush1.bf16.msra.mxu0 %v753_v11  ;;  %v3403_v24 = vld [vmem:[#allocation2 + $0x140] ss:$16 sps:$4 sm:$0xff]  }
  0x62   :  { %832 = vmatpush1.bf16.msra.mxu1 %v759_v12  ;;  %772 = vmatprep.subr.bf16.mxu0 %v3393_v13  ;;  %v4057_v11 = vld [vmem:[%s5030_s4 + $0x30] sm:$0xff]  ;;  %v4069_v13 = vld [vmem:[%s5030_s4 + $0xa8] sm:$0xff] }
  0x63   :  { %833 = vmatprep.subr.bf16.mxu1 %v3396_v14  ;;  %544 = vmatprep.mubr.bf16.mxu0 %v3687_v0  ;;  %5179 = vst [vmem:[#allocation40_spill] sm:$0xff] %v4057_v11  ;;  %v4062_v12 = vld [vmem:[%s5030_s4 + $0x130] sm:$0xff]  ;;  %5181 = vst [vmem:[#allocation42_spill] sm:$0xff] %v4069_v13  ;;  %v4074_v14 = vld [vmem:[%s5030_s4 + $0x1a8] sm:$0xff] }
  0x64   :  { %605 = vmatprep.mubr.bf16.mxu1 %v3687_v0  ;;  %5180 = vst [vmem:[#allocation41_spill] sm:$0xff] %v4062_v12  ;;  %5182 = vst [vmem:[#allocation43_spill] sm:$0xff] %v4074_v14 }
  0x65   :  { %773 = vmatpush1.bf16.msra.mxu0 %v3391_v15  ;;  %v4081_v15 = vld [vmem:[%s5030_s4 + $0x28] sm:$0xff] }
  0x66   :  { %834 = vmatpush1.bf16.msra.mxu1 %v3394_v16  ;;  %774 = vmatprep.subr.bf16.mxu0 %v3399_v17  ;;  %5183 = vst [vmem:[#allocation44_spill] sm:$0xff] %v4081_v15  ;;  %v4086_v16 = vld [vmem:[%s5030_s4 + $0x128] sm:$0xff]  ;;  %v4093_v17 = vld [vmem:[%s5030_s4 + $0xa0] sm:$0xff] }
  0x67   :  { %835 = vmatprep.subr.bf16.mxu1 %v3402_v18  ;;  %5184 = vst [vmem:[#allocation45_spill] sm:$0xff] %v4086_v16  ;;  %5185 = vst [vmem:[#allocation46_spill] sm:$0xff] %v4093_v17  ;;  %v4098_v18 = vld [vmem:[%s5030_s4 + $0x1a0] sm:$0xff] }
  0x68   :  { %2949 = vmatmul.mubr.msk.bf16.gmra.mxu0 %vm245_vm2, %v3756_v25  ;;  %5186 = vst [vmem:[#allocation47_spill] sm:$0xff] %v4098_v18 }
  0x69   :  { %2953 = vmatmul.mubr.msk.bf16.gmra.mxu1 %vm245_vm2, %v3756_v25  ;;  %775 = vmatpush1.bf16.msra.mxu0 %v3397_v19  ;;  %v3829_v25 = vld [vmem:[%s5030_s4 + $0xf8] sm:$0xff]  ;;  %v4105_v19 = vld [vmem:[%s5030_s4 + $0x20] sm:$0xff] }
  0x6a   :  { %836 = vmatpush1.bf16.msra.mxu1 %v3400_v20  ;;  %554 = vmatprep.mubr.bf16.mxu0 %v3687_v0  ;;  %5187 = vst [vmem:[#allocation48_spill] sm:$0xff] %v4105_v19  ;;  %v4110_v20 = vld [vmem:[%s5030_s4 + $0x120] sm:$0xff] }
  0x6b   :  { %615 = vmatprep.mubr.bf16.mxu1 %v3687_v0  ;;  %776 = vmatprep.subr.bf16.mxu0 %v3405_v21  ;;  %5188 = vst [vmem:[#allocation49_spill] sm:$0xff] %v4110_v20  ;;  %v4117_v21 = vld [vmem:[%s5030_s4 + $0x98] sm:$0xff] }
  0x6c   :  { %837 = vmatprep.subr.bf16.mxu1 %v3408_v22  ;;  %5189 = vst [vmem:[#allocation50_spill] sm:$0xff] %v4117_v21  ;;  %v4122_v22 = vld [vmem:[%s5030_s4 + $0x198] sm:$0xff] }
  0x6d   :  { %777 = vmatpush1.bf16.msra.mxu0 %v3403_v24  ;;  %5190 = vst [vmem:[#allocation51_spill] sm:$0xff] %v4122_v22  ;;  %v4129_v24 = vld [vmem:[%s5030_s4 + $0x18] sm:$0xff] }
  0x6e   :  { %838 = vmatpush1.bf16.msra.mxu1 %v3406_v26  ;;  %778 = vmatprep.subr.bf16.mxu0 %v3412_v27  ;;  %5191 = vst [vmem:[#allocation52_spill] sm:$0xff] %v4129_v24  ;;  %v4134_v26 = vld [vmem:[%s5030_s4 + $0x118] sm:$0xff]  ;;  %v4141_v27 = vld [vmem:[%s5030_s4 + $0x90] sm:$0xff] }
  0x6f   :  { %839 = vmatprep.subr.bf16.mxu1 %v3415_v28  ;;  %5192 = vst [vmem:[#allocation53_spill] sm:$0xff] %v4134_v26  ;;  %5193 = vst [vmem:[#allocation54_spill] sm:$0xff] %v4141_v27  ;;  %v4146_v28 = vld [vmem:[%s5030_s4 + $0x190] sm:$0xff] }
  0x70   :  { %2950 = vmatmul.mubr.msk.bf16.gmra.mxu0 %vm245_vm2, %v3409_v30  ;;  %5194 = vst [vmem:[#allocation55_spill] sm:$0xff] %v4146_v28 }
  0x71   :  { %2954 = vmatmul.mubr.msk.bf16.gmra.mxu1 %vm245_vm2, %v3409_v30  ;;  %779 = vmatpush1.bf16.msra.mxu0 %v3410_v31  ;;  %v4158_v30 = vld [vmem:[%s5030_s4 + $0x110] sm:$0xff]  ;;  %v4165_v31 = vld [vmem:[%s5030_s4 + $0x88] sm:$0xff] }
  0x72   :  { %840 = vmatpush1.bf16.msra.mxu1 %v3413_v32  ;;  %796 = vmatprep.mubr.bf16.mxu0 %v3687_v0  ;;  %5196 = vst [vmem:[#allocation57_spill] sm:$0xff] %v4158_v30  ;;  %5197 = vst [vmem:[#allocation58_spill] sm:$0xff] %v4165_v31  ;;  %v4170_v32 = vld [vmem:[%s5030_s4 + $0x188] sm:$0xff] }
  0x73   :  { %857 = vmatprep.mubr.bf16.mxu1 %v3687_v0  ;;  %3038 = vmatprep.subr.mxu0 %v3829_v25  ;;  %5198 = vst [vmem:[#allocation59_spill] sm:$0xff] %v4170_v32 }
  0x74   :  { %3073 = vmatprep.subr.mxu1 %v3834_v38 }
  0x78   :  { %2977 = vmatmul.mubr.msk.bf16.vlgmr.msra.gmra.mxu0 %vm245_vm2, %v650_v36 }
  0x79   :  { %2981 = vmatmul.mubr.msk.bf16.vlgmr.msra.gmra.mxu1 %vm245_vm2, %v650_v36  ;;  %806 = vmatprep.mubr.bf16.mxu0 %v3687_v0  ;;  %v4194_v36 = vld [vmem:[%s5030_s4 + $0x180] sm:$0xff] }
  0x7a   :  { %867 = vmatprep.mubr.bf16.mxu1 %v3687_v0  ;;  %3074 = vmatpush3.msra.mxu1 %v3846_v39  ;;  %5202 = vst [vmem:[#allocation63_spill] sm:$0xff] %v4194_v36 }
  0x7b   :  { %3075 = vmatprep.subr.mxu1 %v3858_v41 }
  0x7c   :  { %3076 = vmatpush3.msra.mxu1 %v3870_v43 }
  0x7d   :  { %3077 = vmatprep.subr.mxu1 %v3882_v45 }
  0x7e   :  { %3078 = vmatpush3.msra.mxu1 %v3894_v47 }
  0x7f   :  { %3079 = vmatprep.subr.mxu1 %v3906_v49 }
  0x80   :  { %2978 = vmatmul.mubr.msk.bf16.gmra.mxu0 %vm245_vm2, %v652_v37  ;;  %3080 = vmatpush3.msra.mxu1 %v3918_v51 }
  0x81   :  { %2982 = vmatmul.mubr.msk.bf16.gmra.mxu1 %vm245_vm2, %v652_v37  ;;  %816 = vmatprep.mubr.bf16.mxu0 %v3687_v0  ;;  %v4207_v37 = vld [vmem:[%s5030_s4 + $0x100] sm:$0xff] }
  0x82   :  { %877 = vmatprep.mubr.bf16.mxu1 %v3687_v0  ;;  %v3841_v0 = vld [vmem:[%s5030_s4 + $0x78] sm:$0xff]  ;;  %3081 = vmatprep.subr.mxu1 %v3930_v53  ;;  %5204 = vst [vmem:[#allocation65_spill] sm:$0xff] %v4207_v37 }
  0x83   :  { %3039 = vmatpush3.msra.mxu0 %v3841_v0  ;;  %3082 = vmatpush3.msra.mxu1 %v3942_v55 }
  0x84   :  { %3040 = vmatprep.subr.mxu0 %v3853_v40  ;;  %3083 = vmatprep.subr.mxu1 %v3954_v57 }
  0x85   :  { %3041 = vmatpush3.msra.mxu0 %v3865_v42  ;;  %3084 = vmatpush3.msra.mxu1 %v3966_v59 }
  0x86   :  { %3042 = vmatprep.subr.mxu0 %v3877_v44  ;;  %3085 = vmatprep.subr.mxu1 %v3978_v61 }
  0x87   :  { %3043 = vmatpush3.msra.mxu0 %v3889_v46  ;;  %3086 = vmatpush3.msra.mxu1 %v3990_v63 }
  0x88   :  { %2979 = vmatmul.mubr.msk.bf16.gmra.mxu0 %vm245_vm2, %v651_v23  ;;  %3044 = vmatprep.subr.mxu0 %v3901_v48 }
  0x89   :  { %2983 = vmatmul.mubr.msk.bf16.gmra.mxu1 %vm245_vm2, %v651_v23  ;;  %3045 = vmatpush3.msra.mxu0 %v3913_v50  ;;  %v4201_v23 = vld [vmem:[%s5030_s4] sm:$0xff] }
  0x8a   :  { %3046 = vmatprep.subr.mxu0 %v3925_v52  ;;  %3087 = vmatprep.subr.mxu1 %v4002_v2  ;;  %5203 = vst [vmem:[#allocation64_spill] sm:$0xff] %v4201_v23 }
  0x8b   :  { %3047 = vmatpush3.msra.mxu0 %v3937_v54  ;;  %3088 = vmatpush3.msra.mxu1 %v4014_v4 }
  0x8c   :  { %3048 = vmatprep.subr.mxu0 %v3949_v56  ;;  %3089 = vmatprep.subr.mxu1 %v4026_v6 }
  0x8d   :  { %3049 = vmatpush3.msra.mxu0 %v3961_v58  ;;  %3090 = vmatpush3.msra.mxu1 %v4038_v8 }
  0x8e   :  { %3050 = vmatprep.subr.mxu0 %v3973_v60  ;;  %3091 = vmatprep.subr.mxu1 %v4050_v10 }
  0x8f   :  { %3051 = vmatpush3.msra.mxu0 %v3985_v62  ;;  %3092 = vmatpush3.msra.mxu1 %v4062_v12 }
  0x90   :  { %3052 = vmatprep.subr.mxu0 %v3997_v1  ;;  %3093 = vmatprep.subr.mxu1 %v4074_v14 }
  0x91   :  { %3053 = vmatpush3.msra.mxu0 %v4009_v3  ;;  %3094 = vmatpush3.msra.mxu1 %v4086_v16 }
  0x92   :  { %3054 = vmatprep.subr.mxu0 %v4021_v5  ;;  %3095 = vmatprep.subr.mxu1 %v4098_v18 }
  0x93   :  { %3055 = vmatpush3.msra.mxu0 %v4033_v7  ;;  %3096 = vmatpush3.msra.mxu1 %v4110_v20 }
  0x94   :  { %3056 = vmatprep.subr.mxu0 %v4045_v9  ;;  %3097 = vmatprep.subr.mxu1 %v4122_v22 }
  0x95   :  { %3057 = vmatpush3.msra.mxu0 %v4057_v11  ;;  %3098 = vmatpush3.msra.mxu1 %v4134_v26 }
  0x96   :  { %3058 = vmatprep.subr.mxu0 %v4069_v13  ;;  %3099 = vmatprep.subr.mxu1 %v4146_v28 }
  0x97   :  { %3059 = vmatpush3.msra.mxu0 %v4081_v15  ;;  %3100 = vmatpush3.msra.mxu1 %v4158_v30 }
  0x98   :  { %3060 = vmatprep.subr.mxu0 %v4093_v17  ;;  %3101 = vmatprep.subr.mxu1 %v4170_v32 }
  0x99   :  { %3061 = vmatpush3.msra.mxu0 %v4105_v19  ;;  %3102 = vmatpush3.msra.mxu1 %v4182_v34  ;;  %v4210_v34 = vld [vmem:[#allocation7 + $0x68] sm:$0xff] }
  0x9a   :  { %3062 = vmatprep.subr.mxu0 %v4117_v21  ;;  %3103 = vmatprep.subr.mxu1 %v4194_v36  ;;  %5205 = vst [vmem:[#allocation66_spill] sm:$0xff] %v4210_v34 }
  0x9b   :  { %3063 = vmatpush3.msra.mxu0 %v4129_v24  ;;  %3104 = vmatpush3.msra.mxu1 %v4207_v37 }
  0x9c   :  { %3064 = vmatprep.subr.mxu0 %v4141_v27 }
  0x9d   :  { %3065 = vmatpush3.msra.mxu0 %v4153_v29 }
  0x9e   :  { %3066 = vmatprep.subr.mxu0 %v4165_v31 }
  0x9f   :  { %3067 = vmatpush3.msra.mxu0 %v4177_v33  ;;  %v4212_v33 = vld [vmem:[#allocation7 + $0x78] sm:$0xff] }
  0xa0   :  { %3068 = vmatprep.subr.mxu0 %v4189_v35  ;;  %5206 = vst [vmem:[#allocation67_spill] sm:$0xff] %v4212_v33  ;;  %1253 = vmatprep.subr.mxu1 %v4212_v33 }
  0xa1   :  { %3069 = vmatpush3.msra.mxu0 %v4201_v23 }
  0xa2   :  { %1182 = vmatprep.subr.mxu0 %v4210_v34 }
 0x108   :  { %v4216_v36 = vpop.f32.mrf.mxu0 }
 0x109   :  { %v4218_v35 = vpop.f32.mrf.mxu1 }
 0x10a   :  { %v4220_v23 = vpop.f32.mrf.mxu0 }
 0x10b   :  { %v4222_v32 = vpop.f32.mrf.mxu1 }
 0x10c   :  { %v306_v31 = vpop.f32.mrf.mxu0 }
 0x10d   :  { %v367_v30 = vpop.f32.mrf.mxu1 }
 0x10e   :  { %v4224_v29 = vpop.f32.mrf.mxu0 }
 0x10f   :  { %v4226_v37 = vpop.f32.mrf.mxu1 }
 0x110   :  { %v312_v28 = vpop.f32.mrf.mxu0 }
 0x111   :  { %v373_v27 = vpop.f32.mrf.mxu1 }
 0x112   :  { %v314_v26 = vpop.f32.mrf.mxu0 }
 0x113   :  { %v375_v34 = vpop.f32.mrf.mxu1 }
 0x114   :  { %v316_v24 = vpop.f32.mrf.mxu0 }
 0x115   :  { %v377_v33 = vpop.f32.mrf.mxu1 }
 0x116   :  { %v318_v22 = vpop.f32.mrf.mxu0 }
 0x117   :  { %v379_v21 = vpop.f32.mrf.mxu1 }
 0x118   :  { %v322_v20 = vpop.f32.mrf.mxu0 }
 0x119   :  { %v383_v19 = vpop.f32.mrf.mxu1 }
 0x11a   :  { %v324_v18 = vpop.f32.mrf.mxu0 }
 0x11b   :  { %v385_v17 = vpop.f32.mrf.mxu1 }
 0x11c   :  { %v326_v16 = vpop.f32.mrf.mxu0 }
 0x11d   :  { %v387_v15 = vpop.f32.mrf.mxu1 }
 0x11e   :  { %v327_v14 = vpop.f32.mrf.mxu0 }
 0x11f   :  { %v388_v13 = vpop.f32.mrf.mxu1 }
 0x120   :  { %v536_v12 = vpop.f32.mrf.mxu0 }
 0x121   :  { %v597_v11 = vpop.f32.mrf.mxu1 }
 0x122   :  { %v538_v10 = vpop.f32.mrf.mxu0 }
 0x123   :  { %v599_v9 = vpop.f32.mrf.mxu1 }
 0x124   :  { %v540_v8 = vpop.f32.mrf.mxu0 }
 0x125   :  { %v601_v7 = vpop.f32.mrf.mxu1 }
 0x126   :  { %v542_v6 = vpop.f32.mrf.mxu0 }
 0x127   :  { %v603_v5 = vpop.f32.mrf.mxu1 }
 0x128   :  { %v546_v4 = vpop.f32.mrf.mxu0 }
 0x129   :  { %v607_v3 = vpop.f32.mrf.mxu1  ;;  %v547_v2 = vadd.f32 %v546_v4, %v312_v28 }
 0x12a   :  { %v608_v1 = vadd.f32 %v607_v3, %v373_v27  ;;  %v548_v63 = vpop.f32.mrf.mxu0 }
 0x12b   :  { %v609_v62 = vpop.f32.mrf.mxu1  ;;  %v549_v61 = vadd.f32 %v548_v63, %v314_v26 }
 0x12c   :  { %v610_v60 = vadd.f32 %v609_v62, %v375_v34  ;;  %v550_v16 = vpop.f32.mrf.mxu0 }
 0x12d   :  { %v611_v15 = vpop.f32.mrf.mxu1  ;;  %v4228_v14 = vadd.f32 %v550_v16, %v316_v24  ;;  %v537_v16 = vadd.f32 %v536_v12, %v4216_v36 }
 0x12e   :  { %v4230_v13 = vadd.f32 %v611_v15, %v377_v33  ;;  %v552_v59 = vpop.f32.mrf.mxu0  ;;  %v604_v15 = vadd.f32 %v603_v5, %v4226_v37 }
 0x12f   :  { %v613_v58 = vpop.f32.mrf.mxu1  ;;  %v4232_v57 = vadd.f32 %v552_v59, %v318_v22 }
 0x130   :  { %v4234_v56 = vadd.f32 %v613_v58, %v379_v21  ;;  %v556_v55 = vpop.f32.mrf.mxu0 }
 0x131   :  { %v617_v54 = vpop.f32.mrf.mxu1  ;;  %v4236_v4 = vadd.f32 %v556_v55, %v322_v20  ;;  %v598_v55 = vadd.f32 %v597_v11, %v4218_v35  ;;  %v539_v20 = vadd.f32 %v538_v10, %v4220_v23 }
 0x132   :  { %v4238_v3 = vadd.f32 %v617_v54, %v383_v19  ;;  %v558_v63 = vpop.f32.mrf.mxu0  ;;  %v541_v54 = vadd.f32 %v540_v8, %v306_v31  ;;  %v602_v19 = vadd.f32 %v601_v7, %v367_v30 }
 0x133   :  { %v619_v62 = vpop.f32.mrf.mxu1  ;;  %v4240_v26 = vadd.f32 %v558_v63, %v324_v18  ;;  %v600_v18 = vadd.f32 %v599_v9, %v4222_v32 }
 0x134   :  { %v4242_v24 = vadd.f32 %v619_v62, %v385_v17  ;;  %v560_v27 = vpop.f32.mrf.mxu0  ;;  %v543_v17 = vadd.f32 %v542_v6, %v4224_v29 }
 0x135   :  { %v621_v28 = vpop.f32.mrf.mxu1 }
 0x136   :  { %v561_v33 = vpop.f32.mrf.mxu0 }
 0x137   :  { %v622_v34 = vpop.f32.mrf.mxu1 }
 0x138   :  { %v798_v59 = vpop.f32.mrf.mxu0 }
 0x139   :  { %v859_v22 = vpop.f32.mrf.mxu1  ;;  %v4250_v27 = vadd.f32 %v798_v59, %v537_v16 }
 0x13a   :  { %v800_v58 = vpop.f32.mrf.mxu0  ;;  %v4252_v28 = vadd.f32 %v859_v22, %v598_v55 }
 0x13b   :  { %v861_v21 = vpop.f32.mrf.mxu1  ;;  %v4258_v8 = vadd.f32 %v800_v58, %v539_v20 }
 0x13c   :  { %v802_v63 = vpop.f32.mrf.mxu0  ;;  %v4260_v7 = vadd.f32 %v861_v21, %v600_v18 }
 0x13d   :  { %v863_v62 = vpop.f32.mrf.mxu1  ;;  %v4254_v33 = vadd.f32 %v802_v63, %v541_v54 }
 0x13e   :  { %v4256_v12 = vadd.f32 %v863_v62, %v602_v19  ;;  %v804_v10 = vpop.f32.mrf.mxu0 }
 0x13f   :  { %v865_v9 = vpop.f32.mrf.mxu1  ;;  %v906_v6 = vadd.f32 %v4254_v33, %v4250_v27  ;;  %v4266_v11 = vadd.f32 %v804_v10, %v543_v17 }
 0x140   :  { %v920_v5 = vadd.f32 %v4256_v12, %v4252_v28  ;;  %v4268_v29 = vadd.f32 %v865_v9, %v604_v15  ;;  %v808_v30 = vpop.f32.mrf.mxu0 }
 0x141   :  { %v869_v31 = vpop.f32.mrf.mxu1  ;;  %v907_v32 = vrot.slane %v906_v6, 4  ;;  %v913_v36 = vadd.f32 %v4266_v11, %v4258_v8  ;;  %v4274_v37 = vadd.f32 %v808_v30, %v547_v2 }
 0x142   :  { %v921_v35 = vrot.slane %v920_v5, 4  ;;  %v927_v23 = vadd.f32 %v4268_v29, %v4260_v7  ;;  %v4276_v34 = vadd.f32 %v869_v31, %v608_v1  ;;  %v810_v59 = vpop.f32.mrf.mxu0 }
 0x143   :  { %v871_v22 = vpop.f32.mrf.mxu1  ;;  %v908_v58 = vadd.f32 %v907_v32, %v906_v6  ;;  %v914_v16 = vrot.slane %v913_v36, 4  ;;  %v4278_v54 = vadd.f32 %v810_v59, %v549_v61 }
 0x144   :  { %v922_v21 = vadd.f32 %v921_v35, %v920_v5  ;;  %v928_v55 = vrot.slane %v927_v23, 4  ;;  %v4280_v19 = vadd.f32 %v871_v22, %v610_v60  ;;  %v812_v20 = vpop.f32.mrf.mxu0 }
 0x145   :  { %v873_v18 = vpop.f32.mrf.mxu1  ;;  %v915_v17 = vadd.f32 %v914_v16, %v913_v36  ;;  %v909_v63 = vrot.slane %v908_v58, 2  ;;  %v4283_v2 = vadd.f32 %v812_v20, %v4228_v14 }
 0x146   :  { %v929_v15 = vadd.f32 %v928_v55, %v927_v23  ;;  %v923_v62 = vrot.slane %v922_v21, 2  ;;  %v4286_v1 = vadd.f32 %v873_v18, %v4230_v13  ;;  %v814_v10 = vpop.f32.mrf.mxu0 }
 0x147   :  { %v875_v9 = vpop.f32.mrf.mxu1  ;;  %v4289_v6 = vadd.f32 %v814_v10, %v4232_v57  ;;  %v916_v30 = vrot.slane %v915_v17, 2  ;;  %v910_v13 = vadd.f32 %v909_v63, %v908_v58 }
 0x148   :  { %v4292_v60 = vadd.f32 %v875_v9, %v4234_v56  ;;  %v818_v61 = vpop.f32.mrf.mxu0  ;;  %v930_v31 = vrot.slane %v929_v15, 2  ;;  %v924_v35 = vadd.f32 %v923_v62, %v922_v21 }
 0x149   :  { %v879_v5 = vpop.f32.mrf.mxu1  ;;  %v4295_v32 = vadd.f32 %v818_v61, %v4236_v4  ;;  %v917_v16 = vadd.f32 %v916_v30, %v915_v17  ;;  %v911_v20 = vrot.slane %v910_v13, 1  ;;  %v4312_v17 = vld [vmem:[#allocation7 + $0x48] sm:$0xff]  ;;  %v4318_v61 = vld [vmem:[#allocation7 + $0x40] sm:$0xff] }
 0x14a   :  { %v4298_v14 = vadd.f32 %v879_v5, %v4238_v3  ;;  %v820_v36 = vpop.f32.mrf.mxu0  ;;  %v931_v55 = vadd.f32 %v930_v31, %v929_v15  ;;  %v925_v4 = vrot.slane %v924_v35, 1  ;;  %v4314_v15 = vld [vmem:[#allocation7 + $0x58] sm:$0xff]  ;;  %v4320_v5 = vld [vmem:[#allocation7 + $0x50] sm:$0xff]  ;;  %v4324_v30 = vld [vmem:[#allocation7 + $0x28] sm:$0xff] }
 0x14b   :  { %v881_v23 = vpop.f32.mrf.mxu1  ;;  %v4301_v57 = vadd.f32 %v820_v36, %v4240_v26  ;;  %v918_v3 = vrot.slane %v917_v16, 1  ;;  %v912_v63 = vadd.f32 %v911_v20, %v910_v13  ;;  %v4306_v26 = vld [vmem:[#allocation7 + $0x60] sm:$0xff]  ;;  %v4326_v31 = vld [vmem:[#allocation7 + $0x38] sm:$0xff]  ;;  %v4336_v36 = vld [vmem:[#allocation7 + $0x8] sm:$0xff] }
 0x14c   :  { %v4304_v56 = vadd.f32 %v881_v23, %v4242_v24  ;;  %v822_v59 = vpop.f32.mrf.mxu0  ;;  %v932_v9 = vrot.slane %v931_v55, 1  ;;  %v926_v62 = vadd.f32 %v925_v4, %v924_v35  ;;  %v4308_v24 = vld [vmem:[#allocation7 + $0x70] sm:$0xff]  ;;  %v4330_v13 = vld [vmem:[#allocation7 + $0x20] sm:$0xff]  ;;  %v4338_v23 = vld [vmem:[#allocation7 + $0x18] sm:$0xff] }
 0x14d   :  { %v883_v22 = vpop.f32.mrf.mxu1  ;;  %v919_v58 = vadd.f32 %v918_v3, %v917_v16  ;;  %v4332_v35 = vld [vmem:[#allocation7 + $0x30] sm:$0xff]  ;;  %v4342_v59 = vld [vmem:[#allocation7] sm:$0xff]  ;;  %v5129_v16 = vmov 0.0  }
 0x14e   :  { %v823_v18 = vpop.f32.mrf.mxu0  ;;  %v933_v21 = vadd.f32 %v932_v9, %v931_v55  ;;  %v4344_v22 = vld [vmem:[#allocation7 + $0x10] sm:$0xff] }
 0x14f   :  { %v884_v10 = vpop.f32.mrf.mxu1  ;;  %1062 = vmatprep.mubr.f32.mxu0 %v919_v58  ;;  %v5207_v58 = vld [vmem:[#allocation20_spill] sm:$0xff] }
 0x150   :  { %1132 = vmatprep.mubr.f32.mxu1 %v933_v21  ;;  %1063 = vmatmul.mubr.f32.vlgmr.msra.gmra.mxu0 %v912_v63  ;;  %v5208_v21 = vld [vmem:[#allocation21_spill] sm:$0xff]  ;;  %v5209_v63 = vld [vmem:[#allocation22_spill] sm:$0xff] }
 0x151   :  { %1133 = vmatmul.mubr.f32.vlgmr.msra.gmra.mxu1 %v926_v62  ;;  %1183 = vmatpush1.msra.mxu0 %v4306_v26  ;;  %v5210_v62 = vld [vmem:[#allocation23_spill] sm:$0xff] }
 0x152   :  { %1254 = vmatpush1.msra.mxu1 %v4308_v24  ;;  %1184 = vmatprep.subr.mxu0 %v4312_v17 }
 0x153   :  { %1255 = vmatprep.subr.mxu1 %v4314_v15  ;;  %1185 = vmatpush1.msra.mxu0 %v4318_v61 }
 0x154   :  { %1256 = vmatpush1.msra.mxu1 %v4320_v5  ;;  %1186 = vmatprep.subr.mxu0 %v4324_v30 }
 0x155   :  { %1257 = vmatprep.subr.mxu1 %v4326_v31  ;;  %1187 = vmatpush1.msra.mxu0 %v4330_v13 }
 0x156   :  { %1258 = vmatpush1.msra.mxu1 %v4332_v35  ;;  %1188 = vmatprep.subr.mxu0 %v4336_v36 }
 0x157   :  { %1259 = vmatprep.subr.mxu1 %v4338_v23  ;;  %1189 = vmatpush1.msra.mxu0 %v4342_v59 }
 0x158   :  { %1222 = vmatprep.mubr.f32.mxu0 %v5129_v16  ;;  %1260 = vmatpush1.msra.mxu1 %v4344_v22 }
 0x159   :  { %1293 = vmatprep.mubr.f32.mxu1 %v5129_v16  ;;  %3108 = vmatprep.subr.mxu0 %v3829_v25  ;;  %v5218_v16 = vld [vmem:[#allocation31_spill] sm:$0xff] }
 0x15a   :  { %3143 = vmatprep.subr.mxu1 %v3834_v38 }
 0x210   :  { %v3070_v55 = vpop.f32.mrf.mxu0 }
 0x211   :  { %v3105_v20 = vpop.f32.mrf.mxu1 }
 0x212   :  { %v3071_v4 = vpop.f32.mrf.mxu0 }
 0x213   :  { %v3106_v18 = vpop.f32.mrf.mxu1  ;;  %v3072_v10 = vadd.f32 %v3071_v4, %v3070_v55  ;;  %v5211_v55 = vld [vmem:[#allocation24_spill] sm:$0xff]  ;;  %v5213_v4 = vld [vmem:[#allocation26_spill] sm:$0xff] }
 0x214   :  { %v3107_v3 = vadd.f32 %v3106_v18, %v3105_v20  ;;  %v5212_v20 = vld [vmem:[#allocation25_spill] sm:$0xff]  ;;  %v5214_v18 = vld [vmem:[#allocation27_spill] sm:$0xff] }
 0x216   :  { %v1135_v9 = vadd.f32 %v3107_v3, %v3072_v10  ;;  %v5215_v10 = vld [vmem:[#allocation28_spill] sm:$0xff]  ;;  %v5216_v3 = vld [vmem:[#allocation29_spill] sm:$0xff] }
 0x218   :  { %2984 = vmatmul.mubr.msk.f32.vlgmr.msra.gmra.mxu0 %vm1154_vm4, %v1135_v9  ;;  %2985 = vmatmul.mubr.msk.f32.vlgmr.msra.gmra.mxu1 %vm1154_vm4, %v1135_v9  ;;  %v5217_v9 = vld [vmem:[#allocation30_spill] sm:$0xff] }
 0x219   :  { %3109 = vmatpush3.msra.mxu0 %v3841_v0  ;;  %3144 = vmatpush3.msra.mxu1 %v3846_v39 }
 0x21a   :  { %3110 = vmatprep.subr.mxu0 %v3853_v40  ;;  %3145 = vmatprep.subr.mxu1 %v3858_v41 }
 0x21b   :  { %3111 = vmatpush3.msra.mxu0 %v3865_v42  ;;  %3146 = vmatpush3.msra.mxu1 %v3870_v43 }
 0x21c   :  { %3112 = vmatprep.subr.mxu0 %v3877_v44  ;;  %3147 = vmatprep.subr.mxu1 %v3882_v45 }
 0x21d   :  { %3113 = vmatpush3.msra.mxu0 %v3889_v46  ;;  %3148 = vmatpush3.msra.mxu1 %v3894_v47 }
 0x21e   :  { %3114 = vmatprep.subr.mxu0 %v3901_v48  ;;  %3149 = vmatprep.subr.mxu1 %v3906_v49 }
 0x21f   :  { %3115 = vmatpush3.msra.mxu0 %v3913_v50  ;;  %3150 = vmatpush3.msra.mxu1 %v3918_v51 }
 0x220   :  { %3116 = vmatprep.subr.mxu0 %v3925_v52  ;;  %3151 = vmatprep.subr.mxu1 %v3930_v53 }
 0x221   :  { %3117 = vmatpush3.msra.mxu0 %v5207_v58  ;;  %3152 = vmatpush3.msra.mxu1 %v5208_v21  ;;  %v5219_v21 = vld [vmem:[#allocation32_spill] sm:$0xff] }
 0x222   :  { %3118 = vmatprep.subr.mxu0 %v5209_v63  ;;  %3153 = vmatprep.subr.mxu1 %v5210_v62  ;;  %v5220_v63 = vld [vmem:[#allocation33_spill] sm:$0xff]  ;;  %v5221_v62 = vld [vmem:[#allocation34_spill] sm:$0xff] }
 0x223   :  { %3119 = vmatpush3.msra.mxu0 %v5211_v55  ;;  %3154 = vmatpush3.msra.mxu1 %v5212_v20  ;;  %v5222_v55 = vld [vmem:[#allocation35_spill] sm:$0xff]  ;;  %v5223_v20 = vld [vmem:[#allocation36_spill] sm:$0xff] }
 0x224   :  { %3120 = vmatprep.subr.mxu0 %v5213_v4  ;;  %3155 = vmatprep.subr.mxu1 %v5214_v18  ;;  %v5224_v4 = vld [vmem:[#allocation37_spill] sm:$0xff]  ;;  %v5225_v18 = vld [vmem:[#allocation38_spill] sm:$0xff] }
 0x225   :  { %3121 = vmatpush3.msra.mxu0 %v5215_v10  ;;  %3156 = vmatpush3.msra.mxu1 %v5216_v3  ;;  %v5226_v10 = vld [vmem:[#allocation39_spill] sm:$0xff]  ;;  %v5227_v3 = vld [vmem:[#allocation40_spill] sm:$0xff] }
 0x226   :  { %3122 = vmatprep.subr.mxu0 %v5217_v9  ;;  %3157 = vmatprep.subr.mxu1 %v5218_v16  ;;  %v5228_v9 = vld [vmem:[#allocation41_spill] sm:$0xff]  ;;  %v5229_v16 = vld [vmem:[#allocation42_spill] sm:$0xff] }
 0x227   :  { %3123 = vmatpush3.msra.mxu0 %v5219_v21  ;;  %3158 = vmatpush3.msra.mxu1 %v5220_v63  ;;  %v5230_v21 = vld [vmem:[#allocation43_spill] sm:$0xff]  ;;  %v5231_v63 = vld [vmem:[#allocation44_spill] sm:$0xff] }
 0x228   :  { %3124 = vmatprep.subr.mxu0 %v5221_v62  ;;  %3159 = vmatprep.subr.mxu1 %v5222_v55  ;;  %v5232_v62 = vld [vmem:[#allocation45_spill] sm:$0xff]  ;;  %v5233_v55 = vld [vmem:[#allocation46_spill] sm:$0xff] }
 0x229   :  { %3125 = vmatpush3.msra.mxu0 %v5223_v20  ;;  %3160 = vmatpush3.msra.mxu1 %v5224_v4  ;;  %v5234_v20 = vld [vmem:[#allocation47_spill] sm:$0xff]  ;;  %v5235_v4 = vld [vmem:[#allocation48_spill] sm:$0xff] }
 0x22a   :  { %3126 = vmatprep.subr.mxu0 %v5225_v18  ;;  %3161 = vmatprep.subr.mxu1 %v5226_v10  ;;  %v5236_v18 = vld [vmem:[#allocation49_spill] sm:$0xff]  ;;  %v5237_v10 = vld [vmem:[#allocation50_spill] sm:$0xff] }
 0x22b   :  { %3127 = vmatpush3.msra.mxu0 %v5227_v3  ;;  %3162 = vmatpush3.msra.mxu1 %v5228_v9  ;;  %v5238_v3 = vld [vmem:[#allocation51_spill] sm:$0xff]  ;;  %v5239_v9 = vld [vmem:[#allocation52_spill] sm:$0xff] }
 0x22c   :  { %3128 = vmatprep.subr.mxu0 %v5229_v16  ;;  %3163 = vmatprep.subr.mxu1 %v5230_v21  ;;  %v5240_v16 = vld [vmem:[#allocation53_spill] sm:$0xff]  ;;  %v5241_v21 = vld [vmem:[#allocation54_spill] sm:$0xff] }
 0x22d   :  { %3129 = vmatpush3.msra.mxu0 %v5231_v63  ;;  %3164 = vmatpush3.msra.mxu1 %v5232_v62  ;;  %v5242_v63 = vld [vmem:[#allocation55_spill] sm:$0xff]  ;;  %v5243_v62 = vld [vmem:[#allocation56_spill] sm:$0xff] }
 0x22e   :  { %3130 = vmatprep.subr.mxu0 %v5233_v55  ;;  %3165 = vmatprep.subr.mxu1 %v5234_v20  ;;  %v5244_v55 = vld [vmem:[#allocation57_spill] sm:$0xff]  ;;  %v5245_v20 = vld [vmem:[#allocation58_spill] sm:$0xff] }
 0x22f   :  { %3131 = vmatpush3.msra.mxu0 %v5235_v4  ;;  %3166 = vmatpush3.msra.mxu1 %v5236_v18  ;;  %v5246_v4 = vld [vmem:[#allocation59_spill] sm:$0xff]  ;;  %v5247_v18 = vld [vmem:[#allocation60_spill] sm:$0xff] }
 0x230   :  { %3132 = vmatprep.subr.mxu0 %v5237_v10  ;;  %3167 = vmatprep.subr.mxu1 %v5238_v3  ;;  %v5248_v10 = vld [vmem:[#allocation61_spill] sm:$0xff]  ;;  %v5249_v3 = vld [vmem:[#allocation62_spill] sm:$0xff] }
 0x231   :  { %3133 = vmatpush3.msra.mxu0 %v5239_v9  ;;  %3168 = vmatpush3.msra.mxu1 %v5240_v16  ;;  %v5250_v9 = vld [vmem:[#allocation63_spill] sm:$0xff]  ;;  %v5251_v16 = vld [vmem:[#allocation64_spill] sm:$0xff] }
 0x232   :  { %3134 = vmatprep.subr.mxu0 %v5241_v21  ;;  %3169 = vmatprep.subr.mxu1 %v5242_v63  ;;  %v5252_v21 = vld [vmem:[#allocation65_spill] sm:$0xff]  ;;  %v5253_v63 = vld [vmem:[#allocation66_spill] sm:$0xff] }
 0x233   :  { %3135 = vmatpush3.msra.mxu0 %v5243_v62  ;;  %3170 = vmatpush3.msra.mxu1 %v5244_v55  ;;  %v5254_v62 = vld [vmem:[#allocation67_spill] sm:$0xff]  ;;  %v1300_v55 = vlaneseq }
 0x234   :  { %3136 = vmatprep.subr.mxu0 %v5245_v20  ;;  %3171 = vmatprep.subr.mxu1 %v5246_v4 }
 0x235   :  { %3137 = vmatpush3.msra.mxu0 %v5247_v18  ;;  %3172 = vmatpush3.msra.mxu1 %v5248_v10  ;;  %v4418_v20 = vshrl.u32 %v1300_v55, 7 }
 0x236   :  { %3138 = vmatprep.subr.mxu0 %v5249_v3  ;;  %3173 = vmatprep.subr.mxu1 %v5250_v9 }
 0x237   :  { %3139 = vmatpush3.msra.mxu0 %v5251_v16  ;;  %3174 = vmatpush3.msra.mxu1 %v5252_v21  ;;  %5255 = vst [vmem:[#allocation68_spill] sm:$0xff] %v4418_v20  ;;  %v4421_v4 = vsub.s32 0, %v4418_v20 }
 0x238   :  { %1527 = vmatprep.subr.mxu0 %v5253_v63  ;;  %1598 = vmatprep.subr.mxu1 %v5254_v62 }
 0x239   :  { %5256 = vst [vmem:[#allocation69_spill] sm:$0xff] %v4421_v4 }
 0x2d8   :  { %v1224_v18 = vpop.f32.mrf.mxu0  ;;  %v1295_v10 = vpop.f32.mrf.mxu1 }
 0x2d9   :  { %v1303_v3 = vrot.slane %v1224_v18, %v4421_v4  ;;  %v1311_v9 = vrot.slane %v1295_v10, %v4421_v4 }
 0x2da   :  { %v1226_v58 = vpop.f32.mrf.mxu0  ;;  %v1297_v16 = vpop.f32.mrf.mxu1 }
 0x2db   :  { %v4426_v21 = vsub.f32 %v4250_v27, %v1303_v3  ;;  %v4429_v63 = vsub.f32 %v4254_v33, %v1303_v3  ;;  %v4432_v55 = vsub.f32 %v4252_v28, %v1311_v9  ;;  %v4435_v20 = vsub.f32 %v4256_v12, %v1311_v9 }
 0x2dc   :  { %v1307_v62 = vrot.slane %v1226_v58, %v4421_v4  ;;  %v1315_v18 = vrot.slane %v1297_v16, %v4421_v4 }
 0x2dd   :  { %5257 = vst [vmem:[#allocation70_spill] sm:$0xff] %v4426_v21  ;;  %5258 = vst [vmem:[#allocation71_spill] sm:$0xff] %v4429_v63  ;;  %v1324_v10 = vmul.f32 %v4426_v21, %v4426_v21  ;;  %v1328_v27 = vmul.f32 %v4429_v63, %v4429_v63  ;;  %v1326_v33 = vmul.f32 %v4432_v55, %v4432_v55 }
 0x2de   :  { %5259 = vst [vmem:[#allocation72_spill] sm:$0xff] %v4432_v55  ;;  %5260 = vst [vmem:[#allocation73_spill] sm:$0xff] %v4435_v20  ;;  %v1330_v28 = vmul.f32 %v4435_v20, %v4435_v20  ;;  %v4448_v3 = vsub.f32 %v4258_v8, %v1307_v62  ;;  %v4451_v12 = vsub.f32 %v4266_v11, %v1307_v62 }
 0x2df   :  { %v4454_v16 = vsub.f32 %v4260_v7, %v1315_v18  ;;  %v4457_v58 = vsub.f32 %v4268_v29, %v1315_v18  ;;  %v1332_v9 = vadd.f32 %v1328_v27, %v1324_v10 }
 0x2e0   :  { %5261 = vst [vmem:[#allocation74_spill] sm:$0xff] %v4448_v3  ;;  %5262 = vst [vmem:[#allocation75_spill] sm:$0xff] %v4451_v12  ;;  %v1346_v63 = vadd.f32 %v1330_v28, %v1326_v33  ;;  %v1325_v55 = vmul.f32 %v4448_v3, %v4448_v3  ;;  %v1329_v20 = vmul.f32 %v4451_v12, %v4451_v12 }
 0x2e1   :  { %5263 = vst [vmem:[#allocation76_spill] sm:$0xff] %v4454_v16  ;;  %5264 = vst [vmem:[#allocation77_spill] sm:$0xff] %v4457_v58  ;;  %v1327_v8 = vmul.f32 %v4454_v16, %v4454_v16  ;;  %v1331_v11 = vmul.f32 %v4457_v58, %v4457_v58  ;;  %v1333_v62 = vrot.slane %v1332_v9, 4 }
 0x2e2   :  { %v1347_v7 = vrot.slane %v1346_v63, 4  ;;  %v1339_v21 = vadd.f32 %v1329_v20, %v1325_v55 }
 0x2e3   :  { %v1353_v4 = vadd.f32 %v1331_v11, %v1327_v8  ;;  %v1334_v29 = vadd.f32 %v1333_v62, %v1332_v9 }
 0x2e4   :  { %v1348_v18 = vadd.f32 %v1347_v7, %v1346_v63  ;;  %v1340_v10 = vrot.slane %v1339_v21, 4 }
 0x2e5   :  { %v1354_v27 = vrot.slane %v1353_v4, 4  ;;  %v1335_v33 = vrot.slane %v1334_v29, 2 }
 0x2e6   :  { %v1349_v28 = vrot.slane %v1348_v18, 2  ;;  %v1341_v3 = vadd.f32 %v1340_v10, %v1339_v21 }
 0x2e7   :  { %v1355_v53 = vadd.f32 %v1354_v27, %v1353_v4  ;;  %v1336_v52 = vadd.f32 %v1335_v33, %v1334_v29 }
 0x2e8   :  { %v1350_v12 = vadd.f32 %v1349_v28, %v1348_v18  ;;  %v1342_v51 = vrot.slane %v1341_v3, 2 }
 0x2e9   :  { %v1356_v50 = vrot.slane %v1355_v53, 2  ;;  %v1337_v48 = vrot.slane %v1336_v52, 1 }
 0x2ea   :  { %v1343_v16 = vadd.f32 %v1342_v51, %v1341_v3  ;;  %v1351_v58 = vrot.slane %v1350_v12, 1  ;;  %v1833_v51 = vrot.slane %v4278_v54, 2 }
 0x2eb   :  { %v1357_v49 = vadd.f32 %v1356_v50, %v1355_v53  ;;  %v1338_v9 = vadd.f32 %v1337_v48, %v1336_v52  ;;  %v1848_v48 = vrot.slane %v4304_v56, 2  ;;  %v1840_v50 = vrot.slane %v4292_v60, 2 }
 0x2ec   :  { %v1344_v47 = vrot.slane %v1343_v16, 1  ;;  %v1352_v63 = vadd.f32 %v1351_v58, %v1350_v12  ;;  %v1839_v53 = vrot.slane %v4280_v19, 2 }
 0x2ed   :  { %v1358_v46 = vrot.slane %v1357_v49, 1  ;;  %v1849_v21 = vsel %vm1829_vm5, %v1840_v50, %v1848_v48  ;;  %v1846_v48 = vrot.slane %v4298_v14, 2 }
 0x2ee   :  { %v1345_v20 = vadd.f32 %v1344_v47, %v1343_v16  ;;  %v1844_v47 = vrot.slane %v4301_v57, 2 }
 0x2ef   :  { %v1359_v55 = vadd.f32 %v1358_v46, %v1357_v49  ;;  %v5265_v46 = vmov 0.0   ;;  %v1834_v49 = vrot.slane %v4289_v6, 2 }
 0x2f0   :  { %1424 = vmatprep.mubr.f32.mxu0 %v1345_v20 }
 0x2f1   :  { %1494 = vmatprep.mubr.f32.mxu1 %v1359_v55  ;;  %1425 = vmatmul.mubr.f32.vlgmr.msra.gmra.mxu0 %v1338_v9  ;;  %v1845_v52 = vsel %vm1829_vm5, %v1834_v49, %v1844_v47  ;;  %v1842_v47 = vrot.slane %v4295_v32, 2 }
 0x2f2   :  { %1495 = vmatmul.mubr.f32.vlgmr.msra.gmra.mxu1 %v1352_v63  ;;  %1528 = vmatpush1.msra.mxu0 %v4306_v26 }
 0x2f3   :  { %1599 = vmatpush1.msra.mxu1 %v4308_v24  ;;  %1529 = vmatprep.subr.mxu0 %v4312_v17 }
 0x2f4   :  { %1600 = vmatprep.subr.mxu1 %v4314_v15  ;;  %1530 = vmatpush1.msra.mxu0 %v4318_v61 }
 0x2f5   :  { %1601 = vmatpush1.msra.mxu1 %v4320_v5  ;;  %1531 = vmatprep.subr.mxu0 %v4324_v30 }
 0x2f6   :  { %1602 = vmatprep.subr.mxu1 %v4326_v31  ;;  %1532 = vmatpush1.msra.mxu0 %v4330_v13 }
 0x2f7   :  { %1603 = vmatpush1.msra.mxu1 %v4332_v35  ;;  %1533 = vmatprep.subr.mxu0 %v4336_v36 }
 0x2f8   :  { %1604 = vmatprep.subr.mxu1 %v4338_v23  ;;  %1534 = vmatpush1.msra.mxu0 %v4342_v59 }
 0x2f9   :  { %1605 = vmatpush1.msra.mxu1 %v4344_v22  ;;  %1567 = vmatprep.mubr.f32.mxu0 %v5265_v46 }
 0x2fa   :  { %1638 = vmatprep.mubr.f32.mxu1 %v5265_v46  ;;  %3178 = vmatprep.subr.mxu0 %v3829_v25  ;;  %v1835_v25 = vsel %vm1829_vm5, %v1833_v51, %v1834_v49  ;;  %v1831_v51 = vrot.slane %v4283_v2, 2 }
 0x2fb   :  { %3213 = vmatprep.subr.mxu1 %v3834_v38  ;;  %v1841_v38 = vsel %vm1829_vm5, %v1839_v53, %v1840_v50  ;;  %v1865_v4 = vadd.f32 %v1845_v52, %v1835_v25  ;;  %v1837_v52 = vrot.slane %v4286_v1, 2  ;;  %v1830_v53 = vrot.slane %v4274_v37, 2 }
 0x2fc   :  { %v1879_v3 = vadd.f32 %v1849_v21, %v1841_v38  ;;  %v1836_v21 = vrot.slane %v4276_v34, 2  ;;  %v1843_v25 = vsel %vm1829_vm5, %v1831_v51, %v1842_v47  ;;  %v5267_v38 = vld [vmem:[#allocation13_spill] sm:$0xff]  ;;  %v5285_v47 = vld [vmem:[#allocation31_spill] sm:$0xff] }
 0x2fd   :  { %v1866_v12 = vrot.slane %v1865_v4, 4 }
 0x2fe   :  { %v1880_v16 = vrot.slane %v1879_v3, 4 }
 0x2ff   :  { %v1867_v58 = vadd.f32 %v1866_v12, %v1865_v4  ;;  %v5268_v12 = vld [vmem:[#allocation14_spill] sm:$0xff] }
 0x300   :  { %v1881_v8 = vadd.f32 %v1880_v16, %v1879_v3  ;;  %v5269_v16 = vld [vmem:[#allocation15_spill] sm:$0xff] }
 0x301   :  { %v1868_v11 = vrot.slane %v1867_v58, 2 }
 0x302   :  { %v1882_v62 = vrot.slane %v1881_v8, 2 }
 0x303   :  { %v1869_v7 = vadd.f32 %v1868_v11, %v1867_v58  ;;  %v5274_v58 = vld [vmem:[#allocation20_spill] sm:$0xff] }
 0x304   :  { %v1883_v10 = vadd.f32 %v1882_v62, %v1881_v8  ;;  %v5275_v8 = vld [vmem:[#allocation21_spill] sm:$0xff] }
 0x305   :  { %v1870_v55 = vrot.slane %v1869_v7, 1 }
 0x306   :  { %v1884_v9 = vrot.slane %v1883_v10, 1 }
 0x307   :  { %v1871_v49 = vadd.f32 %v1870_v55, %v1869_v7  ;;  %v5276_v7 = vld [vmem:[#allocation22_spill] sm:$0xff] }
 0x308   :  { %v1885_v50 = vadd.f32 %v1884_v9, %v1883_v10  ;;  %v5279_v10 = vld [vmem:[#allocation25_spill] sm:$0xff] }
 0x3b1   :  { %v3140_v29 = vpop.f32.mrf.mxu0 }
 0x3b2   :  { %v3175_v18 = vpop.f32.mrf.mxu1 }
 0x3b3   :  { %v3141_v27 = vpop.f32.mrf.mxu0 }
 0x3b4   :  { %v3176_v33 = vpop.f32.mrf.mxu1  ;;  %v3142_v28 = vadd.f32 %v3141_v27, %v3140_v29  ;;  %v5277_v29 = vld [vmem:[#allocation23_spill] sm:$0xff]  ;;  %v5280_v27 = vld [vmem:[#allocation26_spill] sm:$0xff] }
 0x3b5   :  { %v3177_v20 = vadd.f32 %v3176_v33, %v3175_v18  ;;  %v5278_v18 = vld [vmem:[#allocation24_spill] sm:$0xff]  ;;  %v5281_v33 = vld [vmem:[#allocation27_spill] sm:$0xff] }
 0x3b7   :  { %v1497_v63 = vadd.f32 %v3177_v20, %v3142_v28  ;;  %v5282_v28 = vld [vmem:[#allocation28_spill] sm:$0xff]  ;;  %v5283_v20 = vld [vmem:[#allocation29_spill] sm:$0xff] }
 0x3b9   :  { %2986 = vmatmul.mubr.msk.f32.vlgmr.msra.gmra.mxu0 %vm1154_vm4, %v1497_v63  ;;  %2987 = vmatmul.mubr.msk.f32.vlgmr.msra.gmra.mxu1 %vm1154_vm4, %v1497_v63  ;;  %v5284_v63 = vld [vmem:[#allocation30_spill] sm:$0xff] }
 0x3ba   :  { %3179 = vmatpush3.msra.mxu0 %v3841_v0  ;;  %3214 = vmatpush3.msra.mxu1 %v3846_v39  ;;  %v1847_v0 = vsel %vm1829_vm5, %v1837_v52, %v1846_v48  ;;  %v1832_v39 = vsel %vm1829_vm5, %v1830_v53, %v1831_v51  ;;  %v5286_v48 = vld [vmem:[#allocation32_spill] sm:$0xff]  ;;  %v5289_v51 = vld [vmem:[#allocation35_spill] sm:$0xff]  ;;  %v5291_v53 = vld [vmem:[#allocation37_spill] sm:$0xff] }
 0x3bb   :  { %3180 = vmatprep.subr.mxu0 %v3853_v40  ;;  %2014 = vmatprep.mubr.f32.mxu0 %v1871_v49  ;;  %v1838_v40 = vsel %vm1829_vm5, %v1836_v21, %v1837_v52  ;;  %v1858_v4 = vadd.f32 %v1843_v25, %v1832_v39  ;;  %v5287_v49 = vld [vmem:[#allocation33_spill] sm:$0xff]  ;;  %v5290_v52 = vld [vmem:[#allocation36_spill] sm:$0xff]  ;;  %v5292_v21 = vld [vmem:[#allocation38_spill] sm:$0xff] }
 0x3bc   :  { %3215 = vmatprep.subr.mxu1 %v3858_v41  ;;  %2084 = vmatprep.mubr.f32.mxu1 %v1885_v50  ;;  %v5266_v41 = vld [vmem:[#allocation12_spill] sm:$0xff]  ;;  %v1872_v3 = vadd.f32 %v1847_v0, %v1838_v40  ;;  %v5288_v50 = vld [vmem:[#allocation34_spill] sm:$0xff]  ;;  %v5293_v25 = vld [vmem:[#allocation39_spill] sm:$0xff] }
 0x3bd   :  { %3181 = vmatpush3.msra.mxu0 %v3865_v42  ;;  %3216 = vmatpush3.msra.mxu1 %v3870_v43  ;;  %v5270_v42 = vld [vmem:[#allocation16_spill] sm:$0xff]  ;;  %v5271_v43 = vld [vmem:[#allocation17_spill] sm:$0xff]  ;;  %v1859_v11 = vrot.slane %v1858_v4, 4 }
 0x3be   :  { %3182 = vmatprep.subr.mxu0 %v3877_v44  ;;  %3217 = vmatprep.subr.mxu1 %v3882_v45  ;;  %v5272_v44 = vld [vmem:[#allocation18_spill] sm:$0xff]  ;;  %v5273_v45 = vld [vmem:[#allocation19_spill] sm:$0xff]  ;;  %v1873_v62 = vrot.slane %v1872_v3, 4  ;;  %v5294_v40 = vld [vmem:[#allocation40_spill] sm:$0xff] }
 0x3bf   :  { %3183 = vmatpush3.msra.mxu0 %v5266_v41  ;;  %3218 = vmatpush3.msra.mxu1 %v5267_v38  ;;  %v1860_v55 = vadd.f32 %v1859_v11, %v1858_v4  ;;  %v5295_v41 = vld [vmem:[#allocation41_spill] sm:$0xff]  ;;  %v5296_v38 = vld [vmem:[#allocation42_spill] sm:$0xff]  ;;  %v5297_v4 = vld [vmem:[#allocation43_spill] sm:$0xff] }
 0x3c0   :  { %3184 = vmatprep.subr.mxu0 %v5268_v12  ;;  %3219 = vmatprep.subr.mxu1 %v5269_v16  ;;  %v1874_v9 = vadd.f32 %v1873_v62, %v1872_v3  ;;  %v5298_v3 = vld [vmem:[#allocation44_spill] sm:$0xff]  ;;  %v5299_v12 = vld [vmem:[#allocation45_spill] sm:$0xff]  ;;  %v5300_v16 = vld [vmem:[#allocation46_spill] sm:$0xff] }
 0x3c1   :  { %3185 = vmatpush3.msra.mxu0 %v5270_v42  ;;  %3220 = vmatpush3.msra.mxu1 %v5271_v43  ;;  %v1861_v0 = vrot.slane %v1860_v55, 2  ;;  %v5301_v42 = vld [vmem:[#allocation47_spill] sm:$0xff]  ;;  %v5306_v62 = vld [vmem:[#allocation52_spill] sm:$0xff] }
 0x3c2   :  { %3186 = vmatprep.subr.mxu0 %v5272_v44  ;;  %3221 = vmatprep.subr.mxu1 %v5273_v45  ;;  %v1875_v39 = vrot.slane %v1874_v9, 2  ;;  %v5302_v45 = vld [vmem:[#allocation48_spill] sm:$0xff]  ;;  %v5305_v11 = vld [vmem:[#allocation51_spill] sm:$0xff] }
 0x3c3   :  { %3187 = vmatpush3.msra.mxu0 %v5274_v58  ;;  %3222 = vmatpush3.msra.mxu1 %v5275_v8  ;;  %v1862_v43 = vadd.f32 %v1861_v0, %v1860_v55  ;;  %v5303_v58 = vld [vmem:[#allocation49_spill] sm:$0xff]  ;;  %v5304_v8 = vld [vmem:[#allocation50_spill] sm:$0xff]  ;;  %v5313_v55 = vld [vmem:[#allocation59_spill] sm:$0xff] }
 0x3c4   :  { %3188 = vmatprep.subr.mxu0 %v5276_v7  ;;  %3223 = vmatprep.subr.mxu1 %v5277_v29  ;;  %v1876_v44 = vadd.f32 %v1875_v39, %v1874_v9  ;;  %v5307_v7 = vld [vmem:[#allocation53_spill] sm:$0xff]  ;;  %v5308_v29 = vld [vmem:[#allocation54_spill] sm:$0xff]  ;;  %v5314_v9 = vld [vmem:[#allocation60_spill] sm:$0xff] }
 0x3c5   :  { %3189 = vmatpush3.msra.mxu0 %v5278_v18  ;;  %3224 = vmatpush3.msra.mxu1 %v5279_v10  ;;  %v5309_v18 = vld [vmem:[#allocation55_spill] sm:$0xff]  ;;  %v1863_v10 = vrot.slane %v1862_v43, 1 }
 0x3c6   :  { %3190 = vmatprep.subr.mxu0 %v5280_v27  ;;  %3225 = vmatprep.subr.mxu1 %v5281_v33  ;;  %v1877_v27 = vrot.slane %v1876_v44, 1  ;;  %v5310_v33 = vld [vmem:[#allocation56_spill] sm:$0xff] }
 0x3c7   :  { %3191 = vmatpush3.msra.mxu0 %v5282_v28  ;;  %3226 = vmatpush3.msra.mxu1 %v5283_v20  ;;  %v5311_v28 = vld [vmem:[#allocation57_spill] sm:$0xff]  ;;  %v5312_v20 = vld [vmem:[#allocation58_spill] sm:$0xff] }
 0x3c8   :  { %3192 = vmatprep.subr.mxu0 %v5284_v63  ;;  %3227 = vmatprep.subr.mxu1 %v5285_v47  ;;  %v5315_v63 = vld [vmem:[#allocation61_spill] sm:$0xff]  ;;  %v5316_v47 = vld [vmem:[#allocation62_spill] sm:$0xff] }
 0x3c9   :  { %3193 = vmatpush3.msra.mxu0 %v5286_v48  ;;  %3228 = vmatpush3.msra.mxu1 %v5287_v49  ;;  %v5317_v48 = vld [vmem:[#allocation63_spill] sm:$0xff]  ;;  %v1864_v49 = vadd.f32 %v1863_v10, %v1862_v43  ;;  %v5326_v10 = vld [vmem:[#allocation72_spill] sm:$0xff] }
 0x3ca   :  { %3194 = vmatprep.subr.mxu0 %v5288_v50  ;;  %3229 = vmatprep.subr.mxu1 %v5289_v51  ;;  %v1878_v50 = vadd.f32 %v1877_v27, %v1876_v44  ;;  %v5318_v51 = vld [vmem:[#allocation64_spill] sm:$0xff] }
 0x3cb   :  { %3195 = vmatpush3.msra.mxu0 %v5290_v52  ;;  %3230 = vmatpush3.msra.mxu1 %v5291_v53  ;;  %v5319_v52 = vld [vmem:[#allocation65_spill] sm:$0xff]  ;;  %v5320_v53 = vld [vmem:[#allocation66_spill] sm:$0xff] }
 0x3cc   :  { %3196 = vmatprep.subr.mxu0 %v5292_v21  ;;  %3231 = vmatprep.subr.mxu1 %v5293_v25  ;;  %v5321_v21 = vld [vmem:[#allocation67_spill] sm:$0xff] }
 0x3cd   :  { %3197 = vmatpush3.msra.mxu0 %v5294_v40  ;;  %3232 = vmatpush3.msra.mxu1 %v5295_v41  ;;  %v5323_v41 = vld [vmem:[#allocation69_spill] sm:$0xff] }
 0x3ce   :  { %3198 = vmatprep.subr.mxu0 %v5296_v38  ;;  %3233 = vmatprep.subr.mxu1 %v5297_v4 }
 0x3cf   :  { %3199 = vmatpush3.msra.mxu0 %v5298_v3  ;;  %3234 = vmatpush3.msra.mxu1 %v5299_v12 }
 0x3d0   :  { %3200 = vmatprep.subr.mxu0 %v5300_v16  ;;  %3235 = vmatprep.subr.mxu1 %v5301_v42 }
 0x3d1   :  { %3201 = vmatpush3.msra.mxu0 %v5302_v45  ;;  %3236 = vmatpush3.msra.mxu1 %v5303_v58 }
 0x3d2   :  { %3202 = vmatprep.subr.mxu0 %v5304_v8  ;;  %3237 = vmatprep.subr.mxu1 %v5305_v11  ;;  %v5324_v8 = vld [vmem:[#allocation70_spill] sm:$0xff] }
 0x3d3   :  { %3203 = vmatpush3.msra.mxu0 %v5306_v62  ;;  %3238 = vmatpush3.msra.mxu1 %v5307_v7  ;;  %v5325_v62 = vld [vmem:[#allocation71_spill] sm:$0xff] }
 0x3d4   :  { %3204 = vmatprep.subr.mxu0 %v5308_v29  ;;  %3239 = vmatprep.subr.mxu1 %v5309_v18 }
 0x3d5   :  { %3205 = vmatpush3.msra.mxu0 %v5310_v33  ;;  %3240 = vmatpush3.msra.mxu1 %v5311_v28  ;;  %v5327_v33 = vld [vmem:[#allocation73_spill] sm:$0xff] }
 0x3d6   :  { %3206 = vmatprep.subr.mxu0 %v5312_v20  ;;  %3241 = vmatprep.subr.mxu1 %v5313_v55 }
 0x3d7   :  { %3207 = vmatpush3.msra.mxu0 %v5314_v9  ;;  %3242 = vmatpush3.msra.mxu1 %v5315_v63 }
 0x3d8   :  { %3208 = vmatprep.subr.mxu0 %v5316_v47  ;;  %3243 = vmatprep.subr.mxu1 %v5317_v48  ;;  %v5328_v47 = vld [vmem:[#allocation74_spill] sm:$0xff] }
 0x3d9   :  { %3209 = vmatpush3.msra.mxu0 %v5318_v51  ;;  %3244 = vmatpush3.msra.mxu1 %v5319_v52 }
 0x3da   :  { %2015 = vmatmul.mubr.f32.vlgmr.msra.gmra.mxu0 %v1864_v49  ;;  %2085 = vmatmul.mubr.f32.vlgmr.msra.gmra.mxu1 %v1878_v50  ;;  %v5329_v49 = vld [vmem:[#allocation75_spill] sm:$0xff] }
 0x3db   :  { %2133 = vmatprep.subr.mxu0 %v5320_v53  ;;  %2204 = vmatprep.subr.mxu1 %v5321_v21  ;;  %v5330_v53 = vld [vmem:[#allocation76_spill] sm:$0xff] }
 0x3dc   :  { %2134 = vmatpush1.msra.mxu0 %v4306_v26  ;;  %2205 = vmatpush1.msra.mxu1 %v4308_v24  ;;  %v3513_v26 = vld [vmem:[%s5030_s4 + $0xf8] sm:$0xff] }
 0x3dd   :  { %2135 = vmatprep.subr.mxu0 %v4312_v17  ;;  %2206 = vmatprep.subr.mxu1 %v4314_v15  ;;  %v3514_v24 = vld [vmem:[%s5030_s4 + $0x1f8] sm:$0xff] }
 0x3de   :  { %2136 = vmatpush1.msra.mxu0 %v4318_v61  ;;  %2207 = vmatpush1.msra.mxu1 %v4320_v5 }
 0x3df   :  { %2137 = vmatprep.subr.mxu0 %v4324_v30  ;;  %2208 = vmatprep.subr.mxu1 %v4326_v31 }
 0x3e0   :  { %2138 = vmatpush1.msra.mxu0 %v4330_v13  ;;  %2209 = vmatpush1.msra.mxu1 %v4332_v35 }
 0x3e1   :  { %2139 = vmatprep.subr.mxu0 %v4336_v36  ;;  %2210 = vmatprep.subr.mxu1 %v4338_v23  ;;  %v5322_v36 = vld [vmem:[#allocation68_spill] sm:$0xff] }
 0x3e2   :  { %2140 = vmatpush1.msra.mxu0 %v4342_v59  ;;  %2173 = vmatprep.mubr.f32.mxu0 %v5265_v46  ;;  %v4594_v23 = vsub.s32 2, %v5322_v36  ;;  %v1673_v59 = vld [vmem:[#allocation4] sm:$0xf]  ;;  %v4597_v25 = vsub.s32 1, %v5322_v36  ;;  %v4600_v0 = vsub.s32 3, %v5322_v36 }
 0x3e3   :  { %2211 = vmatpush1.msra.mxu1 %v4344_v22  ;;  %2244 = vmatprep.mubr.f32.mxu1 %v5265_v46  ;;  %v1703_v22 = vld [vmem:[#allocation6] sm:$0xf]  ;;  %v1678_v4 = vrot.slane %v1673_v59, %v5323_v41 }
 0x3e4   :  { %3248 = vmatprep.subr.mxu0 %v3513_v26  ;;  %3283 = vmatprep.subr.mxu1 %v3514_v24  ;;  %v1708_v3 = vrot.slane %v1703_v22, %v5323_v41  ;;  %v1686_v12 = vrot.slane %v1673_v59, %v4594_v23  ;;  %v1716_v43 = vrot.slane %v1703_v22, %v4594_v23  ;;  %v5331_v26 = vld [vmem:[#allocation77_spill] sm:$0xff] }
 0x3e5   :  { %v1682_v44 = vrot.slane %v1673_v59, %v4597_v25  ;;  %v1690_v45 = vrot.slane %v1673_v59, %v4600_v0  ;;  %v1712_v18 = vrot.slane %v1703_v22, %v4597_v25  ;;  %v1720_v55 = vrot.slane %v1703_v22, %v4600_v0 }
 0x479   :  { %v1569_v17 = vpop.f32.mrf.mxu0  ;;  %v1640_v15 = vpop.f32.mrf.mxu1 }
 0x47a   :  { %v1570_v61 = vadd.f32 1e-05, %v1569_v17  ;;  %v1641_v5 = vadd.f32 1e-05, %v1640_v15 }
 0x47b   :  { %v1571_v30 = vpop.f32.mrf.mxu0  ;;  %v1642_v31 = vpop.f32.mrf.mxu1 }
 0x47c   :  { %3417 = vrsqrt.f32 %v1570_v61  ;;  %v1572_v13 = vadd.f32 1e-05, %v1571_v30  ;;  %v1643_v35 = vadd.f32 1e-05, %v1642_v31 }
 0x47d   :  { %3419 = vrsqrt.f32 %v1641_v5 }
 0x47e   :  { %3421 = vrsqrt.f32 %v1572_v13 }
 0x47f   :  { %3423 = vrsqrt.f32 %v1643_v35 }
 0x489   :  { %v3418_v39 = vpop.eup %3417 }
 0x48a   :  { %v3420_v40 = vpop.eup %3419  ;;  %v1652_v38 = vrot.slane %v3418_v39, %v5323_v41 }
 0x48b   :  { %v3422_v16 = vpop.eup %3421  ;;  %v1660_v42 = vrot.slane %v3420_v40, %v5323_v41 }
 0x48c   :  { %v3424_v58 = vpop.eup %3423  ;;  %v1665_v11 = vmul.f32 %v1652_v38, %v5324_v8  ;;  %v1669_v7 = vmul.f32 %v1652_v38, %v5325_v62  ;;  %v1656_v29 = vrot.slane %v3422_v16, %v5323_v41 }
 0x48d   :  { %v1667_v27 = vmul.f32 %v1660_v42, %v5326_v10  ;;  %v1671_v28 = vmul.f32 %v1660_v42, %v5327_v33  ;;  %v1664_v20 = vrot.slane %v3424_v58, %v5323_v41  ;;  %v3516_v33 = vld [vmem:[%s5030_s4 + $0x178] sm:$0xff] }
 0x48e   :  { %v1695_v9 = vmul.f32 %v1678_v4, %v1665_v11  ;;  %v1699_v63 = vmul.f32 %v1678_v4, %v1669_v7  ;;  %v1666_v48 = vmul.f32 %v1656_v29, %v5328_v47  ;;  %v1670_v50 = vmul.f32 %v1656_v29, %v5329_v49  ;;  %v3520_v49 = vld [vmem:[%s5030_s4 + $0x170] sm:$0xff] }
 0x48f   :  { %v1697_v51 = vmul.f32 %v1686_v12, %v1667_v27  ;;  %v1701_v52 = vmul.f32 %v1686_v12, %v1671_v28  ;;  %v1668_v21 = vmul.f32 %v1664_v20, %v5330_v53  ;;  %v1672_v24 = vmul.f32 %v1664_v20, %v5331_v26  ;;  %v3515_v27 = vld [vmem:[%s5030_s4 + $0x78] sm:$0xff]  ;;  %v3522_v53 = vld [vmem:[%s5030_s4 + $0x1e8] sm:$0xff] }
 0x490   :  { %v4622_v17 = vadd.f32 %v1708_v3, %v1695_v9  ;;  %v4624_v15 = vadd.f32 %v1708_v3, %v1699_v63  ;;  %v1696_v61 = vmul.f32 %v1682_v44, %v1666_v48  ;;  %v1700_v5 = vmul.f32 %v1682_v44, %v1670_v50  ;;  %v3518_v9 = vld [vmem:[%s5030_s4 + $0x1f0] sm:$0xff] }
 0x491   :  { %v4626_v30 = vadd.f32 %v1716_v43, %v1697_v51  ;;  %v4628_v31 = vadd.f32 %v1716_v43, %v1701_v52  ;;  %v1698_v13 = vmul.f32 %v1690_v45, %v1668_v21  ;;  %v1702_v35 = vmul.f32 %v1690_v45, %v1672_v24  ;;  %v3519_v48 = vld [vmem:[%s5030_s4 + $0x70] sm:$0xff]  ;;  %v3521_v52 = vld [vmem:[%s5030_s4 + $0xe8] sm:$0xff] }
 0x492   :  { %v2988_v36 = vmul.f32 -1.442695, %v4622_v17  ;;  %v2992_v59 = vmul.f32 -1.442695, %v4624_v15  ;;  %v4632_v22 = vadd.f32 %v1712_v18, %v1696_v61  ;;  %v4634_v39 = vadd.f32 %v1712_v18, %v1700_v5  ;;  %v3523_v24 = vld [vmem:[%s5030_s4 + $0x68] sm:$0xff] }
 0x493   :  { %v2990_v40 = vmul.f32 -1.442695, %v4626_v30  ;;  %v2994_v38 = vmul.f32 -1.442695, %v4628_v31  ;;  %v4638_v4 = vadd.f32 %v1720_v55, %v1698_v13  ;;  %v4640_v3 = vadd.f32 %v1720_v55, %v1702_v35  ;;  %v3517_v55 = vld [vmem:[%s5030_s4 + $0xf0] sm:$0xff]  ;;  %v3524_v61 = vld [vmem:[%s5030_s4 + $0x168] sm:$0xff] }
 0x494   :  { %3425 = vpow2.f32 %v2988_v36  ;;  %v2989_v12 = vmul.f32 -1.442695, %v4632_v22  ;;  %v2993_v16 = vmul.f32 -1.442695, %v4634_v39  ;;  %v3525_v35 = vld [vmem:[%s5030_s4 + $0xe0] sm:$0xff] }
 0x495   :  { %3427 = vpow2.f32 %v2992_v59  ;;  %v2991_v42 = vmul.f32 -1.442695, %v4638_v4  ;;  %v2995_v43 = vmul.f32 -1.442695, %v4640_v3  ;;  %v3526_v36 = vld [vmem:[%s5030_s4 + $0x1e0] sm:$0xff] }
 0x496   :  { %3429 = vpow2.f32 %v2990_v40 }
 0x497   :  { %3431 = vpow2.f32 %v2994_v38  ;;  %v3527_v38 = vld [vmem:[%s5030_s4 + $0x60] sm:$0xff] }
 0x498   :  { %3433 = vpow2.f32 %v2989_v12  ;;  %v3528_v12 = vld [vmem:[%s5030_s4 + $0x160] sm:$0xff] }
 0x499   :  { %3435 = vpow2.f32 %v2993_v16 }
 0x49a   :  { %3437 = vpow2.f32 %v2991_v42  ;;  %v3210_v44 = vpop.f32.mrf.mxu0  ;;  %v3245_v45 = vpop.f32.mrf.mxu1  ;;  %v3529_v42 = vld [vmem:[%s5030_s4 + $0xd8] sm:$0xff] }
 0x49b   :  { %3439 = vpow2.f32 %v2995_v43  ;;  %v3530_v43 = vld [vmem:[%s5030_s4 + $0x1d8] sm:$0xff] }
 0x49c   :  { %v3211_v58 = vpop.f32.mrf.mxu0  ;;  %v3246_v8 = vpop.f32.mrf.mxu1 }
 0x49d   :  { %v3212_v11 = vadd.f32 %v3211_v58, %v3210_v44  ;;  %v3247_v62 = vadd.f32 %v3246_v8, %v3245_v45  ;;  %v3531_v44 = vld [vmem:[%s5030_s4 + $0x58] sm:$0xff]  ;;  %v3533_v58 = vld [vmem:[%s5030_s4 + $0xd0] sm:$0xff] }
 0x49e   :  { %v3532_v45 = vld [vmem:[%s5030_s4 + $0x158] sm:$0xff]  ;;  %v3534_v8 = vld [vmem:[%s5030_s4 + $0x1d0] sm:$0xff] }
 0x49f   :  { %v2087_v7 = vadd.f32 %v3247_v62, %v3212_v11  ;;  %v3535_v11 = vld [vmem:[%s5030_s4 + $0x50] sm:$0xff] }
 0x4a0   :  { %v3536_v62 = vld [vmem:[%s5030_s4 + $0x150] sm:$0xff] }
 0x4a1   :  { %v3426_v29 = vpop.eup %3425  ;;  %3000 = vmatmul.mubr.msk.f32.vlgmr.msra.gmra.mxu0 %vm1154_vm4, %v2087_v7  ;;  %3001 = vmatmul.mubr.msk.f32.vlgmr.msra.gmra.mxu1 %vm1154_vm4, %v2087_v7  ;;  %v3537_v7 = vld [vmem:[%s5030_s4 + $0xc8] sm:$0xff] }
 0x4a2   :  { %v3428_v18 = vpop.eup %3427  ;;  %v1757_v10 = vadd.f32 1.0, %v3426_v29  ;;  %3249 = vmatpush3.msra.mxu0 %v3515_v27  ;;  %3284 = vmatpush3.msra.mxu1 %v3516_v33  ;;  %v3538_v29 = vld [vmem:[%s5030_s4 + $0x1c8] sm:$0xff]  ;;  %v3541_v27 = vld [vmem:[%s5030_s4 + $0xc0] sm:$0xff] }
 0x4a3   :  { %v3430_v28 = vpop.eup %3429  ;;  %v1761_v20 = vadd.f32 1.0, %v3428_v18  ;;  %3250 = vmatprep.subr.mxu0 %v3517_v55  ;;  %3285 = vmatprep.subr.mxu1 %v3518_v9  ;;  %v3539_v18 = vld [vmem:[%s5030_s4 + $0x48] sm:$0xff]  ;;  %v3542_v33 = vld [vmem:[%s5030_s4 + $0x1c0] sm:$0xff]  ;;  %v3545_v9 = vld [vmem:[%s5030_s4 + $0xb8] sm:$0xff] }
 0x4a4   :  { %v3432_v63 = vpop.eup %3431  ;;  %3441 = vrcp.f32 %v1757_v10  ;;  %v1759_v47 = vadd.f32 1.0, %v3430_v28  ;;  %3251 = vmatpush3.msra.mxu0 %v3519_v48  ;;  %3286 = vmatpush3.msra.mxu1 %v3520_v49  ;;  %v3540_v10 = vld [vmem:[%s5030_s4 + $0x148] sm:$0xff]  ;;  %v3543_v28 = vld [vmem:[%s5030_s4 + $0x40] sm:$0xff]  ;;  %v3547_v48 = vld [vmem:[%s5030_s4 + $0x38] sm:$0xff] }
 0x4a5   :  { %v3434_v50 = vpop.eup %3433  ;;  %3443 = vrcp.f32 %v1761_v20  ;;  %v1763_v51 = vadd.f32 1.0, %v3432_v63  ;;  %3252 = vmatprep.subr.mxu0 %v3521_v52  ;;  %3287 = vmatprep.subr.mxu1 %v3522_v53  ;;  %v3544_v20 = vld [vmem:[%s5030_s4 + $0x140] sm:$0xff]  ;;  %v3546_v63 = vld [vmem:[%s5030_s4 + $0x1b8] sm:$0xff]  ;;  %v3550_v52 = vld [vmem:[%s5030_s4 + $0x1b0] sm:$0xff] }
 0x4a6   :  { %v3436_v21 = vpop.eup %3435  ;;  %3445 = vrcp.f32 %v1759_v47  ;;  %v1758_v26 = vadd.f32 1.0, %v3434_v50  ;;  %3253 = vmatpush3.msra.mxu0 %v3523_v24  ;;  %3288 = vmatpush3.msra.mxu1 %v3524_v61  ;;  %v3548_v49 = vld [vmem:[%s5030_s4 + $0x138] sm:$0xff]  ;;  %v3553_v61 = vld [vmem:[%s5030_s4 + $0xa8] sm:$0xff] }
 0x4a7   :  { %v3438_v5 = vpop.eup %3437  ;;  %3447 = vrcp.f32 %v1763_v51  ;;  %v1762_v13 = vadd.f32 1.0, %v3436_v21  ;;  %3254 = vmatprep.subr.mxu0 %v3525_v35  ;;  %3289 = vmatprep.subr.mxu1 %v3526_v36  ;;  %v3549_v51 = vld [vmem:[%s5030_s4 + $0xb0] sm:$0xff] }
 0x4a8   :  { %v3440_v59 = vpop.eup %3439  ;;  %3449 = vrcp.f32 %v1758_v26  ;;  %v1760_v40 = vadd.f32 1.0, %v3438_v5  ;;  %3255 = vmatpush3.msra.mxu0 %v3527_v38  ;;  %3290 = vmatpush3.msra.mxu1 %v3528_v12  ;;  %v3551_v21 = vld [vmem:[%s5030_s4 + $0x30] sm:$0xff]  ;;  %v3554_v5 = vld [vmem:[%s5030_s4 + $0x1a8] sm:$0xff] }
 0x4a9   :  { %3451 = vrcp.f32 %v1762_v13  ;;  %v1764_v16 = vadd.f32 1.0, %v3440_v59  ;;  %3256 = vmatprep.subr.mxu0 %v3529_v42  ;;  %3291 = vmatprep.subr.mxu1 %v3530_v43  ;;  %v3552_v26 = vld [vmem:[%s5030_s4 + $0x130] sm:$0xff]  ;;  %v3555_v59 = vld [vmem:[%s5030_s4 + $0x28] sm:$0xff] }
 0x4aa   :  { %3453 = vrcp.f32 %v1760_v40  ;;  %3257 = vmatpush3.msra.mxu0 %v3531_v44  ;;  %3292 = vmatpush3.msra.mxu1 %v3532_v45  ;;  %v3556_v40 = vld [vmem:[%s5030_s4 + $0x128] sm:$0xff] }
 0x4ab   :  { %3455 = vrcp.f32 %v1764_v16  ;;  %3258 = vmatprep.subr.mxu0 %v3533_v58  ;;  %3293 = vmatprep.subr.mxu1 %v3534_v8 }
 0x4ac   :  { %3259 = vmatpush3.msra.mxu0 %v3535_v11  ;;  %3294 = vmatpush3.msra.mxu1 %v3536_v62 }
 0x4ad   :  { %3260 = vmatprep.subr.mxu0 %v3537_v7  ;;  %3295 = vmatprep.subr.mxu1 %v3538_v29  ;;  %v3565_v29 = vld [vmem:[%s5030_s4 + $0x90] sm:$0xff] }
 0x4ae   :  { %3261 = vmatpush3.msra.mxu0 %v3539_v18  ;;  %3296 = vmatpush3.msra.mxu1 %v3540_v10  ;;  %v3566_v18 = vld [vmem:[%s5030_s4 + $0x190] sm:$0xff] }
 0x4af   :  { %3262 = vmatprep.subr.mxu0 %v3541_v27  ;;  %3297 = vmatprep.subr.mxu1 %v3542_v33  ;;  %v3567_v10 = vld [vmem:[%s5030_s4 + $0x10] sm:$0xff]  ;;  %v3569_v33 = vld [vmem:[%s5030_s4 + $0x88] sm:$0xff] }
 0x4b0   :  { %3263 = vmatpush3.msra.mxu0 %v3543_v28  ;;  %3298 = vmatpush3.msra.mxu1 %v3544_v20  ;;  %v3568_v27 = vld [vmem:[%s5030_s4 + $0x110] sm:$0xff]  ;;  %v3570_v28 = vld [vmem:[%s5030_s4 + $0x188] sm:$0xff] }
 0x4b1   :  { %v3442_v55 = vpop.eup %3441  ;;  %3264 = vmatprep.subr.mxu0 %v3545_v9  ;;  %3299 = vmatprep.subr.mxu1 %v3546_v63  ;;  %v3571_v20 = vld [vmem:[%s5030_s4 + $0x8] sm:$0xff]  ;;  %v3573_v9 = vld [vmem:[%s5030_s4 + $0x80] sm:$0xff] }
 0x4b2   :  { %v3444_v47 = vpop.eup %3443  ;;  %3265 = vmatpush3.msra.mxu0 %v3547_v48  ;;  %3300 = vmatpush3.msra.mxu1 %v3548_v49  ;;  %v1781_v35 = vmul.f32 %v3442_v55, %v4622_v17  ;;  %v3557_v17 = vld [vmem:[%s5030_s4 + $0xa0] sm:$0xff]  ;;  %v3572_v55 = vld [vmem:[%s5030_s4 + $0x108] sm:$0xff] }
 0x4b3   :  { %v3446_v50 = vpop.eup %3445  ;;  %3266 = vmatprep.subr.mxu0 %v3549_v51  ;;  %3301 = vmatprep.subr.mxu1 %v3550_v52  ;;  %v1785_v12 = vmul.f32 %v3444_v47, %v4624_v15  ;;  %v3559_v15 = vld [vmem:[%s5030_s4 + $0x20] sm:$0xff] }
 0x4b4   :  { %v3448_v53 = vpop.eup %3447  ;;  %3267 = vmatpush3.msra.mxu0 %v3551_v21  ;;  %3302 = vmatpush3.msra.mxu1 %v3552_v26  ;;  %v1783_v43 = vmul.f32 %v3446_v50, %v4626_v30  ;;  %v3561_v30 = vld [vmem:[%s5030_s4 + $0x98] sm:$0xff]  ;;  %v3574_v63 = vld [vmem:[%s5030_s4 + $0x180] sm:$0xff]  ;;  %v3578_v50 = vld [vmem:[#allocation7 + $0x78] sm:$0xff] }
 0x4b5   :  { %v3450_v24 = vpop.eup %3449  ;;  %3268 = vmatprep.subr.mxu0 %v3553_v61  ;;  %3303 = vmatprep.subr.mxu1 %v3554_v5  ;;  %v1787_v58 = vmul.f32 %v3448_v53, %v4628_v31  ;;  %v3563_v31 = vld [vmem:[%s5030_s4 + $0x18] sm:$0xff]  ;;  %v3575_v47 = vld [vmem:[%s5030_s4] sm:$0xff] }
 0x4b6   :  { %v3452_v13 = vpop.eup %3451  ;;  %v1782_v36 = vmul.f32 %v3450_v24, %v4632_v22  ;;  %3269 = vmatpush3.msra.mxu0 %v3555_v59  ;;  %3304 = vmatpush3.msra.mxu1 %v3556_v40  ;;  %v3558_v22 = vld [vmem:[%s5030_s4 + $0x1a0] sm:$0xff] }
 0x4b7   :  { %v3454_v38 = vpop.eup %3453  ;;  %v1786_v16 = vmul.f32 %v3452_v13, %v4634_v39  ;;  %3270 = vmatprep.subr.mxu0 %v3557_v17  ;;  %3305 = vmatprep.subr.mxu1 %v3558_v22  ;;  %v3560_v39 = vld [vmem:[%s5030_s4 + $0x120] sm:$0xff] }
 0x4b8   :  { %v3456_v42 = vpop.eup %3455  ;;  %v3028_v44 = vpack.c.bf16 %v1782_v36, %v1781_v35  ;;  %v1784_v45 = vmul.f32 %v3454_v38, %v4638_v4  ;;  %3271 = vmatpush3.msra.mxu0 %v3559_v15  ;;  %3306 = vmatpush3.msra.mxu1 %v3560_v39  ;;  %v3562_v4 = vld [vmem:[%s5030_s4 + $0x198] sm:$0xff]  ;;  %v3576_v48 = vld [vmem:[%s5030_s4 + $0x100] sm:$0xff] }
 0x4b9   :  { %v3030_v8 = vpack.c.bf16 %v1786_v16, %v1785_v12  ;;  %v1788_v11 = vmul.f32 %v3456_v42, %v4640_v3  ;;  %3272 = vmatprep.subr.mxu0 %v3561_v30  ;;  %3307 = vmatprep.subr.mxu1 %v3562_v4  ;;  %v3564_v3 = vld [vmem:[%s5030_s4 + $0x118] sm:$0xff]  ;;  %v3577_v49 = vld [vmem:[#allocation7 + $0x68] sm:$0xff] }
 0x4ba   :  { %1813 = vst [vmem:[%s5032_s6] sm:$0xff] %v3028_v44  ;;  %v3029_v62 = vpack.c.bf16 %v1784_v45, %v1783_v43  ;;  %3273 = vmatpush3.msra.mxu0 %v3563_v31  ;;  %3308 = vmatpush3.msra.mxu1 %v3564_v3 }
 0x4bb   :  { %1815 = vst [vmem:[%s5032_s6 + $0x10] sm:$0xff] %v3030_v8  ;;  %v3031_v7 = vpack.c.bf16 %v1788_v11, %v1787_v58  ;;  %3274 = vmatprep.subr.mxu0 %v3565_v29  ;;  %3309 = vmatprep.subr.mxu1 %v3566_v18 }
 0x4bc   :  { %1814 = vst [vmem:[%s5032_s6 + $0x8] sm:$0xff] %v3029_v62  ;;  %3275 = vmatpush3.msra.mxu0 %v3567_v10  ;;  %3310 = vmatpush3.msra.mxu1 %v3568_v27 }
 0x4bd   :  { %1816 = vst [vmem:[%s5032_s6 + $0x18] sm:$0xff] %v3031_v7  ;;  %3276 = vmatprep.subr.mxu0 %v3569_v33  ;;  %3311 = vmatprep.subr.mxu1 %v3570_v28 }
 0x4be   :  { %3277 = vmatpush3.msra.mxu0 %v3571_v20  ;;  %3312 = vmatpush3.msra.mxu1 %v3572_v55 }
 0x4bf   :  { %3278 = vmatprep.subr.mxu0 %v3573_v9  ;;  %3313 = vmatprep.subr.mxu1 %v3574_v63 }
 0x4c0   :  { %3279 = vmatpush3.msra.mxu0 %v3575_v47  ;;  %3314 = vmatpush3.msra.mxu1 %v3576_v48 }
 0x4c1   :  { %2526 = vmatprep.subr.mxu0 %v3577_v49  ;;  %2597 = vmatprep.subr.mxu1 %v3578_v50 }
 0x561   :  { %v2175_v51 = vpop.f32.mrf.mxu0  ;;  %v2246_v52 = vpop.f32.mrf.mxu1 }
 0x562   :  { %v2254_v53 = vrot.slane %v2175_v51, %v5323_v41  ;;  %v2262_v21 = vrot.slane %v2246_v52, %v5323_v41 }
 0x563   :  { %v2177_v26 = vpop.f32.mrf.mxu0  ;;  %v2248_v24 = vpop.f32.mrf.mxu1 }
 0x564   :  { %v4857_v61 = vsub.f32 %v4274_v37, %v2254_v53  ;;  %v4860_v5 = vsub.f32 %v4283_v2, %v2254_v53  ;;  %v4863_v13 = vsub.f32 %v4295_v32, %v2254_v53  ;;  %v4866_v35 = vsub.f32 %v4276_v34, %v2262_v21 }
 0x565   :  { %v4869_v36 = vsub.f32 %v4286_v1, %v2262_v21  ;;  %v4872_v59 = vsub.f32 %v4298_v14, %v2262_v21  ;;  %v2258_v40 = vrot.slane %v2177_v26, %v5323_v41  ;;  %v2266_v37 = vrot.slane %v2248_v24, %v5323_v41 }
 0x566   :  { %v2279_v2 = vmul.f32 %v4857_v61, %v4857_v61  ;;  %v2283_v32 = vmul.f32 %v4860_v5, %v4860_v5  ;;  %v2287_v34 = vmul.f32 %v4863_v13, %v4863_v13  ;;  %v2281_v1 = vmul.f32 %v4866_v35, %v4866_v35 }
 0x567   :  { %v2285_v14 = vmul.f32 %v4869_v36, %v4869_v36  ;;  %v2289_v38 = vmul.f32 %v4872_v59, %v4872_v59  ;;  %v4889_v12 = vsub.f32 %v4278_v54, %v2258_v40  ;;  %v4892_v16 = vsub.f32 %v4289_v6, %v2258_v40 }
 0x568   :  { %v2303_v17 = vrot.slane %v2279_v2, 2  ;;  %v2304_v22 = vrot.slane %v2283_v32, 2  ;;  %v2315_v42 = vrot.slane %v2287_v34, 2  ;;  %v2309_v43 = vrot.slane %v2281_v1, 2 }
 0x569   :  { %v2310_v44 = vrot.slane %v2285_v14, 2  ;;  %v2319_v45 = vrot.slane %v2289_v38, 2  ;;  %v4895_v15 = vsub.f32 %v4301_v57, %v2258_v40  ;;  %v2280_v39 = vmul.f32 %v4889_v12, %v4889_v12 }
 0x56a   :  { %v2305_v58 = vsel %vm1829_vm5, %v2303_v17, %v2304_v22  ;;  %v2316_v54 = vsel %vm1829_vm5, %v2304_v22, %v2315_v42  ;;  %v2284_v6 = vmul.f32 %v4892_v16, %v4892_v16  ;;  %v4904_v8 = vsub.f32 %v4280_v19, %v2266_v37 }
 0x56b   :  { %v2331_v11 = vadd.f32 %v2316_v54, %v2305_v58  ;;  %v2311_v30 = vsel %vm1829_vm5, %v2309_v43, %v2310_v44  ;;  %v2320_v4 = vsel %vm1829_vm5, %v2310_v44, %v2319_v45  ;;  %v2288_v57 = vmul.f32 %v4895_v15, %v4895_v15  ;;  %v3580_v54 = vld [vmem:[#allocation7 + $0x48] sm:$0xff] }
 0x56c   :  { %v2345_v62 = vadd.f32 %v2320_v4, %v2311_v30  ;;  %v2306_v31 = vrot.slane %v2280_v39, 2  ;;  %v2307_v3 = vrot.slane %v2284_v6, 2  ;;  %v4911_v7 = vsub.f32 %v4292_v60, %v2266_v37  ;;  %v3579_v39 = vld [vmem:[#allocation7 + $0x60] sm:$0xff]  ;;  %v3583_v30 = vld [vmem:[#allocation7 + $0x70] sm:$0xff] }
 0x56d   :  { %v2317_v29 = vrot.slane %v2288_v57, 2  ;;  %v4914_v18 = vsub.f32 %v4304_v56, %v2266_v37  ;;  %v2282_v19 = vmul.f32 %v4904_v8, %v4904_v8  ;;  %v2332_v10 = vrot.slane %v2331_v11, 4  ;;  %v3581_v6 = vld [vmem:[#allocation7 + $0x40] sm:$0xff]  ;;  %v3585_v57 = vld [vmem:[#allocation7 + $0x58] sm:$0xff] }
 0x56e   :  { %v2286_v27 = vmul.f32 %v4911_v7, %v4911_v7  ;;  %v2308_v33 = vsel %vm1829_vm5, %v2306_v31, %v2307_v3  ;;  %v2346_v28 = vrot.slane %v2345_v62, 4  ;;  %v3584_v4 = vld [vmem:[#allocation7 + $0x20] sm:$0xff]  ;;  %v3587_v31 = vld [vmem:[#allocation7 + $0x50] sm:$0xff] }
 0x56f   :  { %v2290_v20 = vmul.f32 %v4914_v18, %v4914_v18  ;;  %v2312_v55 = vrot.slane %v2282_v19, 2  ;;  %v2318_v60 = vsel %vm1829_vm5, %v2307_v3, %v2317_v29  ;;  %v2333_v9 = vadd.f32 %v2332_v10, %v2331_v11  ;;  %v3582_v11 = vld [vmem:[#allocation7 + $0x28] sm:$0xff]  ;;  %v3588_v3 = vld [vmem:[#allocation7] sm:$0xff]  ;;  %v3589_v29 = vld [vmem:[#allocation7 + $0x38] sm:$0xff] }
 0x570   :  { %v2313_v63 = vrot.slane %v2286_v27, 2  ;;  %v2338_v56 = vadd.f32 %v2318_v60, %v2308_v33  ;;  %v2347_v49 = vadd.f32 %v2346_v28, %v2345_v62  ;;  %v3586_v62 = vld [vmem:[#allocation7 + $0x8] sm:$0xff]  ;;  %v3590_v19 = vld [vmem:[#allocation7 + $0x30] sm:$0xff]  ;;  %v3591_v10 = vld [vmem:[#allocation7 + $0x18] sm:$0xff] }
 0x571   :  { %v2321_v47 = vrot.slane %v2290_v20, 2  ;;  %v2334_v48 = vrot.slane %v2333_v9, 2  ;;  %v3592_v27 = vld [vmem:[#allocation7 + $0x10] sm:$0xff] }
 0x572   :  { %v2339_v50 = vrot.slane %v2338_v56, 4  ;;  %v2314_v51 = vsel %vm1829_vm5, %v2312_v55, %v2313_v63  ;;  %v2348_v24 = vrot.slane %v2347_v49, 2 }
 0x573   :  { %v2322_v52 = vsel %vm1829_vm5, %v2313_v63, %v2321_v47  ;;  %v2335_v26 = vadd.f32 %v2334_v48, %v2333_v9 }
 0x574   :  { %v2340_v53 = vadd.f32 %v2339_v50, %v2338_v56  ;;  %v2352_v21 = vadd.f32 %v2322_v52, %v2314_v51  ;;  %v2349_v1 = vadd.f32 %v2348_v24, %v2347_v49 }
 0x575   :  { %v2336_v34 = vrot.slane %v2335_v26, 1 }
 0x576   :  { %v2341_v40 = vrot.slane %v2340_v53, 2  ;;  %v2353_v37 = vrot.slane %v2352_v21, 4  ;;  %v2350_v43 = vrot.slane %v2349_v1, 1 }
 0x577   :  { %v2337_v42 = vadd.f32 %v2336_v34, %v2335_v26 }
 0x578   :  { %v2342_v2 = vadd.f32 %v2341_v40, %v2340_v53  ;;  %v2354_v32 = vadd.f32 %v2353_v37, %v2352_v21  ;;  %v2351_v58 = vadd.f32 %v2350_v43, %v2349_v1  ;;  %v2676_v53 = vld [vmem:[#allocation4] sm:$0xf]  ;;  %v2710_v21 = vld [vmem:[#allocation6] sm:$0xf] }
 0x579   :  { %v2681_v24 = vrot.slane %v2676_v53, %v5323_v41  ;;  %v2715_v40 = vrot.slane %v2710_v21, %v5323_v41  ;;  %v2723_v34 = vrot.slane %v2710_v21, %v4594_v23  ;;  %v2685_v1 = vrot.slane %v2676_v53, %v4597_v25 }
 0x57a   :  { %v2343_v14 = vrot.slane %v2342_v2, 1  ;;  %v2355_v38 = vrot.slane %v2354_v32, 2 }
 0x57c   :  { %v2344_v17 = vadd.f32 %v2343_v14, %v2342_v2  ;;  %v2356_v22 = vadd.f32 %v2355_v38, %v2354_v32  ;;  %v2689_v32 = vrot.slane %v2676_v53, %v4594_v23 }
 0x57e   :  { %2423 = vmatprep.mubr.f32.mxu0 %v2344_v17  ;;  %v2357_v44 = vrot.slane %v2356_v22, 1  ;;  %v2719_v17 = vrot.slane %v2710_v21, %v4597_v25 }
 0x57f   :  { %2424 = vmatmul.mubr.f32.vlgmr.msra.gmra.mxu0 %v2337_v42  ;;  %v2727_v42 = vrot.slane %v2710_v21, %v4600_v0 }
 0x580   :  { %v2358_v45 = vadd.f32 %v2357_v44, %v2356_v22  ;;  %2527 = vmatpush1.msra.mxu0 %v3579_v39  ;;  %2566 = vmatprep.mubr.f32.mxu0 %v5265_v46  ;;  %v2693_v22 = vrot.slane %v2676_v53, %v4600_v0 }
 0x581   :  { %2528 = vmatprep.subr.mxu0 %v3580_v54 }
 0x582   :  { %2493 = vmatprep.mubr.f32.mxu1 %v2358_v45  ;;  %2529 = vmatpush1.msra.mxu0 %v3581_v6 }
 0x583   :  { %2494 = vmatmul.mubr.f32.vlgmr.msra.gmra.mxu1 %v2351_v58  ;;  %2530 = vmatprep.subr.mxu0 %v3582_v11 }
 0x584   :  { %2598 = vmatpush1.msra.mxu1 %v3583_v30  ;;  %2531 = vmatpush1.msra.mxu0 %v3584_v4 }
 0x585   :  { %2599 = vmatprep.subr.mxu1 %v3585_v57  ;;  %2532 = vmatprep.subr.mxu0 %v3586_v62 }
 0x586   :  { %2600 = vmatpush1.msra.mxu1 %v3587_v31  ;;  %2533 = vmatpush1.msra.mxu0 %v3588_v3 }
 0x587   :  { %2601 = vmatprep.subr.mxu1 %v3589_v29  ;;  %2637 = vmatprep.mubr.f32.mxu1 %v5265_v46 }
 0x588   :  { %2602 = vmatpush1.msra.mxu1 %v3590_v19 }
 0x589   :  { %2603 = vmatprep.subr.mxu1 %v3591_v10 }
 0x58a   :  { %2604 = vmatpush1.msra.mxu1 %v3592_v27 }
 0x63f   :  { %v3280_v33 = vpop.f32.mrf.mxu0 }
 0x641   :  { %v3281_v28 = vpop.f32.mrf.mxu0 }
 0x642   :  { %v3282_v55 = vadd.f32 %v3281_v28, %v3280_v33 }
 0x643   :  { %v3315_v20 = vpop.f32.mrf.mxu1 }
 0x645   :  { %v3316_v60 = vpop.f32.mrf.mxu1 }
 0x646   :  { %v3317_v9 = vadd.f32 %v3316_v60, %v3315_v20 }
 0x648   :  { %v2496_v63 = vadd.f32 %v3317_v9, %v3282_v55 }
 0x64a   :  { %3002 = vmatmul.mubr.msk.f32.vlgmr.msra.gmra.mxu0 %vm1154_vm4, %v2496_v63  ;;  %3003 = vmatmul.mubr.msk.f32.vlgmr.msra.gmra.mxu1 %vm1154_vm4, %v2496_v63 }
 0x70a   :  { %v2568_v56 = vpop.f32.mrf.mxu0  ;;  %v2639_v47 = vpop.f32.mrf.mxu1 }
 0x70b   :  { %v2569_v46 = vadd.f32 1e-05, %v2568_v56  ;;  %v2640_v48 = vadd.f32 1e-05, %v2639_v47 }
 0x70c   :  { %v2570_v49 = vpop.f32.mrf.mxu0  ;;  %v2641_v50 = vpop.f32.mrf.mxu1 }
 0x70d   :  { %3457 = vrsqrt.f32 %v2569_v46  ;;  %v2571_v51 = vadd.f32 1e-05, %v2570_v49  ;;  %v2642_v52 = vadd.f32 1e-05, %v2641_v50 }
 0x70e   :  { %3459 = vrsqrt.f32 %v2640_v48 }
 0x70f   :  { %3461 = vrsqrt.f32 %v2571_v51 }
 0x710   :  { %3463 = vrsqrt.f32 %v2642_v52 }
 0x71a   :  { %v3458_v26 = vpop.eup %3457 }
 0x71b   :  { %v3460_v37 = vpop.eup %3459  ;;  %v2651_v2 = vrot.slane %v3458_v26, %v5323_v41 }
 0x71c   :  { %v3462_v14 = vpop.eup %3461  ;;  %v2659_v38 = vrot.slane %v3460_v37, %v5323_v41 }
 0x71d   :  { %v3464_v43 = vpop.eup %3463  ;;  %v2664_v44 = vmul.f32 %v2651_v2, %v4857_v61  ;;  %v2668_v45 = vmul.f32 %v2651_v2, %v4860_v5  ;;  %v2672_v39 = vmul.f32 %v2651_v2, %v4863_v13  ;;  %v2655_v23 = vrot.slane %v3462_v14, %v5323_v41 }
 0x71e   :  { %v2666_v58 = vmul.f32 %v2659_v38, %v4866_v35  ;;  %v2670_v54 = vmul.f32 %v2659_v38, %v4869_v36  ;;  %v2674_v6 = vmul.f32 %v2659_v38, %v4872_v59  ;;  %v2663_v25 = vrot.slane %v3464_v43, %v5323_v41 }
 0x71f   :  { %v2698_v11 = vmul.f32 %v2681_v24, %v2664_v44  ;;  %v2702_v30 = vmul.f32 %v2681_v24, %v2668_v45  ;;  %v2706_v0 = vmul.f32 %v2681_v24, %v2672_v39  ;;  %v2665_v4 = vmul.f32 %v2655_v23, %v4889_v12 }
 0x720   :  { %v2700_v61 = vmul.f32 %v2689_v32, %v2666_v58  ;;  %v2704_v57 = vmul.f32 %v2689_v32, %v2670_v54  ;;  %v2708_v5 = vmul.f32 %v2689_v32, %v2674_v6  ;;  %v2669_v13 = vmul.f32 %v2655_v23, %v4892_v16 }
 0x721   :  { %v4950_v62 = vadd.f32 %v2715_v40, %v2698_v11  ;;  %v4952_v31 = vadd.f32 %v2715_v40, %v2702_v30  ;;  %v4954_v35 = vadd.f32 %v2715_v40, %v2706_v0  ;;  %v2673_v36 = vmul.f32 %v2655_v23, %v4895_v15 }
 0x722   :  { %v4957_v59 = vadd.f32 %v2723_v34, %v2700_v61  ;;  %v4959_v41 = vadd.f32 %v2723_v34, %v2704_v57  ;;  %v4961_v3 = vadd.f32 %v2723_v34, %v2708_v5  ;;  %v2699_v12 = vmul.f32 %v2685_v1, %v2665_v4 }
 0x723   :  { %v3004_v29 = vmul.f32 -1.442695, %v4950_v62  ;;  %v3008_v19 = vmul.f32 -1.442695, %v4952_v31  ;;  %v3012_v16 = vmul.f32 -1.442695, %v4954_v35  ;;  %v2703_v10 = vmul.f32 %v2685_v1, %v2669_v13 }
 0x724   :  { %v3006_v27 = vmul.f32 -1.442695, %v4957_v59  ;;  %v3010_v33 = vmul.f32 -1.442695, %v4959_v41  ;;  %v3014_v15 = vmul.f32 -1.442695, %v4961_v3  ;;  %v2707_v28 = vmul.f32 %v2685_v1, %v2673_v36 }
 0x725   :  { %3465 = vpow2.f32 %v3004_v29  ;;  %v4969_v20 = vadd.f32 %v2719_v17, %v2699_v12  ;;  %v4971_v55 = vadd.f32 %v2719_v17, %v2703_v10  ;;  %v2667_v60 = vmul.f32 %v2663_v25, %v4904_v8 }
 0x726   :  { %3467 = vpow2.f32 %v3008_v19  ;;  %v4974_v9 = vadd.f32 %v2719_v17, %v2707_v28  ;;  %v2671_v63 = vmul.f32 %v2663_v25, %v4911_v7  ;;  %v2675_v56 = vmul.f32 %v2663_v25, %v4914_v18 }
 0x727   :  { %3469 = vpow2.f32 %v3012_v16  ;;  %v3005_v47 = vmul.f32 -1.442695, %v4969_v20  ;;  %v2701_v46 = vmul.f32 %v2693_v22, %v2667_v60  ;;  %v3009_v48 = vmul.f32 -1.442695, %v4971_v55 }
 0x728   :  { %3471 = vpow2.f32 %v3006_v27  ;;  %v2705_v49 = vmul.f32 %v2693_v22, %v2671_v63  ;;  %v2709_v50 = vmul.f32 %v2693_v22, %v2675_v56  ;;  %v3013_v51 = vmul.f32 -1.442695, %v4974_v9 }
 0x729   :  { %3473 = vpow2.f32 %v3010_v33  ;;  %v4981_v8 = vadd.f32 %v2727_v42, %v2701_v46 }
 0x72a   :  { %3475 = vpow2.f32 %v3014_v15  ;;  %v4983_v52 = vadd.f32 %v2727_v42, %v2705_v49  ;;  %v4985_v7 = vadd.f32 %v2727_v42, %v2709_v50 }
 0x72b   :  { %3477 = vpow2.f32 %v3005_v47  ;;  %v3007_v18 = vmul.f32 -1.442695, %v4981_v8 }
 0x72c   :  { %3479 = vpow2.f32 %v3009_v48  ;;  %v3011_v53 = vmul.f32 -1.442695, %v4983_v52  ;;  %v3015_v21 = vmul.f32 -1.442695, %v4985_v7 }
 0x72d   :  { %3481 = vpow2.f32 %v3013_v51 }
 0x72e   :  { %3483 = vpow2.f32 %v3007_v18 }
 0x72f   :  { %3485 = vpow2.f32 %v3011_v53 }
 0x730   :  { %3487 = vpow2.f32 %v3015_v21 }
 0x732   :  { %v3466_v26 = vpop.eup %3465 }
 0x733   :  { %v3468_v24 = vpop.eup %3467  ;;  %v2780_v40 = vadd.f32 1.0, %v3466_v26 }
 0x734   :  { %v3470_v37 = vpop.eup %3469  ;;  %v2784_v2 = vadd.f32 1.0, %v3468_v24 }
 0x735   :  { %v3472_v32 = vpop.eup %3471  ;;  %v2788_v34 = vadd.f32 1.0, %v3470_v37  ;;  %3489 = vrcp.f32 %v2780_v40 }
 0x736   :  { %v3474_v1 = vpop.eup %3473  ;;  %3491 = vrcp.f32 %v2784_v2  ;;  %v2782_v14 = vadd.f32 1.0, %v3472_v32 }
 0x737   :  { %v3476_v38 = vpop.eup %3475  ;;  %3493 = vrcp.f32 %v2788_v34  ;;  %v2786_v17 = vadd.f32 1.0, %v3474_v1 }
 0x738   :  { %v3478_v22 = vpop.eup %3477  ;;  %v2790_v42 = vadd.f32 1.0, %v3476_v38  ;;  %3495 = vrcp.f32 %v2782_v14 }
 0x739   :  { %v3480_v43 = vpop.eup %3479  ;;  %3497 = vrcp.f32 %v2786_v17  ;;  %v2781_v44 = vadd.f32 1.0, %v3478_v22 }
 0x73a   :  { %v3482_v45 = vpop.eup %3481  ;;  %3499 = vrcp.f32 %v2790_v42  ;;  %v2785_v39 = vadd.f32 1.0, %v3480_v43 }
 0x73b   :  { %v3484_v23 = vpop.eup %3483  ;;  %v2789_v58 = vadd.f32 1.0, %v3482_v45  ;;  %3501 = vrcp.f32 %v2781_v44 }
 0x73c   :  { %v3486_v54 = vpop.eup %3485  ;;  %3503 = vrcp.f32 %v2785_v39  ;;  %v2783_v6 = vadd.f32 1.0, %v3484_v23 }
 0x73d   :  { %v3488_v25 = vpop.eup %3487  ;;  %3505 = vrcp.f32 %v2789_v58  ;;  %v2787_v11 = vadd.f32 1.0, %v3486_v54 }
 0x73e   :  { %v2791_v30 = vadd.f32 1.0, %v3488_v25  ;;  %3507 = vrcp.f32 %v2783_v6 }
 0x73f   :  { %3509 = vrcp.f32 %v2787_v11 }
 0x740   :  { %3511 = vrcp.f32 %v2791_v30 }
 0x742   :  { %v3490_v0 = vpop.eup %3489 }
 0x743   :  { %v3492_v4 = vpop.eup %3491  ;;  %v2816_v29 = vmul.f32 %v3490_v0, %v4950_v62 }
 0x744   :  { %v3494_v61 = vpop.eup %3493  ;;  %v2820_v10 = vmul.f32 %v3492_v4, %v4952_v31 }
 0x745   :  { %v3496_v57 = vpop.eup %3495  ;;  %v2824_v15 = vmul.f32 %v3494_v61, %v4954_v35 }
 0x746   :  { %v3498_v5 = vpop.eup %3497  ;;  %v2818_v56 = vmul.f32 %v3496_v57, %v4957_v59 }
 0x747   :  { %v3500_v13 = vpop.eup %3499  ;;  %v2822_v46 = vmul.f32 %v3498_v5, %v4959_v41 }
 0x748   :  { %v3502_v36 = vpop.eup %3501 }
 0x749   :  { %v3504_v12 = vpop.eup %3503  ;;  %v2817_v19 = vmul.f32 %v3502_v36, %v4969_v20 }
 0x74a   :  { %v3506_v16 = vpop.eup %3505  ;;  %v2821_v27 = vmul.f32 %v3504_v12, %v4971_v55 }
 0x74b   :  { %v3508_v33 = vpop.eup %3507  ;;  %v2825_v28 = vmul.f32 %v3506_v16, %v4974_v9  ;;  %v3032_v60 = vpack.c.bf16 %v2817_v19, %v2816_v29  ;;  %v2826_v9 = vmul.f32 %v3500_v13, %v4961_v3 }
 0x74c   :  { %v3510_v63 = vpop.eup %3509  ;;  %v3034_v47 = vpack.c.bf16 %v2821_v27, %v2820_v10  ;;  %v2819_v62 = vmul.f32 %v3508_v33, %v4981_v8 }
 0x74d   :  { %v3512_v20 = vpop.eup %3511  ;;  %v3036_v31 = vpack.c.bf16 %v2825_v28, %v2824_v15  ;;  %v3022_v48 = vrot.slane %v3032_v60, 9  ;;  %v2823_v35 = vmul.f32 %v3510_v63, %v4983_v52 }
 0x74e   :  { %v2867_v49 = vrot.slane %v3034_v47, 5  ;;  %v2827_v50 = vmul.f32 %v3512_v20, %v4985_v7  ;;  %v3033_v59 = vpack.c.bf16 %v2819_v62, %v2818_v56 }
 0x74f   :  { %v2874_v51 = vrot.slane %v3036_v31, 5  ;;  %v3035_v18 = vpack.c.bf16 %v2823_v35, %v2822_v46 }
 0x750   :  { %v2868_v8 = vsel %vm4999_vm8, %v3022_v48, %v2867_v49  ;;  %v2873_v41 = vrot.slane %v2867_v49, 4  ;;  %v3037_v53 = vpack.c.bf16 %v2827_v50, %v2826_v9  ;;  %v3023_v21 = vrot.slane %v3033_v59, 9 }
 0x751   :  { %3024 = vst [vmem:[%s5032_s6 + $0x20] sm:$0xff] %v2868_v8  ;;  %v2871_v26 = vrot.slane %v3035_v18, 5 }
 0x752   :  { %v2875_v3 = vsel %vm4999_vm8, %v2873_v41, %v2874_v51  ;;  %v2877_v24 = vrot.slane %v3037_v53, 5 }
 0x753   :  { %3026 = vst [vmem:[%s5032_s6 + $0x30] sm:$0xff] %v2875_v3  ;;  %v2872_v52 = vsel %vm4999_vm8, %v3023_v21, %v2871_v26  ;;  %v2876_v7 = vrot.slane %v2871_v26, 4 }
 0x754   :  { %3025 = vst [vmem:[%s5032_s6 + $0x28] sm:$0xff] %v2872_v52 }
 0x755   :  { %v2878_v40 = vsel %vm4999_vm8, %v2876_v7, %v2877_v24 }
 0x756   :  { %3027 = vst [vmem:[%s5032_s6 + $0x38] sm:$0xff] %v2878_v40 }
 0x757   :  { %2892 = vsyncpa [#allocation3], 1 }
 0x758   :  { %2893 = vsyncpa [#allocation5], 1 }
 0x759   :  { %2894 = vsyncpa [#allocation8], 1 }

// kernel: encoder_forward.5
= control target key start
LH: loop header
LB: loop body
LE: loop exit
PB: predicated region body
PF: predicated region fallthrough
CT: control target
= control target key end

     0   :  { %v2759_v34 = vmov 0.0   ;;  %vm2760_vm0 = vmmov 0   ;;  %vm989_vm1 = vcmask 1043456   ;;  %vm1087_vm2 = vcmask 261120   ;;  %s3507_s1 = inlined_call_operand.vmem [shape: bf16[2,640,128], index: 1, kind: input, shape index: {}]   ;;  %s3508_s0 = inlined_call_operand.vmem [shape: bf16[10,640], index: 0, kind: input, shape index: {}]   ;;  %s3509_s4 = inlined_call_operand.vmem [shape: f32[128,32], index: 4, kind: input, shape index: {}]   ;;  %s3510_s5 = inlined_call_operand.vmem [shape: f32[32,128], index: 5, kind: input, shape index: {}]   ;;  %s3511_s6 = inlined_call_operand.vmem [shape: bf16[128,32], index: 6, kind: input, shape index: {}]   ;;  %s3512_s2 = inlined_call_operand.vmem [shape: f32[1,128], index: 2, kind: input, shape index: {}]   ;;  %s3513_s3 = inlined_call_operand.vmem [shape: f32[1,128], index: 3, kind: input, shape index: {}]   ;;  %s3514_s7 = inlined_call_operand.vmem [shape: f32[1,32], index: 7, kind: input, shape index: {}]   ;;  %s3515_s8 = inlined_call_operand.vmem [shape: f32[2,4,32], index: 8, kind: output, shape index: {}]  }
   0x1   :  { %v2640_v0 = vld [vmem:[%s3507_s1 + $0x1b8] sm:$0xff]   ;;  %v2644_v4 = vld [vmem:[%s3507_s1 + $0x1b0] sm:$0xff]   ;;  %v2648_v8 = vld [vmem:[%s3507_s1 + $0x1a8] sm:$0xff]   ;;  %vm1462_vm3 = vcmask 1042432   ;;  %vm1458_vm4 = vcmask 257024  }
   0x2   :  { %v2641_v1 = vld [vmem:[%s3507_s1 + $0x238] sm:$0xff]   ;;  %2162 = vmatprep.subr.bf16.mxu0 %v2640_v0  ;;  %v2645_v5 = vld [vmem:[%s3507_s1 + $0x230] sm:$0xff]   ;;  %v2649_v9 = vld [vmem:[%s3507_s1 + $0x228] sm:$0xff]  }
   0x3   :  { %v2642_v2 = vld [vmem:[%s3507_s1 + $0x178] sm:$0xff]   ;;  %2184 = vmatprep.subr.bf16.mxu1 %v2641_v1  ;;  %v2646_v6 = vld [vmem:[%s3507_s1 + $0x170] sm:$0xff]   ;;  %v2650_v10 = vld [vmem:[%s3507_s1 + $0x168] sm:$0xff]  }
   0x4   :  { %v2643_v3 = vld [vmem:[%s3507_s1 + $0x1f8] sm:$0xff]   ;;  %2163 = vmatpush3.bf16.msra.mxu0 %v2642_v2  ;;  %v2647_v7 = vld [vmem:[%s3507_s1 + $0x1f0] sm:$0xff]   ;;  %v2651_v11 = vld [vmem:[%s3507_s1 + $0x1e8] sm:$0xff]  }
   0x5   :  { %2185 = vmatpush3.bf16.msra.mxu1 %v2643_v3  ;;  %2164 = vmatprep.subr.bf16.mxu0 %v2644_v4  ;;  %v2652_v12 = vld [vmem:[%s3507_s1 + $0x1a0] sm:$0xff]   ;;  %v2656_v16 = vld [vmem:[%s3507_s1 + $0x198] sm:$0xff]   ;;  %v2660_v20 = vld [vmem:[%s3507_s1 + $0x190] sm:$0xff]  }
   0x6   :  { %2186 = vmatprep.subr.bf16.mxu1 %v2645_v5  ;;  %v2653_v13 = vld [vmem:[%s3507_s1 + $0x220] sm:$0xff]   ;;  %v2657_v17 = vld [vmem:[%s3507_s1 + $0x218] sm:$0xff]   ;;  %v2661_v21 = vld [vmem:[%s3507_s1 + $0x210] sm:$0xff]  }
   0x7   :  { %v2654_v14 = vld [vmem:[%s3507_s1 + $0x160] sm:$0xff]   ;;  %v2658_v18 = vld [vmem:[%s3507_s1 + $0x158] sm:$0xff]   ;;  %v2662_v22 = vld [vmem:[%s3507_s1 + $0x150] sm:$0xff]  }
   0x8   :  { %2165 = vmatpush3.bf16.msra.mxu0 %v2646_v6  ;;  %v2655_v15 = vld [vmem:[%s3507_s1 + $0x1e0] sm:$0xff]   ;;  %v2659_v19 = vld [vmem:[%s3507_s1 + $0x1d8] sm:$0xff]   ;;  %v2663_v23 = vld [vmem:[%s3507_s1 + $0x1d0] sm:$0xff]  }
   0x9   :  { %2187 = vmatpush3.bf16.msra.mxu1 %v2647_v7  ;;  %2166 = vmatprep.subr.bf16.mxu0 %v2648_v8  ;;  %v2664_v24 = vld [vmem:[%s3507_s1 + $0x188] sm:$0xff]   ;;  %v2668_v28 = vld [vmem:[%s3507_s1 + $0x180] sm:$0xff]   ;;  %v2678_v47 = vld [vmem:[%s3507_s1 + $0x78] sm:$0xff]  }
   0xa   :  { %2188 = vmatprep.subr.bf16.mxu1 %v2649_v9  ;;  %v2665_v25 = vld [vmem:[%s3507_s1 + $0x208] sm:$0xff]   ;;  %v2669_v29 = vld [vmem:[%s3507_s1 + $0x200] sm:$0xff]   ;;  %v2679_v52 = vld [vmem:[%s3507_s1 + $0x278] sm:$0xff]  }
   0xb   :  { %v2666_v26 = vld [vmem:[%s3507_s1 + $0x148] sm:$0xff]   ;;  %v2670_v30 = vld [vmem:[%s3507_s1 + $0x140] sm:$0xff]   ;;  %v2680_v55 = vld [vmem:[%s3507_s1 + $0x38] sm:$0xff]  }
   0xc   :  { %2167 = vmatpush3.bf16.msra.mxu0 %v2650_v10  ;;  %v2667_v27 = vld [vmem:[%s3507_s1 + $0x1c8] sm:$0xff]   ;;  %v2671_v31 = vld [vmem:[%s3507_s1 + $0x1c0] sm:$0xff]   ;;  %v2681_v56 = vld [vmem:[%s3507_s1 + $0x70] sm:$0xff]  }
   0xd   :  { %2189 = vmatpush3.bf16.msra.mxu1 %v2651_v11  ;;  %2168 = vmatprep.subr.bf16.mxu0 %v2652_v12  ;;  %v2905_v32 = vld [vmem:[%s3508_s0] ss:$20 sps:$4 sm:$0x1f]   ;;  %v2674_v33 = vld [vmem:[%s3508_s0 + $0x4] ss:$20 sps:$4 sm:$0x1f]  }
   0xe   :  { %2190 = vmatprep.subr.bf16.mxu1 %v2653_v13  ;;  %v2914_v35 = vld [vmem:[%s3508_s0 + $0x8] ss:$20 sps:$4 sm:$0x1f]   ;;  %v2919_v36 = vld [vmem:[%s3508_s0 + $0xc] ss:$20 sps:$4 sm:$0x1f]  }
   0xf   :  { %v226_v37 = vshrl.u32 %v2674_v33, 16  ;;  %v228_v38 = vshll.u32 %v2674_v33, 16  ;;  %v219_v39 = vshrl.u32 %v2905_v32, 16  ;;  %v221_v40 = vshll.u32 %v2905_v32, 16  ;;  %v2682_v57 = vld [vmem:[%s3507_s1 + $0x270] sm:$0xff]   ;;  %v2684_v59 = vld [vmem:[%s3507_s1 + $0x68] sm:$0xff]  }
  0x10   :  { %2169 = vmatpush3.bf16.msra.mxu0 %v2654_v14  ;;  %v240_v41 = vshrl.u32 %v2919_v36, 16  ;;  %v242_v42 = vshll.u32 %v2919_v36, 16  ;;  %v233_v43 = vshrl.u32 %v2914_v35, 16  ;;  %v235_v44 = vshll.u32 %v2914_v35, 16  ;;  %v2683_v58 = vld [vmem:[%s3507_s1 + $0x30] sm:$0xff]   ;;  %v2685_v60 = vld [vmem:[%s3507_s1 + $0x268] sm:$0xff]  }
  0x11   :  { %2191 = vmatpush3.bf16.msra.mxu1 %v2655_v15  ;;  %2170 = vmatprep.subr.bf16.mxu0 %v2656_v16  ;;  %v230_v45 = vrot.slane %v228_v38, 1  ;;  %v223_v46 = vrot.slane %v221_v40, 1  ;;  %v2686_v61 = vld [vmem:[%s3507_s1 + $0x28] sm:$0xff]   ;;  %v2687_v62 = vld [vmem:[%s3507_s1 + $0x60] sm:$0xff]   ;;  %v2690_v1 = vld [vmem:[%s3507_s1 + $0x58] sm:$0xff]  }
  0x12   :  { %2192 = vmatprep.subr.bf16.mxu1 %v2657_v17  ;;  %v244_v48 = vrot.slane %v242_v42, 1  ;;  %v237_v49 = vrot.slane %v235_v44, 1  ;;  %v2688_v63 = vld [vmem:[%s3507_s1 + $0x260] sm:$0xff]   ;;  %v2691_v2 = vld [vmem:[%s3507_s1 + $0x258] sm:$0xff]   ;;  %v2693_v4 = vld [vmem:[%s3507_s1 + $0x50] sm:$0xff]  }
  0x13   :  { %v231_v50 = vor.u32 %v230_v45, %v226_v37  ;;  %v224_v51 = vor.u32 %v223_v46, %v219_v39  ;;  %v2689_v0 = vld [vmem:[%s3507_s1 + $0x20] sm:$0xff]   ;;  %v2692_v3 = vld [vmem:[%s3507_s1 + $0x18] sm:$0xff]   ;;  %v2694_v5 = vld [vmem:[%s3507_s1 + $0x250] sm:$0xff]  }
  0x14   :  { %2171 = vmatpush3.bf16.msra.mxu0 %v2658_v18  ;;  %v245_v53 = vor.u32 %v244_v48, %v240_v41  ;;  %v238_v54 = vor.u32 %v237_v49, %v233_v43  ;;  %v2695_v6 = vld [vmem:[%s3507_s1 + $0x10] sm:$0xff]   ;;  %v2696_v7 = vld [vmem:[%s3507_s1 + $0x48] sm:$0xff]   ;;  %v2699_v11 = vld [vmem:[%s3507_s1 + $0x40] sm:$0xff]  }
  0x15   :  { %2193 = vmatpush3.bf16.msra.mxu1 %v2659_v19  ;;  %2172 = vmatprep.subr.bf16.mxu0 %v2660_v20  ;;  %v2697_v8 = vld [vmem:[%s3507_s1 + $0x248] sm:$0xff]   ;;  %v2997_v9 = vld [vmem:[%s3508_s0 + $0x10] ss:$20 sps:$4 sm:$0x1f]   ;;  %v2703_v17 = vld [vmem:[%s3507_s1 + $0xf8] sm:$0xff]  }
  0x16   :  { %2194 = vmatprep.subr.bf16.mxu1 %v2661_v21  ;;  %530 = vmatprep.mubr.bf16.mxu0 %v231_v50  ;;  %v2698_v10 = vld [vmem:[%s3507_s1 + $0x8] sm:$0xff]   ;;  %v249_v12 = vshll.u32 %v2997_v9, 16  ;;  %v2700_v13 = vld [vmem:[%s3507_s1 + $0x240] sm:$0xff]   ;;  %v247_v14 = vshrl.u32 %v2997_v9, 16  ;;  %v2704_v19 = vld [vmem:[%s3507_s1 + $0xb8] sm:$0xff]  }
  0x17   :  { %571 = vmatprep.mubr.bf16.mxu1 %v245_v53  ;;  %v2701_v16 = vld [vmem:[%s3507_s1] sm:$0xff]   ;;  %v2705_v20 = vld [vmem:[%s3507_s1 + $0x138] sm:$0xff]   ;;  %v2706_v21 = vld [vmem:[%s3507_s1 + $0xf0] sm:$0xff]  }
  0x18   :  { %2173 = vmatpush3.bf16.msra.mxu0 %v2662_v22  ;;  %v251_v15 = vrot.slane %v249_v12, 1  ;;  %v2707_v22 = vld [vmem:[%s3507_s1 + $0xb0] sm:$0xff]   ;;  %v2721_v38 = vld [vmem:[%s3507_s1 + $0xc8] sm:$0xff]   ;;  %v2724_v41 = vld [vmem:[%s3507_s1 + $0xc0] sm:$0xff]  }
  0x19   :  { %2195 = vmatpush3.bf16.msra.mxu1 %v2663_v23  ;;  %2174 = vmatprep.subr.bf16.mxu0 %v2664_v24  ;;  %v2708_v23 = vld [vmem:[%s3507_s1 + $0x130] sm:$0xff]   ;;  %v2709_v24 = vld [vmem:[%s3507_s1 + $0xe8] sm:$0xff]   ;;  %v2725_v42 = vld [vmem:[%s3507_s1 + $0x80] sm:$0xff]  }
  0x1a   :  { %2196 = vmatprep.subr.bf16.mxu1 %v2665_v25  ;;  %v252_v18 = vor.u32 %v251_v15, %v247_v14  ;;  %v2710_v25 = vld [vmem:[%s3507_s1 + $0xa8] sm:$0xff]   ;;  %v2720_v37 = vld [vmem:[%s3507_s1 + $0x110] sm:$0xff]   ;;  %v2726_v43 = vld [vmem:[%s3507_s1 + $0x100] sm:$0xff]  }
  0x1b   :  { %v2722_v39 = vld [vmem:[%s3507_s1 + $0x88] sm:$0xff]   ;;  %v3110_v44 = vld [vmem:[%s3509_s4 + $0x78] sm:$0xff]  ;;  %v3115_v45 = vld [vmem:[%s3509_s4 + $0x70] sm:$0xff] }
  0x1c   :  { %2175 = vmatpush3.bf16.msra.mxu0 %v2666_v26  ;;  %v2711_v26 = vld [vmem:[%s3507_s1 + $0x128] sm:$0xff]   ;;  %v3129_v46 = vld [vmem:[%s3509_s4 + $0x60] sm:$0xff]  ;;  %v3145_v48 = vld [vmem:[%s3509_s4 + $0x50] sm:$0xff] }
  0x1d   :  { %2197 = vmatpush3.bf16.msra.mxu1 %v2667_v27  ;;  %2176 = vmatprep.subr.bf16.mxu0 %v2668_v28  ;;  %v2712_v27 = vld [vmem:[%s3507_s1 + $0xe0] sm:$0xff]   ;;  %v2723_v40 = vld [vmem:[%s3507_s1 + $0x108] sm:$0xff]  }
  0x1e   :  { %2198 = vmatprep.subr.bf16.mxu1 %v2669_v29  ;;  %v2713_v28 = vld [vmem:[%s3507_s1 + $0xa0] sm:$0xff]   ;;  %v3152_v49 = vld [vmem:[%s3509_s4 + $0x48] sm:$0xff] }
  0x1f   :  { %v2714_v29 = vld [vmem:[%s3507_s1 + $0x120] sm:$0xff]   ;;  %v3180_v53 = vld [vmem:[%s3509_s4 + $0x28] sm:$0xff] }
  0x20   :  { %2177 = vmatpush3.bf16.msra.mxu0 %v2670_v30  ;;  %v2715_v30 = vld [vmem:[%s3507_s1 + $0xd8] sm:$0xff]   ;;  %v3159_v50 = vld [vmem:[%s3509_s4 + $0x40] sm:$0xff] }
  0x21   :  { %2199 = vmatpush3.bf16.msra.mxu1 %v2671_v31  ;;  %2374 = vmatprep.subr.bf16.mxu0 %v2759_v34  ;;  %v2716_v31 = vld [vmem:[%s3507_s1 + $0x98] sm:$0xff]  }
  0x22   :  { %2215 = vmatprep.subr.bf16.mxu1 %v2678_v47  ;;  %v3136_v47 = vld [vmem:[%s3509_s4 + $0x58] sm:$0xff] }
  0x23   :  { %531 = vmatmul.mubr.bf16.vlgmr.msra.gmra.mxu0 %v224_v51  ;;  %v3166_v51 = vld [vmem:[%s3509_s4 + $0x38] sm:$0xff] }
  0x24   :  { %572 = vmatmul.mubr.bf16.vlgmr.msra.gmra.mxu1 %v238_v54  ;;  %2375 = vmatpush3.bf16.msra.mxu0 %v2679_v52  ;;  %v3173_v52 = vld [vmem:[%s3509_s4 + $0x30] sm:$0xff]  ;;  %v3187_v54 = vld [vmem:[%s3509_s4 + $0x20] sm:$0xff] }
  0x25   :  { %2216 = vmatpush3.bf16.msra.mxu1 %v2680_v55  ;;  %2376 = vmatprep.subr.bf16.mxu0 %v2759_v34  ;;  %v3194_v55 = vld [vmem:[%s3509_s4 + $0x18] sm:$0xff] }
  0x26   :  { %2217 = vmatprep.subr.bf16.mxu1 %v2681_v56  ;;  %2390 = vmatprep.mubr.msk.bf16.mxu0 %vm2760_vm0, %v2759_v34  ;;  %v3201_v56 = vld [vmem:[%s3509_s4 + $0x10] sm:$0xff] }
  0x27   :  { %898 = vmatprep.mubr.bf16.mxu1 %v2674_v33  ;;  %v2718_v33 = vld [vmem:[%s3507_s1 + $0xd0] sm:$0xff]  }
  0x28   :  { %2377 = vmatpush3.bf16.msra.mxu0 %v2682_v57  ;;  %v3206_v57 = vld [vmem:[%s3509_s4 + $0x8] sm:$0xff] }
  0x29   :  { %2218 = vmatpush3.bf16.msra.mxu1 %v2683_v58  ;;  %2378 = vmatprep.subr.bf16.mxu0 %v2759_v34  ;;  %v3213_v58 = vld [vmem:[%s3509_s4] sm:$0xff] }
  0x2a   :  { %2219 = vmatprep.subr.bf16.mxu1 %v2684_v59  ;;  %v3221_v59 = vld [vmem:[%s3510_s5 + $0x18] sm:$0xff] }
  0x2c   :  { %2379 = vmatpush3.bf16.msra.mxu0 %v2685_v60  ;;  %v3226_v60 = vld [vmem:[%s3510_s5 + $0x10] sm:$0xff] }
  0x2d   :  { %2220 = vmatpush3.bf16.msra.mxu1 %v2686_v61  ;;  %2380 = vmatprep.subr.bf16.mxu0 %v2759_v34  ;;  %v3234_v61 = vld [vmem:[%s3510_s5 + $0x8] sm:$0xff] }
  0x2e   :  { %2221 = vmatprep.subr.bf16.mxu1 %v2687_v62  ;;  %v3241_v62 = vld [vmem:[%s3510_s5] sm:$0xff] }
  0x30   :  { %2381 = vmatpush3.bf16.msra.mxu0 %v2688_v63 }
  0x31   :  { %2222 = vmatpush3.bf16.msra.mxu1 %v2689_v0  ;;  %2382 = vmatprep.subr.bf16.mxu0 %v2759_v34 }
  0x32   :  { %2223 = vmatprep.subr.bf16.mxu1 %v2690_v1 }
  0x34   :  { %2383 = vmatpush3.bf16.msra.mxu0 %v2691_v2 }
  0x35   :  { %2224 = vmatpush3.bf16.msra.mxu1 %v2692_v3  ;;  %2384 = vmatprep.subr.bf16.mxu0 %v2759_v34 }
  0x36   :  { %2225 = vmatprep.subr.bf16.mxu1 %v2693_v4 }
  0x38   :  { %2385 = vmatpush3.bf16.msra.mxu0 %v2694_v5 }
  0x39   :  { %2226 = vmatpush3.bf16.msra.mxu1 %v2695_v6  ;;  %2386 = vmatprep.subr.bf16.mxu0 %v2759_v34 }
  0x3a   :  { %2227 = vmatprep.subr.bf16.mxu1 %v2696_v7 }
  0x3c   :  { %2387 = vmatpush3.bf16.msra.mxu0 %v2697_v8 }
  0x3d   :  { %2228 = vmatpush3.bf16.msra.mxu1 %v2698_v10  ;;  %2388 = vmatprep.subr.bf16.mxu0 %v2759_v34 }
  0x3e   :  { %2229 = vmatprep.subr.bf16.mxu1 %v2699_v11 }
  0x40   :  { %2389 = vmatpush3.bf16.msra.mxu0 %v2700_v13 }
  0x41   :  { %2230 = vmatpush3.bf16.msra.mxu1 %v2701_v16  ;;  %2237 = vmatprep.subr.bf16.mxu0 %v2703_v17 }
  0x42   :  { %2394 = vmatprep.subr.bf16.mxu1 %v2759_v34 }
  0x43   :  { %2391 = vmatmul.mubr.bf16.vlgmr.msra.gmra.mxu0 %v252_v18 }
  0x44   :  { %899 = vmatmul.mubr.bf16.vlgmr.msra.gmra.mxu1 %v2905_v32  ;;  %2238 = vmatpush3.bf16.msra.mxu0 %v2704_v19  ;;  %v2717_v32 = vld [vmem:[%s3507_s1 + $0x118] sm:$0xff]  }
  0x45   :  { %2395 = vmatpush3.bf16.msra.mxu1 %v2705_v20  ;;  %2239 = vmatprep.subr.bf16.mxu0 %v2706_v21 }
  0x46   :  { %2396 = vmatprep.subr.bf16.mxu1 %v2759_v34  ;;  %939 = vmatprep.mubr.bf16.mxu0 %v2919_v36  ;;  %v2719_v36 = vld [vmem:[%s3507_s1 + $0x90] sm:$0xff]  }
  0x47   :  { %2410 = vmatprep.mubr.msk.bf16.mxu1 %vm2760_vm0, %v2759_v34 }
  0x48   :  { %2240 = vmatpush3.bf16.msra.mxu0 %v2707_v22 }
  0x49   :  { %2397 = vmatpush3.bf16.msra.mxu1 %v2708_v23  ;;  %2241 = vmatprep.subr.bf16.mxu0 %v2709_v24 }
  0x4a   :  { %2398 = vmatprep.subr.bf16.mxu1 %v2759_v34 }
  0x4c   :  { %2242 = vmatpush3.bf16.msra.mxu0 %v2710_v25 }
  0x4d   :  { %2399 = vmatpush3.bf16.msra.mxu1 %v2711_v26  ;;  %2243 = vmatprep.subr.bf16.mxu0 %v2712_v27 }
  0x4e   :  { %2400 = vmatprep.subr.bf16.mxu1 %v2759_v34 }
  0x50   :  { %2244 = vmatpush3.bf16.msra.mxu0 %v2713_v28 }
  0x51   :  { %2401 = vmatpush3.bf16.msra.mxu1 %v2714_v29  ;;  %2245 = vmatprep.subr.bf16.mxu0 %v2715_v30 }
  0x52   :  { %2402 = vmatprep.subr.bf16.mxu1 %v2759_v34 }
  0x54   :  { %2246 = vmatpush3.bf16.msra.mxu0 %v2716_v31 }
  0x55   :  { %2403 = vmatpush3.bf16.msra.mxu1 %v2717_v32  ;;  %2247 = vmatprep.subr.bf16.mxu0 %v2718_v33 }
  0x56   :  { %2404 = vmatprep.subr.bf16.mxu1 %v2759_v34 }
  0x58   :  { %2248 = vmatpush3.bf16.msra.mxu0 %v2719_v36 }
  0x59   :  { %2405 = vmatpush3.bf16.msra.mxu1 %v2720_v37  ;;  %2249 = vmatprep.subr.bf16.mxu0 %v2721_v38 }
  0x5a   :  { %2406 = vmatprep.subr.bf16.mxu1 %v2759_v34 }
  0x5c   :  { %2250 = vmatpush3.bf16.msra.mxu0 %v2722_v39 }
  0x5d   :  { %2407 = vmatpush3.bf16.msra.mxu1 %v2723_v40  ;;  %2251 = vmatprep.subr.bf16.mxu0 %v2724_v41 }
  0x5e   :  { %2408 = vmatprep.subr.bf16.mxu1 %v2759_v34 }
  0x60   :  { %2252 = vmatpush3.bf16.msra.mxu0 %v2725_v42 }
  0x61   :  { %2409 = vmatpush3.bf16.msra.mxu1 %v2726_v43  ;;  %2414 = vmatprep.subr.mxu0 %v2759_v34 }
  0x62   :  { %2449 = vmatprep.subr.mxu1 %v2759_v34 }
  0x63   :  { %940 = vmatmul.mubr.bf16.vlgmr.msra.gmra.mxu0 %v2914_v35  ;;  %v3122_v35 = vld [vmem:[%s3509_s4 + $0x68] sm:$0xff] }
  0x64   :  { %2411 = vmatmul.mubr.bf16.vlgmr.msra.gmra.mxu1 %v2997_v9  ;;  %2446 = vmatprep.mubr.msk.f32.mxu0 %vm2760_vm0, %v2759_v34 }
  0x65   :  { %2457 = vmatprep.mubr.msk.f32.mxu1 %vm2760_vm0, %v2759_v34  ;;  %2415 = vmatpush3.msra.mxu0 %v3110_v44 }
  0x66   :  { %2416 = vmatprep.subr.mxu0 %v2759_v34  ;;  %2450 = vmatpush3.msra.mxu1 %v3221_v59 }
  0x67   :  { %2417 = vmatpush3.msra.mxu0 %v3115_v45  ;;  %2451 = vmatprep.subr.mxu1 %v2759_v34 }
  0x68   :  { %2418 = vmatprep.subr.mxu0 %v2759_v34  ;;  %2452 = vmatpush3.msra.mxu1 %v3226_v60 }
  0x69   :  { %2419 = vmatpush3.msra.mxu0 %v3122_v35  ;;  %2453 = vmatprep.subr.mxu1 %v2759_v34 }
  0x6a   :  { %2420 = vmatprep.subr.mxu0 %v2759_v34  ;;  %2454 = vmatpush3.msra.mxu1 %v3234_v61 }
  0x6b   :  { %2421 = vmatpush3.msra.mxu0 %v3129_v46  ;;  %2455 = vmatprep.subr.mxu1 %v2759_v34 }
  0x6c   :  { %2422 = vmatprep.subr.mxu0 %v2759_v34  ;;  %2456 = vmatpush3.msra.mxu1 %v3241_v62 }
  0x6d   :  { %2423 = vmatpush3.msra.mxu0 %v3136_v47  ;;  %2460 = vmatprep.subr.mxu1 %v2759_v34 }
  0x6e   :  { %2424 = vmatprep.subr.mxu0 %v2759_v34 }
  0x6f   :  { %2425 = vmatpush3.msra.mxu0 %v3145_v48 }
  0x70   :  { %2426 = vmatprep.subr.mxu0 %v2759_v34 }
  0x71   :  { %2427 = vmatpush3.msra.mxu0 %v3152_v49 }
  0x72   :  { %2428 = vmatprep.subr.mxu0 %v2759_v34 }
  0x73   :  { %2429 = vmatpush3.msra.mxu0 %v3159_v50 }
  0x74   :  { %2430 = vmatprep.subr.mxu0 %v2759_v34 }
  0x75   :  { %2431 = vmatpush3.msra.mxu0 %v3166_v51 }
  0x76   :  { %2432 = vmatprep.subr.mxu0 %v2759_v34 }
  0x77   :  { %2433 = vmatpush3.msra.mxu0 %v3173_v52 }
  0x78   :  { %2434 = vmatprep.subr.mxu0 %v2759_v34 }
  0x79   :  { %2435 = vmatpush3.msra.mxu0 %v3180_v53 }
  0x7a   :  { %2436 = vmatprep.subr.mxu0 %v2759_v34 }
  0x7b   :  { %2437 = vmatpush3.msra.mxu0 %v3187_v54 }
  0x7c   :  { %2438 = vmatprep.subr.mxu0 %v2759_v34 }
  0x7d   :  { %2439 = vmatpush3.msra.mxu0 %v3194_v55 }
  0x7e   :  { %2440 = vmatprep.subr.mxu0 %v2759_v34 }
  0x7f   :  { %2441 = vmatpush3.msra.mxu0 %v3201_v56 }
  0x80   :  { %2442 = vmatprep.subr.mxu0 %v2759_v34 }
  0x81   :  { %2443 = vmatpush3.msra.mxu0 %v3206_v57 }
  0x82   :  { %2444 = vmatprep.subr.mxu0 %v2759_v34 }
  0x83   :  { %2445 = vmatpush3.msra.mxu0 %v3213_v58 }
  0x84   :  { %2506 = vmatprep.subr.bf16.mxu0 %v2759_v34 }
  0xe3   :  { %v2178_v63 = vpop.f32.mrf.mxu0 }
  0xe4   :  { %v2200_v0 = vpop.f32.mrf.mxu1 }
  0xe5   :  { %v2179_v1 = vpop.f32.mrf.mxu0 }
  0xe6   :  { %v2201_v2 = vpop.f32.mrf.mxu1  ;;  %v2180_v21 = vadd.f32 %v2179_v1, %v2178_v63 }
  0xe7   :  { %v2181_v3 = vpop.f32.mrf.mxu0  ;;  %v2202_v22 = vadd.f32 %v2201_v2, %v2200_v0 }
  0xe8   :  { %v2203_v4 = vpop.f32.mrf.mxu1 }
  0xe9   :  { %v2182_v5 = vpop.f32.mrf.mxu0  ;;  %v574_v23 = vadd.f32 %v2202_v22, %v2180_v21 }
  0xea   :  { %v2183_v6 = vadd.f32 %v2182_v5, %v2181_v3  ;;  %v2204_v7 = vpop.f32.mrf.mxu1 }
  0xeb   :  { %v2205_v8 = vadd.f32 %v2204_v7, %v2203_v4  ;;  %v1161_v7 = vlaneseq }
  0xed   :  { %v577_v9 = vadd.f32 %v2205_v8, %v2183_v6  ;;  %v1162_v8 = vshrl.u32 %v1161_v7, 7 }
 0x103   :  { %v614_v10 = vpop.f32.mrf.mxu0 }
 0x104   :  { %v2231_v11 = vpop.f32.mrf.mxu1  ;;  %v615_v26 = vadd.f32 %v614_v10, %v574_v23 }
 0x105   :  { %v2392_v12 = vpop.f32.mrf.mxu0 }
 0x106   :  { %v2232_v13 = vpop.f32.mrf.mxu1 }
 0x107   :  { %v617_v14 = vpop.f32.mrf.mxu0  ;;  %v2233_v24 = vadd.f32 %v2232_v13, %v2231_v11 }
 0x108   :  { %v618_v15 = vadd.f32 %v617_v14, %v577_v9  ;;  %v2234_v16 = vpop.f32.mrf.mxu1  ;;  %v3290_v9 = vsub.s32 0, %v1162_v8 }
 0x109   :  { %v2393_v17 = vpop.f32.mrf.mxu0  ;;  %v901_v29 = vadd.f32 %v2233_v24, %v615_v26 }
 0x10a   :  { %v2235_v18 = vpop.f32.mrf.mxu1 }
 0x10b   :  { %v2236_v19 = vadd.f32 %v2235_v18, %v2234_v16 }
 0x10d   :  { %v904_v20 = vadd.f32 %v2236_v19, %v618_v15 }
 0x123   :  { %v2253_v25 = vpop.f32.mrf.mxu0 }
 0x124   :  { %v982_v27 = vpop.f32.mrf.mxu1 }
 0x125   :  { %v2254_v28 = vpop.f32.mrf.mxu0 }
 0x126   :  { %v2255_v30 = vadd.f32 %v2254_v28, %v2253_v25  ;;  %v2412_v31 = vpop.f32.mrf.mxu1 }
 0x127   :  { %v2256_v32 = vpop.f32.mrf.mxu0 }
 0x128   :  { %v942_v33 = vadd.f32 %v2255_v30, %v901_v29  ;;  %v985_v36 = vpop.f32.mrf.mxu1 }
 0x129   :  { %v2257_v37 = vpop.f32.mrf.mxu0 }
 0x12a   :  { %v3247_v38 = vadd.f32 %v982_v27, %v942_v33  ;;  %v2258_v39 = vadd.f32 %v2257_v37, %v2256_v32  ;;  %v2413_v40 = vpop.f32.mrf.mxu1 }
 0x12c   :  { %v945_v41 = vadd.f32 %v2258_v39, %v904_v20  ;;  %v990_v42 = vsel %vm989_vm1, %v3247_v38, 0.0  ;;  %v1463_v25 = vrot.slane %v3247_v38, 5 }
 0x12d   :  { %v991_v43 = vrot.slane %v990_v42, 4 }
 0x12e   :  { %v3251_v63 = vadd.f32 %v985_v36, %v945_v41 }
 0x12f   :  { %v992_v0 = vadd.f32 %v991_v43, %v990_v42 }
 0x130   :  { %v1464_v23 = vrot.slane %v3251_v63, 5 }
 0x131   :  { %v993_v1 = vrot.slane %v992_v0, 2 }
 0x132   :  { %v1465_v26 = vsel %vm1462_vm3, %v1463_v25, %v1464_v23  ;;  %v2737_v25 = vld [vmem:[%s3511_s6 + $0x28] sm:$0xff]  }
 0x133   :  { %v994_v2 = vadd.f32 %v993_v1, %v992_v0  ;;  %v1467_v27 = vsel %vm989_vm1, %v1465_v26, 0.0  ;;  %v2738_v26 = vld [vmem:[%s3511_s6 + $0x20] sm:$0xff]  }
 0x134   :  { %v1468_v28 = vrot.slane %v1467_v27, 4 }
 0x135   :  { %v995_v3 = vrot.slane %v994_v2, 1 }
 0x136   :  { %v1469_v29 = vadd.f32 %v1468_v28, %v1467_v27  ;;  %v2739_v27 = vld [vmem:[%s3511_s6 + $0x18] sm:$0xff]   ;;  %v2740_v28 = vld [vmem:[%s3511_s6 + $0x10] sm:$0xff]  }
 0x137   :  { %v996_v4 = vadd.f32 %v995_v3, %v994_v2 }
 0x138   :  { %v1470_v30 = vrot.slane %v1469_v29, 2 }
 0x139   :  { %2447 = vmatmul.mubr.f32.vlgmr.msra.gmra.mxu0 %v996_v4 }
 0x13a   :  { %2522 = vmatprep.mubr.msk.bf16.mxu0 %vm2760_vm0, %v2759_v34  ;;  %v1471_v31 = vadd.f32 %v1470_v30, %v1469_v29  ;;  %v2741_v29 = vld [vmem:[%s3511_s6 + $0x8] sm:$0xff]   ;;  %v2742_v30 = vld [vmem:[%s3511_s6] sm:$0xff]  }
 0x13c   :  { %v1472_v32 = vrot.slane %v1471_v31, 1 }
 0x13e   :  { %v1473_v33 = vadd.f32 %v1472_v32, %v1471_v31 }
 0x1f9   :  { %v1079_v5 = vpop.f32.mrf.mxu0 }
 0x1fa   :  { %2458 = vmatmul.mubr.msk.f32.vlgmr.msra.gmra.mxu1 %vm1087_vm2, %v1079_v5 }
 0x1fb   :  { %v2448_v6 = vpop.f32.mrf.mxu0  ;;  %2461 = vmatpush3.msra.mxu1 %v3110_v44  ;;  %2492 = vmatprep.mubr.msk.f32.mxu1 %vm2760_vm0, %v2759_v34 }
 0x1fc   :  { %2462 = vmatprep.subr.mxu1 %v2759_v34 }
 0x1fd   :  { %2463 = vmatpush3.msra.mxu1 %v3115_v45 }
 0x1fe   :  { %2464 = vmatprep.subr.mxu1 %v2759_v34 }
 0x1ff   :  { %2465 = vmatpush3.msra.mxu1 %v3122_v35 }
 0x200   :  { %2466 = vmatprep.subr.mxu1 %v2759_v34 }
 0x201   :  { %2467 = vmatpush3.msra.mxu1 %v3129_v46 }
 0x202   :  { %2468 = vmatprep.subr.mxu1 %v2759_v34 }
 0x203   :  { %2469 = vmatpush3.msra.mxu1 %v3136_v47 }
 0x204   :  { %2470 = vmatprep.subr.mxu1 %v2759_v34 }
 0x205   :  { %2471 = vmatpush3.msra.mxu1 %v3145_v48 }
 0x206   :  { %2472 = vmatprep.subr.mxu1 %v2759_v34 }
 0x207   :  { %2473 = vmatpush3.msra.mxu1 %v3152_v49 }
 0x208   :  { %2474 = vmatprep.subr.mxu1 %v2759_v34 }
 0x209   :  { %2475 = vmatpush3.msra.mxu1 %v3159_v50 }
 0x20a   :  { %2476 = vmatprep.subr.mxu1 %v2759_v34 }
 0x20b   :  { %2477 = vmatpush3.msra.mxu1 %v3166_v51 }
 0x20c   :  { %2478 = vmatprep.subr.mxu1 %v2759_v34 }
 0x20d   :  { %2479 = vmatpush3.msra.mxu1 %v3173_v52 }
 0x20e   :  { %2480 = vmatprep.subr.mxu1 %v2759_v34 }
 0x20f   :  { %2481 = vmatpush3.msra.mxu1 %v3180_v53 }
 0x210   :  { %2482 = vmatprep.subr.mxu1 %v2759_v34 }
 0x211   :  { %2483 = vmatpush3.msra.mxu1 %v3187_v54 }
 0x212   :  { %2484 = vmatprep.subr.mxu1 %v2759_v34 }
 0x213   :  { %2485 = vmatpush3.msra.mxu1 %v3194_v55 }
 0x214   :  { %2486 = vmatprep.subr.mxu1 %v2759_v34 }
 0x215   :  { %2487 = vmatpush3.msra.mxu1 %v3201_v56 }
 0x216   :  { %2488 = vmatprep.subr.mxu1 %v2759_v34 }
 0x217   :  { %2489 = vmatpush3.msra.mxu1 %v3206_v57 }
 0x218   :  { %2490 = vmatprep.subr.mxu1 %v2759_v34 }
 0x219   :  { %2491 = vmatpush3.msra.mxu1 %v3213_v58 }
 0x21a   :  { %2495 = vmatprep.subr.mxu1 %v2759_v34 }
 0x2ba   :  { %v1157_v10 = vpop.f32.mrf.mxu1 }
 0x2bb   :  { %v1164_v11 = vrot.slane %v1157_v10, %v3290_v9 }
 0x2bc   :  { %v2459_v12 = vpop.f32.mrf.mxu1 }
 0x2bd   :  { %v3294_v13 = vsub.f32 %v3247_v38, %v1164_v11 }
 0x2bf   :  { %v1166_v14 = vmul.f32 %v3294_v13, %v3294_v13 }
 0x2c1   :  { %v1167_v15 = vsel %vm989_vm1, %v1166_v14, 0.0 }
 0x2c2   :  { %v1168_v16 = vrot.slane %v1167_v15, 4 }
 0x2c4   :  { %v1169_v17 = vadd.f32 %v1168_v16, %v1167_v15 }
 0x2c6   :  { %v1170_v18 = vrot.slane %v1169_v17, 2 }
 0x2c8   :  { %v1171_v19 = vadd.f32 %v1170_v18, %v1169_v17 }
 0x2ca   :  { %v1172_v20 = vrot.slane %v1171_v19, 1 }
 0x2cc   :  { %v1173_v21 = vadd.f32 %v1172_v20, %v1171_v19 }
 0x2ce   :  { %2493 = vmatmul.mubr.f32.vlgmr.msra.gmra.mxu1 %v1173_v21 }
 0x2cf   :  { %2496 = vmatpush3.msra.mxu1 %v3221_v59  ;;  %2503 = vmatprep.mubr.msk.f32.mxu1 %vm2760_vm0, %v2759_v34 }
 0x2d0   :  { %2497 = vmatprep.subr.mxu1 %v2759_v34 }
 0x2d1   :  { %2498 = vmatpush3.msra.mxu1 %v3226_v60 }
 0x2d2   :  { %2499 = vmatprep.subr.mxu1 %v2759_v34 }
 0x2d3   :  { %2500 = vmatpush3.msra.mxu1 %v3234_v61 }
 0x2d4   :  { %2501 = vmatprep.subr.mxu1 %v2759_v34 }
 0x2d5   :  { %2502 = vmatpush3.msra.mxu1 %v3241_v62 }
 0x2d6   :  { %2526 = vmatprep.subr.mxu1 %v2759_v34 }
 0x38e   :  { %v1240_v22 = vpop.f32.mrf.mxu1 }
 0x38f   :  { %2504 = vmatmul.mubr.msk.f32.vlgmr.msra.gmra.mxu1 %vm1087_vm2, %v1240_v22 }
 0x390   :  { %2527 = vmatpush3.msra.mxu1 %v3110_v44  ;;  %v2494_v24 = vpop.f32.mrf.mxu1  ;;  %2558 = vmatprep.mubr.msk.f32.mxu1 %vm2760_vm0, %v2759_v34 }
 0x391   :  { %2528 = vmatprep.subr.mxu1 %v2759_v34  ;;  %v2736_v24 = vld [vmem:[%s3511_s6 + $0x30] sm:$0xff]  }
 0x392   :  { %2529 = vmatpush3.msra.mxu1 %v3115_v45 }
 0x393   :  { %2530 = vmatprep.subr.mxu1 %v2759_v34 }
 0x394   :  { %2531 = vmatpush3.msra.mxu1 %v3122_v35 }
 0x395   :  { %2532 = vmatprep.subr.mxu1 %v2759_v34 }
 0x396   :  { %2533 = vmatpush3.msra.mxu1 %v3129_v46 }
 0x397   :  { %2534 = vmatprep.subr.mxu1 %v2759_v34 }
 0x398   :  { %2535 = vmatpush3.msra.mxu1 %v3136_v47 }
 0x399   :  { %2536 = vmatprep.subr.mxu1 %v2759_v34 }
 0x39a   :  { %2537 = vmatpush3.msra.mxu1 %v3145_v48 }
 0x39b   :  { %2538 = vmatprep.subr.mxu1 %v2759_v34 }
 0x39c   :  { %2539 = vmatpush3.msra.mxu1 %v3152_v49 }
 0x39d   :  { %2540 = vmatprep.subr.mxu1 %v2759_v34 }
 0x39e   :  { %2541 = vmatpush3.msra.mxu1 %v3159_v50 }
 0x39f   :  { %2542 = vmatprep.subr.mxu1 %v2759_v34 }
 0x3a0   :  { %2543 = vmatpush3.msra.mxu1 %v3166_v51 }
 0x3a1   :  { %2544 = vmatprep.subr.mxu1 %v2759_v34 }
 0x3a2   :  { %2545 = vmatpush3.msra.mxu1 %v3173_v52 }
 0x3a3   :  { %2546 = vmatprep.subr.mxu1 %v2759_v34 }
 0x3a4   :  { %2547 = vmatpush3.msra.mxu1 %v3180_v53 }
 0x3a5   :  { %2548 = vmatprep.subr.mxu1 %v2759_v34 }
 0x3a6   :  { %2549 = vmatpush3.msra.mxu1 %v3187_v54 }
 0x3a7   :  { %2550 = vmatprep.subr.mxu1 %v2759_v34 }
 0x3a8   :  { %2551 = vmatpush3.msra.mxu1 %v3194_v55 }
 0x3a9   :  { %2552 = vmatprep.subr.mxu1 %v2759_v34 }
 0x3aa   :  { %2553 = vmatpush3.msra.mxu1 %v3201_v56 }
 0x3ab   :  { %2554 = vmatprep.subr.mxu1 %v2759_v34 }
 0x3ac   :  { %2555 = vmatpush3.msra.mxu1 %v3206_v57 }
 0x3ad   :  { %2556 = vmatprep.subr.mxu1 %v2759_v34 }
 0x3ae   :  { %2557 = vmatpush3.msra.mxu1 %v3213_v58 }
 0x3af   :  { %2559 = vmatmul.mubr.f32.vlgmr.msra.gmra.mxu1 %v1473_v33  ;;  %2572 = vmatprep.subr.mxu1 %v2759_v34 }
 0x3b0   :  { %2573 = vmatpush3.msra.mxu1 %v3110_v44  ;;  %2604 = vmatprep.mubr.msk.f32.mxu1 %vm2760_vm0, %v2759_v34  ;;  %v2727_v44 = vld [vmem:[%s3511_s6 + $0x38] sm:$0xff]  }
 0x3b1   :  { %2574 = vmatprep.subr.mxu1 %v2759_v34  ;;  %2507 = vmatpush3.bf16.msra.mxu0 %v2727_v44 }
 0x3b2   :  { %2575 = vmatpush3.msra.mxu1 %v3115_v45  ;;  %2508 = vmatprep.subr.bf16.mxu0 %v2759_v34  ;;  %v2728_v45 = vld [vmem:[%s3511_s6 + $0x30] sm:$0xff]  }
 0x3b3   :  { %2576 = vmatprep.subr.mxu1 %v2759_v34 }
 0x3b4   :  { %2577 = vmatpush3.msra.mxu1 %v3122_v35  ;;  %v2729_v35 = vld [vmem:[%s3511_s6 + $0x28] sm:$0xff]  }
 0x3b5   :  { %2578 = vmatprep.subr.mxu1 %v2759_v34  ;;  %2509 = vmatpush3.bf16.msra.mxu0 %v2728_v45 }
 0x3b6   :  { %2579 = vmatpush3.msra.mxu1 %v3129_v46  ;;  %2510 = vmatprep.subr.bf16.mxu0 %v2759_v34  ;;  %v2730_v46 = vld [vmem:[%s3511_s6 + $0x20] sm:$0xff]  }
 0x3b7   :  { %2580 = vmatprep.subr.mxu1 %v2759_v34 }
 0x3b8   :  { %2581 = vmatpush3.msra.mxu1 %v3136_v47  ;;  %v2731_v47 = vld [vmem:[%s3511_s6 + $0x18] sm:$0xff]  }
 0x3b9   :  { %2582 = vmatprep.subr.mxu1 %v2759_v34  ;;  %2511 = vmatpush3.bf16.msra.mxu0 %v2729_v35 }
 0x3ba   :  { %2583 = vmatpush3.msra.mxu1 %v3145_v48  ;;  %2512 = vmatprep.subr.bf16.mxu0 %v2759_v34  ;;  %v2732_v48 = vld [vmem:[%s3511_s6 + $0x10] sm:$0xff]  }
 0x3bb   :  { %2584 = vmatprep.subr.mxu1 %v2759_v34 }
 0x3bc   :  { %2585 = vmatpush3.msra.mxu1 %v3152_v49  ;;  %v2733_v49 = vld [vmem:[%s3511_s6 + $0x8] sm:$0xff]  }
 0x3bd   :  { %2586 = vmatprep.subr.mxu1 %v2759_v34  ;;  %2513 = vmatpush3.bf16.msra.mxu0 %v2730_v46 }
 0x3be   :  { %2587 = vmatpush3.msra.mxu1 %v3159_v50  ;;  %2514 = vmatprep.subr.bf16.mxu0 %v2759_v34  ;;  %v2734_v50 = vld [vmem:[%s3511_s6] sm:$0xff]  }
 0x3bf   :  { %2588 = vmatprep.subr.mxu1 %v2759_v34 }
 0x3c0   :  { %2589 = vmatpush3.msra.mxu1 %v3166_v51 }
 0x3c1   :  { %2590 = vmatprep.subr.mxu1 %v2759_v34  ;;  %2515 = vmatpush3.bf16.msra.mxu0 %v2731_v47 }
 0x3c2   :  { %2591 = vmatpush3.msra.mxu1 %v3173_v52  ;;  %2516 = vmatprep.subr.bf16.mxu0 %v2759_v34 }
 0x3c3   :  { %2592 = vmatprep.subr.mxu1 %v2759_v34 }
 0x3c4   :  { %2593 = vmatpush3.msra.mxu1 %v3180_v53 }
 0x3c5   :  { %2594 = vmatprep.subr.mxu1 %v2759_v34  ;;  %2517 = vmatpush3.bf16.msra.mxu0 %v2732_v48 }
 0x3c6   :  { %2595 = vmatpush3.msra.mxu1 %v3187_v54  ;;  %2518 = vmatprep.subr.bf16.mxu0 %v2759_v34 }
 0x3c7   :  { %2596 = vmatprep.subr.mxu1 %v2759_v34 }
 0x3c8   :  { %2597 = vmatpush3.msra.mxu1 %v3194_v55 }
 0x3c9   :  { %2598 = vmatprep.subr.mxu1 %v2759_v34  ;;  %2519 = vmatpush3.bf16.msra.mxu0 %v2733_v49 }
 0x3ca   :  { %2599 = vmatpush3.msra.mxu1 %v3201_v56  ;;  %2520 = vmatprep.subr.bf16.mxu0 %v2759_v34  ;;  %v3417_v56 = vld [vmem:[%s3512_s2] ss:$0 sm:$0xff] }
 0x3cb   :  { %2600 = vmatprep.subr.mxu1 %v2759_v34 }
 0x3cc   :  { %2601 = vmatpush3.msra.mxu1 %v3206_v57 }
 0x3cd   :  { %2602 = vmatprep.subr.mxu1 %v2759_v34  ;;  %2521 = vmatpush3.bf16.msra.mxu0 %v2734_v50 }
 0x3ce   :  { %2603 = vmatpush3.msra.mxu1 %v3213_v58  ;;  %2561 = vmatprep.subr.mxu0 %v2759_v34  ;;  %v3423_v58 = vld [vmem:[%s3513_s3] ss:$0 sm:$0xff] }
 0x44f   :  { %v1313_v51 = vpop.f32.mrf.mxu1 }
 0x450   :  { %v1314_v52 = vadd.f32 1e-05, %v1313_v51 }
 0x451   :  { %v2505_v53 = vpop.f32.mrf.mxu1 }
 0x452   :  { %2743 = vrsqrt.f32 %v1314_v52 }
 0x45f   :  { %v2744_v54 = vpop.eup %2743 }
 0x460   :  { %v1321_v55 = vrot.slane %v2744_v54, %v3290_v9 }
 0x462   :  { %v1322_v57 = vmul.f32 %v1321_v55, %v3294_v13 }
 0x464   :  { %v1330_v36 = vmul.f32 %v3417_v56, %v1322_v57 }
 0x466   :  { %v1338_v37 = vadd.f32 %v3423_v58, %v1330_v36 }
 0x468   :  { %v2136_v39 = vmul.f32 -1.442695, %v1338_v37 }
 0x46a   :  { %2745 = vpow2.f32 %v2136_v39 }
 0x46f   :  { %v1556_v40 = vpop.f32.mrf.mxu1 }
 0x471   :  { %v2560_v41 = vpop.f32.mrf.mxu1 }
 0x477   :  { %v2746_v42 = vpop.eup %2745 }
 0x478   :  { %v1342_v43 = vadd.f32 1.0, %v2746_v42 }
 0x47a   :  { %2747 = vrcp.f32 %v1342_v43 }
 0x487   :  { %v2748_v0 = vpop.eup %2747 }
 0x488   :  { %v1345_v1 = vmul.f32 %v2748_v0, %v1338_v37 }
 0x48a   :  { %v1346_v2 = vpack.c.bf16 %v1345_v1, %v1345_v1 }
 0x48c   :  { %2523 = vmatmul.mubr.bf16.vlgmr.msra.gmra.mxu0 %v1346_v2 }
 0x48d   :  { %2562 = vmatpush3.msra.mxu0 %v3221_v59  ;;  %2569 = vmatprep.mubr.msk.f32.mxu0 %vm2760_vm0, %v2759_v34 }
 0x48e   :  { %2563 = vmatprep.subr.mxu0 %v2759_v34 }
 0x48f   :  { %2564 = vmatpush3.msra.mxu0 %v3226_v60 }
 0x490   :  { %2565 = vmatprep.subr.mxu0 %v2759_v34 }
 0x491   :  { %2566 = vmatpush3.msra.mxu0 %v3234_v61 }
 0x492   :  { %2567 = vmatprep.subr.mxu0 %v2759_v34 }
 0x493   :  { %2568 = vmatpush3.msra.mxu0 %v3241_v62 }
 0x494   :  { %2570 = vmatmul.mubr.msk.f32.vlgmr.msra.gmra.mxu0 %vm1087_vm2, %v1556_v40  ;;  %2607 = vmatprep.subr.mxu0 %v2759_v34 }
 0x495   :  { %2608 = vmatpush3.msra.mxu0 %v3221_v59  ;;  %2615 = vmatprep.mubr.msk.f32.mxu0 %vm2760_vm0, %v2759_v34  ;;  %v3451_v59 = vld [vmem:[%s3514_s7] ss:$0 sm:$0xff] }
 0x496   :  { %2609 = vmatprep.subr.mxu0 %v2759_v34 }
 0x497   :  { %2610 = vmatpush3.msra.mxu0 %v3226_v60 }
 0x498   :  { %2611 = vmatprep.subr.mxu0 %v2759_v34 }
 0x499   :  { %2612 = vmatpush3.msra.mxu0 %v3234_v61 }
 0x49a   :  { %2613 = vmatprep.subr.mxu0 %v2759_v34 }
 0x49b   :  { %2614 = vmatpush3.msra.mxu0 %v3241_v62 }
 0x49c   :  { %2618 = vmatprep.subr.bf16.mxu0 %v2759_v34 }
 0x54c   :  { %v1452_v3 = vpop.f32.mrf.mxu0 }
 0x54d   :  { %v1453_v4 = vadd.f32 %v3451_v59, %v1452_v3 }
 0x54e   :  { %v2524_v60 = vpop.f32.mrf.mxu0 }
 0x54f   :  { %1459 = vst.msk [vmem:[%s3515_s8] sm:$0xf] %vm1458_vm4, %v1453_v4 }
 0x550   :  { %v1455_v61 = vpop.f32.mrf.mxu0 }
 0x552   :  { %v2525_v5 = vpop.f32.mrf.mxu0 }
 0x554   :  { %v1633_v62 = vpop.f32.mrf.mxu0 }
 0x555   :  { %v1640_v6 = vrot.slane %v1633_v62, %v3290_v9 }
 0x556   :  { %v2571_v7 = vpop.f32.mrf.mxu0 }
 0x557   :  { %v1641_v8 = vsub.f32 %v3247_v38, %v1640_v6  ;;  %v1642_v10 = vsub.f32 %v3251_v63, %v1640_v6  ;;  %v2735_v63 = vld [vmem:[%s3511_s6 + $0x38] sm:$0xff]  }
 0x559   :  { %v1643_v11 = vmul.f32 %v1641_v8, %v1641_v8  ;;  %v1644_v12 = vmul.f32 %v1642_v10, %v1642_v10 }
 0x55b   :  { %v1647_v13 = vrot.slane %v1643_v11, 5  ;;  %v1648_v14 = vrot.slane %v1644_v12, 5 }
 0x55d   :  { %v1649_v15 = vsel %vm1462_vm3, %v1647_v13, %v1648_v14 }
 0x55e   :  { %v1651_v16 = vsel %vm989_vm1, %v1649_v15, 0.0 }
 0x55f   :  { %v1652_v17 = vrot.slane %v1651_v16, 4 }
 0x561   :  { %v1653_v18 = vadd.f32 %v1652_v17, %v1651_v16 }
 0x563   :  { %v1654_v19 = vrot.slane %v1653_v18, 2 }
 0x565   :  { %v1655_v20 = vadd.f32 %v1654_v19, %v1653_v18 }
 0x567   :  { %v1656_v21 = vrot.slane %v1655_v20, 1 }
 0x569   :  { %v1657_v22 = vadd.f32 %v1656_v21, %v1655_v20 }
 0x56b   :  { %2605 = vmatmul.mubr.f32.vlgmr.msra.gmra.mxu1 %v1657_v22 }
 0x62b   :  { %v1724_v23 = vpop.f32.mrf.mxu1 }
 0x62c   :  { %2616 = vmatmul.mubr.msk.f32.vlgmr.msra.gmra.mxu0 %vm1087_vm2, %v1724_v23 }
 0x62d   :  { %v2606_v38 = vpop.f32.mrf.mxu1  ;;  %2634 = vmatprep.mubr.msk.bf16.mxu0 %vm2760_vm0, %v2759_v34  ;;  %2619 = vmatpush3.bf16.msra.mxu0 %v2735_v63 }
 0x62e   :  { %2620 = vmatprep.subr.bf16.mxu0 %v2759_v34 }
 0x631   :  { %2621 = vmatpush3.bf16.msra.mxu0 %v2736_v24 }
 0x632   :  { %2622 = vmatprep.subr.bf16.mxu0 %v2759_v34 }
 0x635   :  { %2623 = vmatpush3.bf16.msra.mxu0 %v2737_v25 }
 0x636   :  { %2624 = vmatprep.subr.bf16.mxu0 %v2759_v34 }
 0x639   :  { %2625 = vmatpush3.bf16.msra.mxu0 %v2738_v26 }
 0x63a   :  { %2626 = vmatprep.subr.bf16.mxu0 %v2759_v34 }
 0x63d   :  { %2627 = vmatpush3.bf16.msra.mxu0 %v2739_v27 }
 0x63e   :  { %2628 = vmatprep.subr.bf16.mxu0 %v2759_v34 }
 0x641   :  { %2629 = vmatpush3.bf16.msra.mxu0 %v2740_v28 }
 0x642   :  { %2630 = vmatprep.subr.bf16.mxu0 %v2759_v34 }
 0x645   :  { %2631 = vmatpush3.bf16.msra.mxu0 %v2741_v29 }
 0x646   :  { %2632 = vmatprep.subr.bf16.mxu0 %v2759_v34 }
 0x649   :  { %2633 = vmatpush3.bf16.msra.mxu0 %v2742_v30 }
 0x6ec   :  { %v1797_v31 = vpop.f32.mrf.mxu0 }
 0x6ed   :  { %v1798_v32 = vadd.f32 1e-05, %v1797_v31 }
 0x6ee   :  { %v2617_v33 = vpop.f32.mrf.mxu0 }
 0x6ef   :  { %2749 = vrsqrt.f32 %v1798_v32 }
 0x6fc   :  { %v2750_v44 = vpop.eup %2749 }
 0x6fd   :  { %v1805_v45 = vrot.slane %v2750_v44, %v3290_v9 }
 0x6ff   :  { %v1806_v35 = vmul.f32 %v1805_v45, %v1641_v8  ;;  %v1807_v46 = vmul.f32 %v1805_v45, %v1642_v10 }
 0x701   :  { %v1815_v47 = vmul.f32 %v3417_v56, %v1806_v35  ;;  %v1816_v48 = vmul.f32 %v3417_v56, %v1807_v46 }
 0x703   :  { %v1824_v49 = vadd.f32 %v3423_v58, %v1815_v47  ;;  %v1825_v50 = vadd.f32 %v3423_v58, %v1816_v48 }
 0x705   :  { %v2150_v51 = vmul.f32 -1.442695, %v1824_v49  ;;  %v2151_v34 = vmul.f32 -1.442695, %v1825_v50 }
 0x707   :  { %2751 = vpow2.f32 %v2150_v51 }
 0x708   :  { %2753 = vpow2.f32 %v2151_v34 }
 0x714   :  { %v2752_v52 = vpop.eup %2751 }
 0x715   :  { %v2754_v53 = vpop.eup %2753  ;;  %v1832_v54 = vadd.f32 1.0, %v2752_v52 }
 0x716   :  { %v1833_v55 = vadd.f32 1.0, %v2754_v53 }
 0x717   :  { %2755 = vrcp.f32 %v1832_v54 }
 0x718   :  { %2757 = vrcp.f32 %v1833_v55 }
 0x724   :  { %v2756_v9 = vpop.eup %2755 }
 0x725   :  { %v2758_v57 = vpop.eup %2757  ;;  %v1838_v36 = vmul.f32 %v2756_v9, %v1824_v49 }
 0x726   :  { %v1839_v37 = vmul.f32 %v2758_v57, %v1825_v50 }
 0x728   :  { %v1840_v39 = vpack.c.bf16 %v1839_v37, %v1838_v36 }
 0x72a   :  { %v1865_v56 = vshrl.u32 %v1840_v39, 16  ;;  %v1868_v40 = vshll.u32 %v1840_v39, 16 }
 0x72c   :  { %v1867_v41 = vrot.slane %v1865_v56, 2  ;;  %v1870_v42 = vrot.slane %v1868_v40, 3 }
 0x72e   :  { %v1871_v58 = vor.u32 %v1870_v42, %v1867_v41 }
 0x730   :  { %2635 = vmatmul.mubr.bf16.vlgmr.msra.gmra.mxu0 %v1871_v58 }
 0x7f0   :  { %v1955_v43 = vpop.f32.mrf.mxu0 }
 0x7f1   :  { %v1956_v0 = vadd.f32 %v3451_v59, %v1955_v43 }
 0x7f2   :  { %v2636_v1 = vpop.f32.mrf.mxu0 }
 0x7f3   :  { %2161 = vst.msk [vmem:[%s3515_s8 + $0x4] sm:$0xf] %vm1458_vm4, %v1956_v0 }
 0x7f4   :  { %v1958_v2 = vpop.f32.mrf.mxu0 }
 0x7f6   :  { %v2637_v3 = vpop.f32.mrf.mxu0 }

// kernel: encoder_forward.4
= control target key start
LH: loop header
LB: loop body
LE: loop exit
PB: predicated region body
PF: predicated region fallthrough
CT: control target
= control target key end

     0   :  { %vm388_vm0 = vsmask.f32 7424  ;;  %vm2623_vm1 = vcmask 261120   ;;  %vm2933_vm2 = vcmask 1046528   ;;  %vm3406_vm3 = vsmask.f32 3328  ;;  %s6049_s1 = inlined_call_operand.vmem [shape: bf16[2,1152,256], index: 1, kind: input, shape index: {}]   ;;  %s6050_s0 = inlined_call_operand.vmem [shape: bf16[18,1152], index: 0, kind: input, shape index: {}]   ;;  %s6051_s4 = inlined_call_operand.vmem [shape: f32[256,32], index: 4, kind: input, shape index: {}]   ;;  %s6052_s5 = inlined_call_operand.vmem [shape: f32[32,256], index: 5, kind: input, shape index: {}]   ;;  %s6053_s2 = inlined_call_operand.vmem [shape: f32[1,256], index: 2, kind: input, shape index: {}]   ;;  %s6054_s3 = inlined_call_operand.vmem [shape: f32[1,256], index: 3, kind: input, shape index: {}]   ;;  %s6055_s6 = inlined_call_operand.vmem [shape: bf16[2,8,256], index: 6, kind: output, shape index: {}]  }
   0x1   :  { %v4039_v0 = vld [vmem:[%s6049_s1 + $0x4f4] ss:$8 sps:$4 sm:$0xff]   ;;  %v4043_v2 = vld [vmem:[%s6049_s1 + $0x4f0] ss:$8 sps:$4 sm:$0xff]   ;;  %v4045_v4 = vld [vmem:[%s6049_s1 + $0x4e4] ss:$8 sps:$4 sm:$0xff]  }
   0x2   :  { %v4041_v1 = vld [vmem:[%s6049_s1 + $0x5f4] ss:$8 sps:$4 sm:$0xff]   ;;  %1253 = vmatprep.subr.bf16.mxu0 %v4039_v0  ;;  %v4044_v3 = vld [vmem:[%s6049_s1 + $0x5f0] ss:$8 sps:$4 sm:$0xff]   ;;  %v4047_v5 = vld [vmem:[%s6049_s1 + $0x5e4] ss:$8 sps:$4 sm:$0xff]  }
   0x3   :  { %1304 = vmatprep.subr.bf16.mxu1 %v4041_v1  ;;  %1254 = vmatpush1.bf16.msra.mxu0 %v4043_v2  ;;  %v4049_v6 = vld [vmem:[%s6049_s1 + $0x4e0] ss:$8 sps:$4 sm:$0xff]   ;;  %v4051_v8 = vld [vmem:[%s6049_s1 + $0x4d4] ss:$8 sps:$4 sm:$0xff]   ;;  %v4055_v10 = vld [vmem:[%s6049_s1 + $0x4d0] ss:$8 sps:$4 sm:$0xff]  }
   0x4   :  { %1305 = vmatpush1.bf16.msra.mxu1 %v4044_v3  ;;  %1255 = vmatprep.subr.bf16.mxu0 %v4045_v4  ;;  %v4050_v7 = vld [vmem:[%s6049_s1 + $0x5e0] ss:$8 sps:$4 sm:$0xff]   ;;  %v4053_v9 = vld [vmem:[%s6049_s1 + $0x5d4] ss:$8 sps:$4 sm:$0xff]   ;;  %v4056_v11 = vld [vmem:[%s6049_s1 + $0x5d0] ss:$8 sps:$4 sm:$0xff]  }
   0x5   :  { %1306 = vmatprep.subr.bf16.mxu1 %v4047_v5  ;;  %v4057_v12 = vld [vmem:[%s6049_s1 + $0x4c4] ss:$8 sps:$4 sm:$0xff]   ;;  %v4061_v14 = vld [vmem:[%s6049_s1 + $0x4c0] ss:$8 sps:$4 sm:$0xff]   ;;  %v4063_v16 = vld [vmem:[%s6049_s1 + $0x4b4] ss:$8 sps:$4 sm:$0xff]  }
   0x6   :  { %v4059_v13 = vld [vmem:[%s6049_s1 + $0x5c4] ss:$8 sps:$4 sm:$0xff]   ;;  %v4062_v15 = vld [vmem:[%s6049_s1 + $0x5c0] ss:$8 sps:$4 sm:$0xff]   ;;  %v4065_v17 = vld [vmem:[%s6049_s1 + $0x5b4] ss:$8 sps:$4 sm:$0xff]  }
   0x7   :  { %1256 = vmatpush1.bf16.msra.mxu0 %v4049_v6  ;;  %v4067_v18 = vld [vmem:[%s6049_s1 + $0x4b0] ss:$8 sps:$4 sm:$0xff]   ;;  %v4069_v20 = vld [vmem:[%s6049_s1 + $0x4a4] ss:$8 sps:$4 sm:$0xff]   ;;  %v4073_v22 = vld [vmem:[%s6049_s1 + $0x4a0] ss:$8 sps:$4 sm:$0xff]  }
   0x8   :  { %1307 = vmatpush1.bf16.msra.mxu1 %v4050_v7  ;;  %1257 = vmatprep.subr.bf16.mxu0 %v4051_v8  ;;  %v4068_v19 = vld [vmem:[%s6049_s1 + $0x5b0] ss:$8 sps:$4 sm:$0xff]   ;;  %v4071_v21 = vld [vmem:[%s6049_s1 + $0x5a4] ss:$8 sps:$4 sm:$0xff]   ;;  %v4074_v23 = vld [vmem:[%s6049_s1 + $0x5a0] ss:$8 sps:$4 sm:$0xff]  }
   0x9   :  { %1308 = vmatprep.subr.bf16.mxu1 %v4053_v9  ;;  %v4075_v24 = vld [vmem:[%s6049_s1 + $0x494] ss:$8 sps:$4 sm:$0xff]   ;;  %v4079_v26 = vld [vmem:[%s6049_s1 + $0x490] ss:$8 sps:$4 sm:$0xff]   ;;  %v4081_v28 = vld [vmem:[%s6049_s1 + $0x484] ss:$8 sps:$4 sm:$0xff]  }
   0xa   :  { %v4077_v25 = vld [vmem:[%s6049_s1 + $0x594] ss:$8 sps:$4 sm:$0xff]   ;;  %v4080_v27 = vld [vmem:[%s6049_s1 + $0x590] ss:$8 sps:$4 sm:$0xff]   ;;  %v4083_v29 = vld [vmem:[%s6049_s1 + $0x584] ss:$8 sps:$4 sm:$0xff]  }
   0xb   :  { %1258 = vmatpush1.bf16.msra.mxu0 %v4055_v10  ;;  %v4085_v30 = vld [vmem:[%s6049_s1 + $0x480] ss:$8 sps:$4 sm:$0xff]   ;;  %v4087_v32 = vld [vmem:[%s6049_s1 + $0x574] ss:$8 sps:$4 sm:$0xff]   ;;  %v4091_v34 = vld [vmem:[%s6049_s1 + $0x570] ss:$8 sps:$4 sm:$0xff]  }
   0xc   :  { %1309 = vmatpush1.bf16.msra.mxu1 %v4056_v11  ;;  %1259 = vmatprep.subr.bf16.mxu0 %v4057_v12  ;;  %v4086_v31 = vld [vmem:[%s6049_s1 + $0x580] ss:$8 sps:$4 sm:$0xff]   ;;  %v4089_v33 = vld [vmem:[%s6049_s1 + $0x674] ss:$8 sps:$4 sm:$0xff]   ;;  %v4092_v35 = vld [vmem:[%s6049_s1 + $0x670] ss:$8 sps:$4 sm:$0xff]  }
   0xd   :  { %1310 = vmatprep.subr.bf16.mxu1 %v4059_v13  ;;  %v4093_v36 = vld [vmem:[%s6049_s1 + $0x564] ss:$8 sps:$4 sm:$0xff]   ;;  %v4097_v38 = vld [vmem:[%s6049_s1 + $0x560] ss:$8 sps:$4 sm:$0xff]   ;;  %v4099_v40 = vld [vmem:[%s6049_s1 + $0x554] ss:$8 sps:$4 sm:$0xff]  }
   0xe   :  { %v4095_v37 = vld [vmem:[%s6049_s1 + $0x664] ss:$8 sps:$4 sm:$0xff]   ;;  %v4098_v39 = vld [vmem:[%s6049_s1 + $0x660] ss:$8 sps:$4 sm:$0xff]   ;;  %v4101_v41 = vld [vmem:[%s6049_s1 + $0x654] ss:$8 sps:$4 sm:$0xff]  }
   0xf   :  { %1260 = vmatpush1.bf16.msra.mxu0 %v4061_v14  ;;  %v4103_v42 = vld [vmem:[%s6049_s1 + $0x550] ss:$8 sps:$4 sm:$0xff]   ;;  %v4105_v44 = vld [vmem:[%s6049_s1 + $0x544] ss:$8 sps:$4 sm:$0xff]   ;;  %v4109_v46 = vld [vmem:[%s6049_s1 + $0x540] ss:$8 sps:$4 sm:$0xff]  }
  0x10   :  { %1311 = vmatpush1.bf16.msra.mxu1 %v4062_v15  ;;  %1261 = vmatprep.subr.bf16.mxu0 %v4063_v16  ;;  %v4104_v43 = vld [vmem:[%s6049_s1 + $0x650] ss:$8 sps:$4 sm:$0xff]   ;;  %v4107_v45 = vld [vmem:[%s6049_s1 + $0x644] ss:$8 sps:$4 sm:$0xff]   ;;  %v4110_v47 = vld [vmem:[%s6049_s1 + $0x640] ss:$8 sps:$4 sm:$0xff]  }
  0x11   :  { %1312 = vmatprep.subr.bf16.mxu1 %v4065_v17  ;;  %v4111_v48 = vld [vmem:[%s6049_s1 + $0x534] ss:$8 sps:$4 sm:$0xff]   ;;  %v34_v49 = vld [vmem:[%s6050_s0 + $0x48] sm:$0x11]  ;;  %v4115_v58 = vld [vmem:[%s6049_s1 + $0x530] ss:$8 sps:$4 sm:$0xff]  }
  0x12   :  { %v4720_v50 = vld [vmem:[%s6050_s0 + $0x4] ss:$36 sps:$4 sm:$0xff]   ;;  %v4722_v51 = vcombine.high %v34_v49, %v34_v49  ;;  %v35_v52 = vld [vmem:[%s6050_s0 + $0x50] sm:$0x11]  ;;  %v4764_v13 = vcombine.low %v34_v49, %v34_v49  ;;  %vm3407_vm4 = vsmask.f32 7440 }
  0x13   :  { %1262 = vmatpush1.bf16.msra.mxu0 %v4067_v18  ;;  %v4113_v53 = vld [vmem:[%s6049_s1 + $0x634] ss:$8 sps:$4 sm:$0xff]   ;;  %v402_v54 = vshrl.u32 %v4720_v50, 16  ;;  %v404_v55 = vshll.u32 %v4720_v50, 16  ;;  %v4138_v56 = vld [vmem:[%s6050_s0 + $0xc] ss:$36 sps:$4 sm:$0xff]   ;;  %v4735_v57 = vcombine.high %v35_v52, %v35_v52  ;;  %v4769_v16 = vcombine.low %v35_v52, %v35_v52  ;;  %vm3408_vm5 = vmor %vm3406_vm3, %vm3407_vm4 }
  0x14   :  { %1313 = vmatpush1.bf16.msra.mxu1 %v4068_v19  ;;  %1263 = vmatprep.subr.bf16.mxu0 %v4069_v20  ;;  %v4116_v59 = vld [vmem:[%s6049_s1 + $0x630] ss:$8 sps:$4 sm:$0xff]   ;;  %v409_v60 = vshll.u32 %v4722_v51, 16  ;;  %v4117_v61 = vld [vmem:[%s6049_s1 + $0x524] ss:$8 sps:$4 sm:$0xff]   ;;  %v426_v0 = vshrl.u32 %v4138_v56, 16 }
  0x15   :  { %1314 = vmatprep.subr.bf16.mxu1 %v4071_v21  ;;  %v4119_v62 = vld [vmem:[%s6049_s1 + $0x624] ss:$8 sps:$4 sm:$0xff]   ;;  %v406_v63 = vrot.slane %v404_v55, 1  ;;  %v428_v1 = vshll.u32 %v4138_v56, 16  ;;  %v433_v2 = vshll.u32 %v4735_v57, 16  ;;  %v497_v52 = vshrl.u32 %v4764_v13, 16 }
  0x16   :  { %v411_v3 = vrot.slane %v409_v60, 1  ;;  %v4141_v4 = vld [vmem:[%s6050_s0] ss:$36 sps:$4 sm:$0xff]   ;;  %v4143_v5 = vld [vmem:[%s6050_s0 + $0x8] ss:$36 sps:$4 sm:$0xff]   ;;  %v501_v55 = vshrl.u32 %v4769_v16, 16 }
  0x17   :  { %1264 = vmatpush1.bf16.msra.mxu0 %v4073_v22  ;;  %v407_v6 = vor.u32 %v406_v63, %v402_v54  ;;  %v430_v7 = vrot.slane %v428_v1, 1  ;;  %v435_v8 = vrot.slane %v433_v2, 1  ;;  %v4121_v9 = vld [vmem:[%s6049_s1 + $0x520] ss:$8 sps:$4 sm:$0xff]   ;;  %v4123_v14 = vld [vmem:[%s6049_s1 + $0x514] ss:$8 sps:$4 sm:$0xff]  }
  0x18   :  { %1315 = vmatpush1.bf16.msra.mxu1 %v4074_v23  ;;  %1265 = vmatprep.subr.bf16.mxu0 %v4075_v24  ;;  %v4122_v10 = vld [vmem:[%s6049_s1 + $0x620] ss:$8 sps:$4 sm:$0xff]   ;;  %v392_v15 = vshll.u32 %v4141_v4, 16  ;;  %v416_v17 = vshll.u32 %v4143_v5, 16  ;;  %v4125_v18 = vld [vmem:[%s6049_s1 + $0x614] ss:$8 sps:$4 sm:$0xff]  }
  0x19   :  { %1316 = vmatprep.subr.bf16.mxu1 %v4077_v25  ;;  %v412_v11 = vsel %vm388_vm0, %v407_v6, %v411_v3  ;;  %v431_v12 = vor.u32 %v430_v7, %v426_v0  ;;  %v4127_v20 = vld [vmem:[%s6049_s1 + $0x510] ss:$8 sps:$4 sm:$0xff]   ;;  %v4129_v22 = vld [vmem:[%s6049_s1 + $0x504] ss:$8 sps:$4 sm:$0xff]   ;;  %v390_v23 = vshrl.u32 %v4141_v4, 16  ;;  %v397_v24 = vshll.u32 %v4764_v13, 16 }
  0x1a   :  { %v4128_v21 = vld [vmem:[%s6049_s1 + $0x610] ss:$8 sps:$4 sm:$0xff]   ;;  %1285 = vmatprep.mubr.bf16.mxu0 %v412_v11  ;;  %v394_v25 = vrot.slane %v392_v15, 1  ;;  %v4162_v49 = vld [vmem:[%s6049_s1 + $0x7d4] ss:$8 sps:$4 sm:$0xff]  }
  0x1b   :  { %1266 = vmatpush1.bf16.msra.mxu0 %v4079_v26  ;;  %v436_v19 = vsel %vm388_vm0, %v431_v12, %v435_v8  ;;  %v414_v26 = vshrl.u32 %v4143_v5, 16  ;;  %v4160_v54 = vld [vmem:[%s6049_s1 + $0x7d0] ss:$8 sps:$4 sm:$0xff]   ;;  %v4165_v56 = vld [vmem:[%s6049_s1 + $0x6c4] ss:$8 sps:$4 sm:$0xff]  }
  0x1c   :  { %1317 = vmatpush1.bf16.msra.mxu1 %v4080_v27  ;;  %1267 = vmatprep.subr.bf16.mxu0 %v4081_v28  ;;  %v418_v27 = vrot.slane %v416_v17, 1  ;;  %v421_v28 = vshll.u32 %v4769_v16, 16  ;;  %v4166_v60 = vld [vmem:[%s6049_s1 + $0x7c0] ss:$8 sps:$4 sm:$0xff]   ;;  %v4169_v63 = vld [vmem:[%s6049_s1 + $0x6b0] ss:$8 sps:$4 sm:$0xff]  }
  0x1d   :  { %1318 = vmatprep.subr.bf16.mxu1 %v4083_v29  ;;  %1336 = vmatprep.mubr.bf16.mxu1 %v436_v19  ;;  %v4131_v29 = vld [vmem:[%s6049_s1 + $0x604] ss:$8 sps:$4 sm:$0xff]   ;;  %v4172_v0 = vld [vmem:[%s6049_s1 + $0x7b0] ss:$8 sps:$4 sm:$0xff]   ;;  %v4175_v3 = vld [vmem:[%s6049_s1 + $0x6a0] ss:$8 sps:$4 sm:$0xff]  }
  0x1e   :  { %v4177_v1 = vld [vmem:[%s6049_s1 + $0x6a4] ss:$8 sps:$4 sm:$0xff]   ;;  %v4178_v4 = vld [vmem:[%s6049_s1 + $0x7a0] ss:$8 sps:$4 sm:$0xff]   ;;  %v4183_v5 = vld [vmem:[%s6049_s1 + $0x694] ss:$8 sps:$4 sm:$0xff]  }
  0x1f   :  { %1268 = vmatpush1.bf16.msra.mxu0 %v4085_v30  ;;  %v4133_v30 = vld [vmem:[%s6049_s1 + $0x500] ss:$8 sps:$4 sm:$0xff]   ;;  %v4180_v2 = vld [vmem:[%s6049_s1 + $0x7a4] ss:$8 sps:$4 sm:$0xff]   ;;  %v4186_v6 = vld [vmem:[%s6049_s1 + $0x794] ss:$8 sps:$4 sm:$0xff]  }
  0x20   :  { %1319 = vmatpush1.bf16.msra.mxu1 %v4086_v31  ;;  %1269 = vmatprep.subr.bf16.mxu0 %v4087_v32  ;;  %v4134_v31 = vld [vmem:[%s6049_s1 + $0x600] ss:$8 sps:$4 sm:$0xff]   ;;  %v395_v32 = vor.u32 %v394_v25, %v390_v23  ;;  %v4181_v7 = vld [vmem:[%s6049_s1 + $0x690] ss:$8 sps:$4 sm:$0xff]   ;;  %v4198_v19 = vld [vmem:[%s6049_s1 + $0x874] ss:$8 sps:$4 sm:$0xff]  }
  0x21   :  { %1320 = vmatprep.subr.bf16.mxu1 %v4089_v33  ;;  %v399_v33 = vrot.slane %v397_v24, 1  ;;  %v4184_v8 = vld [vmem:[%s6049_s1 + $0x790] ss:$8 sps:$4 sm:$0xff]   ;;  %v4187_v11 = vld [vmem:[%s6049_s1 + $0x680] ss:$8 sps:$4 sm:$0xff]  }
  0x22   :  { %v4190_v12 = vld [vmem:[%s6049_s1 + $0x780] ss:$8 sps:$4 sm:$0xff]   ;;  %v4903_v15 = vld [vmem:[%s6050_s0 + $0x58] sm:$0x11] }
  0x23   :  { %1270 = vmatpush2.bf16.msra.mxu0 %v4091_v34  ;;  %v419_v34 = vor.u32 %v418_v27, %v414_v26  ;;  %v4908_v17 = vld [vmem:[%s6050_s0 + $0x14] ss:$36 sps:$4 sm:$0xff]  }
  0x24   :  { %1321 = vmatpush2.bf16.msra.mxu1 %v4092_v35  ;;  %1271 = vmatprep.subr.bf16.mxu0 %v4093_v36  ;;  %v423_v35 = vrot.slane %v421_v28, 1  ;;  %v4147_v36 = vld [vmem:[%s6049_s1 + $0x6f4] ss:$8 sps:$4 sm:$0xff]   ;;  %v452_v23 = vshll.u32 %v4908_v17, 16  ;;  %v4193_v28 = vld [vmem:[%s6049_s1 + $0x770] ss:$8 sps:$4 sm:$0xff]  }
  0x25   :  { %1322 = vmatprep.subr.bf16.mxu1 %v4095_v37  ;;  %v4150_v37 = vld [vmem:[%s6049_s1 + $0x7f4] ss:$8 sps:$4 sm:$0xff]  }
  0x27   :  { %1272 = vmatpush2.bf16.msra.mxu0 %v4097_v38  ;;  %v4145_v38 = vld [vmem:[%s6049_s1 + $0x6f0] ss:$8 sps:$4 sm:$0xff]  }
  0x28   :  { %1323 = vmatpush2.bf16.msra.mxu1 %v4098_v39  ;;  %1273 = vmatprep.subr.bf16.mxu0 %v4099_v40  ;;  %v4148_v39 = vld [vmem:[%s6049_s1 + $0x7f0] ss:$8 sps:$4 sm:$0xff]   ;;  %v400_v40 = vsel %vm388_vm0, %v395_v32, %v399_v33  ;;  %v4201_v32 = vld [vmem:[%s6049_s1 + $0x764] ss:$8 sps:$4 sm:$0xff]  }
  0x29   :  { %1324 = vmatprep.subr.bf16.mxu1 %v4101_v41  ;;  %v424_v41 = vsel %vm388_vm0, %v419_v34, %v423_v35  ;;  %v4204_v33 = vld [vmem:[%s6049_s1 + $0x864] ss:$8 sps:$4 sm:$0xff]  }
  0x2b   :  { %1274 = vmatpush2.bf16.msra.mxu0 %v4103_v42  ;;  %v4153_v42 = vld [vmem:[%s6049_s1 + $0x6e4] ss:$8 sps:$4 sm:$0xff]  }
  0x2c   :  { %1325 = vmatpush2.bf16.msra.mxu1 %v4104_v43  ;;  %1275 = vmatprep.subr.bf16.mxu0 %v4105_v44  ;;  %v4156_v43 = vld [vmem:[%s6049_s1 + $0x7e4] ss:$8 sps:$4 sm:$0xff]   ;;  %v499_v44 = vshrl.u32 %v4722_v51, 16 }
  0x2d   :  { %1326 = vmatprep.subr.bf16.mxu1 %v4107_v45  ;;  %v503_v45 = vshrl.u32 %v4735_v57, 16 }
  0x2f   :  { %1276 = vmatpush2.bf16.msra.mxu0 %v4109_v46  ;;  %v4151_v46 = vld [vmem:[%s6049_s1 + $0x6e0] ss:$8 sps:$4 sm:$0xff]  }
  0x30   :  { %1327 = vmatpush2.bf16.msra.mxu1 %v4110_v47  ;;  %1277 = vmatprep.subr.bf16.mxu0 %v4111_v48  ;;  %v4154_v47 = vld [vmem:[%s6049_s1 + $0x7e0] ss:$8 sps:$4 sm:$0xff]   ;;  %v4159_v48 = vld [vmem:[%s6049_s1 + $0x6d4] ss:$8 sps:$4 sm:$0xff]  }
  0x31   :  { %1328 = vmatprep.subr.bf16.mxu1 %v4113_v53  ;;  %v4157_v53 = vld [vmem:[%s6049_s1 + $0x6d0] ss:$8 sps:$4 sm:$0xff]  }
  0x33   :  { %1278 = vmatpush2.bf16.msra.mxu0 %v4115_v58  ;;  %v4168_v58 = vld [vmem:[%s6049_s1 + $0x7c4] ss:$8 sps:$4 sm:$0xff]  }
  0x34   :  { %1329 = vmatpush2.bf16.msra.mxu1 %v4116_v59  ;;  %1279 = vmatprep.subr.bf16.mxu0 %v4117_v61  ;;  %v4163_v59 = vld [vmem:[%s6049_s1 + $0x6c0] ss:$8 sps:$4 sm:$0xff]   ;;  %v4171_v61 = vld [vmem:[%s6049_s1 + $0x6b4] ss:$8 sps:$4 sm:$0xff]  }
  0x35   :  { %1330 = vmatprep.subr.bf16.mxu1 %v4119_v62  ;;  %v4174_v62 = vld [vmem:[%s6049_s1 + $0x7b4] ss:$8 sps:$4 sm:$0xff]  }
  0x37   :  { %1280 = vmatpush2.bf16.msra.mxu0 %v4121_v9  ;;  %v4189_v9 = vld [vmem:[%s6049_s1 + $0x684] ss:$8 sps:$4 sm:$0xff]  }
  0x38   :  { %1331 = vmatpush2.bf16.msra.mxu1 %v4122_v10  ;;  %1281 = vmatprep.subr.bf16.mxu0 %v4123_v14  ;;  %v4192_v10 = vld [vmem:[%s6049_s1 + $0x784] ss:$8 sps:$4 sm:$0xff]   ;;  %v4195_v14 = vld [vmem:[%s6049_s1 + $0x774] ss:$8 sps:$4 sm:$0xff]  }
  0x39   :  { %1332 = vmatprep.subr.bf16.mxu1 %v4125_v18  ;;  %v4912_v18 = vcombine.high %v4903_v15, %v4903_v15 }
  0x3b   :  { %1282 = vmatpush2.bf16.msra.mxu0 %v4127_v20  ;;  %v4920_v20 = vld [vmem:[%s6050_s0 + $0x60] sm:$0x11]  ;;  %v457_v24 = vshll.u32 %v4912_v18, 16 }
  0x3c   :  { %1333 = vmatpush2.bf16.msra.mxu1 %v4128_v21  ;;  %1283 = vmatprep.subr.bf16.mxu0 %v4129_v22  ;;  %v4248_v21 = vld [vmem:[%s6050_s0 + $0x1c] ss:$36 sps:$4 sm:$0xff]   ;;  %v450_v22 = vshrl.u32 %v4908_v17, 16  ;;  %v4930_v25 = vcombine.high %v4920_v20, %v4920_v20 }
  0x3d   :  { %1334 = vmatprep.subr.bf16.mxu1 %v4131_v29  ;;  %v474_v26 = vshrl.u32 %v4248_v21, 16  ;;  %v476_v27 = vshll.u32 %v4248_v21, 16  ;;  %v4196_v29 = vld [vmem:[%s6049_s1 + $0x870] ss:$8 sps:$4 sm:$0xff]   ;;  %v4238_v21 = vld [vmem:[%s6049_s1 + $0x800] ss:$8 sps:$4 sm:$0xff]  }
  0x3e   :  { %v481_v35 = vshll.u32 %v4930_v25, 16 }
  0x3f   :  { %1284 = vmatpush2.bf16.msra.mxu0 %v4133_v30  ;;  %v454_v30 = vrot.slane %v452_v23, 1  ;;  %v478_v34 = vrot.slane %v476_v27, 1  ;;  %v4253_v27 = vld [vmem:[%s6049_s1 + $0x8f4] ss:$8 sps:$4 sm:$0xff]  }
  0x40   :  { %1335 = vmatpush2.bf16.msra.mxu1 %v4134_v31  ;;  %1355 = vmatprep.subr.bf16.mxu0 %v4147_v36  ;;  %v459_v31 = vrot.slane %v457_v24, 1 }
  0x41   :  { %1406 = vmatprep.subr.bf16.mxu1 %v4150_v37  ;;  %v455_v36 = vor.u32 %v454_v30, %v450_v22  ;;  %v4199_v37 = vld [vmem:[%s6049_s1 + $0x760] ss:$8 sps:$4 sm:$0xff]  }
  0x42   :  { %1286 = vmatmul.mubr.bf16.vlgmr.msra.gmra.mxu0 %v400_v40  ;;  %v4202_v40 = vld [vmem:[%s6049_s1 + $0x860] ss:$8 sps:$4 sm:$0xff]  }
  0x43   :  { %1337 = vmatmul.mubr.bf16.vlgmr.msra.gmra.mxu1 %v424_v41  ;;  %1356 = vmatpush1.bf16.msra.mxu0 %v4145_v38  ;;  %v479_v38 = vor.u32 %v478_v34, %v474_v26  ;;  %v4207_v41 = vld [vmem:[%s6049_s1 + $0x754] ss:$8 sps:$4 sm:$0xff]   ;;  %v4262_v34 = vld [vmem:[%s6049_s1 + $0x64] ss:$8 sps:$4 sm:$0xff]  }
  0x44   :  { %1407 = vmatpush1.bf16.msra.mxu1 %v4148_v39  ;;  %1357 = vmatprep.subr.bf16.mxu0 %v4153_v42  ;;  %v483_v39 = vrot.slane %v481_v35, 1  ;;  %v460_v42 = vsel %vm388_vm0, %v455_v36, %v459_v31  ;;  %v507_v35 = vshrl.u32 %v4912_v18, 16  ;;  %v511_v36 = vshrl.u32 %v4930_v25, 16 }
  0x45   :  { %1408 = vmatprep.subr.bf16.mxu1 %v4156_v43  ;;  %1295 = vmatprep.mubr.bf16.mxu0 %v499_v44  ;;  %v4210_v43 = vld [vmem:[%s6049_s1 + $0x854] ss:$8 sps:$4 sm:$0xff]  }
  0x46   :  { %1346 = vmatprep.mubr.bf16.mxu1 %v503_v45  ;;  %v484_v44 = vsel %vm388_vm0, %v479_v38, %v483_v39  ;;  %v4205_v45 = vld [vmem:[%s6049_s1 + $0x750] ss:$8 sps:$4 sm:$0xff]   ;;  %v4260_v38 = vld [vmem:[%s6049_s1 + $0x60] ss:$8 sps:$4 sm:$0xff]   ;;  %v4265_v39 = vld [vmem:[%s6049_s1 + $0x8d4] ss:$8 sps:$4 sm:$0xff]  }
  0x47   :  { %1358 = vmatpush1.bf16.msra.mxu0 %v4151_v46  ;;  %v4208_v46 = vld [vmem:[%s6049_s1 + $0x850] ss:$8 sps:$4 sm:$0xff]  }
  0x48   :  { %1409 = vmatpush1.bf16.msra.mxu1 %v4154_v47  ;;  %1359 = vmatprep.subr.bf16.mxu0 %v4159_v48  ;;  %v4213_v47 = vld [vmem:[%s6049_s1 + $0x744] ss:$8 sps:$4 sm:$0xff]  }
  0x49   :  { %1410 = vmatprep.subr.bf16.mxu1 %v4162_v49  ;;  %v4216_v48 = vld [vmem:[%s6049_s1 + $0x844] ss:$8 sps:$4 sm:$0xff]   ;;  %v4211_v49 = vld [vmem:[%s6049_s1 + $0x740] ss:$8 sps:$4 sm:$0xff]  }
  0x4a   :  { %1296 = vmatmul.mubr.bf16.gmra.mxu0 %v497_v52  ;;  %v4214_v52 = vld [vmem:[%s6049_s1 + $0x840] ss:$8 sps:$4 sm:$0xff]  }
  0x4b   :  { %1347 = vmatmul.mubr.bf16.gmra.mxu1 %v501_v55  ;;  %1360 = vmatpush1.bf16.msra.mxu0 %v4157_v53  ;;  %v4219_v53 = vld [vmem:[%s6049_s1 + $0x734] ss:$8 sps:$4 sm:$0xff]   ;;  %v4217_v55 = vld [vmem:[%s6049_s1 + $0x730] ss:$8 sps:$4 sm:$0xff]  }
  0x4c   :  { %1411 = vmatpush1.bf16.msra.mxu1 %v4160_v54  ;;  %1361 = vmatprep.subr.bf16.mxu0 %v4165_v56  ;;  %v4222_v54 = vld [vmem:[%s6049_s1 + $0x834] ss:$8 sps:$4 sm:$0xff]   ;;  %v4220_v56 = vld [vmem:[%s6049_s1 + $0x830] ss:$8 sps:$4 sm:$0xff]  }
  0x4d   :  { %1412 = vmatprep.subr.bf16.mxu1 %v4168_v58  ;;  %1387 = vmatprep.mubr.bf16.mxu0 %v460_v42  ;;  %v4225_v58 = vld [vmem:[%s6049_s1 + $0x724] ss:$8 sps:$4 sm:$0xff]   ;;  %v4263_v42 = vld [vmem:[%s6049_s1 + $0x8d0] ss:$8 sps:$4 sm:$0xff]  }
  0x4e   :  { %1438 = vmatprep.mubr.bf16.mxu1 %v484_v44  ;;  %v4266_v44 = vld [vmem:[%s6049_s1 + $0x50] ss:$8 sps:$4 sm:$0xff]  }
  0x4f   :  { %1362 = vmatpush1.bf16.msra.mxu0 %v4163_v59  ;;  %v4995_v59 = vld [vmem:[%s6050_s0 + $0x10] ss:$36 sps:$4 sm:$0xff]  }
  0x50   :  { %1413 = vmatpush1.bf16.msra.mxu1 %v4166_v60  ;;  %1363 = vmatprep.subr.bf16.mxu0 %v4171_v61  ;;  %v4246_v60 = vld [vmem:[%s6050_s0 + $0x18] ss:$36 sps:$4 sm:$0xff]   ;;  %v4228_v61 = vld [vmem:[%s6049_s1 + $0x824] ss:$8 sps:$4 sm:$0xff]  }
  0x51   :  { %1414 = vmatprep.subr.bf16.mxu1 %v4174_v62  ;;  %v4223_v62 = vld [vmem:[%s6049_s1 + $0x720] ss:$8 sps:$4 sm:$0xff]  }
  0x53   :  { %1364 = vmatpush1.bf16.msra.mxu0 %v4169_v63  ;;  %v4226_v63 = vld [vmem:[%s6049_s1 + $0x820] ss:$8 sps:$4 sm:$0xff]  }
  0x54   :  { %1415 = vmatpush1.bf16.msra.mxu1 %v4172_v0  ;;  %1365 = vmatprep.subr.bf16.mxu0 %v4177_v1  ;;  %v5011_v0 = vcombine.low %v4903_v15, %v4903_v15  ;;  %v4231_v1 = vld [vmem:[%s6049_s1 + $0x714] ss:$8 sps:$4 sm:$0xff]   ;;  %v4237_v15 = vld [vmem:[%s6049_s1 + $0x704] ss:$8 sps:$4 sm:$0xff]  }
  0x55   :  { %1416 = vmatprep.subr.bf16.mxu1 %v4180_v2  ;;  %v5018_v2 = vcombine.low %v4920_v20, %v4920_v20  ;;  %v4235_v20 = vld [vmem:[%s6049_s1 + $0x700] ss:$8 sps:$4 sm:$0xff]  }
  0x57   :  { %1366 = vmatpush1.bf16.msra.mxu0 %v4175_v3  ;;  %v440_v3 = vshll.u32 %v4995_v59, 16 }
  0x58   :  { %1417 = vmatpush1.bf16.msra.mxu1 %v4178_v4  ;;  %1367 = vmatprep.subr.bf16.mxu0 %v4183_v5  ;;  %v464_v4 = vshll.u32 %v4246_v60, 16  ;;  %v4234_v5 = vld [vmem:[%s6049_s1 + $0x814] ss:$8 sps:$4 sm:$0xff]  }
  0x59   :  { %1418 = vmatprep.subr.bf16.mxu1 %v4186_v6  ;;  %v4229_v6 = vld [vmem:[%s6049_s1 + $0x710] ss:$8 sps:$4 sm:$0xff]  }
  0x5b   :  { %1368 = vmatpush1.bf16.msra.mxu0 %v4181_v7  ;;  %v4232_v7 = vld [vmem:[%s6049_s1 + $0x810] ss:$8 sps:$4 sm:$0xff]  }
  0x5c   :  { %1419 = vmatpush1.bf16.msra.mxu1 %v4184_v8  ;;  %1369 = vmatprep.subr.bf16.mxu0 %v4189_v9  ;;  %v438_v8 = vshrl.u32 %v4995_v59, 16  ;;  %v445_v9 = vshll.u32 %v5011_v0, 16 }
  0x5d   :  { %1420 = vmatprep.subr.bf16.mxu1 %v4192_v10  ;;  %v442_v10 = vrot.slane %v440_v3, 1  ;;  %v4292_v3 = vld [vmem:[%s6049_s1 + $0x14] ss:$8 sps:$4 sm:$0xff]  }
  0x5e   :  { %v447_v23 = vrot.slane %v445_v9, 1  ;;  %v4295_v9 = vld [vmem:[%s6049_s1 + $0x884] ss:$8 sps:$4 sm:$0xff]  }
  0x5f   :  { %1370 = vmatpush1.bf16.msra.mxu0 %v4187_v11  ;;  %v462_v11 = vshrl.u32 %v4246_v60, 16  ;;  %v443_v22 = vor.u32 %v442_v10, %v438_v8  ;;  %v4281_v60 = vld [vmem:[%s6049_s1 + $0x8a0] ss:$8 sps:$4 sm:$0xff]   ;;  %v4298_v10 = vld [vmem:[%s6049_s1 + $0x4] ss:$8 sps:$4 sm:$0xff]  }
  0x60   :  { %1421 = vmatpush1.bf16.msra.mxu1 %v4190_v12  ;;  %1371 = vmatprep.subr.bf16.mxu0 %v4195_v14  ;;  %v466_v12 = vrot.slane %v464_v4, 1  ;;  %v469_v14 = vshll.u32 %v5018_v2, 16  ;;  %v4287_v4 = vld [vmem:[%s6049_s1 + $0x890] ss:$8 sps:$4 sm:$0xff]  }
  0x61   :  { %1422 = vmatprep.subr.bf16.mxu1 %v4198_v19  ;;  %v4240_v19 = vld [vmem:[%s6049_s1 + $0x804] ss:$8 sps:$4 sm:$0xff]   ;;  %v448_v30 = vsel %vm388_vm0, %v443_v22, %v447_v23  ;;  %v4304_v23 = vld [vmem:[%s6049_s1 + $0x170] ss:$8 sps:$4 sm:$0xff]  }
  0x62   :  { %v467_v24 = vor.u32 %v466_v12, %v462_v11  ;;  %v471_v26 = vrot.slane %v469_v14, 1  ;;  %v4293_v11 = vld [vmem:[%s6049_s1 + $0x880] ss:$8 sps:$4 sm:$0xff]  }
  0x63   :  { %1372 = vmatpush2.bf16.msra.mxu0 %v4193_v28  ;;  %v4256_v28 = vld [vmem:[%s6049_s1 + $0x74] ss:$8 sps:$4 sm:$0xff]   ;;  %v4296_v12 = vld [vmem:[%s6049_s1] ss:$8 sps:$4 sm:$0xff]  }
  0x64   :  { %1423 = vmatpush2.bf16.msra.mxu1 %v4196_v29  ;;  %1373 = vmatprep.subr.bf16.mxu0 %v4201_v32  ;;  %v4251_v29 = vld [vmem:[%s6049_s1 + $0x8f0] ss:$8 sps:$4 sm:$0xff]   ;;  %v472_v31 = vsel %vm388_vm0, %v467_v24, %v471_v26  ;;  %v4309_v24 = vld [vmem:[%s6049_s1 + $0xe4] ss:$8 sps:$4 sm:$0xff]  }
  0x65   :  { %1424 = vmatprep.subr.bf16.mxu1 %v4204_v33  ;;  %v4254_v32 = vld [vmem:[%s6049_s1 + $0x70] ss:$8 sps:$4 sm:$0xff]   ;;  %v4259_v33 = vld [vmem:[%s6049_s1 + $0x8e4] ss:$8 sps:$4 sm:$0xff]  }
  0x66   :  { %v4312_v26 = vld [vmem:[%s6049_s1 + $0x164] ss:$8 sps:$4 sm:$0xff]  }
  0x67   :  { %1374 = vmatpush2.bf16.msra.mxu0 %v4199_v37  ;;  %v4257_v37 = vld [vmem:[%s6049_s1 + $0x8e0] ss:$8 sps:$4 sm:$0xff]  }
  0x68   :  { %1425 = vmatpush2.bf16.msra.mxu1 %v4202_v40  ;;  %1375 = vmatprep.subr.bf16.mxu0 %v4207_v41  ;;  %v4268_v40 = vld [vmem:[%s6049_s1 + $0x54] ss:$8 sps:$4 sm:$0xff]   ;;  %v505_v41 = vshrl.u32 %v5011_v0, 16 }
  0x69   :  { %1426 = vmatprep.subr.bf16.mxu1 %v4210_v43  ;;  %v509_v43 = vshrl.u32 %v5018_v2, 16 }
  0x6b   :  { %1376 = vmatpush2.bf16.msra.mxu0 %v4205_v45  ;;  %v4271_v45 = vld [vmem:[%s6049_s1 + $0x8c4] ss:$8 sps:$4 sm:$0xff]  }
  0x6c   :  { %1427 = vmatpush2.bf16.msra.mxu1 %v4208_v46  ;;  %1377 = vmatprep.subr.bf16.mxu0 %v4213_v47  ;;  %v4274_v46 = vld [vmem:[%s6049_s1 + $0x44] ss:$8 sps:$4 sm:$0xff]   ;;  %v4269_v47 = vld [vmem:[%s6049_s1 + $0x8c0] ss:$8 sps:$4 sm:$0xff]  }
  0x6d   :  { %1428 = vmatprep.subr.bf16.mxu1 %v4216_v48  ;;  %v4272_v48 = vld [vmem:[%s6049_s1 + $0x40] ss:$8 sps:$4 sm:$0xff]  }
  0x6f   :  { %1378 = vmatpush2.bf16.msra.mxu0 %v4211_v49  ;;  %v4277_v49 = vld [vmem:[%s6049_s1 + $0x8b4] ss:$8 sps:$4 sm:$0xff]  }
  0x70   :  { %1429 = vmatpush2.bf16.msra.mxu1 %v4214_v52  ;;  %1379 = vmatprep.subr.bf16.mxu0 %v4219_v53  ;;  %v4280_v52 = vld [vmem:[%s6049_s1 + $0x34] ss:$8 sps:$4 sm:$0xff]   ;;  %v4275_v53 = vld [vmem:[%s6049_s1 + $0x8b0] ss:$8 sps:$4 sm:$0xff]  }
  0x71   :  { %1430 = vmatprep.subr.bf16.mxu1 %v4222_v54  ;;  %v4530_v54 = vmov 0  }
  0x73   :  { %1380 = vmatpush2.bf16.msra.mxu0 %v4217_v55  ;;  %v4278_v55 = vld [vmem:[%s6049_s1 + $0x30] ss:$8 sps:$4 sm:$0xff]  }
  0x74   :  { %1431 = vmatpush2.bf16.msra.mxu1 %v4220_v56  ;;  %1381 = vmatprep.subr.bf16.mxu0 %v4225_v58  ;;  %v5116_v56 = vld [vmem:[%s6050_s0 + $0x20] ss:$36 sps:$4 sm:$0xff]  }
  0x75   :  { %1432 = vmatprep.subr.bf16.mxu1 %v4228_v61  ;;  %v4283_v58 = vld [vmem:[%s6049_s1 + $0x8a4] ss:$8 sps:$4 sm:$0xff]   ;;  %v4284_v61 = vld [vmem:[%s6049_s1 + $0x20] ss:$8 sps:$4 sm:$0xff]  }
  0x77   :  { %1382 = vmatpush2.bf16.msra.mxu0 %v4223_v62  ;;  %v5133_v62 = vld [vmem:[%s6050_s0 + $0x68] ss:$0 sps:$4 sm:$0x11]  }
  0x78   :  { %1433 = vmatpush2.bf16.msra.mxu1 %v4226_v63  ;;  %1383 = vmatprep.subr.bf16.mxu0 %v4231_v1  ;;  %v488_v63 = vshll.u32 %v5116_v56, 16  ;;  %v4289_v1 = vld [vmem:[%s6049_s1 + $0x894] ss:$8 sps:$4 sm:$0xff]   ;;  %v493_v8 = vshll.u32 %v5133_v62, 16 }
  0x79   :  { %1434 = vmatprep.subr.bf16.mxu1 %v4234_v5  ;;  %v4290_v5 = vld [vmem:[%s6049_s1 + $0x10] ss:$8 sps:$4 sm:$0xff]  }
  0x7b   :  { %1384 = vmatpush2.bf16.msra.mxu0 %v4229_v6  ;;  %v486_v6 = vshrl.u32 %v5116_v56, 16 }
  0x7c   :  { %1435 = vmatpush2.bf16.msra.mxu1 %v4232_v7  ;;  %1385 = vmatprep.subr.bf16.mxu0 %v4237_v15  ;;  %v490_v7 = vrot.slane %v488_v63, 1  ;;  %v495_v15 = vrot.slane %v493_v8, 1  ;;  %v4349_v63 = vld [vmem:[%s6049_s1 + $0x1f0] ss:$8 sps:$4 sm:$0xff]   ;;  %v4363_v8 = vld [vmem:[%s6049_s1 + $0x1d4] ss:$8 sps:$4 sm:$0xff]  }
  0x7d   :  { %1436 = vmatprep.subr.bf16.mxu1 %v4240_v19  ;;  %v4303_v19 = vld [vmem:[%s6049_s1 + $0xf4] ss:$8 sps:$4 sm:$0xff]  }
  0x7e   :  { %v491_v14 = vor.u32 %v490_v7, %v486_v6  ;;  %v4355_v6 = vld [vmem:[%s6049_s1 + $0x1e0] ss:$8 sps:$4 sm:$0xff]  }
  0x7f   :  { %1386 = vmatpush2.bf16.msra.mxu0 %v4235_v20  ;;  %v4306_v20 = vld [vmem:[%s6049_s1 + $0x174] ss:$8 sps:$4 sm:$0xff]   ;;  %v4358_v7 = vld [vmem:[%s6049_s1 + $0x260] ss:$8 sps:$4 sm:$0xff]  }
  0x80   :  { %1437 = vmatpush2.bf16.msra.mxu1 %v4238_v21  ;;  %1457 = vmatprep.subr.bf16.mxu0 %v4253_v27  ;;  %v4301_v21 = vld [vmem:[%s6049_s1 + $0xf0] ss:$8 sps:$4 sm:$0xff]   ;;  %v496_v22 = vsel %vm388_vm0, %v491_v14, %v495_v15  ;;  %v4307_v27 = vld [vmem:[%s6049_s1 + $0xe0] ss:$8 sps:$4 sm:$0xff]  }
  0x81   :  { %2246 = vmatprep.subr.bf16.mxu1 %v4256_v28  ;;  %v4310_v28 = vld [vmem:[%s6049_s1 + $0x160] ss:$8 sps:$4 sm:$0xff]  }
  0x82   :  { %1388 = vmatmul.mubr.bf16.vlgmr.msra.gmra.mxu0 %v448_v30  ;;  %v4318_v30 = vld [vmem:[%s6049_s1 + $0x154] ss:$8 sps:$4 sm:$0xff]   ;;  %v4367_v14 = vld [vmem:[%s6049_s1 + $0x1c0] ss:$8 sps:$4 sm:$0xff]  }
  0x83   :  { %1439 = vmatmul.mubr.bf16.vlgmr.msra.gmra.mxu1 %v472_v31  ;;  %1458 = vmatpush1.bf16.msra.mxu0 %v4251_v29  ;;  %v4315_v29 = vld [vmem:[%s6049_s1 + $0xd4] ss:$8 sps:$4 sm:$0xff]   ;;  %v513_v31 = vshrl.u32 %v5133_v62, 16  ;;  %v4370_v15 = vld [vmem:[%s6049_s1 + $0x240] ss:$8 sps:$4 sm:$0xff]  }
  0x84   :  { %2247 = vmatpush1.bf16.msra.mxu1 %v4254_v32  ;;  %1459 = vmatprep.subr.bf16.mxu0 %v4259_v33  ;;  %v4313_v32 = vld [vmem:[%s6049_s1 + $0xd0] ss:$8 sps:$4 sm:$0xff]  }
  0x85   :  { %2248 = vmatprep.subr.bf16.mxu1 %v4262_v34  ;;  %1397 = vmatprep.mubr.bf16.mxu0 %v507_v35  ;;  %v4316_v33 = vld [vmem:[%s6049_s1 + $0x150] ss:$8 sps:$4 sm:$0xff]   ;;  %v4321_v34 = vld [vmem:[%s6049_s1 + $0xc4] ss:$8 sps:$4 sm:$0xff]  }
  0x86   :  { %1448 = vmatprep.mubr.bf16.mxu1 %v511_v36  ;;  %v4324_v35 = vld [vmem:[%s6049_s1 + $0x144] ss:$8 sps:$4 sm:$0xff]   ;;  %v4319_v36 = vld [vmem:[%s6049_s1 + $0xc0] ss:$8 sps:$4 sm:$0xff]  }
  0x87   :  { %1460 = vmatpush1.bf16.msra.mxu0 %v4257_v37  ;;  %v4322_v37 = vld [vmem:[%s6049_s1 + $0x140] ss:$8 sps:$4 sm:$0xff]  }
  0x88   :  { %2249 = vmatpush1.bf16.msra.mxu1 %v4260_v38  ;;  %1461 = vmatprep.subr.bf16.mxu0 %v4265_v39  ;;  %v4327_v38 = vld [vmem:[%s6049_s1 + $0xb4] ss:$8 sps:$4 sm:$0xff]  }
  0x89   :  { %2250 = vmatprep.subr.bf16.mxu1 %v4268_v40  ;;  %v4330_v39 = vld [vmem:[%s6049_s1 + $0x134] ss:$8 sps:$4 sm:$0xff]   ;;  %v4525_v40 = vld [vmem:[%s6050_s0 + $0xc] ss:$36 sps:$4 sm:$0xff]  }
  0x8a   :  { %1398 = vmatmul.mubr.bf16.gmra.mxu0 %v505_v41  ;;  %v4325_v41 = vld [vmem:[%s6049_s1 + $0xb0] ss:$8 sps:$4 sm:$0xff]  }
  0x8b   :  { %1449 = vmatmul.mubr.bf16.gmra.mxu1 %v509_v43  ;;  %1462 = vmatpush1.bf16.msra.mxu0 %v4263_v42  ;;  %v4328_v42 = vld [vmem:[%s6049_s1 + $0x130] ss:$8 sps:$4 sm:$0xff]   ;;  %v4333_v43 = vld [vmem:[%s6049_s1 + $0xa4] ss:$8 sps:$4 sm:$0xff]  }
  0x8c   :  { %2251 = vmatpush1.bf16.msra.mxu1 %v4266_v44  ;;  %1463 = vmatprep.subr.bf16.mxu0 %v4271_v45  ;;  %v4336_v44 = vld [vmem:[%s6049_s1 + $0x124] ss:$8 sps:$4 sm:$0xff]   ;;  %v4331_v45 = vld [vmem:[%s6049_s1 + $0xa0] ss:$8 sps:$4 sm:$0xff]  }
  0x8d   :  { %2252 = vmatprep.subr.bf16.mxu1 %v4274_v46  ;;  %1489 = vmatprep.mubr.bf16.mxu0 %v4530_v54  ;;  %v4334_v46 = vld [vmem:[%s6049_s1 + $0x120] ss:$8 sps:$4 sm:$0xff]  }
  0x8e   :  { %2278 = vmatprep.mubr.bf16.mxu1 %v4720_v50  ;;  %v4286_v50 = vld [vmem:[%s6049_s1 + $0x24] ss:$8 sps:$4 sm:$0xff]  }
  0x8f   :  { %1464 = vmatpush1.bf16.msra.mxu0 %v4269_v47  ;;  %v4339_v47 = vld [vmem:[%s6049_s1 + $0x94] ss:$8 sps:$4 sm:$0xff]  }
  0x90   :  { %2253 = vmatpush1.bf16.msra.mxu1 %v4272_v48  ;;  %1465 = vmatprep.subr.bf16.mxu0 %v4277_v49  ;;  %v4342_v48 = vld [vmem:[%s6049_s1 + $0x114] ss:$8 sps:$4 sm:$0xff]   ;;  %v4337_v49 = vld [vmem:[%s6049_s1 + $0x90] ss:$8 sps:$4 sm:$0xff]  }
  0x91   :  { %2254 = vmatprep.subr.bf16.mxu1 %v4280_v52  ;;  %v4340_v52 = vld [vmem:[%s6049_s1 + $0x110] ss:$8 sps:$4 sm:$0xff]  }
  0x93   :  { %1466 = vmatpush1.bf16.msra.mxu0 %v4275_v53  ;;  %v4345_v53 = vld [vmem:[%s6049_s1 + $0x84] ss:$8 sps:$4 sm:$0xff]  }
  0x94   :  { %2255 = vmatpush1.bf16.msra.mxu1 %v4278_v55  ;;  %1467 = vmatprep.subr.bf16.mxu0 %v4283_v58  ;;  %v4348_v55 = vld [vmem:[%s6049_s1 + $0x104] ss:$8 sps:$4 sm:$0xff]   ;;  %v4343_v58 = vld [vmem:[%s6049_s1 + $0x80] ss:$8 sps:$4 sm:$0xff]  }
  0x95   :  { %2256 = vmatprep.subr.bf16.mxu1 %v4286_v50  ;;  %v4346_v50 = vld [vmem:[%s6049_s1 + $0x100] ss:$8 sps:$4 sm:$0xff]  }
  0x97   :  { %1468 = vmatpush1.bf16.msra.mxu0 %v4281_v60  ;;  %v4351_v60 = vld [vmem:[%s6049_s1 + $0x1f4] ss:$8 sps:$4 sm:$0xff]  }
  0x98   :  { %2257 = vmatpush1.bf16.msra.mxu1 %v4284_v61  ;;  %1469 = vmatprep.subr.bf16.mxu0 %v4289_v1  ;;  %v4354_v61 = vld [vmem:[%s6049_s1 + $0x274] ss:$8 sps:$4 sm:$0xff]   ;;  %v4352_v1 = vld [vmem:[%s6049_s1 + $0x270] ss:$8 sps:$4 sm:$0xff]  }
  0x99   :  { %2258 = vmatprep.subr.bf16.mxu1 %v4292_v3  ;;  %v4357_v3 = vld [vmem:[%s6049_s1 + $0x1e4] ss:$8 sps:$4 sm:$0xff]  }
  0x9b   :  { %1470 = vmatpush1.bf16.msra.mxu0 %v4287_v4  ;;  %v4360_v4 = vld [vmem:[%s6049_s1 + $0x264] ss:$8 sps:$4 sm:$0xff]  }
  0x9c   :  { %2259 = vmatpush1.bf16.msra.mxu1 %v4290_v5  ;;  %1471 = vmatprep.subr.bf16.mxu0 %v4295_v9  ;;  %v4526_v5 = vld [vmem:[%s6050_s0] ss:$36 sps:$4 sm:$0xff]   ;;  %v4366_v9 = vld [vmem:[%s6049_s1 + $0x254] ss:$8 sps:$4 sm:$0xff]  }
  0x9d   :  { %2260 = vmatprep.subr.bf16.mxu1 %v4298_v10  ;;  %v4361_v10 = vld [vmem:[%s6049_s1 + $0x1d0] ss:$8 sps:$4 sm:$0xff]  }
  0x9f   :  { %1472 = vmatpush1.bf16.msra.mxu0 %v4293_v11  ;;  %v4364_v11 = vld [vmem:[%s6049_s1 + $0x250] ss:$8 sps:$4 sm:$0xff]  }
  0xa0   :  { %2261 = vmatpush1.bf16.msra.mxu1 %v4296_v12  ;;  %2297 = vmatprep.subr.bf16.mxu0 %v4306_v20  ;;  %v4369_v12 = vld [vmem:[%s6049_s1 + $0x1c4] ss:$8 sps:$4 sm:$0xff]   ;;  %v4373_v20 = vld [vmem:[%s6049_s1 + $0x1b0] ss:$8 sps:$4 sm:$0xff]  }
  0xa1   :  { %2262 = vmatprep.subr.bf16.mxu1 %v4303_v19  ;;  %v4375_v19 = vld [vmem:[%s6049_s1 + $0x1b4] ss:$8 sps:$4 sm:$0xff]  }
  0xa2   :  { %1490 = vmatmul.mubr.bf16.vlgmr.msra.gmra.mxu0 %v496_v22  ;;  %v4381_v22 = vld [vmem:[%s6049_s1 + $0x1a4] ss:$8 sps:$4 sm:$0xff]  }
  0xa3   :  { %2298 = vmatpush1.bf16.msra.mxu0 %v4304_v23  ;;  %1499 = vmatprep.mubr.bf16.mxu0 %v4530_v54  ;;  %v4379_v23 = vld [vmem:[%s6049_s1 + $0x1a0] ss:$8 sps:$4 sm:$0xff]  }
  0xa4   :  { %2263 = vmatpush2.bf16.msra.mxu1 %v4301_v21  ;;  %2299 = vmatprep.subr.bf16.mxu0 %v4312_v26  ;;  %v4376_v21 = vld [vmem:[%s6049_s1 + $0x230] ss:$8 sps:$4 sm:$0xff]   ;;  %v4387_v26 = vld [vmem:[%s6049_s1 + $0x194] ss:$8 sps:$4 sm:$0xff]  }
  0xa5   :  { %2264 = vmatprep.subr.bf16.mxu1 %v4309_v24  ;;  %v4382_v24 = vld [vmem:[%s6049_s1 + $0x220] ss:$8 sps:$4 sm:$0xff]  }
  0xa7   :  { %2300 = vmatpush1.bf16.msra.mxu0 %v4310_v28  ;;  %v4385_v28 = vld [vmem:[%s6049_s1 + $0x190] ss:$8 sps:$4 sm:$0xff]  }
  0xa8   :  { %2265 = vmatpush2.bf16.msra.mxu1 %v4307_v27  ;;  %2301 = vmatprep.subr.bf16.mxu0 %v4318_v30  ;;  %v4390_v27 = vld [vmem:[%s6049_s1 + $0x214] ss:$8 sps:$4 sm:$0xff]   ;;  %v4393_v30 = vld [vmem:[%s6049_s1 + $0x184] ss:$8 sps:$4 sm:$0xff]  }
  0xa9   :  { %2266 = vmatprep.subr.bf16.mxu1 %v4315_v29  ;;  %v4388_v29 = vld [vmem:[%s6049_s1 + $0x210] ss:$8 sps:$4 sm:$0xff]  }
  0xaa   :  { %1500 = vmatmul.mubr.bf16.gmra.mxu0 %v513_v31  ;;  %v4396_v31 = vld [vmem:[%s6049_s1 + $0x204] ss:$8 sps:$4 sm:$0xff]  }
  0xab   :  { %2302 = vmatpush1.bf16.msra.mxu0 %v4316_v33  ;;  %2329 = vmatprep.mubr.bf16.mxu0 %v4525_v40  ;;  %v4394_v33 = vld [vmem:[%s6049_s1 + $0x200] ss:$8 sps:$4 sm:$0xff]  }
  0xac   :  { %2267 = vmatpush2.bf16.msra.mxu1 %v4313_v32  ;;  %2303 = vmatprep.subr.bf16.mxu0 %v4324_v35  ;;  %v4391_v32 = vld [vmem:[%s6049_s1 + $0x180] ss:$8 sps:$4 sm:$0xff]   ;;  %v4402_v35 = vld [vmem:[%s6049_s1 + $0x374] ss:$8 sps:$4 sm:$0xff]  }
  0xad   :  { %2268 = vmatprep.subr.bf16.mxu1 %v4321_v34  ;;  %v4399_v34 = vld [vmem:[%s6049_s1 + $0x2f4] ss:$8 sps:$4 sm:$0xff]   ;;  %v4527_v40 = vld [vmem:[%s6050_s0 + $0x8] ss:$36 sps:$4 sm:$0xff]  }
  0xaf   :  { %2304 = vmatpush1.bf16.msra.mxu0 %v4322_v37  ;;  %v4400_v37 = vld [vmem:[%s6049_s1 + $0x370] ss:$8 sps:$4 sm:$0xff]  }
  0xb0   :  { %2269 = vmatpush2.bf16.msra.mxu1 %v4319_v36  ;;  %2305 = vmatprep.subr.bf16.mxu0 %v4330_v39  ;;  %v4397_v36 = vld [vmem:[%s6049_s1 + $0x2f0] ss:$8 sps:$4 sm:$0xff]   ;;  %v4408_v39 = vld [vmem:[%s6049_s1 + $0x364] ss:$8 sps:$4 sm:$0xff]  }
  0xb1   :  { %2270 = vmatprep.subr.bf16.mxu1 %v4327_v38  ;;  %v4405_v38 = vld [vmem:[%s6049_s1 + $0x2e4] ss:$8 sps:$4 sm:$0xff]  }
  0xb3   :  { %2306 = vmatpush1.bf16.msra.mxu0 %v4328_v42  ;;  %v4406_v42 = vld [vmem:[%s6049_s1 + $0x360] ss:$8 sps:$4 sm:$0xff]  }
  0xb4   :  { %2271 = vmatpush2.bf16.msra.mxu1 %v4325_v41  ;;  %2307 = vmatprep.subr.bf16.mxu0 %v4336_v44  ;;  %v4403_v41 = vld [vmem:[%s6049_s1 + $0x2e0] ss:$8 sps:$4 sm:$0xff]   ;;  %v4414_v44 = vld [vmem:[%s6049_s1 + $0x354] ss:$8 sps:$4 sm:$0xff]  }
  0xb5   :  { %2272 = vmatprep.subr.bf16.mxu1 %v4333_v43  ;;  %v4411_v43 = vld [vmem:[%s6049_s1 + $0x2d4] ss:$8 sps:$4 sm:$0xff]  }
  0xb7   :  { %2308 = vmatpush1.bf16.msra.mxu0 %v4334_v46  ;;  %v4412_v46 = vld [vmem:[%s6049_s1 + $0x350] ss:$8 sps:$4 sm:$0xff]  }
  0xb8   :  { %2273 = vmatpush2.bf16.msra.mxu1 %v4331_v45  ;;  %2309 = vmatprep.subr.bf16.mxu0 %v4342_v48  ;;  %v4409_v45 = vld [vmem:[%s6049_s1 + $0x2d0] ss:$8 sps:$4 sm:$0xff]   ;;  %v4415_v48 = vld [vmem:[%s6049_s1 + $0x2c0] ss:$8 sps:$4 sm:$0xff]  }
  0xb9   :  { %2274 = vmatprep.subr.bf16.mxu1 %v4339_v47  ;;  %v4417_v47 = vld [vmem:[%s6049_s1 + $0x2c4] ss:$8 sps:$4 sm:$0xff]  }
  0xbb   :  { %2310 = vmatpush1.bf16.msra.mxu0 %v4340_v52  ;;  %v4423_v52 = vld [vmem:[%s6049_s1 + $0x2b4] ss:$8 sps:$4 sm:$0xff]  }
  0xbc   :  { %2275 = vmatpush2.bf16.msra.mxu1 %v4337_v49  ;;  %2311 = vmatprep.subr.bf16.mxu0 %v4348_v55  ;;  %v4418_v49 = vld [vmem:[%s6049_s1 + $0x340] ss:$8 sps:$4 sm:$0xff]   ;;  %v4421_v55 = vld [vmem:[%s6049_s1 + $0x2b0] ss:$8 sps:$4 sm:$0xff]  }
  0xbd   :  { %2276 = vmatprep.subr.bf16.mxu1 %v4345_v53  ;;  %v4528_v53 = vld [vmem:[%s6050_s0 + $0x1c] ss:$36 sps:$4 sm:$0xff]  }
  0xbf   :  { %2312 = vmatpush1.bf16.msra.mxu0 %v4346_v50  ;;  %v4429_v50 = vld [vmem:[%s6049_s1 + $0x2a4] ss:$8 sps:$4 sm:$0xff]  }
  0xc0   :  { %2277 = vmatpush2.bf16.msra.mxu1 %v4343_v58  ;;  %2313 = vmatprep.subr.bf16.mxu0 %v4351_v60  ;;  %v4424_v58 = vld [vmem:[%s6049_s1 + $0x330] ss:$8 sps:$4 sm:$0xff]   ;;  %v4432_v60 = vld [vmem:[%s6049_s1 + $0x324] ss:$8 sps:$4 sm:$0xff]  }
  0xc1   :  { %2348 = vmatprep.subr.bf16.mxu1 %v4354_v61  ;;  %v4427_v61 = vld [vmem:[%s6049_s1 + $0x2a0] ss:$8 sps:$4 sm:$0xff]  }
  0xc3   :  { %2279 = vmatmul.mubr.bf16.vlgmr.msra.gmra.mxu1 %v4526_v5  ;;  %2314 = vmatpush2.bf16.msra.mxu0 %v4349_v63  ;;  %v4430_v63 = vld [vmem:[%s6049_s1 + $0x320] ss:$8 sps:$4 sm:$0xff]   ;;  %v4436_v5 = vld [vmem:[%s6049_s1 + $0x310] ss:$8 sps:$4 sm:$0xff]  }
  0xc4   :  { %2349 = vmatpush1.bf16.msra.mxu1 %v4352_v1  ;;  %2315 = vmatprep.subr.bf16.mxu0 %v4357_v3  ;;  %v4435_v1 = vld [vmem:[%s6049_s1 + $0x294] ss:$8 sps:$4 sm:$0xff]  }
  0xc5   :  { %2350 = vmatprep.subr.bf16.mxu1 %v4360_v4  ;;  %2288 = vmatprep.mubr.bf16.mxu1 %v4722_v51  ;;  %v4372_v51 = vld [vmem:[%s6049_s1 + $0x244] ss:$8 sps:$4 sm:$0xff]   ;;  %v4438_v3 = vld [vmem:[%s6049_s1 + $0x314] ss:$8 sps:$4 sm:$0xff]   ;;  %v4433_v4 = vld [vmem:[%s6049_s1 + $0x290] ss:$8 sps:$4 sm:$0xff]  }
  0xc7   :  { %2316 = vmatpush2.bf16.msra.mxu0 %v4355_v6  ;;  %v4441_v6 = vld [vmem:[%s6049_s1 + $0x284] ss:$8 sps:$4 sm:$0xff]  }
  0xc8   :  { %2351 = vmatpush1.bf16.msra.mxu1 %v4358_v7  ;;  %2317 = vmatprep.subr.bf16.mxu0 %v4363_v8  ;;  %v4444_v7 = vld [vmem:[%s6049_s1 + $0x304] ss:$8 sps:$4 sm:$0xff]   ;;  %v4439_v8 = vld [vmem:[%s6049_s1 + $0x280] ss:$8 sps:$4 sm:$0xff]  }
  0xc9   :  { %2352 = vmatprep.subr.bf16.mxu1 %v4366_v9  ;;  %v4442_v9 = vld [vmem:[%s6049_s1 + $0x300] ss:$8 sps:$4 sm:$0xff]  }
  0xcb   :  { %2289 = vmatmul.mubr.bf16.gmra.mxu1 %v4764_v13  ;;  %2318 = vmatpush2.bf16.msra.mxu0 %v4361_v10  ;;  %v4378_v13 = vld [vmem:[%s6049_s1 + $0x234] ss:$8 sps:$4 sm:$0xff]  }
  0xcc   :  { %2353 = vmatpush1.bf16.msra.mxu1 %v4364_v11  ;;  %2319 = vmatprep.subr.bf16.mxu0 %v4369_v12  ;;  %v4447_v10 = vld [vmem:[%s6049_s1 + $0x3f4] ss:$8 sps:$4 sm:$0xff]   ;;  %v4445_v12 = vld [vmem:[%s6049_s1 + $0x3f0] ss:$8 sps:$4 sm:$0xff]  }
  0xcd   :  { %2354 = vmatprep.subr.bf16.mxu1 %v4372_v51  ;;  %2380 = vmatprep.mubr.bf16.mxu1 %v4908_v17  ;;  %v4384_v17 = vld [vmem:[%s6049_s1 + $0x224] ss:$8 sps:$4 sm:$0xff]   ;;  %v4450_v11 = vld [vmem:[%s6049_s1 + $0x474] ss:$8 sps:$4 sm:$0xff]   ;;  %v4448_v51 = vld [vmem:[%s6049_s1 + $0x470] ss:$8 sps:$4 sm:$0xff]  }
  0xcf   :  { %2320 = vmatpush2.bf16.msra.mxu0 %v4367_v14  ;;  %v4453_v14 = vld [vmem:[%s6049_s1 + $0x3e4] ss:$8 sps:$4 sm:$0xff]  }
  0xd0   :  { %2355 = vmatpush1.bf16.msra.mxu1 %v4370_v15  ;;  %2321 = vmatprep.subr.bf16.mxu0 %v4375_v19  ;;  %v4456_v15 = vld [vmem:[%s6049_s1 + $0x464] ss:$8 sps:$4 sm:$0xff]  }
  0xd1   :  { %2356 = vmatprep.subr.bf16.mxu1 %v4378_v13 }
  0xd3   :  { %2322 = vmatpush2.bf16.msra.mxu0 %v4373_v20 }
  0xd4   :  { %2357 = vmatpush1.bf16.msra.mxu1 %v4376_v21  ;;  %2323 = vmatprep.subr.bf16.mxu0 %v4381_v22  ;;  %v4451_v21 = vld [vmem:[%s6049_s1 + $0x3e0] ss:$8 sps:$4 sm:$0xff]  }
  0xd5   :  { %2358 = vmatprep.subr.bf16.mxu1 %v4384_v17  ;;  %v4454_v22 = vld [vmem:[%s6049_s1 + $0x460] ss:$8 sps:$4 sm:$0xff]  }
  0xd7   :  { %2324 = vmatpush2.bf16.msra.mxu0 %v4379_v23 }
  0xd8   :  { %2359 = vmatpush1.bf16.msra.mxu1 %v4382_v24  ;;  %2325 = vmatprep.subr.bf16.mxu0 %v4387_v26  ;;  %v4462_v24 = vld [vmem:[%s6049_s1 + $0x454] ss:$8 sps:$4 sm:$0xff]  }
  0xd9   :  { %2360 = vmatprep.subr.bf16.mxu1 %v4390_v27 }
  0xdb   :  { %2326 = vmatpush2.bf16.msra.mxu0 %v4385_v28 }
  0xdc   :  { %2361 = vmatpush1.bf16.msra.mxu1 %v4388_v29  ;;  %2327 = vmatprep.subr.bf16.mxu0 %v4393_v30  ;;  %v4457_v30 = vld [vmem:[%s6049_s1 + $0x3d0] ss:$8 sps:$4 sm:$0xff]  }
  0xdd   :  { %2362 = vmatprep.subr.bf16.mxu1 %v4396_v31  ;;  %v4460_v31 = vld [vmem:[%s6049_s1 + $0x450] ss:$8 sps:$4 sm:$0xff]  }
  0xdf   :  { %2328 = vmatpush2.bf16.msra.mxu0 %v4391_v32 }
  0xe0   :  { %2363 = vmatpush1.bf16.msra.mxu1 %v4394_v33  ;;  %2399 = vmatprep.subr.bf16.mxu0 %v4402_v35 }
  0xe1   :  { %2364 = vmatprep.subr.bf16.mxu1 %v4399_v34  ;;  %v4468_v34 = vld [vmem:[%s6049_s1 + $0x444] ss:$8 sps:$4 sm:$0xff]  }
  0xe2   :  { %2330 = vmatmul.mubr.bf16.vlgmr.msra.gmra.mxu0 %v4527_v40 }
  0xe3   :  { %2400 = vmatpush1.bf16.msra.mxu0 %v4400_v37  ;;  %2339 = vmatprep.mubr.bf16.mxu0 %v4735_v57  ;;  %v4420_v57 = vld [vmem:[%s6049_s1 + $0x344] ss:$8 sps:$4 sm:$0xff]  }
  0xe4   :  { %2365 = vmatpush2.bf16.msra.mxu1 %v4397_v36  ;;  %2401 = vmatprep.subr.bf16.mxu0 %v4408_v39  ;;  %v4466_v39 = vld [vmem:[%s6049_s1 + $0x440] ss:$8 sps:$4 sm:$0xff]  }
  0xe5   :  { %2366 = vmatprep.subr.bf16.mxu1 %v4405_v38  ;;  %v4463_v38 = vld [vmem:[%s6049_s1 + $0x3c0] ss:$8 sps:$4 sm:$0xff]  }
  0xe7   :  { %2402 = vmatpush1.bf16.msra.mxu0 %v4406_v42 }
  0xe8   :  { %2367 = vmatpush2.bf16.msra.mxu1 %v4403_v41  ;;  %2403 = vmatprep.subr.bf16.mxu0 %v4414_v44  ;;  %v4474_v41 = vld [vmem:[%s6049_s1 + $0x434] ss:$8 sps:$4 sm:$0xff]  }
  0xe9   :  { %2368 = vmatprep.subr.bf16.mxu1 %v4411_v43 }
  0xea   :  { %2340 = vmatmul.mubr.bf16.gmra.mxu0 %v4769_v16  ;;  %v4426_v16 = vld [vmem:[%s6049_s1 + $0x334] ss:$8 sps:$4 sm:$0xff]  }
  0xeb   :  { %2404 = vmatpush1.bf16.msra.mxu0 %v4412_v46  ;;  %2431 = vmatprep.mubr.bf16.mxu0 %v4528_v53  ;;  %v4475_v53 = vld [vmem:[%s6049_s1 + $0x3a0] ss:$8 sps:$4 sm:$0xff]  }
  0xec   :  { %2369 = vmatpush2.bf16.msra.mxu1 %v4409_v45  ;;  %2405 = vmatprep.subr.bf16.mxu0 %v4420_v57  ;;  %v4472_v57 = vld [vmem:[%s6049_s1 + $0x430] ss:$8 sps:$4 sm:$0xff]  }
  0xed   :  { %2370 = vmatprep.subr.bf16.mxu1 %v4417_v47  ;;  %v4469_v47 = vld [vmem:[%s6049_s1 + $0x3b0] ss:$8 sps:$4 sm:$0xff]  }
  0xef   :  { %2406 = vmatpush1.bf16.msra.mxu0 %v4418_v49  ;;  %v4480_v49 = vld [vmem:[%s6049_s1 + $0x424] ss:$8 sps:$4 sm:$0xff]  }
  0xf0   :  { %2371 = vmatpush2.bf16.msra.mxu1 %v4415_v48  ;;  %2407 = vmatprep.subr.bf16.mxu0 %v4426_v16  ;;  %v4477_v48 = vld [vmem:[%s6049_s1 + $0x3a4] ss:$8 sps:$4 sm:$0xff]  }
  0xf1   :  { %2372 = vmatprep.subr.bf16.mxu1 %v4423_v52 }
  0xf3   :  { %2408 = vmatpush1.bf16.msra.mxu0 %v4424_v58  ;;  %v4483_v58 = vld [vmem:[%s6049_s1 + $0x394] ss:$8 sps:$4 sm:$0xff]  }
  0xf4   :  { %2373 = vmatpush2.bf16.msra.mxu1 %v4421_v55  ;;  %2409 = vmatprep.subr.bf16.mxu0 %v4432_v60  ;;  %v4478_v55 = vld [vmem:[%s6049_s1 + $0x420] ss:$8 sps:$4 sm:$0xff]   ;;  %v4481_v60 = vld [vmem:[%s6049_s1 + $0x390] ss:$8 sps:$4 sm:$0xff]  }
  0xf5   :  { %2374 = vmatprep.subr.bf16.mxu1 %v4429_v50  ;;  %v4486_v50 = vld [vmem:[%s6049_s1 + $0x414] ss:$8 sps:$4 sm:$0xff]  }
  0xf7   :  { %2410 = vmatpush1.bf16.msra.mxu0 %v4430_v63  ;;  %v4489_v63 = vld [vmem:[%s6049_s1 + $0x384] ss:$8 sps:$4 sm:$0xff]  }
  0xf8   :  { %2375 = vmatpush2.bf16.msra.mxu1 %v4427_v61  ;;  %2411 = vmatprep.subr.bf16.mxu0 %v4438_v3  ;;  %v4484_v61 = vld [vmem:[%s6049_s1 + $0x410] ss:$8 sps:$4 sm:$0xff]   ;;  %v4487_v3 = vld [vmem:[%s6049_s1 + $0x380] ss:$8 sps:$4 sm:$0xff]  }
  0xf9   :  { %2376 = vmatprep.subr.bf16.mxu1 %v4435_v1  ;;  %v4492_v1 = vld [vmem:[%s6049_s1 + $0x404] ss:$8 sps:$4 sm:$0xff]  }
  0xfb   :  { %2412 = vmatpush1.bf16.msra.mxu0 %v4436_v5  ;;  %v4529_v5 = vld [vmem:[%s6050_s0 + $0x18] ss:$36 sps:$4 sm:$0xff]  }
  0xfc   :  { %2377 = vmatpush2.bf16.msra.mxu1 %v4433_v4  ;;  %2413 = vmatprep.subr.bf16.mxu0 %v4444_v7  ;;  %v4490_v4 = vld [vmem:[%s6049_s1 + $0x400] ss:$8 sps:$4 sm:$0xff]  }
  0xfd   :  { %2378 = vmatprep.subr.bf16.mxu1 %v4441_v6 }
  0xff   :  { %2414 = vmatpush1.bf16.msra.mxu0 %v4442_v9 }
 0x100   :  { %2379 = vmatpush2.bf16.msra.mxu1 %v4439_v8  ;;  %2415 = vmatprep.subr.bf16.mxu0 %v4447_v10 }
 0x101   :  { %2450 = vmatprep.subr.bf16.mxu1 %v4450_v11 }
 0x102   :  { %v1287_v19 = vpop.f32.mrf.mxu0 }
 0x103   :  { %v1338_v13 = vpop.f32.mrf.mxu1  ;;  %2381 = vmatmul.mubr.bf16.vlgmr.msra.gmra.mxu1 %v4995_v59  ;;  %2416 = vmatpush2.bf16.msra.mxu0 %v4445_v12  ;;  %v4459_v59 = vld [vmem:[%s6049_s1 + $0x3d4] ss:$8 sps:$4 sm:$0xff]  }
 0x104   :  { %v5489_v20 = vadd.f32 %v1338_v13, %v1287_v19  ;;  %2451 = vmatpush1.bf16.msra.mxu1 %v4448_v51  ;;  %v1289_v17 = vpop.f32.mrf.mxu0  ;;  %2417 = vmatprep.subr.bf16.mxu0 %v4453_v14 }
 0x105   :  { %v1340_v23 = vpop.f32.mrf.mxu1  ;;  %2452 = vmatprep.subr.bf16.mxu1 %v4456_v15  ;;  %2390 = vmatprep.mubr.bf16.mxu1 %v4912_v18  ;;  %v4465_v18 = vld [vmem:[%s6049_s1 + $0x3c4] ss:$8 sps:$4 sm:$0xff]  }
 0x106   :  { %v5503_v26 = vadd.f32 %v1340_v23, %v1289_v17  ;;  %v1291_v27 = vpop.f32.mrf.mxu0 }
 0x107   :  { %v1342_v28 = vpop.f32.mrf.mxu1  ;;  %2418 = vmatpush2.bf16.msra.mxu0 %v4451_v21 }
 0x108   :  { %v5506_v29 = vadd.f32 %v1342_v28, %v1291_v27  ;;  %2453 = vmatpush1.bf16.msra.mxu1 %v4454_v22  ;;  %v1293_v32 = vpop.f32.mrf.mxu0  ;;  %2419 = vmatprep.subr.bf16.mxu0 %v4459_v59  ;;  %v5599_v27 = vld [vmem:[%s6051_s4 + $0xf8] sm:$0xff] }
 0x109   :  { %v1344_v33 = vpop.f32.mrf.mxu1  ;;  %2454 = vmatprep.subr.bf16.mxu1 %v4462_v24  ;;  %v5604_v28 = vld [vmem:[%s6051_s4 + $0x78] sm:$0xff] }
 0x10a   :  { %v5520_v35 = vadd.f32 %v1344_v33, %v1293_v32  ;;  %v1297_v36 = vpop.f32.mrf.mxu0 }
 0x10b   :  { %2391 = vmatmul.mubr.bf16.gmra.mxu1 %v5011_v0  ;;  %v1348_v37 = vpop.f32.mrf.mxu1  ;;  %2420 = vmatpush2.bf16.msra.mxu0 %v4457_v30  ;;  %v4471_v0 = vld [vmem:[%s6049_s1 + $0x3b4] ss:$8 sps:$4 sm:$0xff]  }
 0x10c   :  { %2455 = vmatpush1.bf16.msra.mxu1 %v4460_v31  ;;  %v5529_v40 = vadd.f32 %v1348_v37, %v1297_v36  ;;  %2421 = vmatprep.subr.bf16.mxu0 %v4465_v18  ;;  %v1299_v42 = vpop.f32.mrf.mxu0  ;;  %v5615_v31 = vld [vmem:[%s6051_s4 + $0x70] sm:$0xff]  ;;  %v5621_v18 = vld [vmem:[%s6051_s4 + $0xe8] sm:$0xff]  ;;  %v5639_v36 = vld [vmem:[%s6051_s4 + $0x60] sm:$0xff] }
 0x10d   :  { %2456 = vmatprep.subr.bf16.mxu1 %v4468_v34  ;;  %v1350_v43 = vpop.f32.mrf.mxu1  ;;  %2482 = vmatprep.mubr.bf16.mxu1 %v4530_v54  ;;  %v5627_v34 = vld [vmem:[%s6051_s4 + $0x68] sm:$0xff]  ;;  %v5645_v37 = vld [vmem:[%s6051_s4 + $0xd8] sm:$0xff] }
 0x10e   :  { %v5538_v44 = vadd.f32 %v1350_v43, %v1299_v42  ;;  %v1301_v45 = vpop.f32.mrf.mxu0  ;;  %v5677_v42 = vld [vmem:[%s6051_s4 + $0x48] sm:$0xff] }
 0x10f   :  { %v1352_v46 = vpop.f32.mrf.mxu1  ;;  %2422 = vmatpush2.bf16.msra.mxu0 %v4463_v38  ;;  %v5651_v38 = vld [vmem:[%s6051_s4 + $0x58] sm:$0xff] }
 0x110   :  { %2457 = vmatpush1.bf16.msra.mxu1 %v4466_v39  ;;  %2423 = vmatprep.subr.bf16.mxu0 %v4471_v0  ;;  %v1302_v52 = vpop.f32.mrf.mxu0  ;;  %v5657_v39 = vld [vmem:[%s6051_s4 + $0xd0] sm:$0xff]  ;;  %v5671_v0 = vld [vmem:[%s6051_s4 + $0xc8] sm:$0xff]  ;;  %v5691_v46 = vld [vmem:[%s6051_s4 + $0x40] sm:$0xff] }
 0x111   :  { %2458 = vmatprep.subr.bf16.mxu1 %v4474_v41  ;;  %v1353_v16 = vpop.f32.mrf.mxu1 }
 0x112   :  { %v5709_v16 = vld [vmem:[%s6051_s4 + $0xb0] sm:$0xff] }
 0x113   :  { %2424 = vmatpush2.bf16.msra.mxu0 %v4469_v47 }
 0x114   :  { %2459 = vmatpush1.bf16.msra.mxu1 %v4472_v57  ;;  %2425 = vmatprep.subr.bf16.mxu0 %v4477_v48  ;;  %v5697_v57 = vld [vmem:[%s6051_s4 + $0xb8] sm:$0xff] }
 0x115   :  { %2460 = vmatprep.subr.bf16.mxu1 %v4480_v49  ;;  %v5703_v49 = vld [vmem:[%s6051_s4 + $0x38] sm:$0xff] }
 0x117   :  { %2426 = vmatpush2.bf16.msra.mxu0 %v4475_v53 }
 0x118   :  { %2461 = vmatpush1.bf16.msra.mxu1 %v4478_v55  ;;  %2427 = vmatprep.subr.bf16.mxu0 %v4483_v58  ;;  %v5715_v55 = vld [vmem:[%s6051_s4 + $0x30] sm:$0xff] }
 0x119   :  { %2462 = vmatprep.subr.bf16.mxu1 %v4486_v50 }
 0x11b   :  { %2428 = vmatpush2.bf16.msra.mxu0 %v4481_v60  ;;  %v5721_v60 = vld [vmem:[%s6051_s4 + $0xa8] sm:$0xff] }
 0x11c   :  { %2463 = vmatpush1.bf16.msra.mxu1 %v4484_v61  ;;  %2429 = vmatprep.subr.bf16.mxu0 %v4489_v63  ;;  %v5727_v63 = vld [vmem:[%s6051_s4 + $0x28] sm:$0xff] }
 0x11d   :  { %2464 = vmatprep.subr.bf16.mxu1 %v4492_v1 }
 0x11f   :  { %2430 = vmatpush2.bf16.msra.mxu0 %v4487_v3  ;;  %v5733_v3 = vld [vmem:[%s6051_s4 + $0xa0] sm:$0xff] }
 0x120   :  { %2465 = vmatpush1.bf16.msra.mxu1 %v4490_v4  ;;  %3897 = vmatprep.subr.mxu0 %v5599_v27 }
 0x122   :  { %2432 = vmatmul.mubr.bf16.vlgmr.msra.gmra.mxu0 %v4529_v5  ;;  %v5739_v5 = vld [vmem:[%s6051_s4 + $0x20] sm:$0xff] }
 0x123   :  { %2483 = vmatmul.mubr.bf16.vlgmr.msra.gmra.mxu1 %v5116_v56  ;;  %2441 = vmatprep.mubr.bf16.mxu0 %v4930_v25 }
 0x124   :  { %2492 = vmatprep.mubr.bf16.mxu1 %v4530_v54  ;;  %3898 = vmatpush3.msra.mxu0 %v5604_v28 }
 0x12a   :  { %2442 = vmatmul.mubr.bf16.gmra.mxu0 %v5018_v2 }
 0x12b   :  { %2493 = vmatmul.mubr.bf16.gmra.mxu1 %v5133_v62 }
 0x142   :  { %v1389_v6 = vpop.f32.mrf.mxu0 }
 0x143   :  { %v1440_v7 = vpop.f32.mrf.mxu1  ;;  %v1390_v8 = vadd.f32 %v1389_v6, %v5489_v20 }
 0x144   :  { %v1391_v9 = vpop.f32.mrf.mxu0 }
 0x145   :  { %v1442_v10 = vpop.f32.mrf.mxu1  ;;  %v1441_v11 = vadd.f32 %v1440_v7, %v1390_v8  ;;  %v1392_v12 = vadd.f32 %v1391_v9, %v5503_v26  ;;  %v5745_v7 = vld [vmem:[%s6051_s4 + $0x98] sm:$0xff] }
 0x146   :  { %v1393_v51 = vpop.f32.mrf.mxu0  ;;  %v5751_v8 = vld [vmem:[%s6051_s4 + $0x18] sm:$0xff] }
 0x147   :  { %v1444_v14 = vpop.f32.mrf.mxu1  ;;  %v1443_v56 = vadd.f32 %v1442_v10, %v1392_v12  ;;  %v1394_v25 = vadd.f32 %v1393_v51, %v5506_v29  ;;  %v5609_v29 = vld [vmem:[%s6051_s4 + $0xf0] sm:$0xff]  ;;  %v5769_v12 = vld [vmem:[%s6051_s4 + $0x88] sm:$0xff] }
 0x148   :  { %v1395_v15 = vpop.f32.mrf.mxu0  ;;  %3899 = vmatprep.subr.mxu0 %v5609_v29  ;;  %v5757_v10 = vld [vmem:[%s6051_s4 + $0x90] sm:$0xff]  ;;  %v5775_v51 = vld [vmem:[%s6051_s4 + $0x8] sm:$0xff] }
 0x149   :  { %v1446_v54 = vpop.f32.mrf.mxu1  ;;  %v1445_v19 = vadd.f32 %v1444_v14, %v1394_v25  ;;  %v1396_v2 = vadd.f32 %v1395_v15, %v5520_v35  ;;  %3900 = vmatpush3.msra.mxu0 %v5615_v31  ;;  %v5633_v35 = vld [vmem:[%s6051_s4 + $0xe0] sm:$0xff]  ;;  %6066 = vst [vmem:[#allocation2_spill] sm:$0xff] %v5775_v51  ;;  %v5793_v25 = vld [vmem:[%s6052_s5 + $0x38] sm:$0xff]  ;;  %v5798_v15 = vld [vmem:[%s6052_s5 + $0x30] sm:$0xff] }
 0x14a   :  { %v1399_v62 = vpop.f32.mrf.mxu0  ;;  %3901 = vmatprep.subr.mxu0 %v5621_v18  ;;  %v5781_v14 = vld [vmem:[%s6051_s4 + $0x80] sm:$0xff]  ;;  %6069 = vst [vmem:[#allocation5_spill] sm:$0xff] %v5793_v25  ;;  %2651 = vmatprep.subr.mxu1 %v5793_v25 }
 0x14b   :  { %v1450_v13 = vpop.f32.mrf.mxu1  ;;  %v1447_v21 = vadd.f32 %v1446_v54, %v1396_v2  ;;  %v1400_v20 = vadd.f32 %v1399_v62, %v5529_v40  ;;  %3902 = vmatpush3.msra.mxu0 %v5627_v34  ;;  %v5663_v40 = vld [vmem:[%s6051_s4 + $0x50] sm:$0xff]  ;;  %6067 = vst [vmem:[#allocation3_spill] sm:$0xff] %v5781_v14  ;;  %v5803_v54 = vld [vmem:[%s6052_s5 + $0x28] sm:$0xff]  ;;  %2652 = vmatpush1.msra.mxu1 %v5798_v15  ;;  %v5816_v2 = vld [vmem:[%s6052_s5 + $0x18] sm:$0xff] }
 0x14c   :  { %v1401_v22 = vpop.f32.mrf.mxu0  ;;  %3903 = vmatprep.subr.mxu0 %v5633_v35  ;;  %2653 = vmatprep.subr.mxu1 %v5803_v54  ;;  %v5822_v62 = vld [vmem:[%s6052_s5 + $0x10] sm:$0xff] }
 0x14d   :  { %v1452_v17 = vpop.f32.mrf.mxu1  ;;  %v1402_v23 = vadd.f32 %v1401_v22, %v5538_v44  ;;  %v1451_v59 = vadd.f32 %v1450_v13, %v1400_v20  ;;  %3904 = vmatpush3.msra.mxu0 %v5639_v36  ;;  %v5685_v44 = vld [vmem:[%s6051_s4 + $0xc0] sm:$0xff] }
 0x14e   :  { %v1403_v24 = vpop.f32.mrf.mxu0  ;;  %3905 = vmatprep.subr.mxu0 %v5645_v37 }
 0x14f   :  { %v1454_v26 = vpop.f32.mrf.mxu1  ;;  %v1453_v30 = vadd.f32 %v1452_v17, %v1402_v23  ;;  %3906 = vmatpush3.msra.mxu0 %v5651_v38 }
 0x150   :  { %v1404_v32 = vpop.f32.mrf.mxu0  ;;  %3907 = vmatprep.subr.mxu0 %v5657_v39 }
 0x151   :  { %v1455_v33 = vpop.f32.mrf.mxu1  ;;  %3908 = vmatpush3.msra.mxu0 %v5663_v40 }
 0x152   :  { %3909 = vmatprep.subr.mxu0 %v5671_v0 }
 0x153   :  { %3910 = vmatpush3.msra.mxu0 %v5677_v42 }
 0x154   :  { %3911 = vmatprep.subr.mxu0 %v5685_v44 }
 0x155   :  { %3912 = vmatpush3.msra.mxu0 %v5691_v46 }
 0x156   :  { %3913 = vmatprep.subr.mxu0 %v5697_v57 }
 0x157   :  { %3914 = vmatpush3.msra.mxu0 %v5703_v49 }
 0x158   :  { %3915 = vmatprep.subr.mxu0 %v5709_v16 }
 0x159   :  { %3916 = vmatpush3.msra.mxu0 %v5715_v55 }
 0x15a   :  { %3917 = vmatprep.subr.mxu0 %v5721_v60 }
 0x15b   :  { %3918 = vmatpush3.msra.mxu0 %v5727_v63 }
 0x15c   :  { %3919 = vmatprep.subr.mxu0 %v5733_v3 }
 0x15d   :  { %3920 = vmatpush3.msra.mxu0 %v5739_v5 }
 0x15e   :  { %3921 = vmatprep.subr.mxu0 %v5745_v7 }
 0x15f   :  { %3922 = vmatpush3.msra.mxu0 %v5751_v8 }
 0x160   :  { %3923 = vmatprep.subr.mxu0 %v5757_v10 }
 0x162   :  { %v1491_v41 = vpop.f32.mrf.mxu0 }
 0x163   :  { %v5679_v43 = vadd.f32 %v1491_v41, %v1441_v11  ;;  %v5763_v11 = vld [vmem:[%s6051_s4 + $0x10] sm:$0xff] }
 0x164   :  { %v1493_v45 = vpop.f32.mrf.mxu0  ;;  %3924 = vmatpush3.msra.mxu0 %v5763_v11 }
 0x165   :  { %v1494_v47 = vadd.f32 %v1493_v45, %v1443_v56  ;;  %3925 = vmatprep.subr.mxu0 %v5769_v12  ;;  %v5787_v56 = vld [vmem:[%s6051_s4] sm:$0xff] }
 0x166   :  { %v1495_v48 = vpop.f32.mrf.mxu0  ;;  %3926 = vmatpush3.msra.mxu0 %v5775_v51  ;;  %6068 = vst [vmem:[#allocation4_spill] sm:$0xff] %v5787_v56 }
 0x167   :  { %v1496_v52 = vadd.f32 %v1495_v48, %v1445_v19  ;;  %3927 = vmatprep.subr.mxu0 %v5781_v14  ;;  %v5809_v19 = vld [vmem:[%s6052_s5 + $0x20] sm:$0xff] }
 0x168   :  { %v1497_v53 = vpop.f32.mrf.mxu0  ;;  %3928 = vmatpush3.msra.mxu0 %v5787_v56  ;;  %2654 = vmatpush1.msra.mxu1 %v5809_v19 }
 0x169   :  { %v1498_v58 = vadd.f32 %v1497_v53, %v1447_v21  ;;  %2819 = vmatprep.subr.mxu0 %v5793_v25  ;;  %2655 = vmatprep.subr.mxu1 %v5816_v2 }
 0x16a   :  { %v1501_v50 = vpop.f32.mrf.mxu0  ;;  %2656 = vmatpush1.msra.mxu1 %v5822_v62 }
 0x16b   :  { %v1502_v61 = vadd.f32 %v1501_v50, %v1451_v59 }
 0x16c   :  { %v1503_v1 = vpop.f32.mrf.mxu0 }
 0x16d   :  { %v1504_v4 = vadd.f32 %v1503_v1, %v1453_v30 }
 0x16e   :  { %v1505_v6 = vpop.f32.mrf.mxu0 }
 0x170   :  { %v1506_v9 = vpop.f32.mrf.mxu0 }
 0x183   :  { %v2280_v13 = vpop.f32.mrf.mxu1 }
 0x184   :  { %v2281_v21 = vadd.f32 %v2280_v13, %v5679_v43 }
 0x185   :  { %v2282_v20 = vpop.f32.mrf.mxu1 }
 0x186   :  { %v2283_v22 = vadd.f32 %v2282_v20, %v1494_v47 }
 0x187   :  { %v2284_v17 = vpop.f32.mrf.mxu1 }
 0x188   :  { %v2285_v23 = vadd.f32 %v2284_v17, %v1496_v52 }
 0x189   :  { %v2286_v59 = vpop.f32.mrf.mxu1 }
 0x18a   :  { %v2287_v24 = vadd.f32 %v2286_v59, %v1498_v58 }
 0x18b   :  { %v2290_v26 = vpop.f32.mrf.mxu1 }
 0x18c   :  { %v2291_v30 = vadd.f32 %v2290_v26, %v1502_v61 }
 0x18d   :  { %v2292_v32 = vpop.f32.mrf.mxu1 }
 0x18e   :  { %v2293_v33 = vadd.f32 %v2292_v32, %v1504_v4 }
 0x18f   :  { %v2294_v41 = vpop.f32.mrf.mxu1 }
 0x191   :  { %v2295_v45 = vpop.f32.mrf.mxu1 }
 0x1a2   :  { %v2331_v48 = vpop.f32.mrf.mxu0 }
 0x1a4   :  { %v2333_v53 = vpop.f32.mrf.mxu0 }
 0x1a6   :  { %v2335_v50 = vpop.f32.mrf.mxu0 }
 0x1a7   :  { %v2336_v1 = vadd.f32 %v2335_v50, %v2285_v23  ;;  %v2332_v50 = vadd.f32 %v2331_v48, %v2281_v21 }
 0x1a8   :  { %v2337_v6 = vpop.f32.mrf.mxu0 }
 0x1a9   :  { %v2338_v9 = vadd.f32 %v2337_v6, %v2287_v24  ;;  %v2334_v24 = vadd.f32 %v2333_v53, %v2283_v22 }
 0x1aa   :  { %v2341_v25 = vpop.f32.mrf.mxu0 }
 0x1ab   :  { %v2342_v43 = vadd.f32 %v2341_v25, %v2291_v30 }
 0x1ac   :  { %v2343_v13 = vpop.f32.mrf.mxu0 }
 0x1ad   :  { %v2344_v47 = vadd.f32 %v2343_v13, %v2293_v33 }
 0x1ae   :  { %v2345_v20 = vpop.f32.mrf.mxu0 }
 0x1b0   :  { %v2346_v52 = vpop.f32.mrf.mxu0 }
 0x1c3   :  { %v2382_v17 = vpop.f32.mrf.mxu1 }
 0x1c4   :  { %v2383_v6 = vadd.f32 %v2382_v17, %v2332_v50 }
 0x1c5   :  { %v2384_v58 = vpop.f32.mrf.mxu1 }
 0x1c6   :  { %v2385_v33 = vadd.f32 %v2384_v58, %v2334_v24 }
 0x1c7   :  { %v2386_v59 = vpop.f32.mrf.mxu1 }
 0x1c8   :  { %v2387_v61 = vadd.f32 %v2386_v59, %v2336_v1 }
 0x1c9   :  { %v2388_v26 = vpop.f32.mrf.mxu1 }
 0x1ca   :  { %v2389_v4 = vadd.f32 %v2388_v26, %v2338_v9 }
 0x1cb   :  { %v2392_v32 = vpop.f32.mrf.mxu1 }
 0x1cc   :  { %v2393_v41 = vadd.f32 %v2392_v32, %v2342_v43 }
 0x1cd   :  { %v2394_v45 = vpop.f32.mrf.mxu1 }
 0x1ce   :  { %v2395_v56 = vadd.f32 %v2394_v45, %v2344_v47 }
 0x1cf   :  { %v2396_v14 = vpop.f32.mrf.mxu1 }
 0x1d1   :  { %v2397_v23 = vpop.f32.mrf.mxu1 }
 0x1e2   :  { %v2433_v25 = vpop.f32.mrf.mxu0 }
 0x1e3   :  { %v2484_v30 = vpop.f32.mrf.mxu1  ;;  %v2434_v13 = vadd.f32 %v2433_v25, %v2383_v6 }
 0x1e4   :  { %v2435_v20 = vpop.f32.mrf.mxu0 }
 0x1e5   :  { %v2486_v52 = vpop.f32.mrf.mxu1  ;;  %v5828_v51 = vadd.f32 %v2484_v30, %v2434_v13  ;;  %v2436_v1 = vadd.f32 %v2435_v20, %v2385_v33 }
 0x1e6   :  { %v2437_v59 = vpop.f32.mrf.mxu0 }
 0x1e7   :  { %v2488_v9 = vpop.f32.mrf.mxu1  ;;  %v2501_v43 = vrot.slane %v5828_v51, 4  ;;  %v5831_v26 = vadd.f32 %v2486_v52, %v2436_v1  ;;  %v2438_v14 = vadd.f32 %v2437_v59, %v2387_v61 }
 0x1e8   :  { %v2439_v47 = vpop.f32.mrf.mxu0 }
 0x1e9   :  { %v2490_v21 = vpop.f32.mrf.mxu1  ;;  %v2502_v22 = vadd.f32 %v2501_v43, %v5828_v51  ;;  %v2507_v48 = vrot.slane %v5831_v26, 4  ;;  %v5835_v53 = vadd.f32 %v2488_v9, %v2438_v14  ;;  %v2440_v17 = vadd.f32 %v2439_v47, %v2389_v4 }
 0x1ea   :  { %v2443_v58 = vpop.f32.mrf.mxu0 }
 0x1eb   :  { %v2494_v32 = vpop.f32.mrf.mxu1  ;;  %v2503_v45 = vrot.slane %v2502_v22, 2  ;;  %v2508_v23 = vadd.f32 %v2507_v48, %v5831_v26  ;;  %v5838_v50 = vadd.f32 %v2490_v21, %v2440_v17  ;;  %v2444_v24 = vadd.f32 %v2443_v58, %v2393_v41  ;;  %v5857_v41 = vld [vmem:[%s6052_s5] sm:$0xff] }
 0x1ec   :  { %v2445_v6 = vpop.f32.mrf.mxu0 }
 0x1ed   :  { %v2496_v25 = vpop.f32.mrf.mxu1  ;;  %v2504_v61 = vadd.f32 %v2503_v45, %v2502_v22  ;;  %v2509_v30 = vrot.slane %v2508_v23, 2  ;;  %v2446_v33 = vadd.f32 %v2445_v6, %v2395_v56  ;;  %v5840_v13 = vadd.f32 %v2494_v32, %v2444_v24  ;;  %v5852_v56 = vld [vmem:[%s6052_s5 + $0x8] sm:$0xff]  ;;  %v6070_v32 = vld [vmem:[#allocation2_spill] sm:$0xff]  ;;  %v6073_v24 = vld [vmem:[#allocation5_spill] sm:$0xff] }
 0x1ee   :  { %v2447_v20 = vpop.f32.mrf.mxu0  ;;  %2657 = vmatprep.subr.mxu1 %v5852_v56  ;;  %v6064_v22 = vmov 0.0   ;;  %v6071_v45 = vld [vmem:[#allocation3_spill] sm:$0xff]  ;;  %v2698_v6 = vlaneseq }
 0x1ef   :  { %v2498_v52 = vpop.f32.mrf.mxu1  ;;  %v5842_v1 = vadd.f32 %v2496_v25, %v2446_v33  ;;  %v2510_v4 = vadd.f32 %v2509_v30, %v2508_v23  ;;  %v2505_v59 = vrot.slane %v2504_v61, 1  ;;  %2658 = vmatpush1.msra.mxu1 %v5857_v41  ;;  %2691 = vmatprep.mubr.f32.mxu1 %v6064_v22  ;;  %v6072_v23 = vld [vmem:[#allocation4_spill] sm:$0xff] }
 0x1f0   :  { %v2448_v9 = vpop.f32.mrf.mxu0  ;;  %3932 = vmatprep.subr.mxu1 %v5599_v27  ;;  %v5900_v25 = vshrl.u32 %v2698_v6, 7 }
 0x1f1   :  { %v2499_v43 = vpop.f32.mrf.mxu1  ;;  %v2511_v14 = vrot.slane %v2510_v4, 1  ;;  %v2506_v21 = vadd.f32 %v2505_v59, %v2504_v61 }
 0x1f2   :  { %v5903_v61 = vsub.s32 0, %v5900_v25 }
 0x1f3   :  { %v2512_v47 = vadd.f32 %v2511_v14, %v2510_v4 }
 0x1f5   :  { %2609 = vmatprep.mubr.f32.mxu0 %v2512_v47 }
 0x1f6   :  { %2610 = vmatmul.mubr.f32.vlgmr.msra.gmra.mxu0 %v2506_v21 }
 0x1f7   :  { %2820 = vmatpush1.msra.mxu0 %v5798_v15  ;;  %2859 = vmatprep.mubr.f32.mxu0 %v6064_v22 }
 0x1f8   :  { %2821 = vmatprep.subr.mxu0 %v5803_v54 }
 0x1f9   :  { %2822 = vmatpush1.msra.mxu0 %v5809_v19 }
 0x1fa   :  { %2823 = vmatprep.subr.mxu0 %v5816_v2 }
 0x1fb   :  { %2824 = vmatpush1.msra.mxu0 %v5822_v62 }
 0x1fc   :  { %2825 = vmatprep.subr.mxu0 %v5852_v56 }
 0x1fd   :  { %2826 = vmatpush1.msra.mxu0 %v5857_v41 }
 0x1fe   :  { %3967 = vmatprep.subr.mxu0 %v5599_v27 }
 0x2b6   :  { %v3929_v48 = vpop.f32.mrf.mxu0 }
 0x2b8   :  { %v3930_v17 = vpop.f32.mrf.mxu0 }
 0x2b9   :  { %v3931_v58 = vadd.f32 %v3930_v17, %v3929_v48 }
 0x2bb   :  { %3880 = vmatmul.mubr.msk.f32.vlgmr.msra.gmra.mxu1 %vm2623_vm1, %v3931_v58 }
 0x2bc   :  { %3933 = vmatpush3.msra.mxu1 %v5604_v28 }
 0x2bd   :  { %3934 = vmatprep.subr.mxu1 %v5609_v29 }
 0x2be   :  { %3935 = vmatpush3.msra.mxu1 %v5615_v31 }
 0x2bf   :  { %3936 = vmatprep.subr.mxu1 %v5621_v18 }
 0x2c0   :  { %3937 = vmatpush3.msra.mxu1 %v5627_v34 }
 0x2c1   :  { %3938 = vmatprep.subr.mxu1 %v5633_v35 }
 0x2c2   :  { %3939 = vmatpush3.msra.mxu1 %v5639_v36 }
 0x2c3   :  { %3940 = vmatprep.subr.mxu1 %v5645_v37 }
 0x2c4   :  { %3941 = vmatpush3.msra.mxu1 %v5651_v38 }
 0x2c5   :  { %3942 = vmatprep.subr.mxu1 %v5657_v39 }
 0x2c6   :  { %3943 = vmatpush3.msra.mxu1 %v5663_v40 }
 0x2c7   :  { %3944 = vmatprep.subr.mxu1 %v5671_v0 }
 0x2c8   :  { %3945 = vmatpush3.msra.mxu1 %v5677_v42 }
 0x2c9   :  { %3946 = vmatprep.subr.mxu1 %v5685_v44 }
 0x2ca   :  { %3947 = vmatpush3.msra.mxu1 %v5691_v46 }
 0x2cb   :  { %3948 = vmatprep.subr.mxu1 %v5697_v57 }
 0x2cc   :  { %3949 = vmatpush3.msra.mxu1 %v5703_v49 }
 0x2cd   :  { %3950 = vmatprep.subr.mxu1 %v5709_v16 }
 0x2ce   :  { %3951 = vmatpush3.msra.mxu1 %v5715_v55 }
 0x2cf   :  { %3952 = vmatprep.subr.mxu1 %v5721_v60 }
 0x2d0   :  { %3953 = vmatpush3.msra.mxu1 %v5727_v63 }
 0x2d1   :  { %3954 = vmatprep.subr.mxu1 %v5733_v3 }
 0x2d2   :  { %3955 = vmatpush3.msra.mxu1 %v5739_v5 }
 0x2d3   :  { %3956 = vmatprep.subr.mxu1 %v5745_v7 }
 0x2d4   :  { %3957 = vmatpush3.msra.mxu1 %v5751_v8 }
 0x2d5   :  { %3958 = vmatprep.subr.mxu1 %v5757_v10 }
 0x2d6   :  { %3959 = vmatpush3.msra.mxu1 %v5763_v11 }
 0x2d7   :  { %3960 = vmatprep.subr.mxu1 %v5769_v12 }
 0x2d8   :  { %3961 = vmatpush3.msra.mxu1 %v6070_v32 }
 0x2d9   :  { %3962 = vmatprep.subr.mxu1 %v6071_v45 }
 0x2da   :  { %3963 = vmatpush3.msra.mxu1 %v6072_v23 }
 0x2db   :  { %3091 = vmatprep.subr.mxu1 %v6073_v24 }
 0x37b   :  { %v2693_v30 = vpop.f32.mrf.mxu1 }
 0x37c   :  { %v2701_v33 = vrot.slane %v2693_v30, %v5903_v61 }
 0x37d   :  { %v2695_v20 = vpop.f32.mrf.mxu1 }
 0x37e   :  { %v5907_v52 = vsub.f32 %v5828_v51, %v2701_v33  ;;  %v2705_v4 = vrot.slane %v2695_v20, %v5903_v61 }
 0x380   :  { %v2708_v59 = vmul.f32 %v5907_v52, %v5907_v52  ;;  %v5913_v9 = vsub.f32 %v5831_v26, %v2705_v4  ;;  %v6074_v26 = vmov 0.0   ;;  %v2937_v4 = vrot.slane %v5838_v50, 1 }
 0x382   :  { %v2710_v43 = vrot.slane %v2708_v59, 4  ;;  %v2709_v14 = vmul.f32 %v5913_v9, %v5913_v9 }
 0x384   :  { %v2711_v47 = vadd.f32 %v2710_v43, %v2708_v59  ;;  %v2716_v21 = vrot.slane %v2709_v14, 4 }
 0x386   :  { %v2712_v48 = vrot.slane %v2711_v47, 2  ;;  %v2717_v17 = vadd.f32 %v2716_v21, %v2709_v14 }
 0x388   :  { %v2713_v58 = vadd.f32 %v2712_v48, %v2711_v47  ;;  %v2718_v6 = vrot.slane %v2717_v17, 2 }
 0x38a   :  { %v2719_v51 = vadd.f32 %v2718_v6, %v2717_v17  ;;  %v2714_v30 = vrot.slane %v2713_v58, 1 }
 0x38c   :  { %v2720_v33 = vrot.slane %v2719_v51, 1  ;;  %v2715_v22 = vadd.f32 %v2714_v30, %v2713_v58  ;;  %v2934_v30 = vrot.slane %v5835_v53, 1 }
 0x38e   :  { %v2721_v20 = vadd.f32 %v2720_v33, %v2719_v51 }
 0x390   :  { %2786 = vmatprep.mubr.f32.mxu1 %v2721_v20 }
 0x391   :  { %2787 = vmatmul.mubr.f32.vlgmr.msra.gmra.mxu1 %v2715_v22  ;;  %v2938_v22 = vrot.slane %v5842_v1, 1 }
 0x392   :  { %3092 = vmatpush1.msra.mxu1 %v5798_v15  ;;  %3131 = vmatprep.mubr.f32.mxu1 %v6074_v26 }
 0x393   :  { %3093 = vmatprep.subr.mxu1 %v5803_v54  ;;  %v2939_v59 = vsel %vm2933_vm2, %v2937_v4, %v2938_v22 }
 0x394   :  { %3094 = vmatpush1.msra.mxu1 %v5809_v19  ;;  %v2948_v43 = vrot.slane %v2939_v59, 4 }
 0x395   :  { %3095 = vmatprep.subr.mxu1 %v5816_v2 }
 0x396   :  { %3096 = vmatpush1.msra.mxu1 %v5822_v62  ;;  %v2949_v14 = vadd.f32 %v2948_v43, %v2939_v59 }
 0x397   :  { %3097 = vmatprep.subr.mxu1 %v5852_v56 }
 0x398   :  { %3098 = vmatpush1.msra.mxu1 %v5857_v41  ;;  %v2950_v47 = vrot.slane %v2949_v14, 2 }
 0x399   :  { %4002 = vmatprep.subr.mxu1 %v5599_v27  ;;  %v2935_v27 = vrot.slane %v5840_v13, 1 }
 0x39a   :  { %v2951_v21 = vadd.f32 %v2950_v47, %v2949_v14 }
 0x39b   :  { %v2936_v33 = vsel %vm2933_vm2, %v2934_v30, %v2935_v27 }
 0x39c   :  { %v2952_v17 = vrot.slane %v2951_v21, 1  ;;  %v2942_v20 = vrot.slane %v2936_v33, 4 }
 0x39e   :  { %v2953_v51 = vadd.f32 %v2952_v17, %v2951_v21  ;;  %v2943_v22 = vadd.f32 %v2942_v20, %v2936_v33 }
 0x3a0   :  { %v2944_v4 = vrot.slane %v2943_v22, 2 }
 0x3a2   :  { %v2945_v59 = vadd.f32 %v2944_v4, %v2943_v22 }
 0x3a4   :  { %v2946_v43 = vrot.slane %v2945_v59, 1 }
 0x3a6   :  { %v2947_v14 = vadd.f32 %v2946_v43, %v2945_v59 }
 0x451   :  { %v3964_v48 = vpop.f32.mrf.mxu1 }
 0x453   :  { %v3965_v58 = vpop.f32.mrf.mxu1 }
 0x454   :  { %v3966_v6 = vadd.f32 %v3965_v58, %v3964_v48 }
 0x456   :  { %3881 = vmatmul.mubr.msk.f32.vlgmr.msra.gmra.mxu0 %vm2623_vm1, %v3966_v6 }
 0x457   :  { %3968 = vmatpush3.msra.mxu0 %v5604_v28  ;;  %3050 = vmatprep.mubr.f32.mxu0 %v2953_v51 }
 0x458   :  { %3969 = vmatprep.subr.mxu0 %v5609_v29 }
 0x459   :  { %3970 = vmatpush3.msra.mxu0 %v5615_v31 }
 0x45a   :  { %3971 = vmatprep.subr.mxu0 %v5621_v18 }
 0x45b   :  { %3972 = vmatpush3.msra.mxu0 %v5627_v34 }
 0x45c   :  { %3973 = vmatprep.subr.mxu0 %v5633_v35 }
 0x45d   :  { %3974 = vmatpush3.msra.mxu0 %v5639_v36 }
 0x45e   :  { %3975 = vmatprep.subr.mxu0 %v5645_v37 }
 0x45f   :  { %3976 = vmatpush3.msra.mxu0 %v5651_v38 }
 0x460   :  { %3977 = vmatprep.subr.mxu0 %v5657_v39 }
 0x461   :  { %3978 = vmatpush3.msra.mxu0 %v5663_v40 }
 0x462   :  { %3979 = vmatprep.subr.mxu0 %v5671_v0 }
 0x463   :  { %3980 = vmatpush3.msra.mxu0 %v5677_v42 }
 0x464   :  { %3981 = vmatprep.subr.mxu0 %v5685_v44 }
 0x465   :  { %3982 = vmatpush3.msra.mxu0 %v5691_v46 }
 0x466   :  { %3983 = vmatprep.subr.mxu0 %v5697_v57 }
 0x467   :  { %3984 = vmatpush3.msra.mxu0 %v5703_v49 }
 0x468   :  { %3985 = vmatprep.subr.mxu0 %v5709_v16 }
 0x469   :  { %3986 = vmatpush3.msra.mxu0 %v5715_v55 }
 0x46a   :  { %3987 = vmatprep.subr.mxu0 %v5721_v60 }
 0x46b   :  { %3988 = vmatpush3.msra.mxu0 %v5727_v63 }
 0x46c   :  { %3989 = vmatprep.subr.mxu0 %v5733_v3 }
 0x46d   :  { %3990 = vmatpush3.msra.mxu0 %v5739_v5 }
 0x46e   :  { %3991 = vmatprep.subr.mxu0 %v5745_v7 }
 0x46f   :  { %3992 = vmatpush3.msra.mxu0 %v5751_v8 }
 0x470   :  { %3993 = vmatprep.subr.mxu0 %v5757_v10 }
 0x471   :  { %3994 = vmatpush3.msra.mxu0 %v5763_v11 }
 0x472   :  { %3995 = vmatprep.subr.mxu0 %v5769_v12 }
 0x473   :  { %3996 = vmatpush3.msra.mxu0 %v6070_v32 }
 0x474   :  { %3997 = vmatprep.subr.mxu0 %v6071_v45 }
 0x475   :  { %3998 = vmatpush3.msra.mxu0 %v6072_v23 }
 0x476   :  { %3051 = vmatmul.mubr.f32.vlgmr.msra.gmra.mxu0 %v2947_v14  ;;  %3275 = vmatprep.subr.mxu0 %v6073_v24 }
 0x477   :  { %3276 = vmatpush1.msra.mxu0 %v5798_v15  ;;  %3315 = vmatprep.mubr.f32.mxu0 %v6074_v26  ;;  %v2878_v15 = vld [vmem:[%s6053_s2] sm:$0x3] }
 0x478   :  { %3277 = vmatprep.subr.mxu0 %v5803_v54  ;;  %v5977_v54 = vsub.s32 1, %v5900_v25 }
 0x479   :  { %3278 = vmatpush1.msra.mxu0 %v5809_v19 }
 0x47a   :  { %3279 = vmatprep.subr.mxu0 %v5816_v2  ;;  %v2892_v2 = vld [vmem:[%s6054_s3] sm:$0x3]  ;;  %v2887_v6 = vrot.slane %v2878_v15, %v5977_v54 }
 0x47b   :  { %3280 = vmatpush1.msra.mxu0 %v5822_v62  ;;  %v2897_v17 = vrot.slane %v2892_v2, %v5903_v61  ;;  %v2901_v27 = vrot.slane %v2892_v2, %v5977_v54 }
 0x47c   :  { %3281 = vmatprep.subr.mxu0 %v5852_v56  ;;  %v2883_v56 = vrot.slane %v2878_v15, %v5903_v61 }
 0x47d   :  { %3282 = vmatpush1.msra.mxu0 %v5857_v41 }
 0x516   :  { %v2861_v47 = vpop.f32.mrf.mxu0 }
 0x517   :  { %v2862_v21 = vadd.f32 1e-05, %v2861_v47 }
 0x518   :  { %v2863_v48 = vpop.f32.mrf.mxu0 }
 0x519   :  { %4493 = vrsqrt.f32 %v2862_v21  ;;  %v2864_v24 = vadd.f32 1e-05, %v2863_v48 }
 0x51b   :  { %4495 = vrsqrt.f32 %v2864_v24 }
 0x526   :  { %v4494_v19 = vpop.eup %4493 }
 0x527   :  { %v2871_v62 = vrot.slane %v4494_v19, %v5903_v61 }
 0x528   :  { %v4496_v41 = vpop.eup %4495 }
 0x529   :  { %v2876_v26 = vmul.f32 %v2871_v62, %v5907_v52  ;;  %v2875_v58 = vrot.slane %v4496_v41, %v5903_v61  ;;  %v3336_v41 = vld [vmem:[%s6053_s2] sm:$0x3] }
 0x52b   :  { %v2890_v25 = vmul.f32 %v2883_v56, %v2876_v26  ;;  %v2877_v51 = vmul.f32 %v2875_v58, %v5913_v9  ;;  %v3352_v26 = vld [vmem:[%s6054_s3] sm:$0x3] }
 0x52d   :  { %v2904_v30 = vadd.f32 %v2897_v17, %v2890_v25  ;;  %v2891_v33 = vmul.f32 %v2887_v6, %v2877_v51  ;;  %v3341_v6 = vrot.slane %v3336_v41, %v5903_v61  ;;  %v3357_v51 = vrot.slane %v3352_v26, %v5903_v61 }
 0x52f   :  { %v3882_v20 = vmul.f32 -1.442695, %v2904_v30  ;;  %v2905_v22 = vadd.f32 %v2901_v27, %v2891_v33 }
 0x531   :  { %4497 = vpow2.f32 %v3882_v20  ;;  %v3883_v4 = vmul.f32 -1.442695, %v2905_v22  ;;  %v3345_v20 = vrot.slane %v3336_v41, %v5977_v54 }
 0x533   :  { %4499 = vpow2.f32 %v3883_v4 }
 0x536   :  { %v3999_v59 = vpop.f32.mrf.mxu0 }
 0x538   :  { %v4000_v52 = vpop.f32.mrf.mxu0 }
 0x539   :  { %v4001_v43 = vadd.f32 %v4000_v52, %v3999_v59 }
 0x53b   :  { %3885 = vmatmul.mubr.msk.f32.vlgmr.msra.gmra.mxu1 %vm2623_vm1, %v4001_v43 }
 0x53c   :  { %4003 = vmatpush3.msra.mxu1 %v5604_v28 }
 0x53d   :  { %4004 = vmatprep.subr.mxu1 %v5609_v29 }
 0x53e   :  { %v4498_v14 = vpop.eup %4497  ;;  %4005 = vmatpush3.msra.mxu1 %v5615_v31 }
 0x53f   :  { %v2912_v9 = vadd.f32 1.0, %v4498_v14  ;;  %4006 = vmatprep.subr.mxu1 %v5621_v18 }
 0x540   :  { %v4500_v47 = vpop.eup %4499  ;;  %4007 = vmatpush3.msra.mxu1 %v5627_v34 }
 0x541   :  { %4501 = vrcp.f32 %v2912_v9  ;;  %v2913_v21 = vadd.f32 1.0, %v4500_v47  ;;  %4008 = vmatprep.subr.mxu1 %v5633_v35 }
 0x542   :  { %4009 = vmatpush3.msra.mxu1 %v5639_v36 }
 0x543   :  { %4503 = vrcp.f32 %v2913_v21  ;;  %4010 = vmatprep.subr.mxu1 %v5645_v37 }
 0x544   :  { %4011 = vmatpush3.msra.mxu1 %v5651_v38 }
 0x545   :  { %4012 = vmatprep.subr.mxu1 %v5657_v39 }
 0x546   :  { %4013 = vmatpush3.msra.mxu1 %v5663_v40 }
 0x547   :  { %4014 = vmatprep.subr.mxu1 %v5671_v0 }
 0x548   :  { %4015 = vmatpush3.msra.mxu1 %v5677_v42 }
 0x549   :  { %4016 = vmatprep.subr.mxu1 %v5685_v44 }
 0x54a   :  { %4017 = vmatpush3.msra.mxu1 %v5691_v46 }
 0x54b   :  { %4018 = vmatprep.subr.mxu1 %v5697_v57 }
 0x54c   :  { %4019 = vmatpush3.msra.mxu1 %v5703_v49 }
 0x54d   :  { %4020 = vmatprep.subr.mxu1 %v5709_v16 }
 0x54e   :  { %v4502_v28 = vpop.eup %4501  ;;  %4021 = vmatpush3.msra.mxu1 %v5715_v55 }
 0x54f   :  { %4022 = vmatprep.subr.mxu1 %v5721_v60  ;;  %v2918_v31 = vmul.f32 %v4502_v28, %v2904_v30 }
 0x550   :  { %v4504_v29 = vpop.eup %4503  ;;  %4023 = vmatpush3.msra.mxu1 %v5727_v63 }
 0x551   :  { %v2919_v18 = vmul.f32 %v4504_v29, %v2905_v22  ;;  %4024 = vmatprep.subr.mxu1 %v5733_v3  ;;  %v3361_v22 = vrot.slane %v3352_v26, %v5977_v54 }
 0x552   :  { %4025 = vmatpush3.msra.mxu1 %v5739_v5 }
 0x553   :  { %v3894_v34 = vpack.c.bf16 %v2919_v18, %v2918_v31  ;;  %4026 = vmatprep.subr.mxu1 %v5745_v7 }
 0x554   :  { %4027 = vmatpush3.msra.mxu1 %v5751_v8 }
 0x555   :  { %2928 = vst [vmem:[%s6055_s6] sm:$0xff] %v3894_v34  ;;  %4028 = vmatprep.subr.mxu1 %v5757_v10 }
 0x556   :  { %4029 = vmatpush3.msra.mxu1 %v5763_v11 }
 0x557   :  { %4030 = vmatprep.subr.mxu1 %v5769_v12 }
 0x558   :  { %4031 = vmatpush3.msra.mxu1 %v6070_v32 }
 0x559   :  { %4032 = vmatprep.subr.mxu1 %v6071_v45 }
 0x55a   :  { %4033 = vmatpush3.msra.mxu1 %v6072_v23 }
 0x5fb   :  { %v3133_v35 = vpop.f32.mrf.mxu1 }
 0x5fc   :  { %v3141_v36 = vrot.slane %v3133_v35, %v5903_v61 }
 0x5fd   :  { %v3135_v37 = vpop.f32.mrf.mxu1 }
 0x5fe   :  { %v3146_v38 = vsub.f32 %v5835_v53, %v3141_v36  ;;  %v3148_v39 = vsub.f32 %v5840_v13, %v3141_v36  ;;  %v3145_v40 = vrot.slane %v3135_v37, %v5903_v61 }
 0x600   :  { %v3150_v0 = vmul.f32 %v3146_v38, %v3146_v38  ;;  %v3152_v42 = vmul.f32 %v3148_v39, %v3148_v39  ;;  %v3147_v44 = vsub.f32 %v5838_v50, %v3145_v40  ;;  %v3149_v46 = vsub.f32 %v5842_v1, %v3145_v40 }
 0x602   :  { %v3158_v57 = vrot.slane %v3150_v0, 1  ;;  %v3159_v49 = vrot.slane %v3152_v42, 1  ;;  %v3151_v16 = vmul.f32 %v3147_v44, %v3147_v44  ;;  %v3153_v55 = vmul.f32 %v3149_v46, %v3149_v46 }
 0x604   :  { %v3160_v60 = vsel %vm2933_vm2, %v3158_v57, %v3159_v49  ;;  %v3161_v63 = vrot.slane %v3151_v16, 1  ;;  %v3162_v3 = vrot.slane %v3153_v55, 1 }
 0x605   :  { %v3166_v5 = vrot.slane %v3160_v60, 4 }
 0x606   :  { %v3163_v7 = vsel %vm2933_vm2, %v3161_v63, %v3162_v3 }
 0x607   :  { %v3167_v8 = vadd.f32 %v3166_v5, %v3160_v60  ;;  %v3172_v10 = vrot.slane %v3163_v7, 4 }
 0x609   :  { %v3173_v11 = vadd.f32 %v3172_v10, %v3163_v7  ;;  %v3168_v12 = vrot.slane %v3167_v8, 2 }
 0x60b   :  { %v3174_v53 = vrot.slane %v3173_v11, 2  ;;  %v3169_v13 = vadd.f32 %v3168_v12, %v3167_v8 }
 0x60d   :  { %v3175_v50 = vadd.f32 %v3174_v53, %v3173_v11  ;;  %v3170_v32 = vrot.slane %v3169_v13, 1 }
 0x60f   :  { %v3176_v1 = vrot.slane %v3175_v50, 1  ;;  %v3171_v23 = vadd.f32 %v3170_v32, %v3169_v13 }
 0x611   :  { %v3177_v45 = vadd.f32 %v3176_v1, %v3175_v50 }
 0x613   :  { %3242 = vmatprep.mubr.f32.mxu1 %v3177_v45 }
 0x614   :  { %3243 = vmatmul.mubr.f32.vlgmr.msra.gmra.mxu1 %v3171_v23 }
 0x6d4   :  { %v4034_v48 = vpop.f32.mrf.mxu1 }
 0x6d6   :  { %v4035_v24 = vpop.f32.mrf.mxu1 }
 0x6d7   :  { %v4036_v15 = vadd.f32 %v4035_v24, %v4034_v48 }
 0x6d9   :  { %3886 = vmatmul.mubr.msk.f32.vlgmr.msra.gmra.mxu0 %vm2623_vm1, %v4036_v15 }
 0x799   :  { %v3317_v19 = vpop.f32.mrf.mxu0 }
 0x79a   :  { %v3318_v2 = vadd.f32 1e-05, %v3317_v19 }
 0x79b   :  { %v3319_v62 = vpop.f32.mrf.mxu0 }
 0x79c   :  { %4505 = vrsqrt.f32 %v3318_v2  ;;  %v3320_v56 = vadd.f32 1e-05, %v3319_v62 }
 0x79e   :  { %4507 = vrsqrt.f32 %v3320_v56 }
 0x7a9   :  { %v4506_v17 = vpop.eup %4505 }
 0x7aa   :  { %v3327_v58 = vrot.slane %v4506_v17, %v5903_v61 }
 0x7ab   :  { %v4508_v25 = vpop.eup %4507 }
 0x7ac   :  { %v3332_v27 = vmul.f32 %v3327_v58, %v3146_v38  ;;  %v3334_v30 = vmul.f32 %v3327_v58, %v3148_v39  ;;  %v3331_v33 = vrot.slane %v4508_v25, %v5903_v61 }
 0x7ae   :  { %v3348_v4 = vmul.f32 %v3341_v6, %v3332_v27  ;;  %v3350_v59 = vmul.f32 %v3341_v6, %v3334_v30  ;;  %v3333_v52 = vmul.f32 %v3331_v33, %v3147_v44  ;;  %v3335_v43 = vmul.f32 %v3331_v33, %v3149_v46 }
 0x7b0   :  { %v3364_v14 = vadd.f32 %v3357_v51, %v3348_v4  ;;  %v3366_v9 = vadd.f32 %v3357_v51, %v3350_v59  ;;  %v3349_v47 = vmul.f32 %v3345_v20, %v3333_v52  ;;  %v3351_v21 = vmul.f32 %v3345_v20, %v3335_v43 }
 0x7b2   :  { %v3887_v28 = vmul.f32 -1.442695, %v3364_v14  ;;  %v3889_v29 = vmul.f32 -1.442695, %v3366_v9  ;;  %v3365_v31 = vadd.f32 %v3361_v22, %v3349_v47  ;;  %v3367_v18 = vadd.f32 %v3361_v22, %v3351_v21 }
 0x7b4   :  { %4509 = vpow2.f32 %v3887_v28  ;;  %v3888_v34 = vmul.f32 -1.442695, %v3365_v31  ;;  %v3890_v35 = vmul.f32 -1.442695, %v3367_v18 }
 0x7b5   :  { %4511 = vpow2.f32 %v3889_v29 }
 0x7b6   :  { %4513 = vpow2.f32 %v3888_v34 }
 0x7b7   :  { %4515 = vpow2.f32 %v3890_v35 }
 0x7c1   :  { %v4510_v61 = vpop.eup %4509 }
 0x7c2   :  { %v4512_v54 = vpop.eup %4511  ;;  %v3380_v36 = vadd.f32 1.0, %v4510_v61 }
 0x7c3   :  { %v4514_v37 = vpop.eup %4513  ;;  %v3382_v38 = vadd.f32 1.0, %v4512_v54 }
 0x7c4   :  { %v4516_v39 = vpop.eup %4515  ;;  %4517 = vrcp.f32 %v3380_v36  ;;  %v3381_v40 = vadd.f32 1.0, %v4514_v37 }
 0x7c5   :  { %4519 = vrcp.f32 %v3382_v38  ;;  %v3383_v0 = vadd.f32 1.0, %v4516_v39 }
 0x7c6   :  { %4521 = vrcp.f32 %v3381_v40 }
 0x7c7   :  { %4523 = vrcp.f32 %v3383_v0 }
 0x7d1   :  { %v4518_v42 = vpop.eup %4517 }
 0x7d2   :  { %v4520_v44 = vpop.eup %4519  ;;  %v3392_v49 = vmul.f32 %v4518_v42, %v3364_v14 }
 0x7d3   :  { %v4522_v46 = vpop.eup %4521  ;;  %v3394_v55 = vmul.f32 %v4520_v44, %v3366_v9 }
 0x7d4   :  { %v4524_v57 = vpop.eup %4523  ;;  %v3393_v16 = vmul.f32 %v4522_v46, %v3365_v31 }
 0x7d5   :  { %v3395_v60 = vmul.f32 %v4524_v57, %v3367_v18 }
 0x7d6   :  { %v3895_v63 = vpack.c.bf16 %v3393_v16, %v3392_v49 }
 0x7d7   :  { %v3896_v3 = vpack.c.bf16 %v3395_v60, %v3394_v55 }
 0x7d8   :  { %v3410_v5 = vshrl.u32 %v3895_v63, 16  ;;  %v3413_v7 = vshll.u32 %v3895_v63, 16 }
 0x7d9   :  { %v3419_v11 = vshll.u32 %v3896_v3, 16 }
 0x7da   :  { %v3412_v8 = vrot.slane %v3410_v5, 4  ;;  %v3415_v10 = vrot.slane %v3413_v7, 5 }
 0x7db   :  { %v3421_v13 = vrot.slane %v3419_v11, 5 }
 0x7dc   :  { %v3416_v12 = vor.u32 %v3415_v10, %v3412_v8 }
 0x7de   :  { %v3417_v53 = vrot.slane %v3416_v12, 4 }
 0x7e0   :  { %v3422_v50 = vsel %vm3408_vm5, %v3417_v53, %v3421_v13 }
 0x7e1   :  { %3893 = vst [vmem:[%s6055_s6 + $0x8] sm:$0xff] %v3422_v50 }

</bundles_post_ra>
